<compile_context>
chip_gen: v5e
topology: v5e:2x2
jax: 0.10.0
libtpu: 0.0.40
codegen_flags: <defaults>
</compile_context>

<pallas_src>
import functools
import math

import jax
import jax.numpy as jnp
from jax.experimental import pallas as pl
from jax.experimental.pallas import tpu as pltpu

LN_EPS = 1e-5   # torch nn.LayerNorm default


# ----------------------------- Pallas kernel --------------------------------
def _make_attention_kernel(S, C, nhead, tq):
    hd = C // nhead

    def kernel(x_ref, g_ref, b_ref, wqkv_ref, bqkv_ref, wout_ref, bout_ref,
               o_ref, xt_sc, q_sc, k_sc, v_sc, ocat_sc):
        t = pl.program_id(1)

        # ---- once per batch element: LayerNorm + fused QKV over the full
        #      sequence, cached in VMEM scratch (bf16). ----------------------
        @pl.when(t == 0)
        def _():
            xt = jnp.transpose(x_ref[0])                         # (S, C) f32
            xt_sc[...] = xt
            mu = jnp.mean(xt, axis=-1, keepdims=True)
            var = jnp.mean(jnp.square(xt - mu), axis=-1, keepdims=True)
            n = (xt - mu) * jax.lax.rsqrt(var + LN_EPS) * g_ref[...] + b_ref[...]
            qkv = jnp.dot(n.astype(jnp.bfloat16), wqkv_ref[...],
                          preferred_element_type=jnp.float32) + bqkv_ref[...]
            # 1/sqrt(hd) is already folded into the Q columns of wqkv/bqkv.
            # bf16 casts hoisted here (128-lane-aligned full thirds).
            q_sc[...] = qkv[:, :C].astype(jnp.bfloat16)
            k_sc[...] = qkv[:, C:2 * C].astype(jnp.bfloat16)
            v_sc[...] = qkv[:, 2 * C:].astype(jnp.bfloat16)

        # ---- per query-row tile --------------------------------------------
        row0 = pl.multiple_of(t * tq, tq)
        q_rows = q_sc[pl.ds(row0, tq), :]                        # (tq, C) bf16
        k_all = k_sc[...]                                        # (S, C) bf16
        v_all = v_sc[...]                                        # (S, C) bf16

        for h in range(nhead):                                   # static unroll
            lo = h * hd
            qh = q_rows[:, lo:lo + hd]                           # (tq, hd)
            kh = k_all[:, lo:lo + hd]                            # (S, hd)
            vh = v_all[:, lo:lo + hd]                            # (S, hd)

            # scores: contract over the head dim of both operands ("NT")
            s = jax.lax.dot_general(qh, kh, (((1,), (1,)), ((), ())),
                                    preferred_element_type=jnp.float32)  # (tq,S)

            # unnormalized softmax (f32); normalization deferred to after PV
            m = jnp.max(s, axis=-1, keepdims=True)
            p = jnp.exp(s - m)
            l = jnp.sum(p, axis=-1, keepdims=True)               # (tq, 1)

            oh = jnp.dot(p.astype(jnp.bfloat16), vh,
                         preferred_element_type=jnp.float32)     # (tq, hd)
            oh = oh * pl.reciprocal(l, approx=True)              # deferred norm
            ocat_sc[:, lo:lo + hd] = oh.astype(jnp.bfloat16)     # head concat

        # single full-depth output projection + residual + bias
        proj = jnp.dot(ocat_sc[...], wout_ref[...],
                       preferred_element_type=jnp.float32)       # (tq, C)
        res = xt_sc[pl.ds(row0, tq), :] + proj + bout_ref[...]
        o_ref[0] = jnp.transpose(res)                            # (C, tq)

    return kernel


# ----------------------------- wrapper ---------------------------------------
def attention2d_forward(prep, x, nhead, tq=128):
    B, C, H, W = x.shape
    S = H * W
    assert S % tq == 0 and C % nhead == 0
    xc = x.reshape(B, C, S)                 # channel-major; reshape is free

    kernel = _make_attention_kernel(S, C, nhead, tq)

    # NOTE: constant-index weight blocks could be single-buffered
    # (pipeline_mode=pl.Buffered(1)); left default — only ~200 KiB here.
    def const(shape):
        return pl.BlockSpec(shape, lambda b, t, _n=len(shape): (0,) * _n)

    out = pl.pallas_call(
        kernel,
        out_shape=jax.ShapeDtypeStruct((B, C, S), jnp.float32),
        grid_spec=pltpu.PrefetchScalarGridSpec(
            num_scalar_prefetch=0,
            grid=(B, S // tq),
            in_specs=[
                pl.BlockSpec((1, C, S), lambda b, t: (b, 0, 0)),   # tokens (C,S)
                const((1, C)), const((1, C)),                      # LN gamma, beta
                const((C, 3 * C)), const((1, 3 * C)),              # Wqkv^T (bf16), bias
                const((C, C)), const((1, C)),                      # Wout^T (bf16), bias
            ],
            out_specs=pl.BlockSpec((1, C, tq), lambda b, t: (b, 0, t)),
            scratch_shapes=[
                pltpu.VMEM((S, C), jnp.float32),    # x^T (residual / LN input)
                pltpu.VMEM((S, C), jnp.bfloat16),   # q (scale pre-folded)
                pltpu.VMEM((S, C), jnp.bfloat16),   # k
                pltpu.VMEM((S, C), jnp.bfloat16),   # v
                pltpu.VMEM((tq, C), jnp.bfloat16),  # concatenated head outputs
            ]),
        compiler_params=pltpu.CompilerParams(
            dimension_semantics=("parallel", "arbitrary")),
    )(xc, prep["ln_g"], prep["ln_b"], prep["wqkv_t"], prep["bqkv"],
      prep["wout_t"], prep["bout"])

    return out.reshape(B, C, H, W)          # already NCHW-ordered


# --------------------------- parameter handling -------------------------------
def init_params(key, c):
    k1, k2, k3, k4 = jax.random.split(key, 4)
    s = 0.02
    return {
        "ln_g": jnp.ones((c,), jnp.float32),
        "ln_b": jnp.zeros((c,), jnp.float32),
        "in_proj_w": s * jax.random.normal(k1, (3 * c, c), jnp.float32),
        "in_proj_b": s * jax.random.normal(k2, (3 * c,), jnp.float32),
        "out_proj_w": s * jax.random.normal(k3, (c, c), jnp.float32),
        "out_proj_b": s * jax.random.normal(k4, (c,), jnp.float32),
    }


def prepare_params(params, nhead):
    """One-time weight prep: fold 1/sqrt(hd) into Q, transpose, bf16 cast."""
    c = params["ln_g"].shape[0]
    scale = 1.0 / math.sqrt(c // nhead)
    wqkv = params["in_proj_w"].at[:c].multiply(scale)     # scale Q rows
    bqkv = params["in_proj_b"].at[:c].multiply(scale)     # scale Q bias
    return {
        "ln_g": params["ln_g"][None, :].astype(jnp.float32),
        "ln_b": params["ln_b"][None, :].astype(jnp.float32),
        "wqkv_t": jnp.transpose(wqkv).astype(jnp.bfloat16),
        "bqkv": bqkv[None, :].astype(jnp.float32),
        "wout_t": jnp.transpose(params["out_proj_w"]).astype(jnp.bfloat16),
        "bout": params["out_proj_b"][None, :].astype(jnp.float32),
    }


# --------------------------- pure-JAX reference -------------------------------
def reference_forward(params, x, nhead):
    B, C, H, W = x.shape
    S = H * W
    xt = x.reshape(B, C, S).transpose(0, 2, 1)
    mu = jnp.mean(xt, axis=-1, keepdims=True)
    var = jnp.mean(jnp.square(xt - mu), axis=-1, keepdims=True)
    n = (xt - mu) / jnp.sqrt(var + LN_EPS) * params["ln_g"] + params["ln_b"]
    qkv = jnp.einsum("bsc,dc->bsd", n, params["in_proj_w"]) + params["in_proj_b"]
    q, k, v = jnp.split(qkv, 3, axis=-1)
    hd = C // nhead

    def heads(t):
        return t.reshape(B, S, nhead, hd).transpose(0, 2, 1, 3)

    q, k, v = heads(q), heads(k), heads(v)
    s = jnp.einsum("bnqh,bnkh->bnqk", q, k) / math.sqrt(hd)
    p = jax.nn.softmax(s, axis=-1)
    o = jnp.einsum("bnqk,bnkh->bnqh", p, v).transpose(0, 2, 1, 3).reshape(B, S, C)
    o = jnp.einsum("bsc,dc->bsd", o, params["out_proj_w"]) + params["out_proj_b"]
    y = xt + o
    return y.transpose(0, 2, 1).reshape(B, C, H, W)


# ----------------------------------- main -------------------------------------
if __name__ == "__main__":
    B, C, H, W = 2, 128, 16, 16     # small, lane-dense test config
    NHEAD = 8

    key = jax.random.PRNGKey(0)
    kx, kp = jax.random.split(key)
    x = jax.random.normal(kx, (B, C, H, W), dtype=jnp.float32)
    params = init_params(kp, C)
    prep = prepare_params(params, NHEAD)

    fwd = jax.jit(functools.partial(attention2d_forward, nhead=NHEAD))
    out = jax.block_until_ready(fwd(prep, x))

    assert out.shape == (B, C, H, W), out.shape
    assert bool(jnp.all(jnp.isfinite(out)))

    ref = reference_forward(params, x, NHEAD)
    max_err = float(jnp.max(jnp.abs(out - ref)))
    assert max_err < 2e-2, f"max abs err vs reference: {max_err}"

    print("KERNEL_OK")
</pallas_src>

<mosaic_0001>
module attributes {stable_mosaic.version = 11 : i64} {
  func.func @kernel(%arg0: i32, %arg1: i32, %arg2: memref<1x128x256xf32, #tpu.memory_space<vmem>>, %arg3: memref<1x128xf32, #tpu.memory_space<vmem>>, %arg4: memref<1x128xf32, #tpu.memory_space<vmem>>, %arg5: memref<128x384xbf16, #tpu.memory_space<vmem>>, %arg6: memref<1x384xf32, #tpu.memory_space<vmem>>, %arg7: memref<128x128xbf16, #tpu.memory_space<vmem>>, %arg8: memref<1x128xf32, #tpu.memory_space<vmem>>, %arg9: memref<1x128x128xf32, #tpu.memory_space<vmem>>, %arg10: memref<256x128xf32, #tpu.memory_space<vmem>>, %arg11: memref<256x128xbf16, #tpu.memory_space<vmem>>, %arg12: memref<256x128xbf16, #tpu.memory_space<vmem>>, %arg13: memref<256x128xbf16, #tpu.memory_space<vmem>>, %arg14: memref<128x128xbf16, #tpu.memory_space<vmem>>) attributes {dimension_semantics = [#tpu.dimension_semantics<parallel>, #tpu.dimension_semantics<arbitrary>], iteration_bounds = array<i64: 2, 2>, scalar_prefetch = 0 : i64, scratch_operands = 5 : i64, tpu.core_type = #tpu.core_type<tc>, window_params = [{transform_indices = @transform_0, window_bounds = array<i64: 1, 128, 256>}, {pipeline_mode = #tpu.pipeline_mode<synchronous>, transform_indices = @transform_1, window_bounds = array<i64: 1, 128>}, {pipeline_mode = #tpu.pipeline_mode<synchronous>, transform_indices = @transform_2, window_bounds = array<i64: 1, 128>}, {pipeline_mode = #tpu.pipeline_mode<synchronous>, transform_indices = @transform_3, window_bounds = array<i64: 128, 384>}, {pipeline_mode = #tpu.pipeline_mode<synchronous>, transform_indices = @transform_4, window_bounds = array<i64: 1, 384>}, {pipeline_mode = #tpu.pipeline_mode<synchronous>, transform_indices = @transform_5, window_bounds = array<i64: 128, 128>}, {pipeline_mode = #tpu.pipeline_mode<synchronous>, transform_indices = @transform_6, window_bounds = array<i64: 1, 128>}, {transform_indices = @transform_7, window_bounds = array<i64: 1, 128, 128>}]} {
    %c0_i32 = arith.constant 0 : i32
    %0 = arith.cmpi eq, %arg1, %c0_i32 : i32
    %1 = arith.extui %0 : i1 to i32
    %c0_i32_0 = arith.constant 0 : i32
    %2 = arith.cmpi ne, %1, %c0_i32_0 : i32
    scf.if %2 {
      %c0_56 = arith.constant 0 : index
      %c0_57 = arith.constant 0 : index
      %c0_58 = arith.constant 0 : index
      %166 = vector.load %arg2[%c0_56, %c0_57, %c0_58] : memref<1x128x256xf32, #tpu.memory_space<vmem>>, vector<1x128x256xf32>
      %167 = vector.shape_cast %166 : vector<1x128x256xf32> to vector<128x256xf32>
      %168 = tpu.transpose %167, [1, 0] : vector<128x256xf32> -> vector<256x128xf32>
      %c0_59 = arith.constant 0 : index
      %c0_60 = arith.constant 0 : index
      %169 = vector.load %arg10[%c0_59, %c0_60] : memref<256x128xf32, #tpu.memory_space<vmem>>, vector<256x128xf32>
      tpu.vector_store %arg10[%c0_59, %c0_60], %168 {strides = array<i32>} : memref<256x128xf32, #tpu.memory_space<vmem>>, vector<256x128xf32>,
      %cst_61 = arith.constant dense<0.000000e+00> : vector<256xf32>
      %170 = vector.multi_reduction <add>, %168, %cst_61 [1] : vector<256x128xf32> to vector<256xf32>
      %171 = vector.shape_cast %170 : vector<256xf32> to vector<256x1xf32>
      %cst_62 = arith.constant 1.280000e+02 : f32
      %172 = vector.broadcast %cst_62 : f32 to vector<256x1xf32>
      %173 = arith.divf %171, %172 : vector<256x1xf32>
      %174 = vector.broadcast %173 : vector<256x1xf32> to vector<256x128xf32>
      %175 = arith.subf %168, %174 : vector<256x128xf32>
      %176 = arith.mulf %175, %175 : vector<256x128xf32>
      %cst_63 = arith.constant dense<0.000000e+00> : vector<256xf32>
      %177 = vector.multi_reduction <add>, %176, %cst_63 [1] : vector<256x128xf32> to vector<256xf32>
      %178 = vector.shape_cast %177 : vector<256xf32> to vector<256x1xf32>
      %cst_64 = arith.constant 1.280000e+02 : f32
      %179 = vector.broadcast %cst_64 : f32 to vector<256x1xf32>
      %180 = arith.divf %178, %179 : vector<256x1xf32>
      %181 = vector.broadcast %173 : vector<256x1xf32> to vector<256x128xf32>
      %182 = arith.subf %168, %181 : vector<256x128xf32>
      %cst_65 = arith.constant 9.99999974E-6 : f32
      %183 = vector.broadcast %cst_65 : f32 to vector<256x1xf32>
      %184 = arith.addf %180, %183 : vector<256x1xf32>
      %185 = math.rsqrt %184 : vector<256x1xf32>
      %186 = vector.broadcast %185 : vector<256x1xf32> to vector<256x128xf32>
      %187 = arith.mulf %182, %186 : vector<256x128xf32>
      %c0_66 = arith.constant 0 : index
      %c0_67 = arith.constant 0 : index
      %188 = vector.load %arg3[%c0_66, %c0_67] : memref<1x128xf32, #tpu.memory_space<vmem>>, vector<1x128xf32>
      %189 = vector.broadcast %188 : vector<1x128xf32> to vector<256x128xf32>
      %190 = arith.mulf %187, %189 : vector<256x128xf32>
      %c0_68 = arith.constant 0 : index
      %c0_69 = arith.constant 0 : index
      %191 = vector.load %arg4[%c0_68, %c0_69] : memref<1x128xf32, #tpu.memory_space<vmem>>, vector<1x128xf32>
      %192 = vector.broadcast %191 : vector<1x128xf32> to vector<256x128xf32>
      %193 = arith.addf %190, %192 : vector<256x128xf32>
      %194 = arith.truncf %193 : vector<256x128xf32> to vector<256x128xbf16>
      %c0_70 = arith.constant 0 : index
      %c0_71 = arith.constant 0 : index
      %195 = vector.load %arg5[%c0_70, %c0_71] : memref<128x384xbf16, #tpu.memory_space<vmem>>, vector<128x384xbf16>
      %cst_72 = arith.constant dense<0.000000e+00> : vector<256x384xf32>
      %196 = tpu.matmul %194, %195, %cst_72 {dimension_numbers = #tpu.dot_dimension_numbers<[1], [0], [0], [1], [0, 0, 1, 1], [], []>} : vector<256x128xbf16>, vector<128x384xbf16>, vector<256x384xf32> -> vector<256x384xf32>
      %c0_73 = arith.constant 0 : index
      %c0_74 = arith.constant 0 : index
      %197 = vector.load %arg6[%c0_73, %c0_74] : memref<1x384xf32, #tpu.memory_space<vmem>>, vector<1x384xf32>
      %198 = vector.broadcast %197 : vector<1x384xf32> to vector<256x384xf32>
      %199 = arith.addf %196, %198 : vector<256x384xf32>
      %200 = vector.extract_strided_slice %199 {offsets = [0, 0], sizes = [256, 128], strides = [1, 1]} : vector<256x384xf32> to vector<256x128xf32>
      %201 = arith.truncf %200 : vector<256x128xf32> to vector<256x128xbf16>
      %c0_75 = arith.constant 0 : index
      %c0_76 = arith.constant 0 : index
      %202 = vector.load %arg11[%c0_75, %c0_76] : memref<256x128xbf16, #tpu.memory_space<vmem>>, vector<256x128xbf16>
      tpu.vector_store %arg11[%c0_75, %c0_76], %201 {strides = array<i32>} : memref<256x128xbf16, #tpu.memory_space<vmem>>, vector<256x128xbf16>,
      %203 = vector.extract_strided_slice %199 {offsets = [0, 128], sizes = [256, 128], strides = [1, 1]} : vector<256x384xf32> to vector<256x128xf32>
      %204 = arith.truncf %203 : vector<256x128xf32> to vector<256x128xbf16>
      %c0_77 = arith.constant 0 : index
      %c0_78 = arith.constant 0 : index
      %205 = vector.load %arg12[%c0_77, %c0_78] : memref<256x128xbf16, #tpu.memory_space<vmem>>, vector<256x128xbf16>
      tpu.vector_store %arg12[%c0_77, %c0_78], %204 {strides = array<i32>} : memref<256x128xbf16, #tpu.memory_space<vmem>>, vector<256x128xbf16>,
      %206 = vector.extract_strided_slice %199 {offsets = [0, 256], sizes = [256, 128], strides = [1, 1]} : vector<256x384xf32> to vector<256x128xf32>
      %207 = arith.truncf %206 : vector<256x128xf32> to vector<256x128xbf16>
      %c0_79 = arith.constant 0 : index
      %c0_80 = arith.constant 0 : index
      %208 = vector.load %arg13[%c0_79, %c0_80] : memref<256x128xbf16, #tpu.memory_space<vmem>>, vector<256x128xbf16>
      tpu.vector_store %arg13[%c0_79, %c0_80], %207 {strides = array<i32>} : memref<256x128xbf16, #tpu.memory_space<vmem>>, vector<256x128xbf16>,
    } else {
    }
    %c128_i32 = arith.constant 128 : i32
    %3 = arith.muli %arg1, %c128_i32 : i32
    %4 = tpu.assume_multiple %3, 128 : i32
    %5 = arith.index_cast %4 : i32 to index
    %c0 = arith.constant 0 : index
    %6 = vector.load %arg11[%5, %c0] : memref<256x128xbf16, #tpu.memory_space<vmem>>, vector<128x128xbf16>
    %c0_1 = arith.constant 0 : index
    %c0_2 = arith.constant 0 : index
    %7 = vector.load %arg12[%c0_1, %c0_2] : memref<256x128xbf16, #tpu.memory_space<vmem>>, vector<256x128xbf16>
    %c0_3 = arith.constant 0 : index
    %c0_4 = arith.constant 0 : index
    %8 = vector.load %arg13[%c0_3, %c0_4] : memref<256x128xbf16, #tpu.memory_space<vmem>>, vector<256x128xbf16>
    %9 = vector.extract_strided_slice %6 {offsets = [0, 0], sizes = [128, 16], strides = [1, 1]} : vector<128x128xbf16> to vector<128x16xbf16>
    %10 = vector.extract_strided_slice %7 {offsets = [0, 0], sizes = [256, 16], strides = [1, 1]} : vector<256x128xbf16> to vector<256x16xbf16>
    %11 = vector.extract_strided_slice %8 {offsets = [0, 0], sizes = [256, 16], strides = [1, 1]} : vector<256x128xbf16> to vector<256x16xbf16>
    %cst = arith.constant dense<0.000000e+00> : vector<128x256xf32>
    %12 = tpu.matmul %9, %10, %cst {dimension_numbers = #tpu.dot_dimension_numbers<[1], [1], [0], [0], [0, 0, 1, 0], [], []>} : vector<128x16xbf16>, vector<256x16xbf16>, vector<128x256xf32> -> vector<128x256xf32>
    %cst_5 = arith.constant dense<0xFF800000> : vector<128xf32>
    %13 = vector.multi_reduction <maximumf>, %12, %cst_5 [1] : vector<128x256xf32> to vector<128xf32>
    %14 = vector.shape_cast %13 : vector<128xf32> to vector<128x1xf32>
    %15 = vector.broadcast %14 : vector<128x1xf32> to vector<128x256xf32>
    %16 = arith.subf %12, %15 : vector<128x256xf32>
    %17 = math.exp %16 : vector<128x256xf32>
    %cst_6 = arith.constant dense<0.000000e+00> : vector<128xf32>
    %18 = vector.multi_reduction <add>, %17, %cst_6 [1] : vector<128x256xf32> to vector<128xf32>
    %19 = vector.shape_cast %18 : vector<128xf32> to vector<128x1xf32>
    %20 = arith.truncf %17 : vector<128x256xf32> to vector<128x256xbf16>
    %cst_7 = arith.constant dense<0.000000e+00> : vector<128x16xf32>
    %21 = tpu.matmul %20, %11, %cst_7 {dimension_numbers = #tpu.dot_dimension_numbers<[1], [0], [0], [1], [0, 0, 1, 1], [], []>} : vector<128x256xbf16>, vector<256x16xbf16>, vector<128x16xf32> -> vector<128x16xf32>
    %22 = tpu.reciprocal %19 {approx = true} : vector<128x1xf32> -> vector<128x1xf32>
    %23 = vector.broadcast %22 : vector<128x1xf32> to vector<128x16xf32>
    %24 = arith.mulf %21, %23 : vector<128x16xf32>
    %25 = arith.truncf %24 : vector<128x16xf32> to vector<128x16xbf16>
    %c0_8 = arith.constant 0 : index
    %c0_9 = arith.constant 0 : index
    %26 = vector.load %arg14[%c0_8, %c0_9] : memref<128x128xbf16, #tpu.memory_space<vmem>>, vector<128x16xbf16>
    tpu.vector_store %arg14[%c0_8, %c0_9], %25 {strides = array<i32>} : memref<128x128xbf16, #tpu.memory_space<vmem>>, vector<128x16xbf16>,
    %27 = vector.extract_strided_slice %6 {offsets = [0, 16], sizes = [128, 16], strides = [1, 1]} : vector<128x128xbf16> to vector<128x16xbf16>
    %28 = vector.extract_strided_slice %7 {offsets = [0, 16], sizes = [256, 16], strides = [1, 1]} : vector<256x128xbf16> to vector<256x16xbf16>
    %29 = vector.extract_strided_slice %8 {offsets = [0, 16], sizes = [256, 16], strides = [1, 1]} : vector<256x128xbf16> to vector<256x16xbf16>
    %cst_10 = arith.constant dense<0.000000e+00> : vector<128x256xf32>
    %30 = tpu.matmul %27, %28, %cst_10 {dimension_numbers = #tpu.dot_dimension_numbers<[1], [1], [0], [0], [0, 0, 1, 0], [], []>} : vector<128x16xbf16>, vector<256x16xbf16>, vector<128x256xf32> -> vector<128x256xf32>
    %cst_11 = arith.constant dense<0xFF800000> : vector<128xf32>
    %31 = vector.multi_reduction <maximumf>, %30, %cst_11 [1] : vector<128x256xf32> to vector<128xf32>
    %32 = vector.shape_cast %31 : vector<128xf32> to vector<128x1xf32>
    %33 = vector.broadcast %32 : vector<128x1xf32> to vector<128x256xf32>
    %34 = arith.subf %30, %33 : vector<128x256xf32>
    %35 = math.exp %34 : vector<128x256xf32>
    %cst_12 = arith.constant dense<0.000000e+00> : vector<128xf32>
    %36 = vector.multi_reduction <add>, %35, %cst_12 [1] : vector<128x256xf32> to vector<128xf32>
    %37 = vector.shape_cast %36 : vector<128xf32> to vector<128x1xf32>
    %38 = arith.truncf %35 : vector<128x256xf32> to vector<128x256xbf16>
    %cst_13 = arith.constant dense<0.000000e+00> : vector<128x16xf32>
    %39 = tpu.matmul %38, %29, %cst_13 {dimension_numbers = #tpu.dot_dimension_numbers<[1], [0], [0], [1], [0, 0, 1, 1], [], []>} : vector<128x256xbf16>, vector<256x16xbf16>, vector<128x16xf32> -> vector<128x16xf32>
    %40 = tpu.reciprocal %37 {approx = true} : vector<128x1xf32> -> vector<128x1xf32>
    %41 = vector.broadcast %40 : vector<128x1xf32> to vector<128x16xf32>
    %42 = arith.mulf %39, %41 : vector<128x16xf32>
    %43 = arith.truncf %42 : vector<128x16xf32> to vector<128x16xbf16>
    %c0_14 = arith.constant 0 : index
    %c16 = arith.constant 16 : index
    %44 = vector.load %arg14[%c0_14, %c16] : memref<128x128xbf16, #tpu.memory_space<vmem>>, vector<128x16xbf16>
    tpu.vector_store %arg14[%c0_14, %c16], %43 {strides = array<i32>} : memref<128x128xbf16, #tpu.memory_space<vmem>>, vector<128x16xbf16>,
    %45 = vector.extract_strided_slice %6 {offsets = [0, 32], sizes = [128, 16], strides = [1, 1]} : vector<128x128xbf16> to vector<128x16xbf16>
    %46 = vector.extract_strided_slice %7 {offsets = [0, 32], sizes = [256, 16], strides = [1, 1]} : vector<256x128xbf16> to vector<256x16xbf16>
    %47 = vector.extract_strided_slice %8 {offsets = [0, 32], sizes = [256, 16], strides = [1, 1]} : vector<256x128xbf16> to vector<256x16xbf16>
    %cst_15 = arith.constant dense<0.000000e+00> : vector<128x256xf32>
    %48 = tpu.matmul %45, %46, %cst_15 {dimension_numbers = #tpu.dot_dimension_numbers<[1], [1], [0], [0], [0, 0, 1, 0], [], []>} : vector<128x16xbf16>, vector<256x16xbf16>, vector<128x256xf32> -> vector<128x256xf32>
    %cst_16 = arith.constant dense<0xFF800000> : vector<128xf32>
    %49 = vector.multi_reduction <maximumf>, %48, %cst_16 [1] : vector<128x256xf32> to vector<128xf32>
    %50 = vector.shape_cast %49 : vector<128xf32> to vector<128x1xf32>
    %51 = vector.broadcast %50 : vector<128x1xf32> to vector<128x256xf32>
    %52 = arith.subf %48, %51 : vector<128x256xf32>
    %53 = math.exp %52 : vector<128x256xf32>
    %cst_17 = arith.constant dense<0.000000e+00> : vector<128xf32>
    %54 = vector.multi_reduction <add>, %53, %cst_17 [1] : vector<128x256xf32> to vector<128xf32>
    %55 = vector.shape_cast %54 : vector<128xf32> to vector<128x1xf32>
    %56 = arith.truncf %53 : vector<128x256xf32> to vector<128x256xbf16>
    %cst_18 = arith.constant dense<0.000000e+00> : vector<128x16xf32>
    %57 = tpu.matmul %56, %47, %cst_18 {dimension_numbers = #tpu.dot_dimension_numbers<[1], [0], [0], [1], [0, 0, 1, 1], [], []>} : vector<128x256xbf16>, vector<256x16xbf16>, vector<128x16xf32> -> vector<128x16xf32>
    %58 = tpu.reciprocal %55 {approx = true} : vector<128x1xf32> -> vector<128x1xf32>
    %59 = vector.broadcast %58 : vector<128x1xf32> to vector<128x16xf32>
    %60 = arith.mulf %57, %59 : vector<128x16xf32>
    %61 = arith.truncf %60 : vector<128x16xf32> to vector<128x16xbf16>
    %c0_19 = arith.constant 0 : index
    %c32 = arith.constant 32 : index
    %62 = vector.load %arg14[%c0_19, %c32] : memref<128x128xbf16, #tpu.memory_space<vmem>>, vector<128x16xbf16>
    tpu.vector_store %arg14[%c0_19, %c32], %61 {strides = array<i32>} : memref<128x128xbf16, #tpu.memory_space<vmem>>, vector<128x16xbf16>,
    %63 = vector.extract_strided_slice %6 {offsets = [0, 48], sizes = [128, 16], strides = [1, 1]} : vector<128x128xbf16> to vector<128x16xbf16>
    %64 = vector.extract_strided_slice %7 {offsets = [0, 48], sizes = [256, 16], strides = [1, 1]} : vector<256x128xbf16> to vector<256x16xbf16>
    %65 = vector.extract_strided_slice %8 {offsets = [0, 48], sizes = [256, 16], strides = [1, 1]} : vector<256x128xbf16> to vector<256x16xbf16>
    %cst_20 = arith.constant dense<0.000000e+00> : vector<128x256xf32>
    %66 = tpu.matmul %63, %64, %cst_20 {dimension_numbers = #tpu.dot_dimension_numbers<[1], [1], [0], [0], [0, 0, 1, 0], [], []>} : vector<128x16xbf16>, vector<256x16xbf16>, vector<128x256xf32> -> vector<128x256xf32>
    %cst_21 = arith.constant dense<0xFF800000> : vector<128xf32>
    %67 = vector.multi_reduction <maximumf>, %66, %cst_21 [1] : vector<128x256xf32> to vector<128xf32>
    %68 = vector.shape_cast %67 : vector<128xf32> to vector<128x1xf32>
    %69 = vector.broadcast %68 : vector<128x1xf32> to vector<128x256xf32>
    %70 = arith.subf %66, %69 : vector<128x256xf32>
    %71 = math.exp %70 : vector<128x256xf32>
    %cst_22 = arith.constant dense<0.000000e+00> : vector<128xf32>
    %72 = vector.multi_reduction <add>, %71, %cst_22 [1] : vector<128x256xf32> to vector<128xf32>
    %73 = vector.shape_cast %72 : vector<128xf32> to vector<128x1xf32>
    %74 = arith.truncf %71 : vector<128x256xf32> to vector<128x256xbf16>
    %cst_23 = arith.constant dense<0.000000e+00> : vector<128x16xf32>
    %75 = tpu.matmul %74, %65, %cst_23 {dimension_numbers = #tpu.dot_dimension_numbers<[1], [0], [0], [1], [0, 0, 1, 1], [], []>} : vector<128x256xbf16>, vector<256x16xbf16>, vector<128x16xf32> -> vector<128x16xf32>
    %76 = tpu.reciprocal %73 {approx = true} : vector<128x1xf32> -> vector<128x1xf32>
    %77 = vector.broadcast %76 : vector<128x1xf32> to vector<128x16xf32>
    %78 = arith.mulf %75, %77 : vector<128x16xf32>
    %79 = arith.truncf %78 : vector<128x16xf32> to vector<128x16xbf16>
    %c0_24 = arith.constant 0 : index
    %c48 = arith.constant 48 : index
    %80 = vector.load %arg14[%c0_24, %c48] : memref<128x128xbf16, #tpu.memory_space<vmem>>, vector<128x16xbf16>
    tpu.vector_store %arg14[%c0_24, %c48], %79 {strides = array<i32>} : memref<128x128xbf16, #tpu.memory_space<vmem>>, vector<128x16xbf16>,
    %81 = vector.extract_strided_slice %6 {offsets = [0, 64], sizes = [128, 16], strides = [1, 1]} : vector<128x128xbf16> to vector<128x16xbf16>
    %82 = vector.extract_strided_slice %7 {offsets = [0, 64], sizes = [256, 16], strides = [1, 1]} : vector<256x128xbf16> to vector<256x16xbf16>
    %83 = vector.extract_strided_slice %8 {offsets = [0, 64], sizes = [256, 16], strides = [1, 1]} : vector<256x128xbf16> to vector<256x16xbf16>
    %cst_25 = arith.constant dense<0.000000e+00> : vector<128x256xf32>
    %84 = tpu.matmul %81, %82, %cst_25 {dimension_numbers = #tpu.dot_dimension_numbers<[1], [1], [0], [0], [0, 0, 1, 0], [], []>} : vector<128x16xbf16>, vector<256x16xbf16>, vector<128x256xf32> -> vector<128x256xf32>
    %cst_26 = arith.constant dense<0xFF800000> : vector<128xf32>
    %85 = vector.multi_reduction <maximumf>, %84, %cst_26 [1] : vector<128x256xf32> to vector<128xf32>
    %86 = vector.shape_cast %85 : vector<128xf32> to vector<128x1xf32>
    %87 = vector.broadcast %86 : vector<128x1xf32> to vector<128x256xf32>
    %88 = arith.subf %84, %87 : vector<128x256xf32>
    %89 = math.exp %88 : vector<128x256xf32>
    %cst_27 = arith.constant dense<0.000000e+00> : vector<128xf32>
    %90 = vector.multi_reduction <add>, %89, %cst_27 [1] : vector<128x256xf32> to vector<128xf32>
    %91 = vector.shape_cast %90 : vector<128xf32> to vector<128x1xf32>
    %92 = arith.truncf %89 : vector<128x256xf32> to vector<128x256xbf16>
    %cst_28 = arith.constant dense<0.000000e+00> : vector<128x16xf32>
    %93 = tpu.matmul %92, %83, %cst_28 {dimension_numbers = #tpu.dot_dimension_numbers<[1], [0], [0], [1], [0, 0, 1, 1], [], []>} : vector<128x256xbf16>, vector<256x16xbf16>, vector<128x16xf32> -> vector<128x16xf32>
    %94 = tpu.reciprocal %91 {approx = true} : vector<128x1xf32> -> vector<128x1xf32>
    %95 = vector.broadcast %94 : vector<128x1xf32> to vector<128x16xf32>
    %96 = arith.mulf %93, %95 : vector<128x16xf32>
    %97 = arith.truncf %96 : vector<128x16xf32> to vector<128x16xbf16>
    %c0_29 = arith.constant 0 : index
    %c64 = arith.constant 64 : index
    %98 = vector.load %arg14[%c0_29, %c64] : memref<128x128xbf16, #tpu.memory_space<vmem>>, vector<128x16xbf16>
    tpu.vector_store %arg14[%c0_29, %c64], %97 {strides = array<i32>} : memref<128x128xbf16, #tpu.memory_space<vmem>>, vector<128x16xbf16>,
    %99 = vector.extract_strided_slice %6 {offsets = [0, 80], sizes = [128, 16], strides = [1, 1]} : vector<128x128xbf16> to vector<128x16xbf16>
    %100 = vector.extract_strided_slice %7 {offsets = [0, 80], sizes = [256, 16], strides = [1, 1]} : vector<256x128xbf16> to vector<256x16xbf16>
    %101 = vector.extract_strided_slice %8 {offsets = [0, 80], sizes = [256, 16], strides = [1, 1]} : vector<256x128xbf16> to vector<256x16xbf16>
    %cst_30 = arith.constant dense<0.000000e+00> : vector<128x256xf32>
    %102 = tpu.matmul %99, %100, %cst_30 {dimension_numbers = #tpu.dot_dimension_numbers<[1], [1], [0], [0], [0, 0, 1, 0], [], []>} : vector<128x16xbf16>, vector<256x16xbf16>, vector<128x256xf32> -> vector<128x256xf32>
    %cst_31 = arith.constant dense<0xFF800000> : vector<128xf32>
    %103 = vector.multi_reduction <maximumf>, %102, %cst_31 [1] : vector<128x256xf32> to vector<128xf32>
    %104 = vector.shape_cast %103 : vector<128xf32> to vector<128x1xf32>
    %105 = vector.broadcast %104 : vector<128x1xf32> to vector<128x256xf32>
    %106 = arith.subf %102, %105 : vector<128x256xf32>
    %107 = math.exp %106 : vector<128x256xf32>
    %cst_32 = arith.constant dense<0.000000e+00> : vector<128xf32>
    %108 = vector.multi_reduction <add>, %107, %cst_32 [1] : vector<128x256xf32> to vector<128xf32>
    %109 = vector.shape_cast %108 : vector<128xf32> to vector<128x1xf32>
    %110 = arith.truncf %107 : vector<128x256xf32> to vector<128x256xbf16>
    %cst_33 = arith.constant dense<0.000000e+00> : vector<128x16xf32>
    %111 = tpu.matmul %110, %101, %cst_33 {dimension_numbers = #tpu.dot_dimension_numbers<[1], [0], [0], [1], [0, 0, 1, 1], [], []>} : vector<128x256xbf16>, vector<256x16xbf16>, vector<128x16xf32> -> vector<128x16xf32>
    %112 = tpu.reciprocal %109 {approx = true} : vector<128x1xf32> -> vector<128x1xf32>
    %113 = vector.broadcast %112 : vector<128x1xf32> to vector<128x16xf32>
    %114 = arith.mulf %111, %113 : vector<128x16xf32>
    %115 = arith.truncf %114 : vector<128x16xf32> to vector<128x16xbf16>
    %c0_34 = arith.constant 0 : index
    %c80 = arith.constant 80 : index
    %116 = vector.load %arg14[%c0_34, %c80] : memref<128x128xbf16, #tpu.memory_space<vmem>>, vector<128x16xbf16>
    tpu.vector_store %arg14[%c0_34, %c80], %115 {strides = array<i32>} : memref<128x128xbf16, #tpu.memory_space<vmem>>, vector<128x16xbf16>,
    %117 = vector.extract_strided_slice %6 {offsets = [0, 96], sizes = [128, 16], strides = [1, 1]} : vector<128x128xbf16> to vector<128x16xbf16>
    %118 = vector.extract_strided_slice %7 {offsets = [0, 96], sizes = [256, 16], strides = [1, 1]} : vector<256x128xbf16> to vector<256x16xbf16>
    %119 = vector.extract_strided_slice %8 {offsets = [0, 96], sizes = [256, 16], strides = [1, 1]} : vector<256x128xbf16> to vector<256x16xbf16>
    %cst_35 = arith.constant dense<0.000000e+00> : vector<128x256xf32>
    %120 = tpu.matmul %117, %118, %cst_35 {dimension_numbers = #tpu.dot_dimension_numbers<[1], [1], [0], [0], [0, 0, 1, 0], [], []>} : vector<128x16xbf16>, vector<256x16xbf16>, vector<128x256xf32> -> vector<128x256xf32>
    %cst_36 = arith.constant dense<0xFF800000> : vector<128xf32>
    %121 = vector.multi_reduction <maximumf>, %120, %cst_36 [1] : vector<128x256xf32> to vector<128xf32>
    %122 = vector.shape_cast %121 : vector<128xf32> to vector<128x1xf32>
    %123 = vector.broadcast %122 : vector<128x1xf32> to vector<128x256xf32>
    %124 = arith.subf %120, %123 : vector<128x256xf32>
    %125 = math.exp %124 : vector<128x256xf32>
    %cst_37 = arith.constant dense<0.000000e+00> : vector<128xf32>
    %126 = vector.multi_reduction <add>, %125, %cst_37 [1] : vector<128x256xf32> to vector<128xf32>
    %127 = vector.shape_cast %126 : vector<128xf32> to vector<128x1xf32>
    %128 = arith.truncf %125 : vector<128x256xf32> to vector<128x256xbf16>
    %cst_38 = arith.constant dense<0.000000e+00> : vector<128x16xf32>
    %129 = tpu.matmul %128, %119, %cst_38 {dimension_numbers = #tpu.dot_dimension_numbers<[1], [0], [0], [1], [0, 0, 1, 1], [], []>} : vector<128x256xbf16>, vector<256x16xbf16>, vector<128x16xf32> -> vector<128x16xf32>
    %130 = tpu.reciprocal %127 {approx = true} : vector<128x1xf32> -> vector<128x1xf32>
    %131 = vector.broadcast %130 : vector<128x1xf32> to vector<128x16xf32>
    %132 = arith.mulf %129, %131 : vector<128x16xf32>
    %133 = arith.truncf %132 : vector<128x16xf32> to vector<128x16xbf16>
    %c0_39 = arith.constant 0 : index
    %c96 = arith.constant 96 : index
    %134 = vector.load %arg14[%c0_39, %c96] : memref<128x128xbf16, #tpu.memory_space<vmem>>, vector<128x16xbf16>
    tpu.vector_store %arg14[%c0_39, %c96], %133 {strides = array<i32>} : memref<128x128xbf16, #tpu.memory_space<vmem>>, vector<128x16xbf16>,
    %135 = vector.extract_strided_slice %6 {offsets = [0, 112], sizes = [128, 16], strides = [1, 1]} : vector<128x128xbf16> to vector<128x16xbf16>
    %136 = vector.extract_strided_slice %7 {offsets = [0, 112], sizes = [256, 16], strides = [1, 1]} : vector<256x128xbf16> to vector<256x16xbf16>
    %137 = vector.extract_strided_slice %8 {offsets = [0, 112], sizes = [256, 16], strides = [1, 1]} : vector<256x128xbf16> to vector<256x16xbf16>
    %cst_40 = arith.constant dense<0.000000e+00> : vector<128x256xf32>
    %138 = tpu.matmul %135, %136, %cst_40 {dimension_numbers = #tpu.dot_dimension_numbers<[1], [1], [0], [0], [0, 0, 1, 0], [], []>} : vector<128x16xbf16>, vector<256x16xbf16>, vector<128x256xf32> -> vector<128x256xf32>
    %cst_41 = arith.constant dense<0xFF800000> : vector<128xf32>
    %139 = vector.multi_reduction <maximumf>, %138, %cst_41 [1] : vector<128x256xf32> to vector<128xf32>
    %140 = vector.shape_cast %139 : vector<128xf32> to vector<128x1xf32>
    %141 = vector.broadcast %140 : vector<128x1xf32> to vector<128x256xf32>
    %142 = arith.subf %138, %141 : vector<128x256xf32>
    %143 = math.exp %142 : vector<128x256xf32>
    %cst_42 = arith.constant dense<0.000000e+00> : vector<128xf32>
    %144 = vector.multi_reduction <add>, %143, %cst_42 [1] : vector<128x256xf32> to vector<128xf32>
    %145 = vector.shape_cast %144 : vector<128xf32> to vector<128x1xf32>
    %146 = arith.truncf %143 : vector<128x256xf32> to vector<128x256xbf16>
    %cst_43 = arith.constant dense<0.000000e+00> : vector<128x16xf32>
    %147 = tpu.matmul %146, %137, %cst_43 {dimension_numbers = #tpu.dot_dimension_numbers<[1], [0], [0], [1], [0, 0, 1, 1], [], []>} : vector<128x256xbf16>, vector<256x16xbf16>, vector<128x16xf32> -> vector<128x16xf32>
    %148 = tpu.reciprocal %145 {approx = true} : vector<128x1xf32> -> vector<128x1xf32>
    %149 = vector.broadcast %148 : vector<128x1xf32> to vector<128x16xf32>
    %150 = arith.mulf %147, %149 : vector<128x16xf32>
    %151 = arith.truncf %150 : vector<128x16xf32> to vector<128x16xbf16>
    %c0_44 = arith.constant 0 : index
    %c112 = arith.constant 112 : index
    %152 = vector.load %arg14[%c0_44, %c112] : memref<128x128xbf16, #tpu.memory_space<vmem>>, vector<128x16xbf16>
    tpu.vector_store %arg14[%c0_44, %c112], %151 {strides = array<i32>} : memref<128x128xbf16, #tpu.memory_space<vmem>>, vector<128x16xbf16>,
    %c0_45 = arith.constant 0 : index
    %c0_46 = arith.constant 0 : index
    %153 = vector.load %arg14[%c0_45, %c0_46] : memref<128x128xbf16, #tpu.memory_space<vmem>>, vector<128x128xbf16>
    %c0_47 = arith.constant 0 : index
    %c0_48 = arith.constant 0 : index
    %154 = vector.load %arg7[%c0_47, %c0_48] : memref<128x128xbf16, #tpu.memory_space<vmem>>, vector<128x128xbf16>
    %cst_49 = arith.constant dense<0.000000e+00> : vector<128x128xf32>
    %155 = tpu.matmul %153, %154, %cst_49 {dimension_numbers = #tpu.dot_dimension_numbers<[1], [0], [0], [1], [0, 0, 1, 1], [], []>} : vector<128x128xbf16>, vector<128x128xbf16>, vector<128x128xf32> -> vector<128x128xf32>
    %156 = arith.index_cast %4 : i32 to index
    %c0_50 = arith.constant 0 : index
    %157 = vector.load %arg10[%156, %c0_50] : memref<256x128xf32, #tpu.memory_space<vmem>>, vector<128x128xf32>
    %158 = arith.addf %157, %155 : vector<128x128xf32>
    %c0_51 = arith.constant 0 : index
    %c0_52 = arith.constant 0 : index
    %159 = vector.load %arg8[%c0_51, %c0_52] : memref<1x128xf32, #tpu.memory_space<vmem>>, vector<1x128xf32>
    %160 = vector.broadcast %159 : vector<1x128xf32> to vector<128x128xf32>
    %161 = arith.addf %158, %160 : vector<128x128xf32>
    %162 = tpu.transpose %161, [1, 0] : vector<128x128xf32> -> vector<128x128xf32>
    %c0_53 = arith.constant 0 : index
    %c0_54 = arith.constant 0 : index
    %c0_55 = arith.constant 0 : index
    %163 = vector.load %arg9[%c0_53, %c0_54, %c0_55] : memref<1x128x128xf32, #tpu.memory_space<vmem>>, vector<1x128x128xf32>
    %164 = vector.shape_cast %163 : vector<1x128x128xf32> to vector<128x128xf32>
    %165 = vector.shape_cast %162 : vector<128x128xf32> to vector<1x128x128xf32>
    tpu.vector_store %arg9[%c0_53, %c0_54, %c0_55], %165 {strides = array<i32>} : memref<1x128x128xf32, #tpu.memory_space<vmem>>, vector<1x128x128xf32>,
    return
  }
  func.func @transform_0(%arg0: i32, %arg1: i32) -> (i32, i32, i32) {
    %c0_i32 = arith.constant 0 : i32
    %c0_i32_0 = arith.constant 0 : i32
    %c0_i32_1 = arith.constant 0 : i32
    return %arg0, %c0_i32, %c0_i32_0 : i32, i32, i32
  }
  func.func @transform_1(%arg0: i32, %arg1: i32) -> (i32, i32) {
    %c0_i32 = arith.constant 0 : i32
    %c0_i32_0 = arith.constant 0 : i32
    %c0_i32_1 = arith.constant 0 : i32
    return %c0_i32, %c0_i32_0 : i32, i32
  }
  func.func @transform_2(%arg0: i32, %arg1: i32) -> (i32, i32) {
    %c0_i32 = arith.constant 0 : i32
    %c0_i32_0 = arith.constant 0 : i32
    %c0_i32_1 = arith.constant 0 : i32
    return %c0_i32, %c0_i32_0 : i32, i32
  }
  func.func @transform_3(%arg0: i32, %arg1: i32) -> (i32, i32) {
    %c0_i32 = arith.constant 0 : i32
    %c0_i32_0 = arith.constant 0 : i32
    %c0_i32_1 = arith.constant 0 : i32
    return %c0_i32, %c0_i32_0 : i32, i32
  }
  func.func @transform_4(%arg0: i32, %arg1: i32) -> (i32, i32) {
    %c0_i32 = arith.constant 0 : i32
    %c0_i32_0 = arith.constant 0 : i32
    %c0_i32_1 = arith.constant 0 : i32
    return %c0_i32, %c0_i32_0 : i32, i32
  }
  func.func @transform_5(%arg0: i32, %arg1: i32) -> (i32, i32) {
    %c0_i32 = arith.constant 0 : i32
    %c0_i32_0 = arith.constant 0 : i32
    %c0_i32_1 = arith.constant 0 : i32
    return %c0_i32, %c0_i32_0 : i32, i32
  }
  func.func @transform_6(%arg0: i32, %arg1: i32) -> (i32, i32) {
    %c0_i32 = arith.constant 0 : i32
    %c0_i32_0 = arith.constant 0 : i32
    %c0_i32_1 = arith.constant 0 : i32
    return %c0_i32, %c0_i32_0 : i32, i32
  }
  func.func @transform_7(%arg0: i32, %arg1: i32) -> (i32, i32, i32) {
    %c0_i32 = arith.constant 0 : i32
    %c0_i32_0 = arith.constant 0 : i32
    return %arg0, %c0_i32, %arg1 : i32, i32, i32
  }
}

</mosaic_0001>

<bundles_post_ra>
// kernel: attention2d_forward.1
= control target key start
LH: loop header
LB: loop body
LE: loop exit
PB: predicated region body
PF: predicated region fallthrough
CT: control target
= control target key end

     0   :  { %s9969_s24 = smov 0   ;;  %s9971_s25 = smov 0   ;;  %s15487_s0 = inlined_call_operand.vmem [shape: f32[2,128,256], index: 0, kind: input, shape index: {}]   ;;  %s15488_s1 = inlined_call_operand.vmem [shape: f32[1,128], index: 1, kind: input, shape index: {}]   ;;  %s15489_s2 = inlined_call_operand.vmem [shape: f32[1,128], index: 2, kind: input, shape index: {}]   ;;  %s15490_s3 = inlined_call_operand.vmem [shape: bf16[128,384], index: 3, kind: input, shape index: {}]   ;;  %s15491_s4 = inlined_call_operand.vmem [shape: f32[1,384], index: 4, kind: input, shape index: {}]   ;;  %s15492_s5 = inlined_call_operand.vmem [shape: bf16[128,128], index: 5, kind: input, shape index: {}]   ;;  %s15493_s6 = inlined_call_operand.vmem [shape: f32[1,128], index: 6, kind: input, shape index: {}]   ;;  %s15494_s7 = inlined_call_operand.vmem [shape: f32[2,128,256], index: 7, kind: output, shape index: {}]  }
   0x1   :  { %s9973_s26 = smov 0   ;;  %s9975_s27 = smov 0  }
   0x2   :  { %s9977_s28 = smov 0   ;;  %s9979_s29 = smov 0  }
   0x3   :  { %s9981_s30 = smov 0  }
   0x4 LB: > { %s26_s8 = sadd.s32 1, %s9911_s28  ;;  %s29_s9 = sadd.s32 1, %s9915_s29  ;;  %s9919_s30 = sphi %s9981_s30, %s17_s30   ;;  %s9915_s29 = sphi %s9979_s29, %s16151_s29   ;;  %s9911_s28 = sphi %s9977_s28, %s16150_s28   ;;  %s9907_s27 = sphi %s9975_s27, %s16149_s27   ;;  %s9903_s26 = sphi %s9973_s26, %s16148_s26   ;;  %s9899_s25 = sphi %s9971_s25, %s16147_s25   ;;  %s9895_s24 = sphi %s9969_s24, %s16146_s24  }
   0x5   : > { %p27_p0 = scmp.ge.s32.totalorder %s26_s8, 2  ;;  %s7981_s10 = sadd.s32 4294967295, %s9919_s30  }
   0x6   : > { %p200_p1 = scmp.ne.s32.totalorder %s9899_s25, %s9895_s24  ;;  %p201_p2 = scmp.eq.s32.totalorder %s7981_s10, 3 }
   0x7   : > { %s16153_s8 = smov (%p27_p0, %s26_s8), 0  ;;  %s16155_s9 = smov (!%p27_p0, %s29_s9), %s9915_s29 }
   0x8   : > { %s186_s11 = ssub.s32 %s9911_s28, %s16153_s8  ;;  %p31_p3 = scmp.ge.s32.totalorder %s16155_s9, 2 }
   0x9   : > { %p7985_p4 = scmp.ge.s32.totalorder %s9919_s30, 1  ;;  %p10015_p5 = por %p201_p2, %p200_p1 }
   0xa   : > { %p251_p6 = scmp.lt.s32.totalorder %s9919_s30, 5  ;;  %s16157_s9 = smov (%p31_p3, %s16155_s9), 0 }
   0xb   : > { %s185_s13 = ssub.s32 %s9915_s29, %s16157_s9  ;;  %s190_s15 = sadd.s32 1, %s9899_s25 }
   0xc   : > { %p252_p7 = pnand %p7985_p4, %p251_p6  ;;  %s187_s14 = sor.u32 %s186_s11, %s185_s13 }
   0xd   : > { %p188_p8 = scmp.eq.s32.totalorder %s187_s14, 0 }
   0xe   : > { %255 = sbr.rel (%p252_p7) target bundleno = 5042 (0x13b2), region = 48 }
   0xf   : > { %s10026_s16 = scalar_select %p188_p8, %s9899_s25, %s190_s15  }
  0x13   : > { %s279_s17 = sand.u32 1, %s9895_s24   ;;  %p282_p9 = scmp.lt.s32.totalorder %s9907_s27, 1 }
  0x14   : > { %s7986_s18 = sshll.u32 %s279_s17, 7  ;;  %p7989_p10 = scmp.ne.s32.totalorder %s9903_s26, 0 }
  0x15   : > { %s283_s19 = scalar_select %p282_p9, %s9907_s27, 1 }
  0x16   : > { %s10036_s10 = scalar_lea.vmem [#allocation7], %s7986_s18  ;;  %290 = sbr.rel (%p7989_p10) target bundleno = 1029 (0x405), region = 52 }
  0x17   : > { %s8445_s20 = sshll.u32 %s283_s19, 8 }
  0x18   : > { %s10034_s23 = scalar_lea.vmem %s15487_s0, %s8445_s20 }
  0x1b   : > { %v292_v0 = vld [vmem:[%s10034_s23 + $0x8] sm:$0xff]  ;;  %v291_v1 = vld [vmem:[%s10034_s23] sm:$0xff]  ;;  %v294_v2 = vld [vmem:[%s10034_s23 + $0x18] sm:$0xff]  ;;  %v9921_v60 = vmov 128.0  }
  0x1c   : > { %355 = vxpose.xlu0.b32.start [1/16] %v292_v0, 128  ;;  %323 = vxpose.xlu1.b32.start [1/16] %v291_v1, 128  ;;  %v293_v3 = vld [vmem:[%s10034_s23 + $0x10] sm:$0xff]  ;;  %v296_v4 = vld [vmem:[%s10034_s23 + $0x28] sm:$0xff]  ;;  %v295_v5 = vld [vmem:[%s10034_s23 + $0x20] sm:$0xff]  ;;  %8917 = vrcp.f32 %v9921_v60 }
  0x1d   : > { %v298_v6 = vld [vmem:[%s10034_s23 + $0x38] sm:$0xff]  ;;  %v297_v7 = vld [vmem:[%s10034_s23 + $0x30] sm:$0xff]  ;;  %v300_v8 = vld [vmem:[%s10034_s23 + $0x48] sm:$0xff] }
  0x1e   : > { %v299_v9 = vld [vmem:[%s10034_s23 + $0x40] sm:$0xff]  ;;  %v302_v10 = vld [vmem:[%s10034_s23 + $0x58] sm:$0xff]  ;;  %v301_v11 = vld [vmem:[%s10034_s23 + $0x50] sm:$0xff] }
  0x1f   : > { %v304_v12 = vld [vmem:[%s10034_s23 + $0x68] sm:$0xff]  ;;  %v303_v13 = vld [vmem:[%s10034_s23 + $0x60] sm:$0xff]  ;;  %v306_v14 = vld [vmem:[%s10034_s23 + $0x78] sm:$0xff] }
  0x20   : > { %v305_v15 = vld [vmem:[%s10034_s23 + $0x70] sm:$0xff]  ;;  %v308_v16 = vld [vmem:[%s10034_s23 + $0x88] sm:$0xff]  ;;  %v307_v17 = vld [vmem:[%s10034_s23 + $0x80] sm:$0xff] }
  0x21   : > { %v310_v18 = vld [vmem:[%s10034_s23 + $0x98] sm:$0xff]  ;;  %v309_v19 = vld [vmem:[%s10034_s23 + $0x90] sm:$0xff]  ;;  %v312_v20 = vld [vmem:[%s10034_s23 + $0xa8] sm:$0xff] }
  0x22   : > { %v311_v21 = vld [vmem:[%s10034_s23 + $0xa0] sm:$0xff]  ;;  %v314_v22 = vld [vmem:[%s10034_s23 + $0xb8] sm:$0xff]  ;;  %v313_v23 = vld [vmem:[%s10034_s23 + $0xb0] sm:$0xff]  ;;  %v8918_v63 = vpop.eup %8917 }
  0x23   : > { %v316_v24 = vld [vmem:[%s10034_s23 + $0xc8] sm:$0xff]  ;;  %v315_v25 = vld [vmem:[%s10034_s23 + $0xc0] sm:$0xff]  ;;  %v318_v26 = vld [vmem:[%s10034_s23 + $0xd8] sm:$0xff]  ;;  %v484_v1 = vmul.f32 128.0, %v8918_v63  ;;  %vm488_vm0 = vweird.f32 %v8918_v63 }
  0x24   : > { %356 = vxpose.xlu0.b32.cont [2/16] %v294_v2, 128  ;;  %324 = vxpose.xlu1.b32.cont [2/16] %v293_v3, 128  ;;  %v317_v27 = vld [vmem:[%s10034_s23 + $0xd0] sm:$0xff]  ;;  %v320_v28 = vld [vmem:[%s10034_s23 + $0xe8] sm:$0xff]  ;;  %v319_v29 = vld [vmem:[%s10034_s23 + $0xe0] sm:$0xff] }
  0x25   : > { %v322_v30 = vld [vmem:[%s10034_s23 + $0xf8] sm:$0xff]  ;;  %v321_v31 = vld [vmem:[%s10034_s23 + $0xf0] sm:$0xff]  ;;  %v485_v3 = vsub.f32 1.0, %v484_v1 }
  0x2c   : > { %357 = vxpose.xlu0.b32.cont [3/16] %v296_v4, 128  ;;  %325 = vxpose.xlu1.b32.cont [3/16] %v295_v5, 128  ;;  %v486_v4 = vmul.f32 %v8918_v63, %v485_v3 }
  0x34   : > { %358 = vxpose.xlu0.b32.cont [4/16] %v298_v6, 128  ;;  %326 = vxpose.xlu1.b32.cont [4/16] %v297_v7, 128  ;;  %v487_v7 = vadd.f32 %v8918_v63, %v486_v4 }
  0x3c   : > { %359 = vxpose.xlu0.b32.cont [5/16] %v300_v8, 128  ;;  %327 = vxpose.xlu1.b32.cont [5/16] %v299_v9, 128  ;;  %v10178_v8 = vsel %vm488_vm0, %v8918_v63, %v487_v7 }
  0x44   : > { %360 = vxpose.xlu0.b32.cont [6/16] %v302_v10, 128  ;;  %328 = vxpose.xlu1.b32.cont [6/16] %v301_v11, 128 }
  0x4c   : > { %361 = vxpose.xlu0.b32.cont [7/16] %v304_v12, 128  ;;  %329 = vxpose.xlu1.b32.cont [7/16] %v303_v13, 128 }
  0x54   : > { %362 = vxpose.xlu0.b32.cont [8/16] %v306_v14, 128  ;;  %330 = vxpose.xlu1.b32.cont [8/16] %v305_v15, 128 }
  0x5c   : > { %363 = vxpose.xlu0.b32.cont [9/16] %v308_v16, 128  ;;  %331 = vxpose.xlu1.b32.cont [9/16] %v307_v17, 128 }
  0x64   : > { %364 = vxpose.xlu0.b32.cont [10/16] %v310_v18, 128  ;;  %332 = vxpose.xlu1.b32.cont [10/16] %v309_v19, 128 }
  0x6c   : > { %365 = vxpose.xlu0.b32.cont [11/16] %v312_v20, 128  ;;  %333 = vxpose.xlu1.b32.cont [11/16] %v311_v21, 128 }
  0x74   : > { %366 = vxpose.xlu0.b32.cont [12/16] %v314_v22, 128  ;;  %334 = vxpose.xlu1.b32.cont [12/16] %v313_v23, 128 }
  0x7c   : > { %367 = vxpose.xlu0.b32.cont [13/16] %v316_v24, 128  ;;  %335 = vxpose.xlu1.b32.cont [13/16] %v315_v25, 128 }
  0x84   : > { %368 = vxpose.xlu0.b32.cont [14/16] %v318_v26, 128  ;;  %336 = vxpose.xlu1.b32.cont [14/16] %v317_v27, 128 }
  0x8c   : > { %369 = vxpose.xlu0.b32.cont [15/16] %v320_v28, 128  ;;  %337 = vxpose.xlu1.b32.cont [15/16] %v319_v29, 128 }
  0x94   : > { %370 = vxpose.xlu0.b32.end [16/16] %v322_v30, 128  ;;  %338 = vxpose.xlu1.b32.end [16/16] %v321_v31, 128 }
  0xc0   : > { %v10071_v32 = vpop.trf.xlu0  ;;  %v10073_v33 = vpop.trf.xlu1 }
  0xc1   : > { %403 = vst [vmem:[#allocation2 + $0x80] sm:$0xff] %v10071_v32  ;;  %419 = vadd.xlane.f32.xlu2 %v10073_v33 }
  0xc2   : > { %387 = vst [vmem:[#allocation2] sm:$0xff] %v10073_v33 }
  0xc8   : > { %v10078_v34 = vpop.trf.xlu0  ;;  %v10080_v35 = vpop.trf.xlu1 }
  0xc9   : > { %404 = vst [vmem:[#allocation2 + $0x88] sm:$0xff] %v10078_v34  ;;  %421 = vadd.xlane.f32.xlu2 %v10080_v35 }
  0xca   : > { %388 = vst [vmem:[#allocation2 + $0x8] sm:$0xff] %v10080_v35 }
  0xd0   : > { %v10085_v36 = vpop.trf.xlu0  ;;  %v10087_v37 = vpop.trf.xlu1 }
  0xd1   : > { %405 = vst [vmem:[#allocation2 + $0x90] sm:$0xff] %v10085_v36  ;;  %423 = vadd.xlane.f32.xlu2 %v10087_v37 }
  0xd2   : > { %389 = vst [vmem:[#allocation2 + $0x10] sm:$0xff] %v10087_v37 }
  0xd8   : > { %v10092_v38 = vpop.trf.xlu0  ;;  %v10094_v39 = vpop.trf.xlu1 }
  0xd9   : > { %406 = vst [vmem:[#allocation2 + $0x98] sm:$0xff] %v10092_v38  ;;  %425 = vadd.xlane.f32.xlu2 %v10094_v39 }
  0xda   : > { %390 = vst [vmem:[#allocation2 + $0x18] sm:$0xff] %v10094_v39 }
  0xe0   : > { %v10099_v40 = vpop.trf.xlu0  ;;  %v10101_v41 = vpop.trf.xlu1 }
  0xe1   : > { %407 = vst [vmem:[#allocation2 + $0xa0] sm:$0xff] %v10099_v40  ;;  %427 = vadd.xlane.f32.xlu2 %v10101_v41 }
  0xe2   : > { %391 = vst [vmem:[#allocation2 + $0x20] sm:$0xff] %v10101_v41 }
  0xe8   : > { %v376_v42 = vpop.trf.xlu0  ;;  %v10106_v43 = vpop.trf.xlu1 }
  0xe9   : > { %408 = vst [vmem:[#allocation2 + $0xa8] sm:$0xff] %v376_v42  ;;  %429 = vadd.xlane.f32.xlu2 %v10106_v43 }
  0xea   : > { %392 = vst [vmem:[#allocation2 + $0x28] sm:$0xff] %v10106_v43 }
  0xf0   : > { %v377_v44 = vpop.trf.xlu0  ;;  %v10110_v45 = vpop.trf.xlu1 }
  0xf1   : > { %409 = vst [vmem:[#allocation2 + $0xb0] sm:$0xff] %v377_v44 }
  0xf2   : > { %393 = vst [vmem:[#allocation2 + $0x30] sm:$0xff] %v10110_v45 }
  0xf8   : > { %v378_v46 = vpop.trf.xlu0  ;;  %v10113_v47 = vpop.trf.xlu1 }
  0xf9   : > { %410 = vst [vmem:[#allocation2 + $0xb8] sm:$0xff] %v378_v46  ;;  %433 = vadd.xlane.f32.xlu1 %v10113_v47 }
  0xfa   : > { %394 = vst [vmem:[#allocation2 + $0x38] sm:$0xff] %v10113_v47 }
 0x100   : > { %v10117_v48 = vpop.trf.xlu0  ;;  %v10119_v49 = vpop.trf.xlu1 }
 0x101   : > { %411 = vst [vmem:[#allocation2 + $0xc0] sm:$0xff] %v10117_v48  ;;  %467 = vadd.xlane.f32.xlu2 %v10117_v48 }
 0x102   : > { %395 = vst [vmem:[#allocation2 + $0x40] sm:$0xff] %v10119_v49 }
 0x105   : > { %431 = vadd.xlane.f32.xlu0 %v10110_v45 }
 0x108   : > { %v10125_v50 = vpop.trf.xlu1  ;;  %v10127_v51 = vpop.trf.xlu0 }
 0x109   : > { %396 = vst [vmem:[#allocation2 + $0x48] sm:$0xff] %v10125_v50  ;;  %435 = vadd.xlane.f32.xlu2 %v10119_v49 }
 0x10a   : > { %412 = vst [vmem:[#allocation2 + $0xc8] sm:$0xff] %v10127_v51 }
 0x110   : > { %v10132_v52 = vpop.trf.xlu1  ;;  %v10134_v53 = vpop.trf.xlu0 }
 0x111   : > { %397 = vst [vmem:[#allocation2 + $0x50] sm:$0xff] %v10132_v52  ;;  %469 = vadd.xlane.f32.xlu2 %v10127_v51  ;;  %439 = vadd.xlane.f32.xlu1 %v10132_v52 }
 0x112   : > { %413 = vst [vmem:[#allocation2 + $0xd0] sm:$0xff] %v10134_v53 }
 0x118   : > { %v10140_v54 = vpop.trf.xlu1  ;;  %v10142_v55 = vpop.trf.xlu0 }
 0x119   : > { %437 = vadd.xlane.f32.xlu2 %v10125_v50  ;;  %398 = vst [vmem:[#allocation2 + $0x58] sm:$0xff] %v10140_v54 }
 0x11a   : > { %414 = vst [vmem:[#allocation2 + $0xd8] sm:$0xff] %v10142_v55 }
 0x120   : > { %v10147_v56 = vpop.trf.xlu1  ;;  %v10149_v57 = vpop.trf.xlu0 }
 0x121   : > { %471 = vadd.xlane.f32.xlu2 %v10134_v53  ;;  %399 = vst [vmem:[#allocation2 + $0x60] sm:$0xff] %v10147_v56  ;;  %443 = vadd.xlane.f32.xlu0 %v10147_v56 }
 0x122   : > { %415 = vst [vmem:[#allocation2 + $0xe0] sm:$0xff] %v10149_v57 }
 0x128   : > { %v10155_v58 = vpop.trf.xlu0  ;;  %v10163_v61 = vpop.trf.xlu1 }
 0x129   : > { %473 = vadd.xlane.f32.xlu2 %v10142_v55  ;;  %416 = vst [vmem:[#allocation2 + $0xe8] sm:$0xff] %v10155_v58 }
 0x12a   : > { %400 = vst [vmem:[#allocation2 + $0x68] sm:$0xff] %v10163_v61 }
 0x130   : > { %v10159_v59 = vpop.trf.xlu0  ;;  %v10170_v2 = vpop.trf.xlu1 }
 0x131   : > { %441 = vadd.xlane.f32.xlu2 %v10140_v54  ;;  %417 = vst [vmem:[#allocation2 + $0xf0] sm:$0xff] %v10159_v59 }
 0x132   : > { %401 = vst [vmem:[#allocation2 + $0x70] sm:$0xff] %v10170_v2 }
 0x134   : > { %v420_v0 = vpop.xlane.xlu2 %419 }
 0x135   : > { %v490_v10 = vmul.f32 %v10178_v8, %v420_v0 }
 0x137   : > { %v10183_v11 = vsub.f32 %v10073_v33, %v490_v10 }
 0x138   : > { %v10166_v62 = vpop.trf.xlu0  ;;  %v10174_v6 = vpop.trf.xlu1 }
 0x139   : > { %475 = vadd.xlane.f32.xlu2 %v10149_v57  ;;  %418 = vst [vmem:[#allocation2 + $0xf8] sm:$0xff] %v10166_v62  ;;  %v554_v13 = vmul.f32 %v10183_v11, %v10183_v11 }
 0x13a   : > { %402 = vst [vmem:[#allocation2 + $0x78] sm:$0xff] %v10174_v6 }
 0x13c   : > { %v422_v5 = vpop.xlane.xlu2 %421 }
 0x13d   : > { %v491_v12 = vmul.f32 %v10178_v8, %v422_v5 }
 0x13f   : > { %v10189_v15 = vsub.f32 %v10080_v35, %v491_v12 }
 0x141   : > { %477 = vadd.xlane.f32.xlu2 %v10155_v58  ;;  %v555_v17 = vmul.f32 %v10189_v15, %v10189_v15 }
 0x144   : > { %v424_v9 = vpop.xlane.xlu2 %423 }
 0x145   : > { %v492_v16 = vmul.f32 %v10178_v8, %v424_v9 }
 0x147   : > { %v10195_v19 = vsub.f32 %v10087_v37, %v492_v16 }
 0x149   : > { %479 = vadd.xlane.f32.xlu2 %v10159_v59  ;;  %v556_v21 = vmul.f32 %v10195_v19, %v10195_v19 }
 0x14c   : > { %v426_v14 = vpop.xlane.xlu2 %425 }
 0x14d   : > { %v493_v20 = vmul.f32 %v10178_v8, %v426_v14 }
 0x14f   : > { %v10201_v22 = vsub.f32 %v10094_v39, %v493_v20 }
 0x151   : > { %481 = vadd.xlane.f32.xlu2 %v10166_v62  ;;  %v557_v25 = vmul.f32 %v10201_v22, %v10201_v22 }
 0x154   : > { %v428_v18 = vpop.xlane.xlu2 %427 }
 0x155   : > { %v494_v24 = vmul.f32 %v10178_v8, %v428_v18 }
 0x157   : > { %v10207_v26 = vsub.f32 %v10101_v41, %v494_v24  ;;  %v8468_v24 = vld [vmem:[%s15490_s3 + $0xb0] sm:$0xf0] }
 0x159   : > { %586 = vadd.xlane.f32.xlu2 %v554_v13  ;;  %v558_v29 = vmul.f32 %v10207_v26, %v10207_v26 }
 0x15c   : > { %v430_v23 = vpop.xlane.xlu2 %429 }
 0x15d   : > { %v495_v28 = vmul.f32 %v10178_v8, %v430_v23  ;;  %v8076_v23 = vld [vmem:[%s15490_s3 + $0xa8] sm:$0xf] }
 0x15f   : > { %v10214_v33 = vsub.f32 %v10106_v43, %v495_v28  ;;  %v8084_v28 = vld [vmem:[%s15490_s3 + $0xb0] sm:$0xf] }
 0x161   : > { %588 = vadd.xlane.f32.xlu2 %v555_v17  ;;  %v559_v42 = vmul.f32 %v10214_v33, %v10214_v33 }
 0x169   : > { %590 = vadd.xlane.f32.xlu2 %v556_v21 }
 0x16c   : > { %v434_v46 = vpop.xlane.xlu1 %433 }
 0x171   : > { %592 = vadd.xlane.f32.xlu2 %v557_v25  ;;  %v8467_v25 = vld [vmem:[%s15490_s3 + $0xac] sm:$0xf] }
 0x174   : > { %v468_v27 = vpop.xlane.xlu2 %467 }
 0x175   : > { %v514_v41 = vmul.f32 %v10178_v8, %v468_v27  ;;  %v8077_v27 = vor.u32 %v8468_v24, %v8076_v23 }
 0x177   : > { %v10227_v44 = vsub.f32 %v10117_v48, %v514_v41  ;;  %1322 = vmatpush.bf16.msra.mxu0 %v8077_v27  ;;  %8811 = vmatpush.bf16.msra.mxu3 %v8077_v27  ;;  %v8459_v27 = vld [vmem:[%s15490_s3 + $0x68] sm:$0xf0] }
 0x178   : > { %v432_v30 = vpop.xlane.xlu0 %431 }
 0x179   : > { %v496_v31 = vmul.f32 %v10178_v8, %v432_v30  ;;  %594 = vadd.xlane.f32.xlu2 %v558_v29  ;;  %v578_v60 = vmul.f32 %v10227_v44, %v10227_v44  ;;  %v8469_v29 = vld [vmem:[%s15490_s3 + $0xb8] sm:$0xf0] }
 0x17b   : > { %v10217_v35 = vsub.f32 %v10110_v45, %v496_v31  ;;  %v10291_v31 = vor.u32 %v8469_v29, %v8084_v28  ;;  %v8042_v28 = vld [vmem:[%s15490_s3 + $0x6c] sm:$0xf0]  ;;  %v8048_v29 = vld [vmem:[%s15490_s3 + $0x68] sm:$0xf] }
 0x17c   : > { %v10219_v37 = vpop.xlane.xlu2 %435 }
 0x17d   : > { %v560_v39 = vmul.f32 %v10217_v35, %v10217_v35  ;;  %1500 = vmatpush.bf16.msra.mxu2 %v10291_v31 }
 0x17f   : > { %598 = vadd.xlane.f32.xlu1 %v560_v39 }
 0x181   : > { %596 = vadd.xlane.f32.xlu2 %v559_v42  ;;  %v8064_v42 = vld [vmem:[%s15490_s3 + $0x90] sm:$0xf] }
 0x184   : > { %v470_v43 = vpop.xlane.xlu2 %469  ;;  %v440_v3 = vpop.xlane.xlu1 %439 }
 0x185   : > { %v515_v45 = vmul.f32 %v10178_v8, %v470_v43  ;;  %v500_v5 = vmul.f32 %v10178_v8, %v440_v3  ;;  %v8465_v43 = vld [vmem:[%s15490_s3 + $0x98] sm:$0xf0]  ;;  %v8466_v3 = vld [vmem:[%s15490_s3 + $0xa0] sm:$0xf0] }
 0x187   : > { %v10233_v63 = vsub.f32 %v10127_v51, %v515_v45  ;;  %v10245_v51 = vsub.f32 %v10132_v52, %v500_v5  ;;  %v8464_v45 = vld [vmem:[%s15490_s3 + $0x94] sm:$0xf] }
 0x189   : > { %634 = vadd.xlane.f32.xlu2 %v578_v60  ;;  %v579_v48 = vmul.f32 %v10233_v63, %v10233_v63  ;;  %v564_v13 = vmul.f32 %v10245_v51, %v10245_v51  ;;  %v8065_v60 = vor.u32 %v8465_v43, %v8064_v42 }
 0x18b   : > { %1323 = vmatpush.bf16.msra.mxu0 %v8065_v60  ;;  %8812 = vmatpush.bf16.msra.mxu3 %v8065_v60 }
 0x18c   : > { %v438_v0 = vpop.xlane.xlu2 %437 }
 0x18d   : > { %v499_v1 = vmul.f32 %v10178_v8, %v438_v0  ;;  %v8066_v0 = vld [vmem:[%s15490_s3 + $0x9c] sm:$0xf0] }
 0x18e   : > { %v10317_v5 = vor.u32 %v8464_v45, %v8066_v0  ;;  %v8456_v0 = vld [vmem:[%s15490_s3 + $0x50] sm:$0xf0] }
 0x18f   : > { %v10237_v4 = vsub.f32 %v10125_v50, %v499_v1  ;;  %v8072_v1 = vld [vmem:[%s15490_s3 + $0x98] sm:$0xf] }
 0x191   : > { %636 = vadd.xlane.f32.xlu2 %v579_v48  ;;  %v563_v7 = vmul.f32 %v10237_v4, %v10237_v4 }
 0x193   : > { %604 = vadd.xlane.f32.xlu0 %v563_v7  ;;  %v10319_v7 = vor.u32 %v8466_v3, %v8072_v1  ;;  %v8455_v1 = vld [vmem:[%s15490_s3 + $0x4c] sm:$0xf] }
 0x194   : > { %v472_v9 = vpop.xlane.xlu2 %471 }
 0x195   : > { %v516_v10 = vmul.f32 %v10178_v8, %v472_v9  ;;  %v497_v9 = vmul.f32 %v10178_v8, %v434_v46  ;;  %1501 = vmatpush.bf16.msra.mxu2 %v10319_v7 }
 0x197   : > { %v10249_v12 = vsub.f32 %v10134_v53, %v516_v10  ;;  %v10349_v23 = vsub.f32 %v10113_v47, %v497_v9  ;;  %v8030_v9 = vld [vmem:[%s15490_s3 + $0x54] sm:$0xf0] }
 0x199   : > { %v580_v50 = vmul.f32 %v10249_v12, %v10249_v12  ;;  %v561_v60 = vmul.f32 %v10349_v23, %v10349_v23 }
 0x19b   : > { %638 = vadd.xlane.f32.xlu2 %v580_v50  ;;  %606 = vadd.xlane.f32.xlu0 %v564_v13  ;;  %v8462_v50 = vld [vmem:[%s15490_s3 + $0x80] sm:$0xf0]  ;;  %v8461_v13 = vld [vmem:[%s15490_s3 + $0x7c] sm:$0xf] }
 0x19c   : > { %v474_v14 = vpop.xlane.xlu2 %473 }
 0x19d   : > { %v517_v16 = vmul.f32 %v10178_v8, %v474_v14  ;;  %v8054_v14 = vld [vmem:[%s15490_s3 + $0x84] sm:$0xf0] }
 0x19f   : > { %v10257_v17 = vsub.f32 %v10142_v55, %v517_v16  ;;  %v8060_v16 = vld [vmem:[%s15490_s3 + $0x80] sm:$0xf] }
 0x1a1   : > { %v581_v52 = vmul.f32 %v10257_v17, %v10257_v17 }
 0x1a3   : > { %640 = vadd.xlane.f32.xlu2 %v581_v52  ;;  %453 = vadd.xlane.f32.xlu0 %v10078_v34  ;;  %v8463_v52 = vld [vmem:[%s15490_s3 + $0x88] sm:$0xf0] }
 0x1a4   : > { %v10262_v53 = vpop.xlane.xlu2 %441 }
 0x1ab   : > { %455 = vadd.xlane.f32.xlu0 %v10085_v36 }
 0x1ac   : > { %v476_v18 = vpop.xlane.xlu2 %475 }
 0x1ad   : > { %v518_v20 = vmul.f32 %v10178_v8, %v476_v18  ;;  %v10344_v18 = vor.u32 %v8461_v13, %v8054_v14 }
 0x1af   : > { %v10267_v21 = vsub.f32 %v10149_v57, %v518_v20  ;;  %v8078_v57 = vld [vmem:[%s15490_s3 + $0xb4] sm:$0xf0]  ;;  %v10346_v20 = vor.u32 %v8463_v52, %v8060_v16  ;;  %v8016_v16 = vld [vmem:[%s15490_s3 + $0x30] sm:$0xf]  ;;  %v8453_v52 = vld [vmem:[%s15490_s3 + $0x38] sm:$0xf0] }
 0x1b0   : > { %v10289_v30 = vor.u32 %v8467_v25, %v8078_v57  ;;  %v8040_v25 = vld [vmem:[%s15490_s3 + $0x60] sm:$0xf]  ;;  %v8458_v57 = vld [vmem:[%s15490_s3 + $0x64] sm:$0xf] }
 0x1b1   : > { %v582_v55 = vmul.f32 %v10267_v21, %v10267_v21  ;;  %1502 = vmatpush.bf16.msra.mxu2 %v10346_v20  ;;  %v8041_v47 = vor.u32 %v8459_v27, %v8040_v25  ;;  %v10375_v42 = vor.u32 %v8458_v57, %v8042_v28  ;;  %v8018_v25 = vld [vmem:[%s15490_s3 + $0x3c] sm:$0xf0]  ;;  %v8024_v27 = vld [vmem:[%s15490_s3 + $0x38] sm:$0xf]  ;;  %v8454_v57 = vld [vmem:[%s15490_s3 + $0x40] sm:$0xf0] }
 0x1b2   : > { %1411 = vmatpush.bf16.msra.mxu1 %v10289_v30 }
 0x1b3   : > { %642 = vadd.xlane.f32.xlu2 %v582_v55 }
 0x1b4   : > { %v478_v39 = vpop.xlane.xlu2 %477 }
 0x1b5   : > { %v519_v41 = vmul.f32 %v10178_v8, %v478_v39  ;;  %v8460_v39 = vld [vmem:[%s15490_s3 + $0x70] sm:$0xf0] }
 0x1b6   : > { %1412 = vmatpush.bf16.msra.mxu1 %v10317_v5  ;;  %v10377_v43 = vor.u32 %v8460_v39, %v8048_v29  ;;  %v10433_v29 = vor.u32 %v8454_v57, %v8024_v27  ;;  %v498_v39 = vmul.f32 %v10178_v8, %v10219_v37  ;;  %v8448_v27 = vld [vmem:[%s15490_s3 + $0x10] sm:$0xf0] }
 0x1b7   : > { %v10315_v48 = vsub.f32 %v10155_v58, %v519_v41  ;;  %v8052_v58 = vld [vmem:[%s15490_s3 + $0x78] sm:$0xf] }
 0x1b8   : > { %v8053_v46 = vor.u32 %v8462_v50, %v8052_v58  ;;  %1503 = vmatpush.bf16.msra.mxu2 %v10377_v43  ;;  %v8457_v58 = vld [vmem:[%s15490_s3 + $0x58] sm:$0xf0]  ;;  %v10403_v50 = vor.u32 %v8455_v1, %v8030_v9  ;;  %v8012_v1 = vld [vmem:[%s15490_s3 + $0x20] sm:$0xf] }
 0x1b9   : > { %v583_v10 = vmul.f32 %v10315_v48, %v10315_v48 }
 0x1ba   : > { %1324 = vmatpush.bf16.msra.mxu0 %v8053_v46  ;;  %8813 = vmatpush.bf16.msra.mxu3 %v8053_v46 }
 0x1bb   : > { %644 = vadd.xlane.f32.xlu2 %v583_v10  ;;  %1413 = vmatpush.bf16.msra.mxu1 %v10344_v18  ;;  %v8036_v10 = vld [vmem:[%s15490_s3 + $0x50] sm:$0xf] }
 0x1bc   : > { %v480_v55 = vpop.xlane.xlu2 %479  ;;  %v10405_v13 = vor.u32 %v8457_v58, %v8036_v10 }
 0x1bd   : > { %v520_v24 = vmul.f32 %v10178_v8, %v480_v55  ;;  %v8452_v55 = vld [vmem:[%s15490_s3 + $0x34] sm:$0xf] }
 0x1be   : > { %1325 = vmatpush.bf16.msra.mxu0 %v8041_v47  ;;  %8814 = vmatpush.bf16.msra.mxu3 %v8041_v47  ;;  %v10431_v28 = vor.u32 %v8452_v55, %v8018_v25  ;;  %v8446_v55 = vld [vmem:[%s15490_s3 + $0x4] sm:$0xf]  ;;  %v8000_v25 = vld [vmem:[%s15490_s3 + $0x8] sm:$0xf] }
 0x1bf   : > { %v10373_v41 = vsub.f32 %v10159_v59, %v520_v24  ;;  %1414 = vmatpush.bf16.msra.mxu1 %v10375_v42  ;;  %v8028_v59 = vld [vmem:[%s15490_s3 + $0x48] sm:$0xf]  ;;  %1504 = vmatpush.bf16.msra.mxu2 %v10405_v13  ;;  %v8017_v24 = vor.u32 %v8453_v52, %v8016_v16  ;;  %v7992_v16 = vld [vmem:[%s15490_s3] sm:$0xf]  ;;  %v8447_v52 = vld [vmem:[%s15490_s3 + $0x8] sm:$0xf0] }
 0x1c0   : > { %v8029_v3 = vor.u32 %v8456_v0, %v8028_v59  ;;  %v8449_v59 = vld [vmem:[%s15490_s3 + $0x1c] sm:$0xf]  ;;  %v8006_v0 = vld [vmem:[%s15490_s3 + $0x24] sm:$0xf0] }
 0x1c1   : > { %v584_v45 = vmul.f32 %v10373_v41, %v10373_v41  ;;  %v10460_v9 = vor.u32 %v8449_v59, %v8006_v0 }
 0x1c2   : > { %1326 = vmatpush.bf16.msra.mxu0 %v8029_v3  ;;  %8815 = vmatpush.bf16.msra.mxu3 %v8029_v3  ;;  %v8451_v3 = vld [vmem:[%s15490_s3 + $0x28] sm:$0xf0] }
 0x1c3   : > { %646 = vadd.xlane.f32.xlu1 %v584_v45  ;;  %600 = vadd.xlane.f32.xlu2 %v561_v60  ;;  %v8450_v60 = vld [vmem:[%s15490_s3 + $0x20] sm:$0xf0]  ;;  %v10462_v10 = vor.u32 %v8451_v3, %v8012_v1 }
 0x1c4   : > { %v482_v46 = vpop.xlane.xlu2 %481  ;;  %1415 = vmatpush.bf16.msra.mxu1 %v10403_v50  ;;  %1505 = vmatpush.bf16.msra.mxu2 %v10433_v29 }
 0x1c5   : > { %v521_v14 = vmul.f32 %v10178_v8, %v482_v46  ;;  %v10465_v46 = vsub.f32 %v10119_v49, %v498_v39  ;;  %v7993_v49 = vor.u32 %v8447_v52, %v7992_v16 }
 0x1c6   : > { %1327 = vmatpush.bf16.msra.mxu0 %v8017_v24  ;;  %8816 = vmatpush.bf16.msra.mxu3 %v8017_v24  ;;  %v7994_v24 = vld [vmem:[%s15490_s3 + $0xc] sm:$0xf0] }
 0x1c7   : > { %v10429_v47 = vsub.f32 %v10166_v62, %v521_v14  ;;  %v8004_v62 = vld [vmem:[%s15490_s3 + $0x18] sm:$0xf]  ;;  %v10488_v39 = vor.u32 %v8446_v55, %v7994_v24 }
 0x1c8   : > { %1416 = vmatpush.bf16.msra.mxu1 %v10431_v28  ;;  %v8005_v37 = vor.u32 %v8450_v60, %v8004_v62  ;;  %1506 = vmatpush.bf16.msra.mxu2 %v10462_v10  ;;  %v501_v62 = vmul.f32 %v10178_v8, %v10262_v53  ;;  %v562_v60 = vmul.f32 %v10465_v46, %v10465_v46  ;;  %v444_v53 = vpop.xlane.xlu0 %443 }
 0x1c9   : > { %v585_v45 = vmul.f32 %v10429_v47, %v10429_v47 }
 0x1ca   : > { %1328 = vmatpush.bf16.msra.mxu0 %v8005_v37  ;;  %8817 = vmatpush.bf16.msra.mxu3 %v8005_v37  ;;  %v10501_v37 = vsub.f32 %v10140_v54, %v501_v62 }
 0x1cb   : > { %445 = vadd.xlane.f32.xlu1 %v10163_v61  ;;  %648 = vadd.xlane.f32.xlu2 %v585_v45  ;;  %v10490_v45 = vor.u32 %v8448_v27, %v8000_v25 }
 0x1cc   : > { %v587_v58 = vpop.xlane.xlu2 %586  ;;  %1417 = vmatpush.bf16.msra.mxu1 %v10460_v9 }
 0x1cd   : > { %v650_v14 = vmul.f32 %v587_v58, %v10178_v8  ;;  %1507 = vmatpush.bf16.msra.mxu2 %v10490_v45 }
 0x1ce   : > { %1329 = vmatpush.bf16.msra.mxu0 %v7993_v49  ;;  %8818 = vmatpush.bf16.msra.mxu3 %v7993_v49 }
 0x1cf   : > { %v682_v57 = vadd.f32 1e-05, %v650_v14  ;;  %v502_v14 = vmul.f32 %v10178_v8, %v444_v53 }
 0x1d0   : > { %1418 = vmatpush.bf16.msra.mxu1 %v10488_v39 }
 0x1d1   : > { %8919 = vrsqrt.f32 %v682_v57  ;;  %v10511_v52 = vsub.f32 %v10147_v56, %v502_v14  ;;  %vm720_vm2 = vweird.f32 %v682_v57 }
 0x1d2   : > { %8819 = vmatpush.bf16.msrb.mxu3 %v10289_v30  ;;  %v565_v30 = vmul.f32 %v10501_v37, %v10501_v37 }
 0x1d3   : > { %447 = vadd.xlane.f32.xlu1 %v10170_v2  ;;  %602 = vadd.xlane.f32.xlu2 %v562_v60 }
 0x1d4   : > { %v589_v59 = vpop.xlane.xlu2 %588 }
 0x1d5   : > { %v651_v0 = vmul.f32 %v589_v59, %v10178_v8 }
 0x1d6   : > { %8820 = vmatpush.bf16.msrb.mxu3 %v10317_v5 }
 0x1d7   : > { %v8920_v1 = vpop.eup %8919  ;;  %v683_v3 = vadd.f32 1e-05, %v651_v0 }
 0x1d8   : > { %v715_v58 = vmul.f32 %v8920_v1, %v682_v57  ;;  %vm721_vm1 = vweird.f32 %v8920_v1 }
 0x1d9   : > { %8921 = vrsqrt.f32 %v683_v3  ;;  %vm722_vm3 = vmor %vm720_vm2, %vm721_vm1  ;;  %vm730_vm5 = vweird.f32 %v683_v3 }
 0x1da   : > { %v716_v2 = vmul.f32 %v8920_v1, %v715_v58  ;;  %8821 = vmatpush.bf16.msrb.mxu3 %v10344_v18  ;;  %v566_v18 = vmul.f32 %v10511_v52, %v10511_v52 }
 0x1db   : > { %608 = vadd.xlane.f32.xlu1 %v565_v30  ;;  %449 = vadd.xlane.f32.xlu2 %v10174_v6  ;;  %v10534_v30 = vld [vmem:[%s15489_s2] ss:$0 sm:$0xff] }
 0x1dc   : > { %v717_v54 = vmul.f32 0.5, %v716_v2  ;;  %v591_v16 = vpop.xlane.xlu2 %590 }
 0x1dd   : > { %v652_v5 = vmul.f32 %v591_v16, %v10178_v8 }
 0x1de   : > { %v718_v55 = vsub.f32 1.5, %v717_v54  ;;  %8822 = vmatpush.bf16.msrb.mxu3 %v10375_v42 }
 0x1df   : > { %v8922_v49 = vpop.eup %8921  ;;  %v684_v24 = vadd.f32 1e-05, %v652_v5 }
 0x1e0   : > { %v719_v25 = vmul.f32 %v8920_v1, %v718_v55  ;;  %v725_v27 = vmul.f32 %v8922_v49, %v683_v3  ;;  %vm731_vm4 = vweird.f32 %v8922_v49 }
 0x1e1   : > { %8923 = vrsqrt.f32 %v684_v24  ;;  %vm732_vm6 = vmor %vm730_vm5, %vm731_vm4  ;;  %vm740_vm8 = vweird.f32 %v684_v24 }
 0x1e2   : > { %v726_v6 = vmul.f32 %v8922_v49, %v725_v27  ;;  %8823 = vmatpush.bf16.msrb.mxu3 %v10403_v50  ;;  %v723_v56 = vsel %vm722_vm3, %v8920_v1, %v719_v25  ;;  %v10525_v50 = vld [vmem:[%s15488_s1] ss:$0 sm:$0xff] }
 0x1e3   : > { %610 = vadd.xlane.f32.xlu1 %v566_v18  ;;  %451 = vadd.xlane.f32.xlu2 %v10071_v32  ;;  %v1034_v53 = vmul.f32 %v723_v56, %v10183_v11 }
 0x1e4   : > { %v727_v62 = vmul.f32 0.5, %v726_v6  ;;  %v593_v42 = vpop.xlane.xlu2 %592 }
 0x1e5   : > { %v653_v60 = vmul.f32 %v593_v42, %v10178_v8  ;;  %v1070_v11 = vmul.f32 %v10525_v50, %v1034_v53 }
 0x1e6   : > { %v728_v59 = vsub.f32 1.5, %v727_v62  ;;  %8824 = vmatpush.bf16.msrb.mxu3 %v10431_v28 }
 0x1e7   : > { %v8924_v0 = vpop.eup %8923  ;;  %v685_v57 = vadd.f32 1e-05, %v653_v60 }
 0x1e8   : > { %v729_v58 = vmul.f32 %v8922_v49, %v728_v59  ;;  %v735_v32 = vmul.f32 %v8924_v0, %v684_v24  ;;  %vm741_vm7 = vweird.f32 %v8924_v0 }
 0x1e9   : > { %8925 = vrsqrt.f32 %v685_v57  ;;  %vm742_vm9 = vmor %vm740_vm8, %vm741_vm7  ;;  %vm750_vm11 = vweird.f32 %v685_v57 }
 0x1ea   : > { %v733_v1 = vsel %vm732_vm6, %v8922_v49, %v729_v58  ;;  %v736_v14 = vmul.f32 %v8924_v0, %v735_v32  ;;  %8825 = vmatpush.bf16.msrb.mxu3 %v10460_v9 }
 0x1eb   : > { %v1035_v28 = vmul.f32 %v733_v1, %v10189_v15  ;;  %457 = vadd.xlane.f32.xlu1 %v10092_v38  ;;  %v1106_v38 = vadd.f32 %v10534_v30, %v1070_v11 }
 0x1ec   : > { %v737_v2 = vmul.f32 0.5, %v736_v14  ;;  %v595_v3 = vpop.xlane.xlu2 %594 }
 0x1ed   : > { %v654_v54 = vmul.f32 %v595_v3, %v10178_v8  ;;  %v1071_v16 = vmul.f32 %v10525_v50, %v1035_v28 }
 0x1ee   : > { %v738_v5 = vsub.f32 1.5, %v737_v2  ;;  %8826 = vmatpush.bf16.msrb.mxu3 %v10488_v39 }
 0x1ef   : > { %v8926_v9 = vpop.eup %8925  ;;  %v686_v15 = vadd.f32 1e-05, %v654_v54  ;;  %v1107_v55 = vadd.f32 %v10534_v30, %v1071_v16 }
 0x1f0   : > { %v739_v49 = vmul.f32 %v8924_v0, %v738_v5  ;;  %v745_v25 = vmul.f32 %v8926_v9, %v685_v57  ;;  %vm751_vm10 = vweird.f32 %v8926_v9 }
 0x1f1   : > { %8927 = vrsqrt.f32 %v686_v15  ;;  %v1138_v27 = vpack.c.bf16 %v1107_v55, %v1106_v38  ;;  %vm752_vm12 = vmor %vm750_vm11, %vm751_vm10  ;;  %vm760_vm14 = vweird.f32 %v686_v15 }
 0x1f2   : > { %v746_v18 = vmul.f32 %v8926_v9, %v745_v25  ;;  %v743_v6 = vsel %vm742_vm9, %v8924_v0, %v739_v49 }
 0x1f3   : > { %1330 = vmatmul.bf16.vlgmr.msra.gmra.mxu0 %v1138_v27  ;;  %1419 = vmatmul.bf16.vlgmr.msra.gmra.mxu1 %v1138_v27  ;;  %v1036_v59 = vmul.f32 %v743_v6, %v10195_v19 }
 0x1f4   : > { %v747_v56 = vmul.f32 0.5, %v746_v18  ;;  %1508 = vmatmul.bf16.vlgmr.msra.gmra.mxu2 %v1138_v27  ;;  %459 = vadd.xlane.f32.xlu1 %v10099_v40  ;;  %v597_v39 = vpop.xlane.xlu2 %596 }
 0x1f5   : > { %v655_v62 = vmul.f32 %v597_v39, %v10178_v8  ;;  %v1072_v40 = vmul.f32 %v10525_v50, %v1036_v59 }
 0x1f6   : > { %v748_v42 = vsub.f32 1.5, %v747_v56 }
 0x1f7   : > { %v8928_v60 = vpop.eup %8927  ;;  %v687_v53 = vadd.f32 1e-05, %v655_v62  ;;  %v1108_v57 = vadd.f32 %v10534_v30, %v1072_v40 }
 0x1f8   : > { %v749_v58 = vmul.f32 %v8926_v9, %v748_v42  ;;  %v755_v24 = vmul.f32 %v8928_v60, %v686_v15  ;;  %vm761_vm13 = vweird.f32 %v8928_v60 }
 0x1f9   : > { %8929 = vrsqrt.f32 %v687_v53  ;;  %vm762_vm15 = vmor %vm760_vm14, %vm761_vm13  ;;  %vm770_vm1 = vweird.f32 %v687_v53 }
 0x1fa   : > { %v753_v32 = vsel %vm752_vm12, %v8926_v9, %v749_v58  ;;  %v756_v0 = vmul.f32 %v8928_v60, %v755_v24 }
 0x1fb   : > { %v1037_v1 = vmul.f32 %v753_v32, %v10201_v22 }
 0x1fc   : > { %v757_v14 = vmul.f32 0.5, %v756_v0  ;;  %v635_v28 = vpop.xlane.xlu2 %634 }
 0x1fd   : > { %v674_v11 = vmul.f32 %v635_v28, %v10178_v8  ;;  %v1073_v2 = vmul.f32 %v10525_v50, %v1037_v1 }
 0x1fe   : > { %v758_v3 = vsub.f32 1.5, %v757_v14 }
 0x1ff   : > { %v8930_v19 = vpop.eup %8929  ;;  %v706_v54 = vadd.f32 1e-05, %v674_v11  ;;  %v1109_v16 = vadd.f32 %v10534_v30, %v1073_v2 }
 0x200   : > { %v759_v5 = vmul.f32 %v8928_v60, %v758_v3  ;;  %v765_v9 = vmul.f32 %v8930_v19, %v687_v53  ;;  %vm771_vm0 = vweird.f32 %v8930_v19 }
 0x201   : > { %8931 = vrsqrt.f32 %v706_v54  ;;  %v1139_v22 = vpack.c.bf16 %v1109_v16, %v1108_v57  ;;  %vm772_vm2 = vmor %vm770_vm1, %vm771_vm0  ;;  %vm960_vm4 = vweird.f32 %v706_v54 }
 0x202   : > { %v766_v38 = vmul.f32 %v8930_v19, %v765_v9  ;;  %v763_v55 = vsel %vm762_vm15, %v8928_v60, %v759_v5  ;;  %v599_v9 = vpop.xlane.xlu1 %598 }
 0x203   : > { %1335 = vmatmul.bf16.gmra.mxu0 %v1139_v22  ;;  %1424 = vmatmul.bf16.gmra.mxu1 %v1139_v22  ;;  %v1038_v39 = vmul.f32 %v763_v55, %v10207_v26 }
 0x204   : > { %v767_v49 = vmul.f32 0.5, %v766_v38  ;;  %1513 = vmatmul.bf16.gmra.mxu2 %v1139_v22  ;;  %v637_v25 = vpop.xlane.xlu2 %636 }
 0x205   : > { %v675_v27 = vmul.f32 %v637_v25, %v10178_v8  ;;  %v1074_v24 = vmul.f32 %v10525_v50, %v1038_v39  ;;  %v656_v39 = vmul.f32 %v599_v9, %v10178_v8 }
 0x206   : > { %v768_v18 = vsub.f32 1.5, %v767_v49  ;;  %v10551_v6 = vpop.xlane.xlu0 %604 }
 0x207   : > { %v8932_v56 = vpop.eup %8931  ;;  %v707_v62 = vadd.f32 1e-05, %v675_v27  ;;  %v1110_v53 = vadd.f32 %v10534_v30, %v1074_v24 }
 0x208   : > { %v769_v42 = vmul.f32 %v8930_v19, %v768_v18  ;;  %v955_v15 = vmul.f32 %v8932_v56, %v706_v54  ;;  %vm961_vm3 = vweird.f32 %v8932_v56 }
 0x209   : > { %8933 = vrsqrt.f32 %v707_v62  ;;  %vm962_vm5 = vmor %vm960_vm4, %vm961_vm3  ;;  %vm970_vm7 = vweird.f32 %v707_v62 }
 0x20a   : > { %v773_v59 = vsel %vm772_vm2, %v8930_v19, %v769_v42  ;;  %v956_v60 = vmul.f32 %v8932_v56, %v955_v15 }
 0x20b   : > { %v1039_v58 = vmul.f32 %v773_v59, %v10214_v33 }
 0x20c   : > { %v957_v32 = vmul.f32 0.5, %v956_v60 }
 0x20d   : > { %v1075_v0 = vmul.f32 %v10525_v50, %v1039_v58 }
 0x20e   : > { %v958_v1 = vsub.f32 1.5, %v957_v32  ;;  %v639_v40 = vpop.xlane.xlu2 %638  ;;  %v10557_v14 = vpop.xlane.xlu0 %606 }
 0x20f   : > { %v8934_v26 = vpop.eup %8933  ;;  %v676_v28 = vmul.f32 %v639_v40, %v10178_v8  ;;  %v1111_v11 = vadd.f32 %v10534_v30, %v1075_v0 }
 0x210   : > { %v959_v2 = vmul.f32 %v8932_v56, %v958_v1  ;;  %v965_v3 = vmul.f32 %v8934_v26, %v707_v62  ;;  %vm971_vm6 = vweird.f32 %v8934_v26  ;;  %v10573_v62 = vadd.f32 1e-05, %v656_v39 }
 0x211   : > { %v708_v33 = vadd.f32 1e-05, %v676_v28  ;;  %v1140_v19 = vpack.c.bf16 %v1111_v11, %v1110_v53  ;;  %vm972_vm8 = vmor %vm970_vm7, %vm971_vm6 }
 0x212   : > { %v966_v57 = vmul.f32 %v8934_v26, %v965_v3  ;;  %v963_v16 = vsel %vm962_vm5, %v8932_v56, %v959_v2  ;;  %vm780_vm2 = vweird.f32 %v10573_v62 }
 0x213   : > { %8935 = vrsqrt.f32 %v708_v33  ;;  %1340 = vmatmul.bf16.gmra.mxu0 %v1140_v19  ;;  %1429 = vmatmul.bf16.gmra.mxu1 %v1140_v19  ;;  %v1058_v49 = vmul.f32 %v963_v16, %v10227_v44  ;;  %vm980_vm10 = vweird.f32 %v708_v33 }
 0x214   : > { %v967_v5 = vmul.f32 0.5, %v966_v57  ;;  %1518 = vmatmul.bf16.gmra.mxu2 %v1140_v19 }
 0x215   : > { %v1094_v44 = vmul.f32 %v10525_v50, %v1058_v49 }
 0x216   : > { %v968_v22 = vsub.f32 1.5, %v967_v5  ;;  %v641_v38 = vpop.xlane.xlu2 %640  ;;  %v454_v55 = vpop.xlane.xlu0 %453 }
 0x217   : > { %v677_v25 = vmul.f32 %v641_v38, %v10178_v8  ;;  %v507_v27 = vmul.f32 %v10178_v8, %v454_v55  ;;  %v1130_v40 = vadd.f32 %v10534_v30, %v1094_v44 }
 0x218   : > { %v969_v54 = vmul.f32 %v8934_v26, %v968_v22 }
 0x219   : > { %v8936_v18 = vpop.eup %8935  ;;  %v709_v56 = vadd.f32 1e-05, %v677_v25  ;;  %v10567_v42 = vsub.f32 %v10078_v34, %v507_v27  ;;  %v659_v27 = vmul.f32 %v10551_v6, %v10178_v8 }
 0x21a   : > { %v973_v15 = vsel %vm972_vm8, %v8934_v26, %v969_v54  ;;  %v975_v59 = vmul.f32 %v8936_v18, %v708_v33  ;;  %vm981_vm9 = vweird.f32 %v8936_v18 }
 0x21b   : > { %v1059_v60 = vmul.f32 %v973_v15, %v10233_v63  ;;  %8937 = vrsqrt.f32 %v709_v56  ;;  %v571_v24 = vmul.f32 %v10567_v42, %v10567_v42  ;;  %vm982_vm11 = vmor %vm980_vm10, %vm981_vm9  ;;  %vm990_vm13 = vweird.f32 %v709_v56 }
 0x21c   : > { %v976_v58 = vmul.f32 %v8936_v18, %v975_v59  ;;  %8939 = vrsqrt.f32 %v10573_v62  ;;  %v10605_v59 = vadd.f32 1e-05, %v659_v27 }
 0x21d   : > { %v1095_v32 = vmul.f32 %v10525_v50, %v1059_v60  ;;  %620 = vadd.xlane.f32.xlu1 %v571_v24 }
 0x21e   : > { %v977_v0 = vmul.f32 0.5, %v976_v58  ;;  %v456_v1 = vpop.xlane.xlu0 %455 }
 0x21f   : > { %v508_v34 = vmul.f32 %v10178_v8, %v456_v1  ;;  %v1131_v63 = vadd.f32 %v10534_v30, %v1095_v32 }
 0x220   : > { %v978_v26 = vsub.f32 1.5, %v977_v0 }
 0x221   : > { %v8938_v28 = vpop.eup %8937  ;;  %v10581_v53 = vsub.f32 %v10085_v36, %v508_v34  ;;  %v10583_v11 = vpack.c.bf16 %v1131_v63, %v1130_v40 }
 0x222   : > { %v979_v2 = vmul.f32 %v8936_v18, %v978_v26  ;;  %v985_v3 = vmul.f32 %v8938_v28, %v709_v56  ;;  %v10589_v9 = vpop.eup %8939  ;;  %vm991_vm12 = vweird.f32 %v8938_v28 }
 0x223   : > { %1390 = vmatmul.bf16.vlgmr.msra.gmra.mxu3 %v10583_v11  ;;  %v572_v19 = vmul.f32 %v10581_v53, %v10581_v53  ;;  %v775_v33 = vmul.f32 %v10589_v9, %v10573_v62  ;;  %vm992_vm14 = vmor %vm990_vm13, %vm991_vm12  ;;  %vm781_vm0 = vweird.f32 %v10589_v9 }
 0x224   : > { %v986_v57 = vmul.f32 %v8938_v28, %v985_v3  ;;  %8827 = vmatpush.bf16.msra.mxu3 %v10291_v31  ;;  %v983_v16 = vsel %vm982_vm11, %v8936_v18, %v979_v2  ;;  %vm782_vm4 = vmor %vm780_vm2, %vm781_vm0  ;;  %vm810_vm2 = vweird.f32 %v10605_v59 }
 0x225   : > { %622 = vadd.xlane.f32.xlu1 %v572_v19  ;;  %v1060_v55 = vmul.f32 %v983_v16, %v10249_v12  ;;  %v776_v12 = vmul.f32 %v10589_v9, %v775_v33 }
 0x226   : > { %v987_v5 = vmul.f32 0.5, %v986_v57  ;;  %v643_v36 = vpop.xlane.xlu2 %642 }
 0x227   : > { %v678_v22 = vmul.f32 %v643_v36, %v10178_v8 }
 0x228   : > { %v988_v38 = vsub.f32 1.5, %v987_v5  ;;  %8828 = vmatpush.bf16.msra.mxu3 %v10319_v7  ;;  %v1096_v7 = vmul.f32 %v10525_v50, %v1060_v55 }
 0x229   : > { %v710_v49 = vadd.f32 1e-05, %v678_v22 }
 0x22a   : > { %v989_v31 = vmul.f32 %v8938_v28, %v988_v38  ;;  %v1132_v60 = vadd.f32 %v10534_v30, %v1096_v7 }
 0x22b   : > { %8941 = vrsqrt.f32 %v710_v49  ;;  %vm1000_vm1 = vweird.f32 %v710_v49 }
 0x22c   : > { %v993_v25 = vsel %vm992_vm14, %v8938_v28, %v989_v31  ;;  %8829 = vmatpush.bf16.msra.mxu3 %v10346_v20 }
 0x22d   : > { %v1061_v54 = vmul.f32 %v993_v25, %v10257_v17  ;;  %v777_v17 = vmul.f32 0.5, %v776_v12 }
 0x22e   : > { %v645_v18 = vpop.xlane.xlu2 %644 }
 0x22f   : > { %v679_v39 = vmul.f32 %v645_v18, %v10178_v8  ;;  %v1097_v15 = vmul.f32 %v10525_v50, %v1061_v54 }
 0x230   : > { %8830 = vmatpush.bf16.msra.mxu3 %v10377_v43  ;;  %v778_v43 = vsub.f32 1.5, %v777_v17 }
 0x231   : > { %v8942_v56 = vpop.eup %8941  ;;  %v711_v20 = vadd.f32 1e-05, %v679_v39  ;;  %v1133_v6 = vadd.f32 %v10534_v30, %v1097_v15 }
 0x232   : > { %v995_v44 = vmul.f32 %v8942_v56, %v710_v49  ;;  %vm1001_vm15 = vweird.f32 %v8942_v56  ;;  %v779_v2 = vmul.f32 %v10589_v9, %v778_v43  ;;  %v660_v49 = vmul.f32 %v10557_v14, %v10178_v8 }
 0x233   : > { %8943 = vrsqrt.f32 %v711_v20  ;;  %v10609_v58 = vpack.c.bf16 %v1133_v6, %v1132_v60  ;;  %vm1002_vm3 = vmor %vm1000_vm1, %vm1001_vm15  ;;  %vm1010_vm6 = vweird.f32 %v711_v20 }
 0x234   : > { %v996_v24 = vmul.f32 %v8942_v56, %v995_v44  ;;  %8831 = vmatpush.bf16.msra.mxu3 %v10405_v13  ;;  %8945 = vrsqrt.f32 %v10605_v59  ;;  %v783_v5 = vsel %vm782_vm4, %v10589_v9, %v779_v2  ;;  %v10648_v18 = vadd.f32 1e-05, %v660_v49  ;;  %v8983_v2 = vld [vmem:[#allocation2 + $0x70] sm:$0xff] }
 0x235   : > { %1395 = vmatmul.bf16.gmra.mxu3 %v10609_v58  ;;  %v1040_v25 = vmul.f32 %v783_v5, %v10217_v35 }
 0x236   : > { %v997_v32 = vmul.f32 0.5, %v996_v24  ;;  %v601_v0 = vpop.xlane.xlu2 %600  ;;  %v647_v1 = vpop.xlane.xlu1 %646 }
 0x237   : > { %v657_v34 = vmul.f32 %v601_v0, %v10178_v8  ;;  %v680_v40 = vmul.f32 %v647_v1, %v10178_v8  ;;  %v1076_v24 = vmul.f32 %v10525_v50, %v1040_v25 }
 0x238   : > { %v998_v63 = vsub.f32 1.5, %v997_v32  ;;  %8832 = vmatpush.bf16.msra.mxu3 %v10433_v29 }
 0x239   : > { %v8944_v26 = vpop.eup %8943  ;;  %v10617_v28 = vadd.f32 1e-05, %v657_v34  ;;  %v10619_v13 = vadd.f32 1e-05, %v680_v40 }
 0x23a   : > { %v999_v3 = vmul.f32 %v8942_v56, %v998_v63  ;;  %v1005_v19 = vmul.f32 %v8944_v26, %v711_v20  ;;  %v10623_v57 = vpop.eup %8945  ;;  %vm1011_vm5 = vweird.f32 %v8944_v26 }
 0x23b   : > { %8947 = vrsqrt.f32 %v10617_v28  ;;  %v805_v36 = vmul.f32 %v10623_v57, %v10605_v59  ;;  %vm1012_vm7 = vmor %vm1010_vm6, %vm1011_vm5  ;;  %vm790_vm9 = vweird.f32 %v10617_v28  ;;  %vm1020_vm12 = vweird.f32 %v10619_v13 }
 0x23c   : > { %v1006_v29 = vmul.f32 %v8944_v26, %v1005_v19  ;;  %8949 = vrsqrt.f32 %v10619_v13  ;;  %8833 = vmatpush.bf16.msra.mxu3 %v10462_v10  ;;  %v1003_v16 = vsel %vm1002_vm3, %v8942_v56, %v999_v3  ;;  %vm811_vm14 = vweird.f32 %v10623_v57 }
 0x23d   : > { %v1062_v31 = vmul.f32 %v1003_v16, %v10267_v21  ;;  %v806_v14 = vmul.f32 %v10623_v57, %v805_v36  ;;  %vm10712_vm3 = vmor %vm810_vm2, %vm811_vm14 }
 0x23e   : > { %v1007_v22 = vmul.f32 0.5, %v1006_v29  ;;  %v649_v38 = vpop.xlane.xlu2 %648  ;;  %v446_v55 = vpop.xlane.xlu1 %445 }
 0x23f   : > { %v681_v62 = vmul.f32 %v649_v38, %v10178_v8  ;;  %v503_v33 = vmul.f32 %v10178_v8, %v446_v55  ;;  %v1098_v15 = vmul.f32 %v10525_v50, %v1062_v31  ;;  %v807_v60 = vmul.f32 0.5, %v806_v14 }
 0x240   : > { %v1008_v10 = vsub.f32 1.5, %v1007_v22  ;;  %8834 = vmatpush.bf16.msra.mxu3 %v10490_v45 }
 0x241   : > { %v8948_v9 = vpop.eup %8947  ;;  %v10639_v27 = vadd.f32 1e-05, %v681_v62  ;;  %v10642_v54 = vsub.f32 %v10163_v61, %v503_v33  ;;  %v808_v5 = vsub.f32 1.5, %v807_v60 }
 0x242   : > { %v10644_v7 = vpop.eup %8949  ;;  %v1009_v12 = vmul.f32 %v8944_v26, %v1008_v10  ;;  %v785_v21 = vmul.f32 %v8948_v9, %v10617_v28  ;;  %vm791_vm8 = vweird.f32 %v8948_v9 }
 0x243   : > { %v1015_v45 = vmul.f32 %v10644_v7, %v10619_v13  ;;  %8951 = vrsqrt.f32 %v10639_v27  ;;  %v567_v61 = vmul.f32 %v10642_v54, %v10642_v54  ;;  %vm1021_vm10 = vweird.f32 %v10644_v7  ;;  %vm792_vm11 = vmor %vm790_vm9, %vm791_vm8 }
 0x244   : > { %v1013_v35 = vsel %vm1012_vm7, %v8944_v26, %v1009_v12  ;;  %v786_v39 = vmul.f32 %v8948_v9, %v785_v21  ;;  %8953 = vrsqrt.f32 %v10648_v18  ;;  %vm10680_vm13 = vmor %vm1020_vm12, %vm1021_vm10  ;;  %v1112_v12 = vadd.f32 %v10534_v30, %v1076_v24 }
 0x245   : > { %v1063_v56 = vmul.f32 %v1013_v35, %v10315_v48  ;;  %v1016_v20 = vmul.f32 %v10644_v7, %v1015_v45  ;;  %612 = vadd.xlane.f32.xlu2 %v567_v61  ;;  %v1134_v48 = vadd.f32 %v10534_v30, %v1098_v15  ;;  %v809_v21 = vmul.f32 %v10623_v57, %v808_v5 }
 0x246   : > { %v787_v6 = vmul.f32 0.5, %v786_v39  ;;  %v603_v17 = vpop.xlane.xlu2 %602  ;;  %v448_v44 = vpop.xlane.xlu1 %447  ;;  %v8984_v39 = vld [vmem:[#allocation2 + $0x78] sm:$0xff]  ;;  %vm1030_vm0 = vweird.f32 %v10639_v27 }
 0x247   : > { %v1017_v43 = vmul.f32 0.5, %v1016_v20  ;;  %v658_v32 = vmul.f32 %v603_v17, %v10178_v8  ;;  %v504_v0 = vmul.f32 %v10178_v8, %v448_v44  ;;  %v1099_v1 = vmul.f32 %v10525_v50, %v1063_v56 }
 0x248   : > { %v788_v34 = vsub.f32 1.5, %v787_v6 }
 0x249   : > { %v8952_v40 = vpop.eup %8951  ;;  %v1018_v63 = vsub.f32 1.5, %v1017_v43  ;;  %v10664_v26 = vadd.f32 1e-05, %v658_v32  ;;  %v10666_v3 = vsub.f32 %v8983_v2, %v504_v0  ;;  %v1135_v19 = vadd.f32 %v10534_v30, %v1099_v1 }
 0x24a   : > { %v789_v29 = vmul.f32 %v8948_v9, %v788_v34  ;;  %v1025_v16 = vmul.f32 %v8952_v40, %v10639_v27  ;;  %v10685_v33 = vpop.eup %8953  ;;  %vm1031_vm15 = vweird.f32 %v8952_v40  ;;  %v813_v0 = vsel %vm10712_vm3, %v10623_v57, %v809_v21 }
 0x24b   : > { %v1019_v36 = vmul.f32 %v10644_v7, %v1018_v63  ;;  %8955 = vrsqrt.f32 %v10664_v26  ;;  %v10674_v22 = vpack.c.bf16 %v1135_v19, %v1134_v48  ;;  %v568_v49 = vmul.f32 %v10666_v3, %v10666_v3  ;;  %vm1032_vm1 = vmor %vm1030_vm0, %vm1031_vm15 }
 0x24c   : > { %v793_v38 = vsel %vm792_vm11, %v8948_v9, %v789_v29  ;;  %v1026_v55 = vmul.f32 %v8952_v40, %v1025_v16  ;;  %v815_v20 = vmul.f32 %v10685_v33, %v10648_v18  ;;  %v1043_v57 = vmul.f32 %v813_v0, %v10237_v4  ;;  %v8986_v29 = vld [vmem:[#allocation2 + $0x80] sm:$0xff] }
 0x24d   : > { %v1041_v28 = vmul.f32 %v793_v38, %v10349_v23  ;;  %1400 = vmatmul.bf16.gmra.mxu3 %v10674_v22  ;;  %v1023_v31 = vsel %vm10680_vm13, %v10644_v7, %v1019_v36  ;;  %614 = vadd.xlane.f32.xlu2 %v568_v49  ;;  %vm800_vm5 = vweird.f32 %v10664_v26  ;;  %vm821_vm8 = vweird.f32 %v10685_v33 }
 0x24e   : > { %v1027_v10 = vmul.f32 0.5, %v1026_v55  ;;  %v450_v13 = vpop.xlane.xlu2 %449  ;;  %v609_v9 = vpop.xlane.xlu1 %608  ;;  %v1064_v7 = vmul.f32 %v1023_v31, %v10373_v41  ;;  %v816_v59 = vmul.f32 %v10685_v33, %v815_v20  ;;  %vm820_vm11 = vweird.f32 %v10648_v18  ;;  %v8990_v18 = vld [vmem:[#allocation2 + $0xa0] sm:$0xff] }
 0x24f   : > { %v505_v25 = vmul.f32 %v10178_v8, %v450_v13  ;;  %v661_v23 = vmul.f32 %v609_v9, %v10178_v8  ;;  %v1077_v14 = vmul.f32 %v10525_v50, %v1041_v28  ;;  %v1079_v13 = vmul.f32 %v10525_v50, %v1043_v57  ;;  %vm822_vm12 = vmor %vm820_vm11, %vm821_vm8 }
 0x250   : > { %v1028_v45 = vsub.f32 1.5, %v1027_v10  ;;  %v1100_v32 = vmul.f32 %v10525_v50, %v1064_v7  ;;  %v817_v38 = vmul.f32 0.5, %v816_v59 }
 0x251   : > { %v8956_v35 = vpop.eup %8955  ;;  %v10697_v61 = vsub.f32 %v8984_v39, %v505_v25  ;;  %v10699_v15 = vadd.f32 1e-05, %v661_v23  ;;  %v1113_v56 = vadd.f32 %v10534_v30, %v1077_v14  ;;  %v10743_v23 = vld [vmem:[#allocation2 + $0xb0] sm:$0xff]  ;;  %v1115_v7 = vadd.f32 %v10534_v30, %v1079_v13 }
 0x252   : > { %v1029_v60 = vmul.f32 %v8952_v40, %v1028_v45  ;;  %v795_v6 = vmul.f32 %v8956_v35, %v10664_v26  ;;  %vm801_vm4 = vweird.f32 %v8956_v35  ;;  %v1136_v5 = vadd.f32 %v10534_v30, %v1100_v32  ;;  %v8988_v45 = vld [vmem:[#allocation2 + $0x98] sm:$0xff] }
 0x253   : > { %8957 = vrsqrt.f32 %v10699_v15  ;;  %v569_v41 = vmul.f32 %v10697_v61, %v10697_v61  ;;  %v1141_v17 = vpack.c.bf16 %v1113_v56, %v1112_v12  ;;  %vm802_vm6 = vmor %vm800_vm5, %vm801_vm4  ;;  %v818_v9 = vsub.f32 1.5, %v817_v38 }
 0x254   : > { %v1033_v44 = vsel %vm1032_vm1, %v8952_v40, %v1029_v60  ;;  %v796_v24 = vmul.f32 %v8956_v35, %v795_v6  ;;  %v10724_v40 = vld [vmem:[#allocation2 + $0xa8] sm:$0xff]  ;;  %vm830_vm9 = vweird.f32 %v10699_v15 }
 0x255   : > { %v1065_v27 = vmul.f32 %v1033_v44, %v10429_v47  ;;  %616 = vadd.xlane.f32.xlu0 %v569_v41  ;;  %1345 = vmatmul.bf16.gmra.mxu0 %v1141_v17  ;;  %v819_v39 = vmul.f32 %v10685_v33, %v818_v9  ;;  %v10758_v41 = vld [vmem:[#allocation2 + $0xb8] sm:$0xff] }
 0x256   : > { %v797_v1 = vmul.f32 0.5, %v796_v24  ;;  %1434 = vmatmul.bf16.gmra.mxu1 %v1141_v17  ;;  %1523 = vmatmul.bf16.gmra.mxu2 %v1141_v17  ;;  %v452_v34 = vpop.xlane.xlu2 %451  ;;  %v10722_v48 = vpop.xlane.xlu1 %610 }
 0x257   : > { %461 = vadd.xlane.f32.xlu2 %v10724_v40  ;;  %v506_v47 = vmul.f32 %v10178_v8, %v452_v34  ;;  %v1101_v63 = vmul.f32 %v10525_v50, %v1065_v27  ;;  %v823_v17 = vsel %vm822_vm12, %v10685_v33, %v819_v39 }
 0x258   : > { %v798_v2 = vsub.f32 1.5, %v797_v1  ;;  %v1044_v43 = vmul.f32 %v823_v17, %v10245_v51  ;;  %v1186_v51 = vld [vmem:[%s15491_s4] sm:$0x7] }
 0x259   : > { %v8958_v19 = vpop.eup %8957  ;;  %v10730_v16 = vsub.f32 %v8986_v29, %v506_v47  ;;  %v1137_v36 = vadd.f32 %v10534_v30, %v1101_v63  ;;  %v10777_v63 = vperm.slane %v1186_v51, 0 }
 0x25a   : > { %v799_v55 = vmul.f32 %v8956_v35, %v798_v2  ;;  %v825_v49 = vmul.f32 %v8958_v19, %v10699_v15  ;;  %vm831_vm7 = vweird.f32 %v8958_v19  ;;  %v1080_v33 = vmul.f32 %v10525_v50, %v1044_v43 }
 0x25b   : > { %v570_v28 = vmul.f32 %v10730_v16, %v10730_v16  ;;  %v10738_v62 = vpack.c.bf16 %v1137_v36, %v1136_v5  ;;  %vm832_vm10 = vmor %vm830_vm9, %vm831_vm7  ;;  %v10779_v2 = vperm.slane %v1186_v51, 1 }
 0x25c   : > { %v803_v4 = vsel %vm802_vm6, %v8956_v35, %v799_v55  ;;  %v826_v31 = vmul.f32 %v8958_v19, %v825_v49  ;;  %v1116_v34 = vadd.f32 %v10534_v30, %v1080_v33  ;;  %v10785_v49 = vperm.slane %v1186_v51, 2 }
 0x25d   : > { %v1042_v10 = vmul.f32 %v803_v4, %v10465_v46  ;;  %618 = vadd.xlane.f32.xlu0 %v570_v28  ;;  %1405 = vmatmul.bf16.gmra.mxu3 %v10738_v62 }
 0x25e   : > { %v827_v25 = vmul.f32 0.5, %v826_v31  ;;  %v458_v26 = vpop.xlane.xlu1 %457 }
 0x25f   : > { %463 = vadd.xlane.f32.xlu2 %v10743_v23  ;;  %v509_v14 = vmul.f32 %v10178_v8, %v458_v26  ;;  %v1078_v12 = vmul.f32 %v10525_v50, %v1042_v10 }
 0x260   : > { %v828_v21 = vsub.f32 1.5, %v827_v25 }
 0x261   : > { %v10748_v46 = vsub.f32 %v8988_v45, %v509_v14  ;;  %v1114_v35 = vadd.f32 %v10534_v30, %v1078_v12 }
 0x262   : > { %v829_v56 = vmul.f32 %v8958_v19, %v828_v21 }
 0x263   : > { %v1142_v20 = vpack.c.bf16 %v1115_v7, %v1114_v35  ;;  %v573_v60 = vmul.f32 %v10748_v46, %v10748_v46 }
 0x264   : > { %v833_v6 = vsel %vm832_vm10, %v8958_v19, %v829_v56 }
 0x265   : > { %465 = vadd.xlane.f32.xlu0 %v10758_v41  ;;  %1350 = vmatmul.bf16.gmra.mxu0 %v1142_v20  ;;  %v1045_v15 = vmul.f32 %v833_v6, %v10501_v37 }
 0x266   : > { %1439 = vmatmul.bf16.gmra.mxu1 %v1142_v20  ;;  %1528 = vmatmul.bf16.gmra.mxu2 %v1142_v20 }
 0x267   : > { %624 = vadd.xlane.f32.xlu2 %v573_v60  ;;  %v460_v44 = vpop.xlane.xlu1 %459  ;;  %v1081_v32 = vmul.f32 %v10525_v50, %v1045_v15 }
 0x268   : > { %v510_v24 = vmul.f32 %v10178_v8, %v460_v44 }
 0x269   : > { %v1117_v37 = vadd.f32 %v10534_v30, %v1081_v32 }
 0x26a   : > { %v10765_v27 = vsub.f32 %v8990_v18, %v510_v24 }
 0x26b   : > { %v1143_v47 = vpack.c.bf16 %v1117_v37, %v1116_v34 }
 0x26c   : > { %v574_v0 = vmul.f32 %v10765_v27, %v10765_v27 }
 0x26d   : > { %1479 = vmatmul.bf16.vlgmr.msrb.gmra.mxu3 %v10583_v11 }
 0x26e   : > { %626 = vadd.xlane.f32.xlu0 %v574_v0 }
 0x270   : > { %v1331_v59 = vpop.f32.mrf.mxu0  ;;  %v1420_v1 = vpop.f32.mrf.mxu1 }
 0x271   : > { %v1332_v29 = vadd.f32 %v1331_v59, %v10777_v63  ;;  %v1421_v5 = vadd.f32 %v1420_v1, %v10779_v2 }
 0x275   : > { %1355 = vmatmul.bf16.gmra.mxu0 %v1143_v47 }
 0x276   : > { %1444 = vmatmul.bf16.gmra.mxu1 %v1143_v47  ;;  %1533 = vmatmul.bf16.gmra.mxu2 %v1143_v47  ;;  %v662_v47 = vmul.f32 %v10722_v48, %v10178_v8 }
 0x277   : > { %v1509_v50 = vpop.f32.mrf.mxu2 }
 0x278   : > { %v1333_v19 = vpop.f32.mrf.mxu0  ;;  %v1422_v57 = vpop.f32.mrf.mxu1  ;;  %v1510_v4 = vadd.f32 %v1509_v50, %v10785_v49 }
 0x279   : > { %v1334_v30 = vadd.f32 %v1333_v19, %v10777_v63  ;;  %v1423_v36 = vadd.f32 %v1422_v57, %v10779_v2  ;;  %v694_v19 = vadd.f32 1e-05, %v662_v47 }
 0x27b   : > { %v8529_v38 = vpack.c.bf16 %v1334_v30, %v1332_v29  ;;  %v8609_v55 = vpack.c.bf16 %v1423_v36, %v1421_v5  ;;  %8959 = vrsqrt.f32 %v694_v19  ;;  %vm840_vm14 = vweird.f32 %v694_v19 }
 0x27d   : > { %8530 = vst [vmem:[#allocation3] sm:$0xff] %v8529_v38   ;;  %1484 = vmatmul.bf16.gmra.mxu3 %v10609_v58 }
 0x27e   : > { %8610 = vst [vmem:[#allocation4 + $0x30] sm:$0xff] %v8609_v55  }
 0x27f   : > { %v1511_v28 = vpop.f32.mrf.mxu2 }
 0x280   : > { %v1512_v31 = vadd.f32 %v1511_v28, %v10785_v49  ;;  %v1336_v10 = vpop.f32.mrf.mxu0  ;;  %v1425_v13 = vpop.f32.mrf.mxu1 }
 0x281   : > { %v1337_v12 = vadd.f32 %v1336_v10, %v10777_v63  ;;  %v1426_v21 = vadd.f32 %v1425_v13, %v10779_v2  ;;  %v8960_v36 = vpop.eup %8959 }
 0x282   : > { %v8689_v9 = vpack.c.bf16 %v1512_v31, %v1510_v4  ;;  %v835_v55 = vmul.f32 %v8960_v36, %v694_v19  ;;  %vm841_vm13 = vweird.f32 %v8960_v36 }
 0x283   : > { %vm842_vm15 = vmor %vm840_vm14, %vm841_vm13 }
 0x284   : > { %8690 = vst [vmem:[#allocation5 + $0x28] sm:$0xff] %v8689_v9   ;;  %v836_v28 = vmul.f32 %v8960_v36, %v835_v55 }
 0x286   : > { %v837_v10 = vmul.f32 0.5, %v836_v28 }
 0x287   : > { %v1514_v25 = vpop.f32.mrf.mxu2 }
 0x288   : > { %v1338_v26 = vpop.f32.mrf.mxu0  ;;  %v1427_v14 = vpop.f32.mrf.mxu1  ;;  %v1515_v20 = vadd.f32 %v1514_v25, %v10785_v49 }
 0x289   : > { %v1339_v45 = vadd.f32 %v1338_v26, %v10777_v63  ;;  %v1428_v35 = vadd.f32 %v1427_v14, %v10779_v2 }
 0x28b   : > { %v8534_v7 = vpack.c.bf16 %v1339_v45, %v1337_v12  ;;  %v8614_v39 = vpack.c.bf16 %v1428_v35, %v1426_v21 }
 0x28d   : > { %8766 = vst [vmem:[#allocation3 + $0x8] sm:$0xff] %v8534_v7   ;;  %1489 = vmatmul.bf16.gmra.mxu3 %v10674_v22 }
 0x28e   : > { %8781 = vst [vmem:[#allocation4] sm:$0xff] %v8614_v39  }
 0x28f   : > { %v1516_v56 = vpop.f32.mrf.mxu2 }
 0x290   : > { %v1517_v60 = vadd.f32 %v1516_v56, %v10785_v49  ;;  %v1341_v6 = vpop.f32.mrf.mxu0  ;;  %v1430_v17 = vpop.f32.mrf.mxu1 }
 0x291   : > { %v1342_v18 = vadd.f32 %v1341_v6, %v10777_v63  ;;  %v1431_v32 = vadd.f32 %v1430_v17, %v10779_v2  ;;  %v621_v9 = vpop.xlane.xlu1 %620 }
 0x292   : > { %v8694_v15 = vpack.c.bf16 %v1517_v60, %v1515_v20  ;;  %v667_v21 = vmul.f32 %v621_v9, %v10178_v8 }
 0x294   : > { %8796 = vst [vmem:[#allocation5 + $0x68] sm:$0xff] %v8694_v15   ;;  %v10815_v20 = vadd.f32 1e-05, %v667_v21 }
 0x296   : > { %vm890_vm13 = vweird.f32 %v10815_v20 }
 0x297   : > { %v1519_v44 = vpop.f32.mrf.mxu2 }
 0x298   : > { %v1343_v24 = vpop.f32.mrf.mxu0  ;;  %v1432_v43 = vpop.f32.mrf.mxu1  ;;  %v1520_v34 = vadd.f32 %v1519_v44, %v10785_v49 }
 0x299   : > { %v1344_v0 = vadd.f32 %v1343_v24, %v10777_v63  ;;  %v1433_v33 = vadd.f32 %v1432_v43, %v10779_v2 }
 0x29b   : > { %v8539_v37 = vpack.c.bf16 %v1344_v0, %v1342_v18  ;;  %v8619_v59 = vpack.c.bf16 %v1433_v33, %v1431_v32 }
 0x29d   : > { %8767 = vst [vmem:[#allocation3 + $0x10] sm:$0xff] %v8539_v37   ;;  %1494 = vmatmul.bf16.gmra.mxu3 %v10738_v62  ;;  %v623_v37 = vpop.xlane.xlu1 %622 }
 0x29e   : > { %8782 = vst [vmem:[#allocation4 + $0x58] sm:$0xff] %v8619_v59  }
 0x29f   : > { %v1521_v1 = vpop.f32.mrf.mxu2 }
 0x2a0   : > { %v1522_v51 = vadd.f32 %v1521_v1, %v10785_v49 }
 0x2a2   : > { %v8699_v50 = vpack.c.bf16 %v1522_v51, %v1520_v34  ;;  %v10831_v34 = vld [vmem:[%s15488_s1] ss:$0 sm:$0xff] }
 0x2a4   : > { %8797 = vst [vmem:[#allocation5 + $0x10] sm:$0xff] %v8699_v50  }
 0x2a6   : > { %v1391_v57 = vpop.f32.mrf.mxu3 }
 0x2a7   : > { %v1392_v5 = vadd.f32 %v1391_v57, %v10777_v63  ;;  %v668_v57 = vmul.f32 %v623_v37, %v10178_v8 }
 0x2ad   : > { %1568 = vmatmul.bf16.vlgmr.msra.gmra.mxu3 %v10583_v11  ;;  %v838_v11 = vsub.f32 1.5, %v837_v10 }
 0x2ae   : > { %v1393_v29 = vpop.f32.mrf.mxu3 }
 0x2af   : > { %v1394_v30 = vadd.f32 %v1393_v29, %v10777_v63  ;;  %v839_v35 = vmul.f32 %v8960_v36, %v838_v11 }
 0x2b1   : > { %v8589_v38 = vpack.c.bf16 %v1394_v30, %v1392_v5  ;;  %v843_v60 = vsel %vm842_vm15, %v8960_v36, %v839_v35 }
 0x2b2   : > { %v1046_v24 = vmul.f32 %v843_v60, %v10511_v52 }
 0x2b3   : > { %8777 = vst [vmem:[#allocation3 + $0x60] sm:$0xff] %v8589_v38  }
 0x2b4   : > { %v1082_v51 = vmul.f32 %v10831_v34, %v1046_v24 }
 0x2b8   : > { %v1396_v4 = vpop.f32.mrf.mxu3  ;;  %v613_v31 = vpop.xlane.xlu2 %612 }
 0x2b9   : > { %v663_v48 = vmul.f32 %v613_v31, %v10178_v8  ;;  %v1397_v26 = vadd.f32 %v1396_v4, %v10777_v63  ;;  %v10845_v4 = vld [vmem:[%s15489_s2] ss:$0 sm:$0xff] }
 0x2bb   : > { %v695_v13 = vadd.f32 1e-05, %v663_v48 }
 0x2bd   : > { %1573 = vmatmul.bf16.gmra.mxu3 %v10609_v58  ;;  %8961 = vrsqrt.f32 %v695_v13  ;;  %vm850_vm1 = vweird.f32 %v695_v13 }
 0x2c0   : > { %v1398_v25 = vpop.f32.mrf.mxu3  ;;  %v615_v12 = vpop.xlane.xlu2 %614 }
 0x2c1   : > { %v1399_v14 = vadd.f32 %v1398_v25, %v10777_v63  ;;  %v664_v45 = vmul.f32 %v615_v12, %v10178_v8  ;;  %v10853_v25 = vadd.f32 1e-05, %v668_v57 }
 0x2c3   : > { %v8594_v7 = vpack.c.bf16 %v1399_v14, %v1397_v26  ;;  %v8962_v39 = vpop.eup %8961  ;;  %v696_v56 = vadd.f32 1e-05, %v664_v45 }
 0x2c4   : > { %v845_v58 = vmul.f32 %v8962_v39, %v695_v13  ;;  %vm851_vm0 = vweird.f32 %v8962_v39 }
 0x2c5   : > { %8778 = vst [vmem:[#allocation3 + $0x68] sm:$0xff] %v8594_v7   ;;  %8963 = vrsqrt.f32 %v696_v56  ;;  %vm852_vm2 = vmor %vm850_vm1, %vm851_vm0  ;;  %vm860_vm4 = vweird.f32 %v696_v56 }
 0x2c6   : > { %v846_v6 = vmul.f32 %v8962_v39, %v845_v58  ;;  %8965 = vrsqrt.f32 %v10815_v20 }
 0x2c8   : > { %v617_v17 = vpop.xlane.xlu0 %616  ;;  %v847_v15 = vmul.f32 0.5, %v846_v6 }
 0x2c9   : > { %v665_v44 = vmul.f32 %v617_v17, %v10178_v8 }
 0x2ca   : > { %v462_v43 = vpop.xlane.xlu2 %461  ;;  %v848_v18 = vsub.f32 1.5, %v847_v15 }
 0x2cb   : > { %v10820_v32 = vadd.f32 1e-05, %v665_v44  ;;  %v511_v0 = vmul.f32 %v10178_v8, %v462_v43  ;;  %v8964_v33 = vpop.eup %8963 }
 0x2cc   : > { %v849_v59 = vmul.f32 %v8962_v39, %v848_v18  ;;  %v855_v1 = vmul.f32 %v8964_v33, %v696_v56  ;;  %v10834_v19 = vpop.eup %8965  ;;  %vm861_vm3 = vweird.f32 %v8964_v33 }
 0x2cd   : > { %8967 = vrsqrt.f32 %v10820_v32  ;;  %1578 = vmatmul.bf16.gmra.mxu3 %v10674_v22  ;;  %v10826_v52 = vsub.f32 %v10724_v40, %v511_v0  ;;  %v885_v9 = vmul.f32 %v10834_v19, %v10815_v20  ;;  %vm10861_vm5 = vmor %vm860_vm4, %vm861_vm3  ;;  %vm870_vm6 = vweird.f32 %v10820_v32 }
 0x2ce   : > { %v853_v47 = vsel %vm852_vm2, %v8962_v39, %v849_v59  ;;  %v856_v50 = vmul.f32 %v8964_v33, %v855_v1  ;;  %vm891_vm10 = vweird.f32 %v10834_v19  ;;  %vm900_vm3 = vweird.f32 %v10853_v25 }
 0x2cf   : > { %v1047_v29 = vmul.f32 %v853_v47, %v10642_v54  ;;  %v575_v22 = vmul.f32 %v10826_v52, %v10826_v52  ;;  %v1118_v54 = vadd.f32 %v10845_v4, %v1082_v51  ;;  %v886_v60 = vmul.f32 %v10834_v19, %v885_v9  ;;  %vm10926_vm14 = vmor %vm890_vm13, %vm891_vm10 }
 0x2d0   : > { %v1401_v40 = vpop.f32.mrf.mxu3  ;;  %v619_v5 = vpop.xlane.xlu0 %618  ;;  %v857_v30 = vmul.f32 0.5, %v856_v50 }
 0x2d1   : > { %v666_v36 = vmul.f32 %v619_v5, %v10178_v8  ;;  %628 = vadd.xlane.f32.xlu1 %v575_v22  ;;  %v1083_v28 = vmul.f32 %v10831_v34, %v1047_v29  ;;  %v1402_v17 = vadd.f32 %v1401_v40, %v10777_v63  ;;  %v887_v5 = vmul.f32 0.5, %v886_v60 }
 0x2d2   : > { %v464_v38 = vpop.xlane.xlu2 %463  ;;  %v1346_v55 = vpop.f32.mrf.mxu0  ;;  %v858_v48 = vsub.f32 1.5, %v857_v30 }
 0x2d3   : > { %v8968_v31 = vpop.eup %8967  ;;  %v10848_v10 = vadd.f32 1e-05, %v666_v36  ;;  %v512_v13 = vmul.f32 %v10178_v8, %v464_v38  ;;  %v1435_v11 = vpop.f32.mrf.mxu1  ;;  %v1119_v14 = vadd.f32 %v10845_v4, %v1083_v28  ;;  %v1347_v0 = vadd.f32 %v1346_v55, %v10777_v63 }
 0x2d4   : > { %v865_v26 = vmul.f32 %v8968_v31, %v10820_v32  ;;  %v859_v12 = vmul.f32 %v8964_v33, %v858_v48  ;;  %vm871_vm7 = vweird.f32 %v8968_v31  ;;  %v1436_v22 = vadd.f32 %v1435_v11, %v10779_v2 }
 0x2d5   : > { %8969 = vrsqrt.f32 %v10848_v10  ;;  %v10859_v21 = vsub.f32 %v10743_v23, %v512_v13  ;;  %v1144_v7 = vpack.c.bf16 %v1119_v14, %v1118_v54  ;;  %vm872_vm8 = vmor %vm870_vm6, %vm871_vm7  ;;  %v888_v11 = vsub.f32 1.5, %v887_v5 }
 0x2d6   : > { %v866_v35 = vmul.f32 %v8968_v31, %v865_v26  ;;  %v863_v39 = vsel %vm10861_vm5, %v8964_v33, %v859_v12  ;;  %8971 = vrsqrt.f32 %v10853_v25  ;;  %vm880_vm11 = vweird.f32 %v10848_v10 }
 0x2d7   : > { %v576_v58 = vmul.f32 %v10859_v21, %v10859_v21  ;;  %1360 = vmatmul.bf16.gmra.mxu0 %v1144_v7  ;;  %1449 = vmatmul.bf16.gmra.mxu1 %v1144_v7  ;;  %v1048_v43 = vmul.f32 %v863_v39, %v10666_v3 }
 0x2d8   : > { %v867_v56 = vmul.f32 0.5, %v866_v35  ;;  %v1403_v23 = vpop.f32.mrf.mxu3  ;;  %v466_v6 = vpop.xlane.xlu0 %465  ;;  %1538 = vmatmul.bf16.gmra.mxu2 %v1144_v7 }
 0x2d9   : > { %630 = vadd.xlane.f32.xlu2 %v576_v58  ;;  %v1404_v15 = vadd.f32 %v1403_v23, %v10777_v63  ;;  %v513_v44 = vmul.f32 %v10178_v8, %v466_v6  ;;  %v1524_v24 = vpop.f32.mrf.mxu2  ;;  %v1084_v32 = vmul.f32 %v10831_v34, %v1048_v43 }
 0x2da   : > { %v868_v18 = vsub.f32 1.5, %v867_v56  ;;  %v625_v33 = vpop.xlane.xlu2 %624  ;;  %v1348_v37 = vpop.f32.mrf.mxu0  ;;  %v889_v56 = vmul.f32 %v10834_v19, %v888_v11 }
 0x2db   : > { %v10877_v59 = vpop.eup %8969  ;;  %v8599_v1 = vpack.c.bf16 %v1404_v15, %v1402_v17  ;;  %v10880_v51 = vsub.f32 %v10758_v41, %v513_v44  ;;  %v669_v47 = vmul.f32 %v625_v33, %v10178_v8  ;;  %v1349_v50 = vadd.f32 %v1348_v37, %v10777_v63  ;;  %v1437_v57 = vpop.f32.mrf.mxu1 }
 0x2dc   : > { %v869_v29 = vmul.f32 %v8968_v31, %v868_v18  ;;  %v875_v3 = vmul.f32 %v10877_v59, %v10848_v10  ;;  %v1438_v40 = vadd.f32 %v1437_v57, %v10779_v2  ;;  %v10896_v38 = vpop.eup %8971  ;;  %vm881_vm9 = vweird.f32 %v10877_v59 }
 0x2dd   : > { %8779 = vst [vmem:[#allocation3 + $0x70] sm:$0xff] %v8599_v1   ;;  %v10891_v41 = vadd.f32 1e-05, %v669_v47  ;;  %v8544_v30 = vpack.c.bf16 %v1349_v50, %v1347_v0  ;;  %1583 = vmatmul.bf16.gmra.mxu3 %v10738_v62  ;;  %v577_v36 = vmul.f32 %v10880_v51, %v10880_v51  ;;  %v1120_v35 = vadd.f32 %v10845_v4, %v1084_v32  ;;  %vm10916_vm12 = vmor %vm880_vm11, %vm881_vm9 }
 0x2de   : > { %v873_v55 = vsel %vm872_vm8, %v8968_v31, %v869_v29  ;;  %v876_v28 = vmul.f32 %v10877_v59, %v875_v3  ;;  %v8624_v54 = vpack.c.bf16 %v1438_v40, %v1436_v22  ;;  %v1525_v31 = vadd.f32 %v1524_v24, %v10785_v49 }
 0x2df   : > { %v1049_v48 = vmul.f32 %v873_v55, %v10697_v61  ;;  %8973 = vrsqrt.f32 %v10891_v41  ;;  %8768 = vst [vmem:[#allocation3 + $0x18] sm:$0xff] %v8544_v30   ;;  %632 = vadd.xlane.f32.xlu0 %v577_v36  ;;  %v895_v23 = vmul.f32 %v10896_v38, %v10853_v25  ;;  %v893_v18 = vsel %vm10926_vm14, %v10834_v19, %v889_v56 }
 0x2e0   : > { %v877_v13 = vmul.f32 0.5, %v876_v28  ;;  %8783 = vst [vmem:[#allocation4 + $0x18] sm:$0xff] %v8624_v54   ;;  %v1406_v62 = vpop.f32.mrf.mxu3  ;;  %v1051_v19 = vmul.f32 %v893_v18, %v10567_v42  ;;  %vm901_vm0 = vweird.f32 %v10896_v38  ;;  %vm910_vm1 = vweird.f32 %v10891_v41 }
 0x2e1   : > { %v1526_v9 = vpop.f32.mrf.mxu2  ;;  %v1085_v26 = vmul.f32 %v10831_v34, %v1049_v48  ;;  %v896_v0 = vmul.f32 %v10896_v38, %v895_v23  ;;  %v1407_v20 = vadd.f32 %v1406_v62, %v10777_v63  ;;  %vm902_vm4 = vmor %vm900_vm3, %vm901_vm0 }
 0x2e2   : > { %v878_v14 = vsub.f32 1.5, %v877_v13  ;;  %v1527_v12 = vadd.f32 %v1526_v9, %v10785_v49  ;;  %v1351_v45 = vpop.f32.mrf.mxu0  ;;  %v1087_v54 = vmul.f32 %v10831_v34, %v1051_v19 }
 0x2e3   : > { %v1440_v61 = vpop.f32.mrf.mxu1  ;;  %v1121_v7 = vadd.f32 %v10845_v4, %v1085_v26  ;;  %v1352_v50 = vadd.f32 %v1351_v45, %v10777_v63  ;;  %v897_v5 = vmul.f32 0.5, %v896_v0 }
 0x2e4   : > { %v879_v39 = vmul.f32 %v10877_v59, %v878_v14  ;;  %v8704_v58 = vpack.c.bf16 %v1527_v12, %v1525_v31  ;;  %v1441_v22 = vadd.f32 %v1440_v61, %v10779_v2  ;;  %v1123_v31 = vadd.f32 %v10845_v4, %v1087_v54  ;;  %v627_v54 = vpop.xlane.xlu0 %626 }
 0x2e5   : > { %v10910_v60 = vpop.eup %8973  ;;  %v1145_v6 = vpack.c.bf16 %v1121_v7, %v1120_v35  ;;  %v898_v48 = vsub.f32 1.5, %v897_v5 }
 0x2e6   : > { %v905_v15 = vmul.f32 %v10910_v60, %v10891_v41  ;;  %8798 = vst [vmem:[#allocation5 + $0x40] sm:$0xff] %v8704_v58   ;;  %v883_v44 = vsel %vm10916_vm12, %v10877_v59, %v879_v39  ;;  %vm911_vm15 = vweird.f32 %v10910_v60 }
 0x2e7   : > { %1365 = vmatmul.bf16.gmra.mxu0 %v1145_v6  ;;  %1454 = vmatmul.bf16.gmra.mxu1 %v1145_v6  ;;  %v1050_v59 = vmul.f32 %v883_v44, %v10730_v16  ;;  %v899_v12 = vmul.f32 %v10896_v38, %v898_v48  ;;  %vm912_vm2 = vmor %vm910_vm1, %vm911_vm15  ;;  %v670_v48 = vmul.f32 %v627_v54, %v10178_v8 }
 0x2e8   : > { %v906_v10 = vmul.f32 %v10910_v60, %v905_v15  ;;  %v1408_v43 = vpop.f32.mrf.mxu3  ;;  %1543 = vmatmul.bf16.gmra.mxu2 %v1145_v6 }
 0x2e9   : > { %v1409_v33 = vadd.f32 %v1408_v43, %v10777_v63  ;;  %v1529_v37 = vpop.f32.mrf.mxu2  ;;  %v1086_v16 = vmul.f32 %v10831_v34, %v1050_v59  ;;  %v903_v7 = vsel %vm902_vm4, %v10896_v38, %v899_v12 }
 0x2ea   : > { %v1353_v1 = vpop.f32.mrf.mxu0  ;;  %v907_v47 = vmul.f32 0.5, %v906_v10  ;;  %v1530_v42 = vadd.f32 %v1529_v37, %v10785_v49  ;;  %v1052_v15 = vmul.f32 %v903_v7, %v10581_v53 }
 0x2eb   : > { %v8604_v57 = vpack.c.bf16 %v1409_v33, %v1407_v20  ;;  %v1354_v29 = vadd.f32 %v1353_v1, %v10777_v63  ;;  %v1442_v3 = vpop.f32.mrf.mxu1  ;;  %v1122_v11 = vadd.f32 %v10845_v4, %v1086_v16 }
 0x2ec   : > { %v1443_v40 = vadd.f32 %v1442_v3, %v10779_v2  ;;  %v908_v55 = vsub.f32 1.5, %v907_v47  ;;  %v1088_v18 = vmul.f32 %v10831_v34, %v1052_v15 }
 0x2ed   : > { %8780 = vst [vmem:[#allocation3 + $0x78] sm:$0xff] %v8604_v57   ;;  %v8549_v30 = vpack.c.bf16 %v1354_v29, %v1352_v50  ;;  %v1146_v45 = vpack.c.bf16 %v1123_v31, %v1122_v11 }
 0x2ee   : > { %v8629_v36 = vpack.c.bf16 %v1443_v40, %v1441_v22  ;;  %v909_v9 = vmul.f32 %v10910_v60, %v908_v55  ;;  %v1124_v59 = vadd.f32 %v10845_v4, %v1088_v18 }
 0x2ef   : > { %8769 = vst [vmem:[#allocation3 + $0x20] sm:$0xff] %v8549_v30  }
 0x2f0   : > { %8784 = vst [vmem:[#allocation4 + $0x50] sm:$0xff] %v8629_v36   ;;  %v1480_v28 = vpop.f32.mrf.mxu3  ;;  %v913_v61 = vsel %vm912_vm2, %v10910_v60, %v909_v9 }
 0x2f1   : > { %v1531_v32 = vpop.f32.mrf.mxu2  ;;  %v1481_v39 = vadd.f32 %v1480_v28, %v10779_v2  ;;  %v1053_v41 = vmul.f32 %v913_v61, %v10748_v46 }
 0x2f2   : > { %v1532_v13 = vadd.f32 %v1531_v32, %v10785_v49  ;;  %v1356_v62 = vpop.f32.mrf.mxu0 }
 0x2f3   : > { %v1445_v26 = vpop.f32.mrf.mxu1  ;;  %v1357_v6 = vadd.f32 %v1356_v62, %v10777_v63  ;;  %v1089_v43 = vmul.f32 %v10831_v34, %v1053_v41 }
 0x2f4   : > { %v8709_v14 = vpack.c.bf16 %v1532_v13, %v1530_v42  ;;  %v1446_v44 = vadd.f32 %v1445_v26, %v10779_v2  ;;  %v702_v42 = vadd.f32 1e-05, %v670_v48 }
 0x2f5   : > { %v1125_v53 = vadd.f32 %v10845_v4, %v1089_v43 }
 0x2f6   : > { %8799 = vst [vmem:[#allocation5 + $0x48] sm:$0xff] %v8709_v14   ;;  %8975 = vrsqrt.f32 %v702_v42  ;;  %vm920_vm6 = vweird.f32 %v702_v42 }
 0x2f7   : > { %1370 = vmatmul.bf16.gmra.mxu0 %v1146_v45  ;;  %1459 = vmatmul.bf16.gmra.mxu1 %v1146_v45  ;;  %v1147_v1 = vpack.c.bf16 %v1125_v53, %v1124_v59 }
 0x2f8   : > { %v1482_v35 = vpop.f32.mrf.mxu3  ;;  %1548 = vmatmul.bf16.gmra.mxu2 %v1146_v45 }
 0x2f9   : > { %v1483_v58 = vadd.f32 %v1482_v35, %v10779_v2  ;;  %v1534_v56 = vpop.f32.mrf.mxu2 }
 0x2fa   : > { %v1358_v23 = vpop.f32.mrf.mxu0  ;;  %v1535_v20 = vadd.f32 %v1534_v56, %v10785_v49 }
 0x2fb   : > { %v8669_v25 = vpack.c.bf16 %v1483_v58, %v1481_v39  ;;  %v1359_v60 = vadd.f32 %v1358_v23, %v10777_v63  ;;  %v1447_v17 = vpop.f32.mrf.mxu1 }
 0x2fc   : > { %v1448_v38 = vadd.f32 %v1447_v17, %v10779_v2  ;;  %v8976_v26 = vpop.eup %8975 }
 0x2fd   : > { %8792 = vst [vmem:[#allocation4 + $0x60] sm:$0xff] %v8669_v25   ;;  %v8554_v24 = vpack.c.bf16 %v1359_v60, %v1357_v6  ;;  %v915_v31 = vmul.f32 %v8976_v26, %v702_v42  ;;  %vm921_vm5 = vweird.f32 %v8976_v26 }
 0x2fe   : > { %v8634_v10 = vpack.c.bf16 %v1448_v38, %v1446_v44  ;;  %vm922_vm7 = vmor %vm920_vm6, %vm921_vm5 }
 0x2ff   : > { %8770 = vst [vmem:[#allocation3 + $0x28] sm:$0xff] %v8554_v24   ;;  %v916_v12 = vmul.f32 %v8976_v26, %v915_v31 }
 0x300   : > { %8785 = vst [vmem:[#allocation4 + $0x68] sm:$0xff] %v8634_v10   ;;  %v1485_v46 = vpop.f32.mrf.mxu3 }
 0x301   : > { %v1536_v0 = vpop.f32.mrf.mxu2  ;;  %v1486_v50 = vadd.f32 %v1485_v46, %v10779_v2  ;;  %v917_v39 = vmul.f32 0.5, %v916_v12 }
 0x302   : > { %v1537_v33 = vadd.f32 %v1536_v0, %v10785_v49 }
 0x303   : > { %v918_v6 = vsub.f32 1.5, %v917_v39 }
 0x304   : > { %v8714_v37 = vpack.c.bf16 %v1537_v33, %v1535_v20 }
 0x305   : > { %v919_v44 = vmul.f32 %v8976_v26, %v918_v6 }
 0x306   : > { %8800 = vst [vmem:[#allocation5 + $0x30] sm:$0xff] %v8714_v37  }
 0x307   : > { %1375 = vmatmul.bf16.gmra.mxu0 %v1147_v1  ;;  %1464 = vmatmul.bf16.gmra.mxu1 %v1147_v1  ;;  %v923_v46 = vsel %vm922_vm7, %v8976_v26, %v919_v44 }
 0x308   : > { %v1487_v47 = vpop.f32.mrf.mxu3  ;;  %1553 = vmatmul.bf16.gmra.mxu2 %v1147_v1  ;;  %v1054_v59 = vmul.f32 %v923_v46, %v10765_v27 }
 0x309   : > { %v1488_v57 = vadd.f32 %v1487_v47, %v10779_v2 }
 0x30b   : > { %v8674_v29 = vpack.c.bf16 %v1488_v57, %v1486_v50 }
 0x30d   : > { %8793 = vst [vmem:[#allocation4 + $0x70] sm:$0xff] %v8674_v29  }
 0x310   : > { %v1490_v3 = vpop.f32.mrf.mxu3 }
 0x311   : > { %v1491_v22 = vadd.f32 %v1490_v3, %v10779_v2 }
 0x318   : > { %v1492_v19 = vpop.f32.mrf.mxu3 }
 0x319   : > { %v1493_v40 = vadd.f32 %v1492_v19, %v10779_v2 }
 0x31b   : > { %v8679_v5 = vpack.c.bf16 %v1493_v40, %v1491_v22 }
 0x31d   : > { %8794 = vst [vmem:[#allocation4 + $0x78] sm:$0xff] %v8679_v5  }
 0x320   : > { %v1495_v30 = vpop.f32.mrf.mxu3 }
 0x321   : > { %v1496_v16 = vadd.f32 %v1495_v30, %v10779_v2 }
 0x328   : > { %v1497_v36 = vpop.f32.mrf.mxu3 }
 0x329   : > { %v1498_v55 = vadd.f32 %v1497_v36, %v10779_v2 }
 0x32b   : > { %v8684_v28 = vpack.c.bf16 %v1498_v55, %v1496_v16  ;;  %v1090_v16 = vmul.f32 %v10831_v34, %v1054_v59 }
 0x32d   : > { %8795 = vst [vmem:[#allocation4 + $0x28] sm:$0xff] %v8684_v28  }
 0x330   : > { %v1569_v32 = vpop.f32.mrf.mxu3 }
 0x331   : > { %v1570_v62 = vadd.f32 %v1569_v32, %v10785_v49 }
 0x338   : > { %v1571_v13 = vpop.f32.mrf.mxu3 }
 0x339   : > { %v1572_v11 = vadd.f32 %v1571_v13, %v10785_v49 }
 0x33b   : > { %v8749_v9 = vpack.c.bf16 %v1572_v11, %v1570_v62 }
 0x33d   : > { %8807 = vst [vmem:[#allocation5] sm:$0xff] %v8749_v9  }
 0x340   : > { %v1574_v14 = vpop.f32.mrf.mxu3 }
 0x341   : > { %v1575_v58 = vadd.f32 %v1574_v14, %v10785_v49  ;;  %v1126_v14 = vadd.f32 %v10845_v4, %v1090_v16 }
 0x344   : > { %v629_v45 = vpop.xlane.xlu1 %628 }
 0x345   : > { %v671_v61 = vmul.f32 %v629_v45, %v10178_v8 }
 0x347   : > { %v703_v35 = vadd.f32 1e-05, %v671_v61 }
 0x348   : > { %v1576_v7 = vpop.f32.mrf.mxu3 }
 0x349   : > { %v1577_v56 = vadd.f32 %v1576_v7, %v10785_v49  ;;  %8977 = vrsqrt.f32 %v703_v35  ;;  %vm930_vm9 = vweird.f32 %v703_v35 }
 0x34b   : > { %v8754_v41 = vpack.c.bf16 %v1577_v56, %v1575_v58 }
 0x34c   : > { %v631_v23 = vpop.xlane.xlu2 %630 }
 0x34d   : > { %8808 = vst [vmem:[#allocation5 + $0x8] sm:$0xff] %v8754_v41   ;;  %v672_v25 = vmul.f32 %v631_v23, %v10178_v8 }
 0x34f   : > { %v704_v60 = vadd.f32 1e-05, %v672_v25  ;;  %v8978_v17 = vpop.eup %8977 }
 0x350   : > { %v1579_v15 = vpop.f32.mrf.mxu3  ;;  %v925_v38 = vmul.f32 %v8978_v17, %v703_v35  ;;  %vm931_vm8 = vweird.f32 %v8978_v17 }
 0x351   : > { %8979 = vrsqrt.f32 %v704_v60  ;;  %v1580_v57 = vadd.f32 %v1579_v15, %v10785_v49  ;;  %vm932_vm10 = vmor %vm930_vm9, %vm931_vm8  ;;  %vm940_vm12 = vweird.f32 %v704_v60 }
 0x352   : > { %v633_v24 = vpop.xlane.xlu0 %632  ;;  %v926_v10 = vmul.f32 %v8978_v17, %v925_v38 }
 0x353   : > { %v673_v43 = vmul.f32 %v633_v24, %v10178_v8 }
 0x354   : > { %v927_v18 = vmul.f32 0.5, %v926_v10  ;;  %v1361_v20 = vpop.f32.mrf.mxu0  ;;  %v1450_v33 = vpop.f32.mrf.mxu1 }
 0x355   : > { %v705_v0 = vadd.f32 1e-05, %v673_v43  ;;  %v1362_v54 = vadd.f32 %v1361_v20, %v10777_v63  ;;  %v1451_v32 = vadd.f32 %v1450_v33, %v10779_v2 }
 0x356   : > { %v928_v37 = vsub.f32 1.5, %v927_v18 }
 0x357   : > { %v8980_v53 = vpop.eup %8979  ;;  %8981 = vrsqrt.f32 %v705_v0  ;;  %vm950_vm15 = vweird.f32 %v705_v0 }
 0x358   : > { %v935_v1 = vmul.f32 %v8980_v53, %v704_v60  ;;  %v1581_v47 = vpop.f32.mrf.mxu3  ;;  %v929_v50 = vmul.f32 %v8978_v17, %v928_v37  ;;  %vm941_vm11 = vweird.f32 %v8980_v53 }
 0x359   : > { %v1582_v8 = vadd.f32 %v1581_v47, %v10785_v49  ;;  %vm10997_vm13 = vmor %vm940_vm12, %vm941_vm11 }
 0x35a   : > { %v936_v29 = vmul.f32 %v8980_v53, %v935_v1  ;;  %v933_v3 = vsel %vm932_vm10, %v8978_v17, %v929_v50 }
 0x35b   : > { %v8759_v19 = vpack.c.bf16 %v1582_v8, %v1580_v57  ;;  %v1055_v22 = vmul.f32 %v933_v3, %v10826_v52  ;;  %v1539_v5 = vpop.f32.mrf.mxu2 }
 0x35c   : > { %v937_v40 = vmul.f32 0.5, %v936_v29  ;;  %v1363_v36 = vpop.f32.mrf.mxu0  ;;  %v1452_v27 = vpop.f32.mrf.mxu1  ;;  %v1540_v58 = vadd.f32 %v1539_v5, %v10785_v49 }
 0x35d   : > { %v8982_v30 = vpop.eup %8981  ;;  %8809 = vst [vmem:[#allocation5 + $0x60] sm:$0xff] %v8759_v19   ;;  %v1364_v48 = vadd.f32 %v1363_v36, %v10777_v63  ;;  %v1453_v42 = vadd.f32 %v1452_v27, %v10779_v2  ;;  %v1091_v52 = vmul.f32 %v10831_v34, %v1055_v22 }
 0x35e   : > { %v938_v55 = vsub.f32 1.5, %v937_v40  ;;  %v945_v28 = vmul.f32 %v8982_v30, %v705_v0  ;;  %vm951_vm14 = vweird.f32 %v8982_v30 }
 0x35f   : > { %v8559_v11 = vpack.c.bf16 %v1364_v48, %v1362_v54  ;;  %v8639_v26 = vpack.c.bf16 %v1453_v42, %v1451_v32  ;;  %v1127_v31 = vadd.f32 %v10845_v4, %v1091_v52  ;;  %vm952_vm0 = vmor %vm950_vm15, %vm951_vm14 }
 0x360   : > { %v939_v13 = vmul.f32 %v8980_v53, %v938_v55  ;;  %v946_v62 = vmul.f32 %v8982_v30, %v945_v28  ;;  %v1584_v9 = vpop.f32.mrf.mxu3 }
 0x361   : > { %8771 = vst [vmem:[#allocation3 + $0x30] sm:$0xff] %v8559_v11   ;;  %v1148_v61 = vpack.c.bf16 %v1127_v31, %v1126_v14  ;;  %v1585_v38 = vadd.f32 %v1584_v9, %v10785_v49 }
 0x362   : > { %v947_v12 = vmul.f32 0.5, %v946_v62  ;;  %8786 = vst [vmem:[#allocation4 + $0x8] sm:$0xff] %v8639_v26   ;;  %v943_v35 = vsel %vm10997_vm13, %v8980_v53, %v939_v13 }
 0x363   : > { %v1541_v39 = vpop.f32.mrf.mxu2  ;;  %1380 = vmatmul.bf16.gmra.mxu0 %v1148_v61  ;;  %1469 = vmatmul.bf16.gmra.mxu1 %v1148_v61  ;;  %v1056_v25 = vmul.f32 %v943_v35, %v10859_v21 }
 0x364   : > { %v948_v7 = vsub.f32 1.5, %v947_v12  ;;  %v1542_v56 = vadd.f32 %v1541_v39, %v10785_v49  ;;  %v1366_v41 = vpop.f32.mrf.mxu0  ;;  %v1455_v23 = vpop.f32.mrf.mxu1  ;;  %1558 = vmatmul.bf16.gmra.mxu2 %v1148_v61 }
 0x365   : > { %v1092_v43 = vmul.f32 %v10831_v34, %v1056_v25  ;;  %v1367_v33 = vadd.f32 %v1366_v41, %v10777_v63 }
 0x366   : > { %v949_v6 = vmul.f32 %v8982_v30, %v948_v7  ;;  %v8719_v60 = vpack.c.bf16 %v1542_v56, %v1540_v58 }
 0x367   : > { %v1128_v59 = vadd.f32 %v10845_v4, %v1092_v43 }
 0x368   : > { %v953_v17 = vsel %vm952_vm0, %v8982_v30, %v949_v6  ;;  %v1586_v15 = vpop.f32.mrf.mxu3  ;;  %8801 = vst [vmem:[#allocation5 + $0x70] sm:$0xff] %v8719_v60  }
 0x369   : > { %v1057_v44 = vmul.f32 %v953_v17, %v10880_v51  ;;  %v1587_v24 = vadd.f32 %v1586_v15, %v10785_v49  ;;  %v1456_v51 = vadd.f32 %v1455_v23, %v10779_v2 }
 0x36b   : > { %v8764_v10 = vpack.c.bf16 %v1587_v24, %v1585_v38  ;;  %v1093_v46 = vmul.f32 %v10831_v34, %v1057_v44  ;;  %v1544_v18 = vpop.f32.mrf.mxu2 }
 0x36c   : > { %v1368_v0 = vpop.f32.mrf.mxu0  ;;  %v1457_v21 = vpop.f32.mrf.mxu1  ;;  %v1545_v57 = vadd.f32 %v1544_v18, %v10785_v49 }
 0x36d   : > { %8810 = vst [vmem:[#allocation5 + $0x50] sm:$0xff] %v8764_v10   ;;  %v1129_v20 = vadd.f32 %v10845_v4, %v1093_v46  ;;  %v1369_v53 = vadd.f32 %v1368_v0, %v10777_v63  ;;  %v1458_v37 = vadd.f32 %v1457_v21, %v10779_v2 }
 0x36f   : > { %v8564_v1 = vpack.c.bf16 %v1369_v53, %v1367_v33  ;;  %v8644_v47 = vpack.c.bf16 %v1458_v37, %v1456_v51  ;;  %v1149_v50 = vpack.c.bf16 %v1129_v20, %v1128_v59 }
 0x371   : > { %8772 = vst [vmem:[#allocation3 + $0x38] sm:$0xff] %v8564_v1  }
 0x372   : > { %8787 = vst [vmem:[#allocation4 + $0x48] sm:$0xff] %v8644_v47  }
 0x373   : > { %v1546_v34 = vpop.f32.mrf.mxu2  ;;  %1385 = vmatmul.bf16.gmra.mxu0 %v1149_v50  ;;  %1474 = vmatmul.bf16.gmra.mxu1 %v1149_v50 }
 0x374   : > { %v1547_v8 = vadd.f32 %v1546_v34, %v10785_v49  ;;  %v1371_v29 = vpop.f32.mrf.mxu0  ;;  %v1460_v3 = vpop.f32.mrf.mxu1  ;;  %1563 = vmatmul.bf16.gmra.mxu2 %v1149_v50 }
 0x375   : > { %v1372_v5 = vadd.f32 %v1371_v29, %v10777_v63  ;;  %v1461_v30 = vadd.f32 %v1460_v3, %v10779_v2 }
 0x376   : > { %v8724_v19 = vpack.c.bf16 %v1547_v8, %v1545_v57 }
 0x378   : > { %8802 = vst [vmem:[#allocation5 + $0x38] sm:$0xff] %v8724_v19  }
 0x37b   : > { %v1549_v22 = vpop.f32.mrf.mxu2 }
 0x37c   : > { %v1373_v40 = vpop.f32.mrf.mxu0  ;;  %v1462_v4 = vpop.f32.mrf.mxu1  ;;  %v1550_v54 = vadd.f32 %v1549_v22, %v10785_v49 }
 0x37d   : > { %v1374_v36 = vadd.f32 %v1373_v40, %v10777_v63  ;;  %v1463_v27 = vadd.f32 %v1462_v4, %v10779_v2 }
 0x37f   : > { %v8569_v16 = vpack.c.bf16 %v1374_v36, %v1372_v5  ;;  %v8649_v55 = vpack.c.bf16 %v1463_v27, %v1461_v30 }
 0x381   : > { %8773 = vst [vmem:[#allocation3 + $0x40] sm:$0xff] %v8569_v16  }
 0x382   : > { %8788 = vst [vmem:[#allocation4 + $0x40] sm:$0xff] %v8649_v55  }
 0x383   : > { %v1551_v28 = vpop.f32.mrf.mxu2 }
 0x384   : > { %v1552_v48 = vadd.f32 %v1551_v28, %v10785_v49  ;;  %v1376_v32 = vpop.f32.mrf.mxu0  ;;  %v1465_v42 = vpop.f32.mrf.mxu1 }
 0x385   : > { %v1377_v9 = vadd.f32 %v1376_v32, %v10777_v63  ;;  %v1466_v26 = vadd.f32 %v1465_v42, %v10779_v2 }
 0x386   : > { %v8729_v52 = vpack.c.bf16 %v1552_v48, %v1550_v54 }
 0x388   : > { %8803 = vst [vmem:[#allocation5 + $0x20] sm:$0xff] %v8729_v52  }
 0x38b   : > { %v1554_v13 = vpop.f32.mrf.mxu2 }
 0x38c   : > { %v1378_v62 = vpop.f32.mrf.mxu0  ;;  %v1467_v11 = vpop.f32.mrf.mxu1  ;;  %v1555_v35 = vadd.f32 %v1554_v13, %v10785_v49 }
 0x38d   : > { %v1379_v14 = vadd.f32 %v1378_v62, %v10777_v63  ;;  %v1468_v31 = vadd.f32 %v1467_v11, %v10779_v2 }
 0x38f   : > { %v8574_v12 = vpack.c.bf16 %v1379_v14, %v1377_v9  ;;  %v8654_v45 = vpack.c.bf16 %v1468_v31, %v1466_v26 }
 0x391   : > { %8774 = vst [vmem:[#allocation3 + $0x48] sm:$0xff] %v8574_v12  }
 0x392   : > { %8789 = vst [vmem:[#allocation4 + $0x20] sm:$0xff] %v8654_v45  }
 0x393   : > { %v1556_v61 = vpop.f32.mrf.mxu2 }
 0x394   : > { %v1557_v7 = vadd.f32 %v1556_v61, %v10785_v49 }
 0x396   : > { %v8734_v39 = vpack.c.bf16 %v1557_v7, %v1555_v35 }
 0x398   : > { %8804 = vst [vmem:[#allocation5 + $0x78] sm:$0xff] %v8734_v39  }
 0x3e0   : > { %v1381_v58 = vpop.f32.mrf.mxu0  ;;  %v1470_v56 = vpop.f32.mrf.mxu1 }
 0x3e1   : > { %v1382_v25 = vadd.f32 %v1381_v58, %v10777_v63  ;;  %v1471_v60 = vadd.f32 %v1470_v56, %v10779_v2 }
 0x3e7   : > { %v1559_v41 = vpop.f32.mrf.mxu2 }
 0x3e8   : > { %v1383_v23 = vpop.f32.mrf.mxu0  ;;  %v1472_v6 = vpop.f32.mrf.mxu1  ;;  %v1560_v10 = vadd.f32 %v1559_v41, %v10785_v49 }
 0x3e9   : > { %v1384_v17 = vadd.f32 %v1383_v23, %v10777_v63  ;;  %v1473_v15 = vadd.f32 %v1472_v6, %v10779_v2 }
 0x3eb   : > { %v8579_v44 = vpack.c.bf16 %v1384_v17, %v1382_v25  ;;  %v8659_v38 = vpack.c.bf16 %v1473_v15, %v1471_v60 }
 0x3ed   : > { %8775 = vst [vmem:[#allocation3 + $0x50] sm:$0xff] %v8579_v44  }
 0x3ee   : > { %8790 = vst [vmem:[#allocation4 + $0x10] sm:$0xff] %v8659_v38  }
 0x3ef   : > { %v1561_v24 = vpop.f32.mrf.mxu2 }
 0x3f0   : > { %v1562_v43 = vadd.f32 %v1561_v24, %v10785_v49  ;;  %v1386_v46 = vpop.f32.mrf.mxu0  ;;  %v1475_v18 = vpop.f32.mrf.mxu1 }
 0x3f1   : > { %v1387_v51 = vadd.f32 %v1386_v46, %v10777_v63  ;;  %v1476_v53 = vadd.f32 %v1475_v18, %v10779_v2 }
 0x3f2   : > { %v8739_v0 = vpack.c.bf16 %v1562_v43, %v1560_v10 }
 0x3f4   : > { %8805 = vst [vmem:[#allocation5 + $0x18] sm:$0xff] %v8739_v0  }
 0x3f7   : > { %v1564_v21 = vpop.f32.mrf.mxu2 }
 0x3f8   : > { %v1388_v20 = vpop.f32.mrf.mxu0  ;;  %v1477_v33 = vpop.f32.mrf.mxu1  ;;  %v1565_v34 = vadd.f32 %v1564_v21, %v10785_v49 }
 0x3f9   : > { %v1389_v37 = vadd.f32 %v1388_v20, %v10777_v63  ;;  %v1478_v59 = vadd.f32 %v1477_v33, %v10779_v2 }
 0x3fb   : > { %v8584_v1 = vpack.c.bf16 %v1389_v37, %v1387_v51  ;;  %v8664_v47 = vpack.c.bf16 %v1478_v59, %v1476_v53 }
 0x3fd   : > { %8776 = vst [vmem:[#allocation3 + $0x58] sm:$0xff] %v8584_v1  }
 0x3fe   : > { %8791 = vst [vmem:[#allocation4 + $0x38] sm:$0xff] %v8664_v47  }
 0x3ff   : > { %v1566_v50 = vpop.f32.mrf.mxu2 }
 0x400   : > { %v1567_v57 = vadd.f32 %v1566_v50, %v10785_v49 }
 0x402   : > { %v8744_v8 = vpack.c.bf16 %v1567_v57, %v1565_v34 }
 0x404   : > { %8806 = vst [vmem:[#allocation5 + $0x58] sm:$0xff] %v8744_v8  }
 0x405 PF: > { %v11043_v29 = vld [vmem:[#allocation4 + $0x48] sm:$0xff]  ;;  %vm1986_vm1 = vcmask 130048   ;;  %s8086_s22 = sshll.u32 %s9903_s26, 7  ;;  %v11056_v19 = vld [vmem:[#allocation4 + $0x78] sm:$0xff]  ;;  %s9922_s13 = smov 112   ;;  %v11090_v28 = vld [vmem:[#allocation4 + $0x70] sm:$0xff] }
 0x406   : > { %v11045_v63 = vld [vmem:[#allocation4 + $0x28] sm:$0xff]  ;;  %s1782_s23 = sshra.s32 %s8086_s22, 3  ;;  %v2033_v2 = vsel %vm1986_vm1, %v11043_v29, 0  ;;  %v2054_v30 = vsel %vm1986_vm1, %v11056_v19, 0  ;;  %v2051_v48 = vsel %vm1986_vm1, %v11090_v28, 0  ;;  %v11102_v32 = vld [vmem:[#allocation4] sm:$0xff] }
 0x407   : > { %v2057_v3 = vsel %vm1986_vm1, %v11045_v63, 0  ;;  %s8087_s24 = sshll.u32 %s1782_s23, 2  ;;  %2059 = vmatpush.bf16.xpose.msra.mxu0 %v2033_v2  ;;  %v11054_v49 = vld [vmem:[#allocation4 + $0x8] sm:$0xff]  ;;  %v11110_v13 = vld [vmem:[#allocation4 + $0x50] sm:$0xff]  ;;  %v11112_v62 = vld [vmem:[#allocation4 + $0x60] sm:$0xff]  ;;  %v2015_v41 = vsel %vm1986_vm1, %v11102_v32, 0 }
 0x408   : > { %2108 = vmatpush.bf16.xpose.msra.mxu1 %v2057_v3  ;;  %s11058_s11 = scalar_lea.vmem [#allocation3], %s8087_s24  ;;  %v2030_v5 = vsel %vm1986_vm1, %v11054_v49, 0  ;;  %v11088_v55 = vld [vmem:[#allocation4 + $0x68] sm:$0xff]  ;;  %v2024_v11 = vsel %vm1986_vm1, %v11110_v13, 0  ;;  %v2048_v9 = vsel %vm1986_vm1, %v11112_v62, 0  ;;  %v11124_v26 = vld [vmem:[#allocation4 + $0x58] sm:$0xff] }
 0x409   : > { %v11061_v22 = vld [vmem:[%s11058_s11 + $0x10] sm:$0xff]  ;;  %v11064_v40 = vld [vmem:[%s11058_s11 + $0x8] sm:$0xff]  ;;  %v11067_v4 = vld [vmem:[%s11058_s11] sm:$0xff]  ;;  %v2027_v54 = vsel %vm1986_vm1, %v11088_v55, 0  ;;  %15617 = vst [vmem:[#allocation9_spill] sm:$0xff] %v11124_v26  ;;  %v2018_v7 = vsel %vm1986_vm1, %v11124_v26, 0 }
 0x40a   : > { %2628 = vrot.lane.b32.xlu1 %v11061_v22, %s9922_s13  ;;  %2626 = vrot.lane.b32.xlu0 %v11064_v40, %s9922_s13  ;;  %v11080_v36 = vld [vmem:[%s11058_s11 + $0x30] sm:$0xff]  ;;  %v11083_v27 = vld [vmem:[%s11058_s11 + $0x20] sm:$0xff]  ;;  %v11128_v31 = vld [vmem:[#allocation4 + $0x18] sm:$0xff]  ;;  %s9923_s14 = smov 96   ;;  %s9924_s15 = smov 80   ;;  %vm2607_vm2 = vcmask 125952  }
 0x40b   : > { %2624 = vrot.lane.b32.xlu2 %v11067_v4, %s9922_s13  ;;  %v11086_v16 = vld [vmem:[%s11058_s11 + $0x18] sm:$0xff]  ;;  %v11108_v52 = vld [vmem:[%s11058_s11 + $0x28] sm:$0xff]  ;;  %v11126_v14 = vld [vmem:[#allocation4 + $0x30] sm:$0xff]  ;;  %15619 = vst [vmem:[#allocation11_spill] sm:$0xff] %v11128_v31  ;;  %v2021_v45 = vsel %vm1986_vm1, %v11128_v31, 0  ;;  %s9925_s17 = smov 64  }
 0x40c   : > { %v11105_v42 = vld [vmem:[%s11058_s11 + $0x38] sm:$0xff]  ;;  %15618 = vst [vmem:[#allocation10_spill] sm:$0xff] %v11126_v14  ;;  %v11142_v35 = vld [vmem:[#allocation4 + $0x10] sm:$0xff]  ;;  %v11154_v58 = vld [vmem:[#allocation4 + $0x40] sm:$0xff]  ;;  %v2012_v25 = vsel %vm1986_vm1, %v11126_v14, 0  ;;  %s9926_s18 = smov 48  }
 0x40d   : > { %15616 = vst [vmem:[#allocation8_spill] sm:$0xff] %v11105_v42  ;;  %v11130_v12 = vld [vmem:[#allocation4 + $0x38] sm:$0xff]  ;;  %v2042_v39 = vsel %vm1986_vm1, %v11142_v35, 0  ;;  %v11156_v56 = vld [vmem:[#allocation4 + $0x20] sm:$0xff]  ;;  %v2036_v60 = vsel %vm1986_vm1, %v11154_v58, 0  ;;  %v11182_v17 = vld [vmem:[#allocation5 + $0x68] sm:$0xff] }
 0x40e   : > { %v2045_v61 = vsel %vm1986_vm1, %v11130_v12, 0  ;;  %v2039_v23 = vsel %vm1986_vm1, %v11156_v56, 0  ;;  %v11168_v6 = vld [vmem:[#allocation5 + $0x38] sm:$0xff]  ;;  %v11184_v15 = vld [vmem:[#allocation5 + $0x70] sm:$0xff]  ;;  %v11204_v24 = vld [vmem:[#allocation5 + $0x48] sm:$0xff]  ;;  %s9927_s19 = smov 32  }
 0x40f   : > { %2060 = vmatpush.bf16.xpose.msra.mxu0 %v2030_v5  ;;  %2461 = vmatpush.bf16.msra.mxu2 %v11168_v6  ;;  %v11194_v44 = vld [vmem:[#allocation5 + $0x30] sm:$0xff]  ;;  %v11214_v10 = vld [vmem:[#allocation5 + $0x40] sm:$0xff]  ;;  %v11218_v46 = vld [vmem:[#allocation5 + $0x28] sm:$0xff]  ;;  %s9928_s20 = smov 16   ;;  %vm3308_vm3 = vcmask 257152   ;;  %vm4009_vm4 = vcmask 388352  }
 0x410   : > { %2109 = vmatpush.bf16.xpose.msra.mxu1 %v2054_v30  ;;  %8835 = vmatpush.bf16.msra.mxu3 %v11168_v6  ;;  %v11200_v38 = vld [vmem:[#allocation5 + $0x10] sm:$0xff]  ;;  %v11216_v43 = vld [vmem:[#allocation5 + $0x20] sm:$0xff]  ;;  %v11234_v18 = vld [vmem:[#allocation5 + $0x58] sm:$0xff]  ;;  %vm4710_vm5 = vcmask 519552   ;;  %vm5411_vm6 = vcmask 650752   ;;  %vm6112_vm7 = vcmask 781952  }
 0x411   : > { %v11244_v0 = vld [vmem:[#allocation5 + $0x50] sm:$0xff]  ;;  %v11249_v21 = vld [vmem:[#allocation5 + $0x18] sm:$0xff]  ;;  %v11251_v20 = vld [vmem:[#allocation5 + $0x60] sm:$0xff]  ;;  %vm6813_vm8 = vcmask 913152   ;;  %vm7514_vm9 = vcmask 1044352  }
 0x412   : > { %2636 = vrot.lane.b32.xlu1 %v11080_v36, %s9922_s13  ;;  %2632 = vrot.lane.b32.xlu0 %v11083_v27, %s9922_s13  ;;  %v11260_v33 = vld [vmem:[#allocation5 + $0x8] sm:$0xff]  ;;  %v11269_v53 = vld [vmem:[#allocation5 + $0x78] sm:$0xff]  ;;  %v11271_v37 = vld [vmem:[#allocation5] sm:$0xff] }
 0x413   : > { %2630 = vrot.lane.b32.xlu2 %v11086_v16, %s9922_s13  ;;  %2462 = vmatpush.bf16.msra.mxu2 %v11184_v15 }
 0x414   : > { %8836 = vmatpush.bf16.msra.mxu3 %v11184_v15 }
 0x417   : > { %2061 = vmatpush.bf16.xpose.msra.mxu0 %v2027_v54  ;;  %2463 = vmatpush.bf16.msra.mxu2 %v11194_v44 }
 0x418   : > { %2110 = vmatpush.bf16.xpose.msra.mxu1 %v2051_v48  ;;  %8837 = vmatpush.bf16.msra.mxu3 %v11194_v44 }
 0x41a   : > { %2642 = vrot.lane.b32.xlu1 %v11102_v32, %s9922_s13  ;;  %2638 = vrot.lane.b32.xlu0 %v11105_v42, %s9922_s13 }
 0x41b   : > { %2634 = vrot.lane.b32.xlu2 %v11108_v52, %s9922_s13  ;;  %2464 = vmatpush.bf16.msra.mxu2 %v11204_v24 }
 0x41c   : > { %8838 = vmatpush.bf16.msra.mxu3 %v11204_v24 }
 0x41f   : > { %2062 = vmatpush.bf16.xpose.msra.mxu0 %v2024_v11  ;;  %2465 = vmatpush.bf16.msra.mxu2 %v11214_v10 }
 0x420   : > { %2111 = vmatpush.bf16.xpose.msra.mxu1 %v2048_v9  ;;  %8839 = vmatpush.bf16.msra.mxu3 %v11214_v10 }
 0x422   : > { %2648 = vrot.lane.b32.xlu1 %v11110_v13, %s9922_s13  ;;  %2644 = vrot.lane.b32.xlu0 %v11124_v26, %s9922_s13 }
 0x423   : > { %2640 = vrot.lane.b32.xlu2 %v11126_v14, %s9922_s13  ;;  %2466 = vmatpush.bf16.msra.mxu2 %v11200_v38 }
 0x424   : > { %8840 = vmatpush.bf16.msra.mxu3 %v11200_v38 }
 0x427   : > { %2063 = vmatpush.bf16.xpose.msra.mxu0 %v2021_v45  ;;  %2467 = vmatpush.bf16.msra.mxu2 %v11182_v17 }
 0x428   : > { %2112 = vmatpush.bf16.xpose.msra.mxu1 %v2045_v61  ;;  %8841 = vmatpush.bf16.msra.mxu3 %v11182_v17 }
 0x42a   : > { %2654 = vrot.lane.b32.xlu1 %v11043_v29, %s9922_s13  ;;  %2650 = vrot.lane.b32.xlu0 %v11088_v55, %s9922_s13 }
 0x42b   : > { %2646 = vrot.lane.b32.xlu2 %v11128_v31, %s9922_s13  ;;  %2468 = vmatpush.bf16.msra.mxu2 %v11218_v46 }
 0x42c   : > { %8842 = vmatpush.bf16.msra.mxu3 %v11218_v46 }
 0x42f   : > { %2064 = vmatpush.bf16.xpose.msra.mxu0 %v2018_v7 }
 0x430   : > { %2113 = vmatpush.bf16.xpose.msra.mxu1 %v2042_v39  ;;  %2510 = vmatpush.bf16.msrb.mxu3 %v11244_v0 }
 0x432   : > { %2656 = vrot.lane.b32.xlu0 %v11154_v58, %s9922_s13  ;;  %2660 = vrot.lane.b32.xlu1 %v11142_v35, %s9922_s13 }
 0x433   : > { %2652 = vrot.lane.b32.xlu2 %v11054_v49, %s9922_s13 }
 0x434   : > { %2511 = vmatpush.bf16.msrb.mxu3 %v11251_v20 }
 0x437   : > { %2065 = vmatpush.bf16.xpose.msra.mxu0 %v2015_v41 }
 0x438   : > { %2114 = vmatpush.bf16.xpose.msra.mxu1 %v2039_v23  ;;  %2512 = vmatpush.bf16.msrb.mxu3 %v11260_v33 }
 0x43a   : > { %2662 = vrot.lane.b32.xlu0 %v11130_v12, %s9922_s13  ;;  %2666 = vrot.lane.b32.xlu1 %v11090_v28, %s9922_s13 }
 0x43b   : > { %2658 = vrot.lane.b32.xlu2 %v11156_v56, %s9922_s13 }
 0x43c   : > { %2513 = vmatpush.bf16.msrb.mxu3 %v11271_v37 }
 0x43f   : > { %2066 = vmatpush.bf16.xpose.msra.mxu0 %v2012_v25 }
 0x440   : > { %2115 = vmatpush.bf16.xpose.msra.mxu1 %v2036_v60  ;;  %2514 = vmatpush.bf16.msrb.mxu3 %v11234_v18 }
 0x442   : > { %2668 = vrot.lane.b32.xlu0 %v11056_v19, %s9922_s13  ;;  %3052 = vrot.lane.b32.xlu1 %v11182_v17, %s9922_s13 }
 0x443   : > { %2664 = vrot.lane.b32.xlu2 %v11112_v62, %s9922_s13 }
 0x444   : > { %2515 = vmatpush.bf16.msrb.mxu3 %v11249_v21 }
 0x446   : > { %8184 = vmatmul.msk.bf16.vlgmr.msra.gmra.mxu0 %vm1986_vm1, %v11067_v4 }
 0x447   : > { %8192 = vmatmul.msk.bf16.vlgmr.msra.gmra.mxu1 %vm1986_vm1, %v11067_v4 }
 0x448   : > { %2516 = vmatpush.bf16.msrb.mxu3 %v11269_v53 }
 0x44a   : > { %3054 = vrot.lane.b32.xlu0 %v11200_v38, %s9922_s13  ;;  %3060 = vrot.lane.b32.xlu1 %v11194_v44, %s9922_s13 }
 0x44b   : > { %2670 = vrot.lane.b32.xlu2 %v11045_v63, %s9922_s13 }
 0x44c   : > { %2517 = vmatpush.bf16.msrb.mxu3 %v11216_v43 }
 0x452   : > { %3058 = vrot.lane.b32.xlu0 %v11204_v24, %s9922_s13  ;;  %3066 = vrot.lane.b32.xlu1 %v11216_v43, %s9922_s13 }
 0x453   : > { %3050 = vrot.lane.b32.xlu2 %v11218_v46, %s9922_s13 }
 0x456   : > { %8185 = vmatmul.msk.bf16.gmra.mxu0 %vm1986_vm1, %v11064_v40 }
 0x457   : > { %8193 = vmatmul.msk.bf16.gmra.mxu1 %vm1986_vm1, %v11064_v40 }
 0x45a   : > { %3064 = vrot.lane.b32.xlu0 %v11168_v6, %s9922_s13  ;;  %3072 = vrot.lane.b32.xlu1 %v11234_v18, %s9922_s13 }
 0x45b   : > { %3056 = vrot.lane.b32.xlu2 %v11214_v10, %s9922_s13 }
 0x462   : > { %3070 = vrot.lane.b32.xlu0 %v11249_v21, %s9922_s13  ;;  %3078 = vrot.lane.b32.xlu1 %v11251_v20, %s9922_s13 }
 0x463   : > { %3062 = vrot.lane.b32.xlu2 %v11184_v15, %s9922_s13 }
 0x465   : > { %v11262_v51 = vpop.permute.xlu2 %2624 }
 0x466   : > { %8186 = vmatmul.msk.bf16.gmra.mxu0 %vm1986_vm1, %v11061_v22 }
 0x467   : > { %8194 = vmatmul.msk.bf16.gmra.mxu1 %vm1986_vm1, %v11061_v22 }
 0x46a   : > { %3076 = vrot.lane.b32.xlu0 %v11260_v33, %s9922_s13  ;;  %3325 = vrot.lane.b32.xlu1 %v11067_v4, %s9923_s14 }
 0x46b   : > { %3068 = vrot.lane.b32.xlu2 %v11269_v53, %s9922_s13 }
 0x46d   : > { %v11280_v59 = vpop.permute.xlu2 %2630 }
 0x472   : > { %3329 = vrot.lane.b32.xlu0 %v11061_v22, %s9923_s14  ;;  %3331 = vrot.lane.b32.xlu1 %v11086_v16, %s9923_s14 }
 0x473   : > { %3074 = vrot.lane.b32.xlu2 %v11271_v37, %s9922_s13 }
 0x475   : > { %v11290_v1 = vpop.permute.xlu2 %2634 }
 0x476   : > { %8187 = vmatmul.msk.bf16.gmra.mxu0 %vm1986_vm1, %v11086_v16 }
 0x477   : > { %8195 = vmatmul.msk.bf16.gmra.mxu1 %vm1986_vm1, %v11086_v16 }
 0x47a   : > { %3335 = vrot.lane.b32.xlu0 %v11108_v52, %s9923_s14  ;;  %3337 = vrot.lane.b32.xlu1 %v11080_v36, %s9923_s14 }
 0x47b   : > { %3080 = vrot.lane.b32.xlu2 %v11244_v0, %s9922_s13 }
 0x47c   : > { %v11304_v47 = vpop.permute.xlu1 %2628  ;;  %v11306_v50 = vpop.permute.xlu0 %2626 }
 0x47d   : > { %v11308_v34 = vpop.permute.xlu2 %2640 }
 0x482   : > { %3341 = vrot.lane.b32.xlu0 %v11126_v14, %s9923_s14  ;;  %3343 = vrot.lane.b32.xlu1 %v11102_v32, %s9923_s14 }
 0x483   : > { %3327 = vrot.lane.b32.xlu2 %v11064_v40, %s9923_s14 }
 0x484   : > { %v11316_v57 = vpop.permute.xlu1 %2636  ;;  %v11318_v8 = vpop.permute.xlu0 %2632 }
 0x485   : > { %15620 = vst [vmem:[#allocation12_spill] sm:$0xff] %v11316_v57  ;;  %v2647_v2 = vpop.permute.xlu2 %2646 }
 0x486   : > { %8188 = vmatmul.msk.bf16.gmra.mxu0 %vm1986_vm1, %v11083_v27 }
 0x487   : > { %8196 = vmatmul.msk.bf16.gmra.mxu1 %vm1986_vm1, %v11083_v27 }
 0x48a   : > { %3347 = vrot.lane.b32.xlu0 %v11128_v31, %s9923_s14  ;;  %3349 = vrot.lane.b32.xlu1 %v11110_v13, %s9923_s14 }
 0x48b   : > { %3333 = vrot.lane.b32.xlu2 %v11083_v27, %s9923_s14 }
 0x48c   : > { %v2643_v3 = vpop.permute.xlu1 %2642  ;;  %v11330_v5 = vpop.permute.xlu0 %2638 }
 0x48d   : > { %15621 = vst [vmem:[#allocation13_spill] sm:$0xff] %v11330_v5  ;;  %v2653_v30 = vpop.permute.xlu2 %2652  ;;  %v2700_v5 = vsel %vm1986_vm1, %v2643_v3, 0 }
 0x48e   : > { %v2715_v61 = vsel %vm1986_vm1, %v2653_v30, 0 }
 0x492   : > { %3353 = vrot.lane.b32.xlu0 %v11054_v49, %s9923_s14  ;;  %3355 = vrot.lane.b32.xlu1 %v11043_v29, %s9923_s14 }
 0x493   : > { %3339 = vrot.lane.b32.xlu2 %v11105_v42, %s9923_s14 }
 0x494   : > { %v2649_v54 = vpop.permute.xlu1 %2648  ;;  %v2645_v48 = vpop.permute.xlu0 %2644 }
 0x495   : > { %v11338_v11 = vpop.permute.xlu2 %2658 }
 0x496   : > { %8189 = vmatmul.msk.bf16.gmra.mxu0 %vm1986_vm1, %v11108_v52 }
 0x497   : > { %8197 = vmatmul.msk.bf16.gmra.mxu1 %vm1986_vm1, %v11108_v52 }
 0x49a   : > { %3359 = vrot.lane.b32.xlu0 %v11156_v56, %s9923_s14  ;;  %3361 = vrot.lane.b32.xlu1 %v11142_v35, %s9923_s14 }
 0x49b   : > { %3345 = vrot.lane.b32.xlu2 %v11124_v26, %s9923_s14 }
 0x49c   : > { %v2655_v29 = vpop.permute.xlu1 %2654  ;;  %v2651_v49 = vpop.permute.xlu0 %2650 }
 0x49d   : > { %v11350_v9 = vpop.permute.xlu2 %2664  ;;  %v2718_v45 = vsel %vm1986_vm1, %v2655_v29, 0 }
 0x49e   : > { %2744 = vmatpush.bf16.xpose.msrb.mxu2 %v2718_v45 }
 0x4a2   : > { %3365 = vrot.lane.b32.xlu0 %v11112_v62, %s9923_s14  ;;  %3367 = vrot.lane.b32.xlu1 %v11090_v28, %s9923_s14 }
 0x4a3   : > { %3351 = vrot.lane.b32.xlu2 %v11088_v55, %s9923_s14  ;;  %v2712_v55 = vsel %vm1986_vm1, %v2651_v49, 0 }
 0x4a4   : > { %v11360_v35 = vpop.permute.xlu0 %2656  ;;  %v11362_v7 = vpop.permute.xlu1 %2660 }
 0x4a5   : > { %15622 = vst [vmem:[#allocation14_spill] sm:$0xff] %v11360_v35  ;;  %v11364_v39 = vpop.permute.xlu2 %2670 }
 0x4a6   : > { %2745 = vmatpush.bf16.xpose.msrb.mxu2 %v2715_v61  ;;  %8190 = vmatmul.msk.bf16.gmra.mxu0 %vm1986_vm1, %v11080_v36 }
 0x4a7   : > { %8198 = vmatmul.msk.bf16.gmra.mxu1 %vm1986_vm1, %v11080_v36 }
 0x4aa   : > { %3371 = vrot.lane.b32.xlu0 %v11045_v63, %s9923_s14  ;;  %v2709_v63 = vsel %vm1986_vm1, %v2649_v54, 0 }
 0x4ab   : > { %3357 = vrot.lane.b32.xlu2 %v11154_v58, %s9923_s14  ;;  %v2706_v58 = vsel %vm1986_vm1, %v2647_v2, 0 }
 0x4ac   : > { %v11375_v28 = vpop.permute.xlu0 %2662  ;;  %v11377_v62 = vpop.permute.xlu1 %2666 }
 0x4ad   : > { %v11379_v56 = vpop.permute.xlu2 %3050 }
 0x4ae   : > { %2746 = vmatpush.bf16.xpose.msrb.mxu2 %v2712_v55  ;;  %v2703_v55 = vsel %vm1986_vm1, %v2645_v48, 0 }
 0x4b3   : > { %3363 = vrot.lane.b32.xlu2 %v11130_v12, %s9923_s14 }
 0x4b4   : > { %v11383_v41 = vpop.permute.xlu0 %2668  ;;  %v3053_v23 = vpop.permute.xlu1 %3052 }
 0x4b5   : > { %v3057_v25 = vpop.permute.xlu2 %3056 }
 0x4b6   : > { %2747 = vmatpush.bf16.xpose.msrb.mxu2 %v2709_v63  ;;  %8191 = vmatmul.msk.bf16.gmra.mxu0 %vm1986_vm1, %v11105_v42 }
 0x4b7   : > { %8199 = vmatmul.msk.bf16.gmra.mxu1 %vm1986_vm1, %v11105_v42 }
 0x4bb   : > { %3369 = vrot.lane.b32.xlu2 %v11056_v19, %s9923_s14 }
 0x4bc   : > { %v3055_v60 = vpop.permute.xlu0 %3054  ;;  %v3061_v12 = vpop.permute.xlu1 %3060 }
 0x4bd   : > { %v3063_v30 = vpop.permute.xlu2 %3062 }
 0x4be   : > { %2748 = vmatpush.bf16.xpose.msrb.mxu2 %v2706_v58 }
 0x4c3   : > { %v11393_v29 = vpop.f32.mrf.mxu0 }
 0x4c4   : > { %v11395_v49 = vpop.f32.mrf.mxu1  ;;  %v3059_v54 = vpop.permute.xlu0 %3058 }
 0x4c5   : > { %v3067_v45 = vpop.permute.xlu1 %3066  ;;  %v3069_v61 = vpop.permute.xlu2 %3068  ;;  %v2157_v31 = vmax.f32 %v11393_v29, %v11395_v49 }
 0x4c6   : > { %2749 = vmatpush.bf16.xpose.msrb.mxu2 %v2703_v55 }
 0x4cb   : > { %v11398_v63 = vpop.f32.mrf.mxu0 }
 0x4cc   : > { %v11400_v26 = vpop.f32.mrf.mxu1  ;;  %v3065_v19 = vpop.permute.xlu0 %3064 }
 0x4cd   : > { %v3075_v2 = vpop.permute.xlu2 %3074  ;;  %3098 = vmatpush.bf16.msrb.mxu0 %v3065_v19  ;;  %v3073_v58 = vpop.permute.xlu1 %3072  ;;  %v2697_v19 = vsel %vm1986_vm1, %v11308_v34, 0 }
 0x4ce   : > { %2750 = vmatpush.bf16.xpose.msrb.mxu2 %v2700_v5  ;;  %v2160_v5 = vmax.f32 %v11398_v63, %v11400_v26 }
 0x4d1   : > { %3099 = vmatpush.bf16.msrb.mxu0 %v3063_v30 }
 0x4d3   : > { %v11405_v42 = vpop.f32.mrf.mxu0 }
 0x4d4   : > { %v11407_v35 = vpop.f32.mrf.mxu1  ;;  %v3071_v48 = vpop.permute.xlu0 %3070  ;;  %2158 = vmax.xlane.f32.xlu0 %v2157_v31 }
 0x4d5   : > { %v2163_v55 = vmax.f32 %v11405_v42, %v11407_v35  ;;  %v3081_v14 = vpop.permute.xlu2 %3080  ;;  %3100 = vmatpush.bf16.msrb.mxu0 %v3061_v12  ;;  %v3079_v3 = vpop.permute.xlu1 %3078 }
 0x4d6   : > { %3147 = vmatpush.bf16.msrb.mxu1 %v3081_v14  ;;  %2751 = vmatpush.bf16.xpose.msrb.mxu2 %v2697_v19 }
 0x4d7   : > { %2164 = vmax.xlane.f32.xlu1 %v2163_v55 }
 0x4d9   : > { %3101 = vmatpush.bf16.msrb.mxu0 %v3059_v54 }
 0x4da   : > { %3148 = vmatpush.bf16.msrb.mxu1 %v3079_v3 }
 0x4db   : > { %v11415_v30 = vpop.f32.mrf.mxu0 }
 0x4dc   : > { %v11417_v31 = vpop.f32.mrf.mxu1  ;;  %v3077_v57 = vpop.permute.xlu0 %3076  ;;  %2161 = vmax.xlane.f32.xlu0 %v2160_v5 }
 0x4dd   : > { %v2166_v34 = vmax.f32 %v11415_v30, %v11417_v31  ;;  %3102 = vmatpush.bf16.msrb.mxu0 %v3057_v25 }
 0x4de   : > { %3149 = vmatpush.bf16.msrb.mxu1 %v3077_v57 }
 0x4df   : > { %2167 = vmax.xlane.f32.xlu1 %v2166_v34 }
 0x4e1   : > { %3103 = vmatpush.bf16.msrb.mxu0 %v3055_v60 }
 0x4e2   : > { %3150 = vmatpush.bf16.msrb.mxu1 %v3075_v2 }
 0x4e3   : > { %v11421_v14 = vpop.f32.mrf.mxu0 }
 0x4e4   : > { %v11423_v12 = vpop.f32.mrf.mxu1 }
 0x4e5   : > { %15623 = vst [vmem:[#allocation15_spill] sm:$0xff] %v11423_v12  ;;  %v2169_v54 = vmax.f32 %v11421_v14, %v11423_v12  ;;  %3104 = vmatpush.bf16.msrb.mxu0 %v3053_v23  ;;  %v11442_v23 = vpop.permute.xlu1 %3325 }
 0x4e6   : > { %3151 = vmatpush.bf16.msrb.mxu1 %v3073_v58  ;;  %15626 = vst [vmem:[#allocation18_spill] sm:$0xff] %v11442_v23 }
 0x4e7   : > { %2170 = vmax.xlane.f32.xlu2 %v2169_v54 }
 0x4e9   : > { %3105 = vmatpush.bf16.msrb.mxu0 %v11379_v56  ;;  %v11440_v56 = vpop.permute.xlu0 %3329 }
 0x4ea   : > { %3152 = vmatpush.bf16.msrb.mxu1 %v3071_v48  ;;  %15625 = vst [vmem:[#allocation17_spill] sm:$0xff] %v11440_v56 }
 0x4eb   : > { %v11428_v55 = vpop.f32.mrf.mxu0 }
 0x4ec   : > { %v11430_v25 = vpop.f32.mrf.mxu1 }
 0x4ed   : > { %15624 = vst [vmem:[#allocation16_spill] sm:$0xff] %v11430_v25  ;;  %v2172_v57 = vmax.f32 %v11428_v55, %v11430_v25 }
 0x4ee   : > { %3153 = vmatpush.bf16.msrb.mxu1 %v3069_v61  ;;  %v11448_v61 = vpop.permute.xlu1 %3331 }
 0x4ef   : > { %2173 = vmax.xlane.f32.xlu2 %v2172_v57  ;;  %15628 = vst [vmem:[#allocation20_spill] sm:$0xff] %v11448_v61 }
 0x4f0   : > { %3751 = vrot.lane.b32.xlu0 %v11218_v46, %s9923_s14 }
 0x4f1   : > { %v11446_v60 = vpop.permute.xlu0 %3335 }
 0x4f2   : > { %3154 = vmatpush.bf16.msrb.mxu1 %v3067_v45  ;;  %15627 = vst [vmem:[#allocation19_spill] sm:$0xff] %v11446_v60 }
 0x4f4   : > { %v11460_v2 = vpop.f32.mrf.mxu1 }
 0x4f5   : > { %15631 = vst [vmem:[#allocation23_spill] sm:$0xff] %v11460_v2 }
 0x4f6   : > { %v11456_v45 = vpop.permute.xlu1 %3337 }
 0x4f7   : > { %15630 = vst [vmem:[#allocation22_spill] sm:$0xff] %v11456_v45 }
 0x4f8   : > { %3753 = vrot.lane.b32.xlu1 %v11182_v17, %s9923_s14  ;;  %3757 = vrot.lane.b32.xlu0 %v11214_v10, %s9923_s14  ;;  %v11454_v17 = vpop.permute.xlu2 %3327  ;;  %v11458_v10 = vpop.f32.mrf.mxu0 }
 0x4f9   : > { %v11452_v46 = vpop.permute.xlu0 %3341  ;;  %15629 = vst [vmem:[#allocation21_spill] sm:$0xff] %v11454_v17  ;;  %v2175_v19 = vmax.f32 %v11458_v10, %v11460_v2 }
 0x4fc   : > { %v11472_v3 = vpop.f32.mrf.mxu1 }
 0x4fd   : > { %15633 = vst [vmem:[#allocation25_spill] sm:$0xff] %v11472_v3 }
 0x4fe   : > { %v11466_v48 = vpop.permute.xlu1 %3343 }
 0x500   : > { %3759 = vrot.lane.b32.xlu1 %v11204_v24, %s9923_s14  ;;  %v11464_v24 = vpop.permute.xlu2 %3333 }
 0x501   : > { %v11462_v58 = vpop.permute.xlu0 %3347  ;;  %15632 = vst [vmem:[#allocation24_spill] sm:$0xff] %v11464_v24 }
 0x504   : > { %v11484_v60 = vpop.f32.mrf.mxu1 }
 0x505   : > { %15635 = vst [vmem:[#allocation27_spill] sm:$0xff] %v11484_v60 }
 0x506   : > { %v11478_v54 = vpop.permute.xlu1 %3349 }
 0x507   : > { %3755 = vrot.lane.b32.xlu2 %v11200_v38, %s9923_s14  ;;  %v11470_v38 = vpop.f32.mrf.mxu0 }
 0x508   : > { %v11476_v34 = vpop.permute.xlu2 %3339  ;;  %v2178_v57 = vmax.f32 %v11470_v38, %v11472_v3 }
 0x509   : > { %v11474_v5 = vpop.permute.xlu0 %3353  ;;  %15634 = vst [vmem:[#allocation26_spill] sm:$0xff] %v11476_v34 }
 0x50e   : > { %v3356_v61 = vpop.permute.xlu1 %3355 }
 0x50f   : > { %v11482_v45 = vpop.f32.mrf.mxu0 }
 0x510   : > { %v2181_v24 = vmax.f32 %v11482_v45, %v11484_v60  ;;  %v11490_v25 = vpop.permute.xlu2 %3345 }
 0x511   : > { %v11486_v2 = vpop.permute.xlu0 %3359 }
 0x512   : > { %15636 = vst [vmem:[#allocation28_spill] sm:$0xff] %v11486_v2 }
 0x516   : > { %v11498_v3 = vpop.permute.xlu1 %3361 }
 0x517   : > { %15638 = vst [vmem:[#allocation30_spill] sm:$0xff] %v11498_v3 }
 0x518   : > { %v11494_v34 = vpop.permute.xlu2 %3351 }
 0x51e   : > { %v11506_v60 = vpop.permute.xlu1 %3367 }
 0x51f   : > { %15641 = vst [vmem:[#allocation33_spill] sm:$0xff] %v11506_v60 }
 0x520   : > { %v11504_v2 = vpop.permute.xlu2 %3357 }
 0x521   : > { %15640 = vst [vmem:[#allocation32_spill] sm:$0xff] %v11504_v2 }
 0x522   : > { %2176 = vmax.xlane.f32.xlu0 %v2175_v19  ;;  %v11492_v19 = vpop.permute.xlu0 %3365 }
 0x523   : > { %15637 = vst [vmem:[#allocation29_spill] sm:$0xff] %v11492_v19 }
 0x528   : > { %v11513_v19 = vpop.permute.xlu2 %3363 }
 0x529   : > { %15642 = vst [vmem:[#allocation34_spill] sm:$0xff] %v11513_v19 }
 0x52a   : > { %2179 = vmax.xlane.f32.xlu1 %v2178_v57  ;;  %v11502_v57 = vpop.permute.xlu0 %3371 }
 0x52b   : > { %15639 = vst [vmem:[#allocation31_spill] sm:$0xff] %v11502_v57 }
 0x530   : > { %2182 = vmax.xlane.f32.xlu2 %v2181_v24 }
 0x536   : > { %3761 = vrot.lane.b32.xlu0 %v11194_v44, %s9923_s14 }
 0x53e   : > { %3767 = vrot.lane.b32.xlu0 %v11216_v43, %s9923_s14 }
 0x543   : > { %3765 = vrot.lane.b32.xlu1 %v11168_v6, %s9923_s14 }
 0x547   : > { %v2159_v24 = vpop.xlane.xlu0 %2158 }
 0x548   : > { %3763 = vrot.lane.b32.xlu2 %v11184_v15, %s9923_s14  ;;  %v2205_v44 = vsub.f32 %v11393_v29, %v2159_v24  ;;  %v2206_v43 = vsub.f32 %v11395_v49, %v2159_v24  ;;  %v11524_v49 = vpop.permute.xlu2 %3369 }
 0x54a   : > { %v2165_v3 = vpop.xlane.xlu1 %2164  ;;  %v2237_v2 = vmul.f32 1.442695, %v2205_v44  ;;  %v2239_v57 = vmul.f32 1.442695, %v2206_v43  ;;  %v11549_v43 = vpop.f32.mrf.mxu1 }
 0x54b   : > { %3771 = vrot.lane.b32.xlu1 %v11249_v21, %s9923_s14  ;;  %v2210_v60 = vsub.f32 %v11407_v35, %v2165_v3 }
 0x54c   : > { %8994 = vpow2.f32 %v2237_v2 }
 0x54d   : > { %v2247_v19 = vmul.f32 1.442695, %v2210_v60  ;;  %8996 = vpow2.f32 %v2239_v57 }
 0x54f   : > { %v2162_v56 = vpop.xlane.xlu0 %2161 }
 0x550   : > { %3769 = vrot.lane.b32.xlu2 %v11269_v53, %s9923_s14  ;;  %v2207_v6 = vsub.f32 %v11398_v63, %v2162_v56  ;;  %v2208_v15 = vsub.f32 %v11400_v26, %v2162_v56 }
 0x552   : > { %v2168_v29 = vpop.xlane.xlu1 %2167  ;;  %v2241_v17 = vmul.f32 1.442695, %v2207_v6  ;;  %v2243_v12 = vmul.f32 1.442695, %v2208_v15  ;;  %v11526_v24 = vpop.eup %8994 }
 0x553   : > { %v2212_v21 = vsub.f32 %v11417_v31, %v2168_v29  ;;  %v11528_v53 = vpop.eup %8996  ;;  %v2211_v63 = vsub.f32 %v11415_v30, %v2168_v29  ;;  %v11551_v6 = vpop.f32.mrf.mxu0 }
 0x554   : > { %8998 = vpow2.f32 %v2241_v17  ;;  %v2209_v17 = vsub.f32 %v11405_v42, %v2165_v3  ;;  %v3416_v3 = vsel %vm1986_vm1, %v11474_v5, 0 }
 0x555   : > { %v2251_v35 = vmul.f32 1.442695, %v2212_v21  ;;  %9000 = vpow2.f32 %v2243_v12  ;;  %v2249_v30 = vmul.f32 1.442695, %v2211_v63  ;;  %v11561_v21 = vpop.f32.mrf.mxu1 }
 0x556   : > { %9002 = vpow2.f32 %v2247_v19  ;;  %v3419_v19 = vsel %vm1986_vm1, %v3356_v61, 0  ;;  %v2245_v42 = vmul.f32 1.442695, %v2209_v17  ;;  %v2184_v61 = vmax.f32 %v11551_v6, %v11549_v43 }
 0x557   : > { %9004 = vpow2.f32 %v2251_v35  ;;  %v3413_v17 = vsel %vm1986_vm1, %v11494_v34, 0  ;;  %v3410_v34 = vsel %vm1986_vm1, %v11478_v54, 0 }
 0x558   : > { %9006 = vpow2.f32 %v2249_v30 }
 0x559   : > { %9008 = vpow2.f32 %v2245_v42 }
 0x55a   : > { %v11530_v26 = vpop.eup %8998  ;;  %v11545_v57 = vpop.xlane.xlu2 %2170 }
 0x55b   : > { %v11533_v56 = vpop.eup %9000  ;;  %v2349_v31 = vpack.c.bf16 %v11530_v26, %v11526_v24  ;;  %v11563_v35 = vpop.f32.mrf.mxu0 }
 0x55c   : > { %v11537_v60 = vpop.eup %9002 }
 0x55d   : > { %v11542_v2 = vpop.eup %9004  ;;  %2469 = vmatmul.bf16.vlgmr.msra.gmra.mxu2 %v2349_v31 }
 0x55e   : > { %3445 = vmatpush.bf16.xpose.msra.mxu2 %v3419_v19  ;;  %v11559_v29 = vpop.eup %9006  ;;  %v2213_v19 = vsub.f32 %v11421_v14, %v11545_v57 }
 0x55f   : > { %v11565_v63 = vpop.eup %9008 }
 0x560   : > { %v2351_v5 = vpack.c.bf16 %v11559_v29, %v11565_v63  ;;  %v2253_v42 = vmul.f32 1.442695, %v2213_v19  ;;  %v3407_v19 = vsel %vm1986_vm1, %v11462_v58, 0 }
 0x562   : > { %v11557_v15 = vpop.xlane.xlu2 %2173  ;;  %v3752_v54 = vpop.permute.xlu0 %3751 }
 0x563   : > { %v2215_v31 = vsub.f32 %v11428_v55, %v11557_v15  ;;  %v11579_v55 = vpop.f32.mrf.mxu0 }
 0x565   : > { %v2257_v30 = vmul.f32 1.442695, %v2215_v31 }
 0x566   : > { %3446 = vmatpush.bf16.xpose.msra.mxu2 %v3416_v3  ;;  %v2187_v3 = vmax.f32 %v11563_v35, %v11561_v21 }
 0x567   : > { %9010 = vpow2.f32 %v2257_v30  ;;  %v3404_v30 = vsel %vm1986_vm1, %v11490_v25, 0 }
 0x568   : > { %2185 = vmax.xlane.f32.xlu0 %v2184_v61  ;;  %v11577_v61 = vpop.f32.mrf.mxu1  ;;  %9012 = vpow2.f32 %v2253_v42 }
 0x569   : > { %v2190_v14 = vmax.f32 %v11579_v55, %v11577_v61 }
 0x56a   : > { %v3754_v42 = vpop.permute.xlu1 %3753 }
 0x56d   : > { %2474 = vmatmul.bf16.gmra.mxu2 %v2351_v5  ;;  %v11585_v31 = vpop.eup %9010 }
 0x56e   : > { %3447 = vmatpush.bf16.xpose.msra.mxu2 %v3413_v17  ;;  %v11587_v5 = vpop.eup %9012 }
 0x56f   : > { %v2353_v17 = vpack.c.bf16 %v11585_v31, %v11587_v5 }
 0x575   : > { %2188 = vmax.xlane.f32.xlu1 %v2187_v3  ;;  %v3401_v3 = vsel %vm1986_vm1, %v11466_v48, 0 }
 0x576   : > { %3448 = vmatpush.bf16.xpose.msra.mxu2 %v3410_v34  ;;  %v3758_v34 = vpop.permute.xlu0 %3757 }
 0x579   : > { %2191 = vmax.xlane.f32.xlu2 %v2190_v14 }
 0x57c   : > { %3773 = vrot.lane.b32.xlu0 %v11234_v18, %s9923_s14  ;;  %v3760_v18 = vpop.permute.xlu1 %3759 }
 0x57d   : > { %2479 = vmatmul.bf16.gmra.mxu2 %v2353_v17  ;;  %v3756_v17 = vpop.permute.xlu2 %3755 }
 0x57e   : > { %3449 = vmatpush.bf16.xpose.msra.mxu2 %v3407_v19 }
 0x584   : > { %3779 = vrot.lane.b32.xlu0 %v11251_v20, %s9923_s14  ;;  %v3398_v20 = vsel %vm1986_vm1, %v11452_v46, 0 }
 0x586   : > { %3450 = vmatpush.bf16.xpose.msra.mxu2 %v3404_v30  ;;  %v11621_v30 = vpop.f32.mrf.mxu0 }
 0x58e   : > { %3777 = vrot.lane.b32.xlu1 %v11260_v33, %s9923_s14  ;;  %3451 = vmatpush.bf16.xpose.msra.mxu2 %v3401_v3 }
 0x591   : > { %3775 = vrot.lane.b32.xlu2 %v11271_v37, %s9923_s14 }
 0x595   : > { %v11607_v58 = vpop.xlane.xlu0 %2176 }
 0x596   : > { %3452 = vmatpush.bf16.xpose.msra.mxu2 %v3398_v20  ;;  %v2217_v25 = vsub.f32 %v11458_v10, %v11607_v58  ;;  %v11623_v10 = vpop.f32.mrf.mxu1  ;;  %v11631_v20 = vpop.f32.mrf.mxu0 }
 0x597   : > { %v2193_v3 = vmax.f32 %v11621_v30, %v11623_v10 }
 0x598   : > { %v2261_v48 = vmul.f32 1.442695, %v2217_v25 }
 0x599   : > { %3781 = vrot.lane.b32.xlu2 %v11244_v0, %s9923_s14 }
 0x59a   : > { %9014 = vpow2.f32 %v2261_v48 }
 0x59d   : > { %v11613_v14 = vpop.xlane.xlu1 %2179 }
 0x59e   : > { %v2219_v33 = vsub.f32 %v11470_v38, %v11613_v14  ;;  %v11633_v25 = vpop.f32.mrf.mxu1  ;;  %v11637_v44 = vpop.f32.mrf.mxu0 }
 0x5a0   : > { %v2265_v37 = vmul.f32 1.442695, %v2219_v33  ;;  %v11617_v46 = vpop.eup %9014  ;;  %v2196_v33 = vmax.f32 %v11631_v20, %v11633_v25 }
 0x5a2   : > { %9016 = vpow2.f32 %v2265_v37 }
 0x5a3   : > { %v11629_v38 = vpop.xlane.xlu2 %2182 }
 0x5a6   : > { %v11641_v12 = vpop.f32.mrf.mxu1 }
 0x5a8   : > { %v11619_v19 = vpop.eup %9016 }
 0x5a9   : > { %v2355_v0 = vpack.c.bf16 %v11619_v19, %v11617_v46 }
 0x5ab   : > { %2484 = vmatmul.bf16.gmra.mxu2 %v2355_v0  ;;  %v3764_v37 = vpop.permute.xlu2 %3763  ;;  %v3762_v0 = vpop.permute.xlu0 %3761 }
 0x5ae   : > { %2194 = vmax.xlane.f32.xlu0 %v2193_v3  ;;  %v2199_v3 = vmax.f32 %v11637_v44, %v11641_v12 }
 0x5b5   : > { %v3766_v48 = vpop.permute.xlu1 %3765 }
 0x5b6   : > { %3799 = vmatpush.bf16.msra.mxu0 %v3766_v48  ;;  %v11653_v48 = vpop.permute.xlu0 %3767 }
 0x5b8   : > { %2197 = vmax.xlane.f32.xlu1 %v2196_v33  ;;  %v2742_v33 = vsel %vm1986_vm1, %v11364_v39, 0 }
 0x5ba   : > { %3800 = vmatpush.bf16.msra.mxu0 %v3764_v37 }
 0x5bb   : > { %8264 = vmatmul.msk.bf16.vlgmr.msrb.gmra.mxu2 %vm1986_vm1, %v11262_v51 }
 0x5be   : > { %3801 = vmatpush.bf16.msra.mxu0 %v3762_v0 }
 0x5c2   : > { %3802 = vmatpush.bf16.msra.mxu0 %v3760_v18  ;;  %2200 = vmax.xlane.f32.xlu2 %v2199_v3  ;;  %v2221_v18 = vsub.f32 %v11482_v45, %v11629_v38  ;;  %v11687_v3 = vpop.f32.mrf.mxu0 }
 0x5c3   : > { %4026 = vrot.lane.b32.xlu0 %v11067_v4, %s9924_s15 }
 0x5c4   : > { %v2269_v4 = vmul.f32 1.442695, %v2221_v18  ;;  %v11689_v18 = vpop.f32.mrf.mxu1 }
 0x5c5   : > { %v2202_v39 = vmax.f32 %v11687_v3, %v11689_v18 }
 0x5c6   : > { %3803 = vmatpush.bf16.msra.mxu0 %v3758_v34  ;;  %9018 = vpow2.f32 %v2269_v4 }
 0x5ca   : > { %3804 = vmatpush.bf16.msra.mxu0 %v3756_v17 }
 0x5cb   : > { %8265 = vmatmul.msk.bf16.gmra.mxu2 %vm1986_vm1, %v11306_v50  ;;  %4032 = vrot.lane.b32.xlu0 %v11086_v16, %s9924_s15 }
 0x5cc   : > { %v11669_v45 = vpop.eup %9018 }
 0x5ce   : > { %3805 = vmatpush.bf16.msra.mxu0 %v3754_v42  ;;  %v3772_v42 = vpop.permute.xlu1 %3771 }
 0x5d1   : > { %4030 = vrot.lane.b32.xlu1 %v11061_v22, %s9924_s15 }
 0x5d2   : > { %3806 = vmatpush.bf16.msra.mxu0 %v3752_v54 }
 0x5d9   : > { %4036 = vrot.lane.b32.xlu1 %v11108_v52, %s9924_s15  ;;  %v3770_v52 = vpop.permute.xlu2 %3769 }
 0x5da   : > { %4028 = vrot.lane.b32.xlu2 %v11064_v40, %s9924_s15 }
 0x5db   : > { %8266 = vmatmul.msk.bf16.gmra.mxu2 %vm1986_vm1, %v11304_v47  ;;  %v11663_v16 = vpop.xlane.xlu0 %2185 }
 0x5dc   : > { %v2223_v22 = vsub.f32 %v11551_v6, %v11663_v16 }
 0x5de   : > { %v2273_v54 = vmul.f32 1.442695, %v2223_v22 }
 0x5e0   : > { %9020 = vpow2.f32 %v2273_v54 }
 0x5e2   : > { %4034 = vrot.lane.b32.xlu2 %v11083_v27, %s9924_s15 }
 0x5e6   : > { %v11671_v40 = vpop.eup %9020 }
 0x5e7   : > { %v2357_v17 = vpack.c.bf16 %v11671_v40, %v11669_v45 }
 0x5e8   : > { %v11673_v34 = vpop.xlane.xlu1 %2188 }
 0x5e9   : > { %v2225_v6 = vsub.f32 %v11563_v35, %v11673_v34  ;;  %2489 = vmatmul.bf16.vlgmr.msra.gmra.mxu3 %v2357_v17  ;;  %v2739_v35 = vsel %vm1986_vm1, %v11383_v41, 0 }
 0x5ea   : > { %2793 = vmatpush.bf16.xpose.msra.mxu3 %v2742_v33  ;;  %v2736_v33 = vsel %vm1986_vm1, %v11377_v62, 0  ;;  %v2730_v62 = vsel %vm1986_vm1, %v11375_v28, 0  ;;  %v2724_v28 = vsel %vm1986_vm1, %v11338_v11, 0  ;;  %v15646_v11 = vld [vmem:[#allocation8_spill] sm:$0xff] }
 0x5eb   : > { %8267 = vmatmul.msk.bf16.gmra.mxu2 %vm1986_vm1, %v11280_v59  ;;  %v2277_v27 = vmul.f32 1.442695, %v2225_v6 }
 0x5ec   : > { %v11683_v37 = vpop.xlane.xlu2 %2191 }
 0x5ed   : > { %v2227_v0 = vsub.f32 %v11579_v55, %v11683_v37  ;;  %9022 = vpow2.f32 %v2277_v27 }
 0x5ee   : > { %v3774_v54 = vpop.permute.xlu0 %3773 }
 0x5ef   : > { %v2281_v4 = vmul.f32 1.442695, %v2227_v0  ;;  %v2301_v0 = vadd.f32 %v11528_v53, %v11526_v24  ;;  %v15643_v24 = vld [vmem:[#allocation12_spill] sm:$0xff] }
 0x5f1   : > { %9024 = vpow2.f32 %v2281_v4  ;;  %v2733_v4 = vsel %vm1986_vm1, %v11350_v9, 0  ;;  %v2727_v9 = vsel %vm1986_vm1, %v11362_v7, 0 }
 0x5f2   : > { %2794 = vmatpush.bf16.xpose.msra.mxu3 %v2739_v35  ;;  %v2304_v35 = vadd.f32 %v11533_v56, %v11530_v26  ;;  %v15645_v26 = vld [vmem:[#allocation14_spill] sm:$0xff] }
 0x5f3   : > { %v11695_v17 = vpop.eup %9022 }
 0x5f4   : > { %v3776_v22 = vpop.permute.xlu2 %3775 }
 0x5f5   : > { %2203 = vmax.xlane.f32.xlu0 %v2202_v39 }
 0x5f6   : > { %v3780_v27 = vpop.permute.xlu0 %3779 }
 0x5f7   : > { %v11697_v55 = vpop.eup %9024 }
 0x5f8   : > { %v2359_v6 = vpack.c.bf16 %v11697_v55, %v11695_v17 }
 0x5fa   : > { %2494 = vmatmul.bf16.gmra.mxu3 %v2359_v6 }
 0x5fb   : > { %2795 = vmatpush.bf16.xpose.msra.mxu3 %v2736_v33  ;;  %8268 = vmatmul.msk.bf16.gmra.mxu2 %vm1986_vm1, %v11318_v8 }
 0x5fc   : > { %v3782_v41 = vpop.permute.xlu2 %3781 }
 0x5fd   : > { %3848 = vmatpush.bf16.msra.mxu1 %v3782_v41  ;;  %v15648_v41 = vld [vmem:[#allocation13_spill] sm:$0xff] }
 0x600   : > { %v3778_v39 = vpop.permute.xlu1 %3777 }
 0x601   : > { %3849 = vmatpush.bf16.msra.mxu1 %v3780_v27 }
 0x603   : > { %2796 = vmatpush.bf16.xpose.msra.mxu3 %v2733_v4  ;;  %2302 = vadd.xlane.f32.xlu1 %v2301_v0 }
 0x605   : > { %3850 = vmatpush.bf16.msra.mxu1 %v3778_v39 }
 0x609   : > { %3851 = vmatpush.bf16.msra.mxu1 %v3776_v22  ;;  %4038 = vrot.lane.b32.xlu0 %v11080_v36, %s9924_s15  ;;  %v11721_v36 = vpop.f32.mrf.mxu2  ;;  %v15647_v22 = vld [vmem:[#allocation11_spill] sm:$0xff] }
 0x60b   : > { %2797 = vmatpush.bf16.xpose.msra.mxu3 %v2730_v62  ;;  %8269 = vmatmul.msk.bf16.gmra.mxu2 %vm1986_vm1, %v11290_v1 }
 0x60c   : > { %2305 = vadd.xlane.f32.xlu2 %v2304_v35 }
 0x60d   : > { %3852 = vmatpush.bf16.msra.mxu1 %v3774_v54 }
 0x611   : > { %3853 = vmatpush.bf16.msra.mxu1 %v3772_v42  ;;  %4044 = vrot.lane.b32.xlu0 %v11102_v32, %s9924_s15  ;;  %v15644_v32 = vld [vmem:[#allocation10_spill] sm:$0xff]  ;;  %v11732_v7 = vpop.f32.mrf.mxu2  ;;  %v2721_v42 = vsel %vm1986_vm1, %v15645_v26, 0 }
 0x613   : > { %2798 = vmatpush.bf16.xpose.msra.mxu3 %v2727_v9 }
 0x615   : > { %3854 = vmatpush.bf16.msra.mxu1 %v3770_v52 }
 0x619   : > { %3855 = vmatpush.bf16.msra.mxu1 %v11653_v48  ;;  %4050 = vrot.lane.b32.xlu0 %v11110_v13, %s9924_s15  ;;  %v11742_v33 = vpop.f32.mrf.mxu2 }
 0x61b   : > { %2799 = vmatpush.bf16.xpose.msra.mxu3 %v2724_v28  ;;  %8270 = vmatmul.msk.bf16.gmra.mxu2 %vm1986_vm1, %v15643_v24 }
 0x61c   : > { %4042 = vrot.lane.b32.xlu1 %v15644_v32, %s9924_s15 }
 0x621   : > { %v2195_v52 = vpop.xlane.xlu0 %2194  ;;  %v11757_v35 = vpop.f32.mrf.mxu2 }
 0x622   : > { %v2229_v48 = vsub.f32 %v11621_v30, %v2195_v52  ;;  %v2230_v13 = vsub.f32 %v11623_v10, %v2195_v52  ;;  %v15649_v10 = vld [vmem:[#allocation9_spill] sm:$0xff] }
 0x623   : > { %2800 = vmatpush.bf16.xpose.msra.mxu3 %v2721_v42 }
 0x624   : > { %4040 = vrot.lane.b32.xlu2 %v15646_v11, %s9924_s15  ;;  %4048 = vrot.lane.b32.xlu1 %v15647_v22, %s9924_s15  ;;  %v2285_v54 = vmul.f32 1.442695, %v2229_v48  ;;  %v2287_v6 = vmul.f32 1.442695, %v2230_v13 }
 0x626   : > { %9026 = vpow2.f32 %v2285_v54 }
 0x627   : > { %9028 = vpow2.f32 %v2287_v6 }
 0x629   : > { %v11766_v48 = vpop.f32.mrf.mxu2 }
 0x62b   : > { %8271 = vmatmul.msk.bf16.gmra.mxu2 %vm1986_vm1, %v15648_v41  ;;  %v11746_v27 = vpop.xlane.xlu1 %2197 }
 0x62c   : > { %v2231_v30 = vsub.f32 %v11631_v20, %v11746_v27  ;;  %4046 = vrot.lane.b32.xlu2 %v15649_v10, %s9924_s15  ;;  %v9027_v0 = vpop.eup %9026  ;;  %v15651_v10 = vld [vmem:[#allocation21_spill] sm:$0xff] }
 0x62d   : > { %v11752_v4 = vpop.eup %9028 }
 0x62e   : > { %v2289_v39 = vmul.f32 1.442695, %v2231_v30  ;;  %v11755_v62 = vadd.f32 %v11752_v4, %v9027_v0 }
 0x630   : > { %9030 = vpow2.f32 %v2289_v39 }
 0x631   : > { %v11777_v30 = vpop.f32.mrf.mxu2 }
 0x635   : > { %v2201_v9 = vpop.xlane.xlu2 %2200 }
 0x636   : > { %v11759_v28 = vpop.eup %9030  ;;  %v2233_v32 = vsub.f32 %v11637_v44, %v2201_v9  ;;  %v2234_v20 = vsub.f32 %v11641_v12, %v2201_v9  ;;  %v2307_v44 = vadd.f32 %v11565_v63, %v11537_v60  ;;  %v15650_v12 = vld [vmem:[#allocation15_spill] sm:$0xff]  ;;  %v11789_v9 = vpop.permute.xlu0 %4026 }
 0x637   : > { %v2361_v26 = vpack.c.bf16 %v11759_v28, %v9027_v0  ;;  %v2214_v22 = vsub.f32 %v15650_v12, %v11545_v57  ;;  %v2310_v0 = vadd.f32 %v11559_v29, %v11542_v2  ;;  %v11799_v29 = vld [vmem:[#allocation4 + $0x10] sm:$0xff] }
 0x638   : > { %v2293_v42 = vmul.f32 1.442695, %v2233_v32  ;;  %v2295_v52 = vmul.f32 1.442695, %v2234_v20  ;;  %v11791_v32 = vld [vmem:[#allocation4 + $0x48] sm:$0xff]  ;;  %15654 = vst [vmem:[#allocation10_spill] sm:$0xff] %v11799_v29 }
 0x639   : > { %2499 = vmatmul.bf16.gmra.mxu3 %v2361_v26  ;;  %v2255_v6 = vmul.f32 1.442695, %v2214_v22  ;;  %v11785_v63 = vpop.f32.mrf.mxu2  ;;  %15652 = vst [vmem:[#allocation12_spill] sm:$0xff] %v11791_v32  ;;  %v15653_v26 = vld [vmem:[#allocation17_spill] sm:$0xff] }
 0x63a   : > { %9032 = vpow2.f32 %v2293_v42 }
 0x63b   : > { %9034 = vpow2.f32 %v2295_v52  ;;  %8280 = vmatmul.msk.bf16.vlgmr.msra.gmra.mxu2 %vm1986_vm1, %v11442_v23  ;;  %v11807_v52 = vld [vmem:[#allocation4 + $0x8] sm:$0xff]  ;;  %v15664_v23 = vld [vmem:[#allocation31_spill] sm:$0xff] }
 0x63c   : > { %9036 = vpow2.f32 %v2255_v6 }
 0x63e   : > { %v11803_v42 = vpop.permute.xlu0 %4032 }
 0x640   : > { %v9033_v13 = vpop.eup %9032 }
 0x641   : > { %v11768_v11 = vpop.eup %9034  ;;  %v11795_v20 = vpop.f32.mrf.mxu2 }
 0x642   : > { %v11775_v54 = vadd.f32 %v11768_v11, %v9033_v13  ;;  %v11783_v39 = vpop.eup %9036 }
 0x643   : > { %2308 = vadd.xlane.f32.xlu0 %v2307_v44  ;;  %v2313_v57 = vadd.f32 %v11783_v39, %v11587_v5 }
 0x649   : > { %v11805_v5 = vpop.f32.mrf.mxu2 }
 0x64a   : > { %15655 = vst [vmem:[#allocation14_spill] sm:$0xff] %v11805_v5 }
 0x64b   : > { %8281 = vmatmul.msk.bf16.gmra.mxu2 %vm1986_vm1, %v15651_v10  ;;  %v11821_v10 = vld [vmem:[#allocation4 + $0x20] sm:$0xff] }
 0x64e   : > { %2311 = vadd.xlane.f32.xlu1 %v2310_v0 }
 0x651   : > { %v11819_v5 = vpop.f32.mrf.mxu2 }
 0x652   : > { %15658 = vst [vmem:[#allocation11_spill] sm:$0xff] %v11819_v5 }
 0x655   : > { %2314 = vadd.xlane.f32.xlu2 %v2313_v57  ;;  %v15656_v57 = vld [vmem:[#allocation20_spill] sm:$0xff] }
 0x657   : > { %4056 = vrot.lane.b32.xlu0 %v11791_v32, %s9924_s15  ;;  %v3443_v32 = vsel %vm1986_vm1, %v15664_v23, 0  ;;  %v3440_v23 = vsel %vm1986_vm1, %v11524_v49, 0 }
 0x659   : > { %v11836_v5 = vpop.f32.mrf.mxu2 }
 0x65a   : > { %15661 = vst [vmem:[#allocation9_spill] sm:$0xff] %v11836_v5 }
 0x65b   : > { %8282 = vmatmul.msk.bf16.gmra.mxu2 %vm1986_vm1, %v15653_v26  ;;  %v11815_v26 = vld [vmem:[#allocation4 + $0x68] sm:$0xff] }
 0x65c   : > { %15657 = vst [vmem:[#allocation8_spill] sm:$0xff] %v11815_v26 }
 0x65f   : > { %4062 = vrot.lane.b32.xlu0 %v11799_v29, %s9924_s15 }
 0x667   : > { %4054 = vrot.lane.b32.xlu1 %v11807_v52, %s9924_s15 }
 0x668   : > { %v2204_v44 = vpop.xlane.xlu0 %2203 }
 0x669   : > { %v2235_v12 = vsub.f32 %v11687_v3, %v2204_v44  ;;  %v2236_v22 = vsub.f32 %v11689_v18, %v2204_v44 }
 0x66b   : > { %v2297_v6 = vmul.f32 1.442695, %v2235_v12  ;;  %v2299_v0 = vmul.f32 1.442695, %v2236_v22  ;;  %8283 = vmatmul.msk.bf16.gmra.mxu2 %vm1986_vm1, %v15656_v57  ;;  %v11827_v12 = vld [vmem:[#allocation4 + $0x40] sm:$0xff] }
 0x66d   : > { %9038 = vpow2.f32 %v2297_v6  ;;  %4052 = vrot.lane.b32.xlu2 %v11815_v26, %s9924_s15  ;;  %v15660_v6 = vld [vmem:[#allocation16_spill] sm:$0xff] }
 0x66e   : > { %9040 = vpow2.f32 %v2299_v0  ;;  %v2216_v0 = vsub.f32 %v15660_v6, %v11557_v15  ;;  %v15662_v26 = vld [vmem:[#allocation24_spill] sm:$0xff]  ;;  %v15666_v15 = vpack.c.bf16 %v11533_v56, %v11528_v53  ;;  %v15670_v56 = vpack.c.bf16 %v11542_v2, %v11537_v60  ;;  %v15674_v60 = vld [vmem:[#allocation29_spill] sm:$0xff] }
 0x66f   : > { %4060 = vrot.lane.b32.xlu1 %v11821_v10, %s9924_s15  ;;  %v3434_v2 = vsel %vm1986_vm1, %v15674_v60, 0  ;;  %v11898_v60 = vld [vmem:[#allocation4 + $0x60] sm:$0xff] }
 0x670   : > { %v2259_v57 = vmul.f32 1.442695, %v2216_v0 }
 0x672   : > { %9042 = vpow2.f32 %v2259_v57  ;;  %v15667_v57 = vld [vmem:[#allocation25_spill] sm:$0xff] }
 0x673   : > { %v9039_v3 = vpop.eup %9038  ;;  %v2220_v0 = vsub.f32 %v15667_v57, %v11613_v14 }
 0x674   : > { %v11825_v18 = vpop.eup %9040  ;;  %v2363_v44 = vpack.c.bf16 %v9039_v3, %v9033_v13  ;;  %v11840_v13 = vpop.f32.mrf.mxu2 }
 0x675   : > { %4058 = vrot.lane.b32.xlu2 %v11827_v12, %s9924_s15  ;;  %v11832_v22 = vadd.f32 %v11825_v18, %v9039_v3  ;;  %15663 = vst [vmem:[#allocation15_spill] sm:$0xff] %v11840_v13  ;;  %v15665_v3 = vld [vmem:[#allocation23_spill] sm:$0xff] }
 0x676   : > { %2504 = vmatmul.bf16.gmra.mxu3 %v2363_v44  ;;  %v15668_v13 = vld [vmem:[#allocation19_spill] sm:$0xff] }
 0x677   : > { %15659 = vst [vmem:[#allocation13_spill] sm:$0xff] %v11832_v22  ;;  %v2218_v22 = vsub.f32 %v15665_v3, %v11607_v58  ;;  %v2267_v58 = vmul.f32 1.442695, %v2220_v0  ;;  %v11880_v0 = vpop.permute.xlu2 %4028 }
 0x678   : > { %v9043_v29 = vpop.eup %9042 }
 0x679   : > { %v2316_v44 = vadd.f32 %v9043_v29, %v11585_v31  ;;  %v2263_v6 = vmul.f32 1.442695, %v2218_v22  ;;  %v15671_v31 = vld [vmem:[#allocation33_spill] sm:$0xff]  ;;  %v2354_v57 = vpack.c.bf16 %v9043_v29, %v11783_v39 }
 0x67a   : > { %v3437_v14 = vsel %vm1986_vm1, %v15671_v31, 0  ;;  %v15678_v31 = vld [vmem:[#allocation26_spill] sm:$0xff] }
 0x67b   : > { %8284 = vmatmul.msk.bf16.gmra.mxu2 %vm1986_vm1, %v15662_v26  ;;  %9044 = vpow2.f32 %v2263_v6 }
 0x67c   : > { %v11854_v5 = vpop.f32.mrf.mxu2  ;;  %9046 = vpow2.f32 %v2267_v58 }
 0x67d   : > { %15669 = vst [vmem:[#allocation16_spill] sm:$0xff] %v11854_v5 }
 0x67f   : > { %v11894_v39 = vpop.permute.xlu2 %4034 }
 0x681   : > { %v9045_v53 = vpop.eup %9044 }
 0x682   : > { %v2319_v22 = vadd.f32 %v9045_v53, %v11617_v46  ;;  %v9047_v3 = vpop.eup %9046  ;;  %v11877_v46 = vpop.permute.xlu1 %4030 }
 0x683   : > { %v2322_v49 = vadd.f32 %v9047_v3, %v11619_v19  ;;  %v15676_v19 = vld [vmem:[#allocation34_spill] sm:$0xff] }
 0x684   : > { %v3431_v58 = vsel %vm1986_vm1, %v15676_v19, 0 }
 0x686   : > { %2518 = vmatmul.bf16.vlgmr.msrb.gmra.mxu3 %v15666_v15  ;;  %v15673_v15 = vld [vmem:[#allocation22_spill] sm:$0xff] }
 0x687   : > { %3494 = vmatpush.bf16.xpose.msrb.mxu3 %v3443_v32  ;;  %v11863_v32 = vpop.f32.mrf.mxu2 }
 0x688   : > { %15672 = vst [vmem:[#allocation31_spill] sm:$0xff] %v11863_v32  ;;  %v11914_v32 = vpop.xlane.xlu2 %2305 }
 0x689   : > { %2317 = vadd.xlane.f32.xlu0 %v2316_v44  ;;  %v11869_v44 = vld [vmem:[#allocation4 + $0x70] sm:$0xff] }
 0x68b   : > { %8285 = vmatmul.msk.bf16.gmra.mxu2 %vm1986_vm1, %v15668_v13 }
 0x68f   : > { %3495 = vmatpush.bf16.xpose.msrb.mxu3 %v3440_v23  ;;  %v11875_v6 = vpop.f32.mrf.mxu2  ;;  %v11882_v23 = vpop.permute.xlu0 %4038 }
 0x690   : > { %15675 = vst [vmem:[#allocation23_spill] sm:$0xff] %v11875_v6  ;;  %v11906_v6 = vld [vmem:[#allocation4 + $0x38] sm:$0xff] }
 0x691   : > { %15681 = vst [vmem:[#allocation33_spill] sm:$0xff] %v11906_v6 }
 0x696   : > { %2523 = vmatmul.bf16.gmra.mxu3 %v15670_v56 }
 0x697   : > { %3496 = vmatpush.bf16.xpose.msrb.mxu3 %v3437_v14  ;;  %v11886_v56 = vpop.f32.mrf.mxu2  ;;  %v11890_v14 = vpop.permute.xlu1 %4036 }
 0x698   : > { %15677 = vst [vmem:[#allocation25_spill] sm:$0xff] %v11886_v56  ;;  %v11896_v29 = vpop.permute.xlu0 %4044 }
 0x699   : > { %2320 = vadd.xlane.f32.xlu1 %v2319_v22  ;;  %v15679_v22 = vld [vmem:[#allocation30_spill] sm:$0xff] }
 0x69b   : > { %8286 = vmatmul.msk.bf16.gmra.mxu2 %vm1986_vm1, %v15673_v15  ;;  %v2226_v15 = vsub.f32 %v11561_v21, %v11673_v34 }
 0x69d   : > { %4068 = vrot.lane.b32.xlu0 %v11869_v44, %s9924_s15 }
 0x69e   : > { %2323 = vadd.xlane.f32.xlu2 %v2322_v49  ;;  %v3428_v49 = vsel %vm1986_vm1, %v15679_v22, 0  ;;  %v15682_v22 = vld [vmem:[#allocation28_spill] sm:$0xff] }
 0x69f   : > { %3497 = vmatpush.bf16.xpose.msrb.mxu3 %v3434_v2  ;;  %v2224_v2 = vsub.f32 %v11549_v43, %v11663_v16  ;;  %v11912_v5 = vpop.xlane.xlu1 %2302  ;;  %v11916_v16 = vld [vmem:[#allocation4 + $0x28] sm:$0xff] }
 0x6a0   : > { %v4051_v43 = vpop.permute.xlu0 %4050  ;;  %15683 = vst [vmem:[#allocation29_spill] sm:$0xff] %v11916_v16 }
 0x6a1   : > { %v2275_v56 = vmul.f32 1.442695, %v2224_v2 }
 0x6a3   : > { %9048 = vpow2.f32 %v2275_v56 }
 0x6a6   : > { %2528 = vmatmul.bf16.gmra.mxu3 %v2354_v57  ;;  %v15680_v57 = vld [vmem:[#allocation27_spill] sm:$0xff] }
 0x6a7   : > { %3498 = vmatpush.bf16.xpose.msrb.mxu3 %v3431_v58  ;;  %v2222_v19 = vsub.f32 %v15680_v57, %v11629_v38  ;;  %v2356_v58 = vpack.c.bf16 %v9047_v3, %v9045_v53  ;;  %v11920_v38 = vld [vmem:[#allocation4 + $0x78] sm:$0xff]  ;;  %v15685_v53 = vld [vmem:[#allocation32_spill] sm:$0xff]  ;;  %v11926_v2 = vpop.permute.xlu1 %4042  ;;  %v11928_v57 = vpop.f32.mrf.mxu3 }
 0x6a8   : > { %15684 = vst [vmem:[#allocation34_spill] sm:$0xff] %v11920_v38  ;;  %v3422_v3 = vsel %vm1986_vm1, %v15685_v53, 0 }
 0x6ab   : > { %8287 = vmatmul.msk.bf16.gmra.mxu2 %vm1986_vm1, %v15678_v31  ;;  %v2271_v31 = vmul.f32 1.442695, %v2222_v19  ;;  %v9049_v19 = vpop.eup %9048 }
 0x6ad   : > { %9050 = vpow2.f32 %v2271_v31  ;;  %v2228_v31 = vsub.f32 %v11577_v61, %v11683_v37 }
 0x6af   : > { %3499 = vmatpush.bf16.xpose.msrb.mxu3 %v3428_v49  ;;  %v3425_v49 = vsel %vm1986_vm1, %v15682_v22, 0  ;;  %v11932_v22 = vpop.permute.xlu2 %4040  ;;  %v2283_v13 = vmul.f32 1.442695, %v2228_v31  ;;  %v4049_v26 = vpop.permute.xlu1 %4048 }
 0x6b0   : > { %15686 = vst [vmem:[#allocation30_spill] sm:$0xff] %v11932_v22  ;;  %v11940_v22 = vpop.f32.mrf.mxu3 }
 0x6b1   : > { %9052 = vpow2.f32 %v2283_v13 }
 0x6b2   : > { %4066 = vrot.lane.b32.xlu1 %v11898_v60, %s9924_s15 }
 0x6b3   : > { %v9051_v56 = vpop.eup %9050 }
 0x6b4   : > { %v2325_v53 = vadd.f32 %v9051_v56, %v11669_v45  ;;  %v2232_v45 = vsub.f32 %v11633_v25, %v11746_v27 }
 0x6b6   : > { %4064 = vrot.lane.b32.xlu2 %v11906_v6, %s9924_s15  ;;  %2533 = vmatmul.bf16.gmra.mxu3 %v2356_v58  ;;  %v11930_v58 = vpop.xlane.xlu0 %2308 }
 0x6b7   : > { %3500 = vmatpush.bf16.xpose.msrb.mxu3 %v3425_v49  ;;  %v2358_v49 = vpack.c.bf16 %v9049_v19, %v9051_v56  ;;  %v4047_v6 = vpop.permute.xlu2 %4046  ;;  %v9053_v61 = vpop.eup %9052 }
 0x6b8   : > { %v11946_v56 = vpop.f32.mrf.mxu3 }
 0x6ba   : > { %4072 = vrot.lane.b32.xlu1 %v11916_v16, %s9924_s15 }
 0x6be   : > { %4070 = vrot.lane.b32.xlu2 %v11920_v38, %s9924_s15 }
 0x6bf   : > { %3501 = vmatpush.bf16.xpose.msrb.mxu3 %v3422_v3  ;;  %v2279_v3 = vmul.f32 1.442695, %v2226_v15 }
 0x6c1   : > { %9054 = vpow2.f32 %v2279_v3  ;;  %v11942_v37 = vpop.xlane.xlu1 %2311  ;;  %v2328_v3 = vadd.f32 %v9049_v19, %v11671_v40  ;;  %v4108_v40 = vsel %vm1986_vm1, %v4049_v26, 0 }
 0x6c6   : > { %2538 = vmatmul.bf16.gmra.mxu3 %v2358_v49 }
 0x6c7   : > { %2326 = vadd.xlane.f32.xlu0 %v2325_v53  ;;  %v9055_v21 = vpop.eup %9054  ;;  %v11955_v53 = vpop.f32.mrf.mxu3 }
 0x6c8   : > { %v2360_v34 = vpack.c.bf16 %v9053_v61, %v9055_v21  ;;  %v11948_v15 = vpop.xlane.xlu2 %2314 }
 0x6c9   : > { %v4057_v38 = vpop.permute.xlu0 %4056 }
 0x6ca   : > { %v4120_v16 = vsel %vm1986_vm1, %v4057_v38, 0  ;;  %v2291_v38 = vmul.f32 1.442695, %v2232_v45 }
 0x6cb   : > { %4146 = vmatpush.bf16.xpose.msrb.mxu2 %v4120_v16  ;;  %v11951_v16 = vld [vmem:[#allocation5 + $0x68] sm:$0xff] }
 0x6cc   : > { %9056 = vpow2.f32 %v2291_v38  ;;  %15687 = vst [vmem:[#allocation27_spill] sm:$0xff] %v11951_v16 }
 0x6cd   : > { %9058 = vrcp.f32 %v11912_v5 }
 0x6ce   : > { %9060 = vrcp.f32 %v11914_v32 }
 0x6cf   : > { %v11961_v38 = vpop.f32.mrf.mxu3  ;;  %9062 = vrcp.f32 %v11930_v58 }
 0x6d0   : > { %v4053_v49 = vpop.permute.xlu2 %4052  ;;  %9064 = vrcp.f32 %v11942_v37 }
 0x6d1   : > { %v4114_v25 = vsel %vm1986_vm1, %v4053_v49, 0  ;;  %9066 = vrcp.f32 %v11948_v15 }
 0x6d2   : > { %v9057_v27 = vpop.eup %9056 }
 0x6d3   : > { %v2362_v45 = vpack.c.bf16 %v9057_v27, %v11752_v4  ;;  %v2340_v49 = vadd.f32 %v9057_v27, %v11759_v28 }
 0x6d6   : > { %2543 = vmatmul.bf16.gmra.mxu3 %v2360_v34  ;;  %v2331_v34 = vadd.f32 %v9055_v21, %v11695_v17  ;;  %v2364_v17 = vpack.c.bf16 %v11825_v18, %v11768_v11  ;;  %v11977_v21 = vld [vmem:[#allocation5 + $0x28] sm:$0xff]  ;;  %v4102_v11 = vsel %vm1986_vm1, %v11896_v29, 0  ;;  %v2334_v18 = vadd.f32 %v9053_v61, %v11697_v55  ;;  %v9059_v55 = vpop.eup %9058  ;;  %v12001_v61 = vld [vmem:[#allocation5 + $0x30] sm:$0xff] }
 0x6d7   : > { %v4099_v29 = vsel %vm1986_vm1, %v11926_v2, 0  ;;  %v9061_v2 = vpop.eup %9060 }
 0x6d9   : > { %v4055_v13 = vpop.permute.xlu1 %4054 }
 0x6da   : > { %v4117_v31 = vsel %vm1986_vm1, %v4055_v13, 0  ;;  %v4111_v13 = vsel %vm1986_vm1, %v4051_v43, 0  ;;  %v4105_v43 = vsel %vm1986_vm1, %v4047_v6, 0  ;;  %v11991_v6 = vld [vmem:[#allocation5 + $0x10] sm:$0xff] }
 0x6db   : > { %4454 = vrot.lane.b32.xlu0 %v11951_v16, %s9924_s15  ;;  %4147 = vmatpush.bf16.xpose.msrb.mxu2 %v4117_v31  ;;  %v11964_v31 = vpop.f32.mrf.mxu2  ;;  %v11967_v16 = vpop.f32.mrf.mxu3 }
 0x6e3   : > { %4148 = vmatpush.bf16.xpose.msrb.mxu2 %v4114_v25  ;;  %v11972_v4 = vpop.f32.mrf.mxu2 }
 0x6e4   : > { %2329 = vadd.xlane.f32.xlu1 %v2328_v3 }
 0x6e6   : > { %2548 = vmatmul.bf16.gmra.mxu3 %v2362_v45 }
 0x6e7   : > { %2332 = vadd.xlane.f32.xlu2 %v2331_v34 }
 0x6eb   : > { %4149 = vmatpush.bf16.xpose.msrb.mxu2 %v4111_v13  ;;  %v11981_v28 = vpop.f32.mrf.mxu2  ;;  %v12011_v13 = vpop.permute.xlu1 %4060 }
 0x6ef   : > { %2341 = vadd.xlane.f32.xlu2 %v2340_v49  ;;  %v12014_v49 = vpop.permute.xlu2 %4058 }
 0x6f3   : > { %4150 = vmatpush.bf16.xpose.msrb.mxu2 %v4108_v40  ;;  %v11995_v27 = vpop.f32.mrf.mxu2 }
 0x6f6   : > { %2553 = vmatmul.bf16.gmra.mxu3 %v2364_v17  ;;  %v12018_v17 = vld [vmem:[#allocation5 + $0x20] sm:$0xff] }
 0x6f9   : > { %v11974_v19 = vpop.f32.mrf.mxu3 }
 0x6fb   : > { %4151 = vmatpush.bf16.xpose.msrb.mxu2 %v4105_v43  ;;  %v12009_v34 = vpop.f32.mrf.mxu2 }
 0x6fd   : > { %4452 = vrot.lane.b32.xlu1 %v11977_v21, %s9924_s15 }
 0x701   : > { %v11983_v26 = vpop.f32.mrf.mxu3 }
 0x703   : > { %4152 = vmatpush.bf16.xpose.msrb.mxu2 %v4102_v11  ;;  %v9063_v11 = vpop.eup %9062 }
 0x705   : > { %2335 = vadd.xlane.f32.xlu0 %v2334_v18 }
 0x706   : > { %8272 = vmatmul.msk.bf16.vlgmr.msra.gmra.mxu3 %vm1986_vm1, %v11262_v51 }
 0x707   : > { %4456 = vrot.lane.b32.xlu2 %v11991_v6, %s9924_s15 }
 0x709   : > { %v2519_v25 = vpop.f32.mrf.mxu3 }
 0x70a   : > { %v2520_v3 = vadd.f32 %v2519_v25, %v11721_v36 }
 0x70b   : > { %4153 = vmatpush.bf16.xpose.msrb.mxu2 %v4099_v29 }
 0x70c   : > { %v2575_v5 = vmul.f32 %v9059_v55, %v2520_v3  ;;  %v2321_v18 = vpop.xlane.xlu1 %2320  ;;  %v12031_v55 = vld [vmem:[#allocation5 + $0x58] sm:$0xff] }
 0x70e   : > { %v2591_v51 = vpack.c.bf16 %v2575_v5, %v2575_v5  ;;  %v12036_v5 = vld [vmem:[#allocation5 + $0x70] sm:$0xff] }
 0x70f   : > { %4462 = vrot.lane.b32.xlu2 %v12001_v61, %s9924_s15 }
 0x710   : > { %2608 = vst.msk [vmem:[#allocation6] sm:$0xf] %vm2607_vm2, %v2591_v51  ;;  %v12040_v51 = vpop.permute.xlu0 %4062 }
 0x711   : > { %v2521_v45 = vpop.f32.mrf.mxu3  ;;  %v2324_v29 = vpop.xlane.xlu2 %2323 }
 0x712   : > { %v2522_v36 = vadd.f32 %v2521_v45, %v11732_v7  ;;  %8296 = vmatmul.msk.bf16.vlgmr.msrb.gmra.mxu2 %vm1986_vm1, %v11789_v9  ;;  %v12023_v7 = vld [vmem:[#allocation5 + $0x40] sm:$0xff]  ;;  %v9065_v45 = vpop.eup %9064 }
 0x714   : > { %v2576_v32 = vmul.f32 %v9061_v2, %v2522_v36 }
 0x716   : > { %v2592_v40 = vpack.c.bf16 %v2576_v32, %v2576_v32  ;;  %8273 = vmatmul.msk.bf16.gmra.mxu3 %vm1986_vm1, %v11306_v50  ;;  %v12029_v50 = vpop.f32.mrf.mxu2 }
 0x717   : > { %4468 = vrot.lane.b32.xlu2 %v12018_v17, %s9924_s15 }
 0x718   : > { %2609 = vst.msk [vmem:[#allocation6 + $0x4] sm:$0xf] %vm2607_vm2, %v2592_v40  ;;  %v12050_v40 = vld [vmem:[#allocation5 + $0x60] sm:$0xff] }
 0x719   : > { %4458 = vrot.lane.b32.xlu0 %v12023_v7, %s9924_s15  ;;  %v2524_v43 = vpop.f32.mrf.mxu3 }
 0x71a   : > { %v2525_v58 = vadd.f32 %v2524_v43, %v11742_v33 }
 0x71c   : > { %v2577_v25 = vmul.f32 %v9063_v11, %v2525_v58  ;;  %v2318_v11 = vpop.xlane.xlu0 %2317 }
 0x71d   : > { %9068 = vrcp.f32 %v2318_v11 }
 0x71e   : > { %v2593_v3 = vpack.c.bf16 %v2577_v25, %v2577_v25  ;;  %v12057_v43 = vpop.f32.mrf.mxu2  ;;  %v9067_v25 = vpop.eup %9066  ;;  %9070 = vrcp.f32 %v2321_v18 }
 0x71f   : > { %4474 = vrot.lane.b32.xlu2 %v12031_v55, %s9924_s15  ;;  %9072 = vrcp.f32 %v2324_v29 }
 0x720   : > { %2610 = vst.msk [vmem:[#allocation6 + $0x8] sm:$0xf] %vm2607_vm2, %v2593_v3 }
 0x721   : > { %4464 = vrot.lane.b32.xlu0 %v12036_v5, %s9924_s15  ;;  %v2526_v33 = vpop.f32.mrf.mxu3 }
 0x722   : > { %v2527_v37 = vadd.f32 %v2526_v33, %v11757_v35  ;;  %8297 = vmatmul.msk.bf16.gmra.mxu2 %vm1986_vm1, %v11880_v0  ;;  %v12055_v35 = vpop.permute.xlu2 %4064 }
 0x724   : > { %v2578_v36 = vmul.f32 %v9065_v45, %v2527_v37  ;;  %v12045_v2 = vpop.permute.xlu1 %4066  ;;  %v12062_v45 = vld [vmem:[#allocation4 + $0x50] sm:$0xff] }
 0x726   : > { %v2594_v32 = vpack.c.bf16 %v2578_v36, %v2578_v36  ;;  %8274 = vmatmul.msk.bf16.gmra.mxu3 %vm1986_vm1, %v11304_v47 }
 0x727   : > { %4480 = vrot.lane.b32.xlu2 %v12050_v40, %s9924_s15  ;;  %2338 = vadd.xlane.f32.xlu1 %v11755_v62 }
 0x728   : > { %2611 = vst.msk [vmem:[#allocation6 + $0xc] sm:$0xf] %vm2607_vm2, %v2594_v32  ;;  %v12067_v32 = vpop.f32.mrf.mxu2 }
 0x729   : > { %v2529_v58 = vpop.f32.mrf.mxu3  ;;  %15688 = vst [vmem:[#allocation28_spill] sm:$0xff] %v12067_v32  ;;  %v15731_v32 = vld [vmem:[#allocation26_spill] sm:$0xff] }
 0x72a   : > { %v2530_v15 = vadd.f32 %v2529_v58, %v11766_v48  ;;  %v4071_v36 = vpop.permute.xlu2 %4070  ;;  %v9069_v58 = vpop.eup %9068 }
 0x72c   : > { %v2579_v3 = vmul.f32 %v9067_v25, %v2530_v15  ;;  %v4073_v47 = vpop.permute.xlu1 %4072  ;;  %v4141_v15 = vsel %vm1986_vm1, %v4071_v36, 0 }
 0x72d   : > { %v4144_v33 = vsel %vm1986_vm1, %v4073_v47, 0  ;;  %v4069_v47 = vpop.permute.xlu0 %4068 }
 0x72e   : > { %v2595_v37 = vpack.c.bf16 %v2579_v3, %v2579_v3  ;;  %4195 = vmatpush.bf16.xpose.msra.mxu3 %v4144_v33  ;;  %v12075_v3 = vld [vmem:[#allocation4 + $0x18] sm:$0xff] }
 0x72f   : > { %4751 = vrot.lane.b32.xlu2 %v12062_v45, %s9925_s17 }
 0x730   : > { %2612 = vst.msk [vmem:[#allocation6 + $0x10] sm:$0xf] %vm2607_vm2, %v2595_v37  ;;  %v9071_v37 = vpop.eup %9070 }
 0x731   : > { %v2531_v62 = vpop.f32.mrf.mxu3 }
 0x732   : > { %v2532_v48 = vadd.f32 %v2531_v62, %v11777_v30  ;;  %8298 = vmatmul.msk.bf16.gmra.mxu2 %vm1986_vm1, %v11877_v46  ;;  %v12081_v62 = vpop.f32.mrf.mxu2 }
 0x733   : > { %15689 = vst [vmem:[#allocation32_spill] sm:$0xff] %v12081_v62 }
 0x734   : > { %v2580_v11 = vmul.f32 %v9069_v58, %v2532_v48  ;;  %v12084_v48 = vld [vmem:[#allocation4 + $0x58] sm:$0xff]  ;;  %v12088_v58 = vld [vmem:[#allocation5 + $0x48] sm:$0xff] }
 0x736   : > { %v2596_v25 = vpack.c.bf16 %v2580_v11, %v2580_v11  ;;  %8275 = vmatmul.msk.bf16.gmra.mxu3 %vm1986_vm1, %v11280_v59  ;;  %v4138_v59 = vsel %vm1986_vm1, %v4069_v47, 0 }
 0x737   : > { %4749 = vrot.lane.b32.xlu2 %v12075_v3, %s9925_s17  ;;  %4196 = vmatpush.bf16.xpose.msra.mxu3 %v4141_v15  ;;  %v9073_v15 = vpop.eup %9072 }
 0x738   : > { %2613 = vst.msk [vmem:[#allocation6 + $0x14] sm:$0xf] %vm2607_vm2, %v2596_v25 }
 0x739   : > { %v2534_v30 = vpop.f32.mrf.mxu3 }
 0x73a   : > { %v2535_v33 = vadd.f32 %v2534_v30, %v11785_v63  ;;  %v2327_v11 = vpop.xlane.xlu0 %2326  ;;  %v12096_v30 = vpop.f32.mrf.mxu2 }
 0x73b   : > { %9074 = vrcp.f32 %v2327_v11  ;;  %15690 = vst [vmem:[#allocation35_spill] sm:$0xff] %v12096_v30  ;;  %v12117_v11 = vld [vmem:[#allocation5 + $0x18] sm:$0xff] }
 0x73c   : > { %v2581_v18 = vmul.f32 %v9071_v37, %v2535_v33  ;;  %v4135_v33 = vsel %vm1986_vm1, %v12045_v2, 0  ;;  %v4132_v2 = vsel %vm1986_vm1, %v12055_v35, 0  ;;  %v12129_v35 = vld [vmem:[%s11058_s11 + $0x10] sm:$0xff] }
 0x73e   : > { %v2597_v36 = vpack.c.bf16 %v2581_v18, %v2581_v18 }
 0x73f   : > { %4747 = vrot.lane.b32.xlu2 %v12084_v48, %s9925_s17  ;;  %4197 = vmatpush.bf16.xpose.msra.mxu3 %v4138_v59 }
 0x740   : > { %4460 = vrot.lane.b32.xlu1 %v12088_v58, %s9924_s15  ;;  %2614 = vst.msk [vmem:[#allocation6 + $0x18] sm:$0xf] %vm2607_vm2, %v2597_v36 }
 0x741   : > { %v2536_v63 = vpop.f32.mrf.mxu3  ;;  %v9075_v36 = vpop.eup %9074 }
 0x742   : > { %v2537_v29 = vadd.f32 %v2536_v63, %v11795_v20  ;;  %8299 = vmatmul.msk.bf16.gmra.mxu2 %vm1986_vm1, %v11803_v42  ;;  %v12104_v20 = vld [vmem:[#allocation5 + $0x38] sm:$0xff]  ;;  %v12115_v63 = vpop.f32.mrf.mxu2 }
 0x743   : > { %15691 = vst [vmem:[#allocation36_spill] sm:$0xff] %v12115_v63  ;;  %v15712_v63 = vld [vmem:[#allocation17_spill] sm:$0xff] }
 0x744   : > { %v2582_v25 = vmul.f32 %v9073_v15, %v2537_v29 }
 0x746   : > { %v2598_v47 = vpack.c.bf16 %v2582_v25, %v2582_v25  ;;  %8276 = vmatmul.msk.bf16.gmra.mxu3 %vm1986_vm1, %v11318_v8 }
 0x747   : > { %4761 = vrot.lane.b32.xlu2 %v11821_v10, %s9925_s17  ;;  %4198 = vmatpush.bf16.xpose.msra.mxu3 %v4135_v33 }
 0x748   : > { %4466 = vrot.lane.b32.xlu1 %v12104_v20, %s9924_s15  ;;  %2615 = vst.msk [vmem:[#allocation6 + $0x1c] sm:$0xf] %vm2607_vm2, %v2598_v47 }
 0x749   : > { %v2539_v37 = vpop.f32.mrf.mxu3 }
 0x74a   : > { %v2540_v18 = vadd.f32 %v2539_v37, %v11928_v57  ;;  %v12133_v25 = vpop.f32.mrf.mxu2 }
 0x74b   : > { %2344 = vadd.xlane.f32.xlu0 %v11775_v54  ;;  %v4129_v54 = vsel %vm1986_vm1, %v12040_v51, 0  ;;  %15692 = vst [vmem:[#allocation37_spill] sm:$0xff] %v12133_v25  ;;  %v9789_v51 = vld [vmem:[%s11058_s11 + $0x28] sm:$0xff] }
 0x74c   : > { %v2583_v8 = vmul.f32 %v9075_v36, %v2540_v18 }
 0x74e   : > { %v2599_v59 = vpack.c.bf16 %v2583_v8, %v2583_v8  ;;  %v12141_v8 = vld [vmem:[#allocation5 + $0x78] sm:$0xff] }
 0x74f   : > { %4759 = vrot.lane.b32.xlu2 %v11827_v12, %s9925_s17  ;;  %4199 = vmatpush.bf16.xpose.msra.mxu3 %v4132_v2 }
 0x750   : > { %4472 = vrot.lane.b32.xlu1 %v12117_v11, %s9924_s15  ;;  %2616 = vst.msk [vmem:[#allocation6 + $0x20] sm:$0xf] %vm2607_vm2, %v2599_v59 }
 0x751   : > { %v2541_v57 = vpop.f32.mrf.mxu3 }
 0x752   : > { %8300 = vmatmul.msk.bf16.gmra.mxu2 %vm1986_vm1, %v11894_v39  ;;  %v2542_v33 = vadd.f32 %v2541_v57, %v11940_v22 }
 0x756   : > { %8277 = vmatmul.msk.bf16.gmra.mxu3 %vm1986_vm1, %v11290_v1  ;;  %v4126_v1 = vsel %vm1986_vm1, %v12011_v13, 0  ;;  %v12148_v13 = vpop.f32.mrf.mxu2 }
 0x757   : > { %4731 = vrot.lane.b32.xlu2 %v12129_v35, %s9925_s17  ;;  %4200 = vmatpush.bf16.xpose.msra.mxu3 %v4129_v54  ;;  %v2330_v29 = vpop.xlane.xlu1 %2329  ;;  %15693 = vst [vmem:[#allocation38_spill] sm:$0xff] %v12148_v13 }
 0x758   : > { %9076 = vrcp.f32 %v2330_v29  ;;  %v12157_v29 = vld [vmem:[#allocation5] sm:$0xff] }
 0x759   : > { %v2544_v15 = vpop.f32.mrf.mxu3 }
 0x75a   : > { %v2333_v47 = vpop.xlane.xlu2 %2332  ;;  %v2545_v36 = vadd.f32 %v2544_v15, %v11946_v56  ;;  %v4123_v56 = vsel %vm1986_vm1, %v12014_v49, 0  ;;  %v12169_v49 = vpop.permute.xlu0 %4454 }
 0x75b   : > { %9078 = vrcp.f32 %v2333_v47  ;;  %15695 = vst [vmem:[#allocation40_spill] sm:$0xff] %v12169_v49  ;;  %v9794_v49 = vld [vmem:[%s11058_s11 + $0x8] sm:$0xff] }
 0x75e   : > { %v9077_v37 = vpop.eup %9076 }
 0x75f   : > { %4737 = vrot.lane.b32.xlu2 %v9789_v51, %s9925_s17  ;;  %4201 = vmatpush.bf16.xpose.msra.mxu3 %v4126_v1  ;;  %v2584_v18 = vmul.f32 %v9077_v37, %v2542_v33  ;;  %v12161_v33 = vpop.f32.mrf.mxu2 }
 0x760   : > { %4470 = vrot.lane.b32.xlu0 %v12141_v8, %s9924_s15  ;;  %15694 = vst [vmem:[#allocation39_spill] sm:$0xff] %v12161_v33 }
 0x761   : > { %v9079_v2 = vpop.eup %9078  ;;  %v2546_v59 = vpop.f32.mrf.mxu3  ;;  %v2600_v54 = vpack.c.bf16 %v2584_v18, %v2584_v18 }
 0x762   : > { %v2585_v22 = vmul.f32 %v9079_v2, %v2545_v36  ;;  %8301 = vmatmul.msk.bf16.gmra.mxu2 %vm1986_vm1, %v11890_v14  ;;  %v2342_v47 = vpop.xlane.xlu2 %2341 }
 0x763   : > { %2617 = vst.msk [vmem:[#allocation6 + $0x24] sm:$0xf] %vm2607_vm2, %v2600_v54  ;;  %9080 = vrcp.f32 %v2342_v47  ;;  %v15697_v54 = vld [vmem:[#allocation12_spill] sm:$0xff] }
 0x764   : > { %v2601_v57 = vpack.c.bf16 %v2585_v22, %v2585_v22 }
 0x766   : > { %8278 = vmatmul.msk.bf16.gmra.mxu3 %vm1986_vm1, %v15643_v24  ;;  %2618 = vst.msk [vmem:[#allocation6 + $0x28] sm:$0xf] %vm2607_vm2, %v2601_v57  ;;  %v12165_v24 = vld [vmem:[#allocation5 + $0x50] sm:$0xff]  ;;  %v15698_v57 = vld [vmem:[#allocation13_spill] sm:$0xff] }
 0x767   : > { %5456 = vrot.lane.b32.xlu2 %v11807_v52, %s9926_s18  ;;  %4202 = vmatpush.bf16.xpose.msra.mxu3 %v4123_v56  ;;  %v12178_v2 = vpop.f32.mrf.mxu2  ;;  %v2547_v56 = vadd.f32 %v2546_v59, %v11955_v53  ;;  %v15703_v53 = vld [vmem:[#allocation10_spill] sm:$0xff]  ;;  %v15704_v59 = vld [vmem:[#allocation8_spill] sm:$0xff] }
 0x768   : > { %4476 = vrot.lane.b32.xlu0 %v12157_v29, %s9924_s15  ;;  %15696 = vst [vmem:[#allocation41_spill] sm:$0xff] %v12178_v2 }
 0x769   : > { %v2549_v15 = vpop.f32.mrf.mxu3  ;;  %v9081_v51 = vpop.eup %9080 }
 0x76f   : > { %5470 = vrot.lane.b32.xlu2 %v11869_v44, %s9926_s18 }
 0x770   : > { %4482 = vrot.lane.b32.xlu0 %v12165_v24, %s9924_s15 }
 0x771   : > { %v2551_v37 = vpop.f32.mrf.mxu3 }
 0x772   : > { %v2552_v1 = vadd.f32 %v2551_v37, %v11967_v16  ;;  %8302 = vmatmul.msk.bf16.gmra.mxu2 %vm1986_vm1, %v11882_v23 }
 0x774   : > { %v2588_v18 = vmul.f32 %v9081_v51, %v2552_v1  ;;  %v12193_v51 = vpop.f32.mrf.mxu2 }
 0x775   : > { %15700 = vst [vmem:[#allocation12_spill] sm:$0xff] %v12193_v51 }
 0x776   : > { %v2604_v36 = vpack.c.bf16 %v2588_v18, %v2588_v18  ;;  %8279 = vmatmul.msk.bf16.gmra.mxu3 %vm1986_vm1, %v15648_v41  ;;  %v15699_v41 = vld [vmem:[#allocation33_spill] sm:$0xff]  ;;  %v15701_v18 = vld [vmem:[#allocation30_spill] sm:$0xff] }
 0x777   : > { %5468 = vrot.lane.b32.xlu2 %v11898_v60, %s9926_s18 }
 0x778   : > { %4757 = vrot.lane.b32.xlu0 %v15697_v54, %s9925_s17  ;;  %v2336_v22 = vpop.xlane.xlu0 %2335  ;;  %2621 = vst.msk [vmem:[#allocation6 + $0x34] sm:$0xf] %vm2607_vm2, %v2604_v36 }
 0x779   : > { %9082 = vrcp.f32 %v2336_v22  ;;  %v12183_v16 = vpop.f32.mrf.mxu3  ;;  %v15702_v22 = vld [vmem:[#allocation18_spill] sm:$0xff] }
 0x77a   : > { %2347 = vadd.xlane.f32.xlu1 %v15698_v57  ;;  %v12206_v57 = vpop.permute.xlu2 %4456 }
 0x77b   : > { %15705 = vst [vmem:[#allocation13_spill] sm:$0xff] %v12206_v57 }
 0x77f   : > { %v9083_v47 = vpop.eup %9082  ;;  %5466 = vrot.lane.b32.xlu2 %v15699_v41, %s9926_s18 }
 0x780   : > { %4755 = vrot.lane.b32.xlu0 %v11807_v52, %s9925_s17  ;;  %v2586_v37 = vmul.f32 %v9083_v47, %v2547_v56  ;;  %v12214_v47 = vpop.permute.xlu1 %4452 }
 0x781   : > { %v12191_v1 = vpop.f32.mrf.mxu3  ;;  %15706 = vst [vmem:[#allocation33_spill] sm:$0xff] %v12214_v47  ;;  %v15709_v47 = vld [vmem:[#allocation29_spill] sm:$0xff] }
 0x782   : > { %8303 = vmatmul.msk.bf16.gmra.mxu2 %vm1986_vm1, %v15701_v18  ;;  %v2602_v36 = vpack.c.bf16 %v2586_v37, %v2586_v37  ;;  %v12216_v37 = vld [vmem:[#allocation5 + $0x8] sm:$0xff]  ;;  %v2557_v25 = vadd.f32 %v12191_v1, %v11983_v26 }
 0x784   : > { %2619 = vst.msk [vmem:[#allocation6 + $0x2c] sm:$0xf] %vm2607_vm2, %v2602_v36  ;;  %v15707_v36 = vld [vmem:[#allocation21_spill] sm:$0xff] }
 0x786   : > { %8288 = vmatmul.msk.bf16.vlgmr.msrb.gmra.mxu3 %vm1986_vm1, %v15702_v22  ;;  %v12222_v22 = vpop.permute.xlu2 %4462 }
 0x787   : > { %5464 = vrot.lane.b32.xlu2 %v15703_v53, %s9926_s18  ;;  %15708 = vst [vmem:[#allocation30_spill] sm:$0xff] %v12222_v22 }
 0x788   : > { %4753 = vrot.lane.b32.xlu0 %v15704_v59, %s9925_s17 }
 0x789   : > { %v12204_v52 = vpop.f32.mrf.mxu3 }
 0x78f   : > { %5462 = vrot.lane.b32.xlu2 %v11821_v10, %s9926_s18 }
 0x790   : > { %4767 = vrot.lane.b32.xlu0 %v11898_v60, %s9925_s17 }
 0x791   : > { %v12212_v56 = vpop.f32.mrf.mxu3 }
 0x793   : > { %4478 = vrot.lane.b32.xlu1 %v12216_v37, %s9924_s15 }
 0x796   : > { %8289 = vmatmul.msk.bf16.gmra.mxu3 %vm1986_vm1, %v15707_v36  ;;  %v2550_v36 = vadd.f32 %v2549_v15, %v11961_v38  ;;  %v9795_v38 = vld [vmem:[%s11058_s11] sm:$0xff] }
 0x797   : > { %5460 = vrot.lane.b32.xlu2 %v11827_v12, %s9926_s18  ;;  %v12237_v12 = vpop.permute.xlu2 %4468 }
 0x798   : > { %4765 = vrot.lane.b32.xlu0 %v15699_v41, %s9925_s17  ;;  %15710 = vst [vmem:[#allocation18_spill] sm:$0xff] %v12237_v12  ;;  %v15718_v12 = vld [vmem:[#allocation27_spill] sm:$0xff] }
 0x799   : > { %v12228_v10 = vpop.f32.mrf.mxu3 }
 0x79a   : > { %v2339_v60 = vpop.xlane.xlu1 %2338 }
 0x79b   : > { %9084 = vrcp.f32 %v2339_v60  ;;  %4773 = vrot.lane.b32.xlu1 %v15709_v47, %s9925_s17  ;;  %v15711_v60 = vld [vmem:[#allocation34_spill] sm:$0xff] }
 0x79f   : > { %5430 = vrot.lane.b32.xlu2 %v9794_v49, %s9926_s18 }
 0x7a0   : > { %4763 = vrot.lane.b32.xlu0 %v15703_v53, %s9925_s17  ;;  %v12252_v53 = vpop.permute.xlu2 %4474 }
 0x7a1   : > { %v9085_v41 = vpop.eup %9084  ;;  %v12239_v33 = vpop.f32.mrf.mxu3  ;;  %15713 = vst [vmem:[#allocation10_spill] sm:$0xff] %v12252_v53 }
 0x7a2   : > { %v2587_v57 = vmul.f32 %v9085_v41, %v2550_v36  ;;  %v15716_v41 = vld [vmem:[#allocation20_spill] sm:$0xff] }
 0x7a3   : > { %4771 = vrot.lane.b32.xlu1 %v15711_v60, %s9925_s17 }
 0x7a4   : > { %v2603_v22 = vpack.c.bf16 %v2587_v57, %v2587_v57  ;;  %v12256_v57 = vpop.permute.xlu0 %4458 }
 0x7a5   : > { %15714 = vst [vmem:[#allocation8_spill] sm:$0xff] %v12256_v57  ;;  %v12280_v57 = vld [vmem:[#allocation4 + $0x30] sm:$0xff] }
 0x7a6   : > { %8290 = vmatmul.msk.bf16.gmra.mxu3 %vm1986_vm1, %v15712_v63  ;;  %2620 = vst.msk [vmem:[#allocation6 + $0x30] sm:$0xf] %vm2607_vm2, %v2603_v22  ;;  %v12261_v63 = vld [vmem:[%s11058_s11 + $0x18] sm:$0xff]  ;;  %v9797_v22 = vld [vmem:[#allocation4] sm:$0xff] }
 0x7a7   : > { %5163 = vrot.lane.b32.xlu2 %v12001_v61, %s9925_s17 }
 0x7a8   : > { %4727 = vrot.lane.b32.xlu0 %v9795_v38, %s9925_s17  ;;  %v12268_v36 = vpop.permute.xlu2 %4480 }
 0x7a9   : > { %v12250_v15 = vpop.f32.mrf.mxu3  ;;  %15715 = vst [vmem:[#allocation21_spill] sm:$0xff] %v12268_v36 }
 0x7ab   : > { %4769 = vrot.lane.b32.xlu1 %v11869_v44, %s9925_s17 }
 0x7ac   : > { %v12272_v44 = vpop.permute.xlu0 %4464 }
 0x7ad   : > { %15717 = vst [vmem:[#allocation29_spill] sm:$0xff] %v12272_v44  ;;  %v15719_v44 = vld [vmem:[#allocation24_spill] sm:$0xff] }
 0x7af   : > { %5175 = vrot.lane.b32.xlu2 %v12031_v55, %s9925_s17  ;;  %v9798_v55 = vld [vmem:[%s11058_s11 + $0x30] sm:$0xff] }
 0x7b0   : > { %4733 = vrot.lane.b32.xlu0 %v12261_v63, %s9925_s17  ;;  %v12284_v36 = vpop.permute.xlu2 %4751 }
 0x7b1   : > { %v12265_v61 = vpop.f32.mrf.mxu3 }
 0x7b3   : > { %4745 = vrot.lane.b32.xlu1 %v9797_v22, %s9925_s17 }
 0x7b6   : > { %8291 = vmatmul.msk.bf16.gmra.mxu3 %vm1986_vm1, %v15716_v41  ;;  %v2555_v41 = vadd.f32 %v12183_v16, %v11974_v19  ;;  %v12307_v19 = vld [vmem:[%s11058_s11 + $0x20] sm:$0xff]  ;;  %v12313_v16 = vpop.permute.xlu1 %4460 }
 0x7b7   : > { %5155 = vrot.lane.b32.xlu2 %v15718_v12, %s9925_s17  ;;  %15720 = vst [vmem:[#allocation34_spill] sm:$0xff] %v12313_v16 }
 0x7b8   : > { %4739 = vrot.lane.b32.xlu0 %v9798_v55, %s9925_s17 }
 0x7b9   : > { %v12278_v53 = vpop.f32.mrf.mxu3 }
 0x7bb   : > { %4743 = vrot.lane.b32.xlu1 %v12280_v57, %s9925_s17 }
 0x7be   : > { %v2345_v51 = vpop.xlane.xlu0 %2344 }
 0x7bf   : > { %5169 = vrot.lane.b32.xlu2 %v12018_v17, %s9925_s17  ;;  %9086 = vrcp.f32 %v2345_v51  ;;  %v12301_v17 = vpop.permute.xlu2 %4749 }
 0x7c0   : > { %5458 = vrot.lane.b32.xlu0 %v15697_v54, %s9926_s18 }
 0x7c1   : > { %v12290_v12 = vpop.f32.mrf.mxu3 }
 0x7c3   : > { %4729 = vrot.lane.b32.xlu1 %v9794_v49, %s9925_s17 }
 0x7c5   : > { %v9087_v55 = vpop.eup %9086 }
 0x7c6   : > { %8292 = vmatmul.msk.bf16.gmra.mxu3 %vm1986_vm1, %v15719_v44  ;;  %v2589_v13 = vmul.f32 %v9087_v55, %v2555_v41  ;;  %v15722_v41 = vld [vmem:[#allocation19_spill] sm:$0xff] }
 0x7c7   : > { %6175 = vrot.lane.b32.xlu2 %v15709_v47, %s9927_s19 }
 0x7c8   : > { %5472 = vrot.lane.b32.xlu0 %v15711_v60, %s9926_s18  ;;  %v2605_v54 = vpack.c.bf16 %v2589_v13, %v2589_v13  ;;  %v12317_v60 = vpop.permute.xlu2 %4747  ;;  %v9801_v13 = vld [vmem:[%s11058_s11 + $0x38] sm:$0xff] }
 0x7c9   : > { %v12303_v49 = vpop.f32.mrf.mxu3 }
 0x7ca   : > { %2622 = vst.msk [vmem:[#allocation6 + $0x38] sm:$0xf] %vm2607_vm2, %v2605_v54  ;;  %v12331_v54 = vpop.permute.xlu1 %4466 }
 0x7cb   : > { %4735 = vrot.lane.b32.xlu1 %v12307_v19, %s9925_s17  ;;  %15724 = vst [vmem:[#allocation27_spill] sm:$0xff] %v12331_v54 }
 0x7d0   : > { %5454 = vrot.lane.b32.xlu0 %v15704_v59, %s9926_s18  ;;  %v12335_v16 = vpop.permute.xlu2 %4761 }
 0x7d1   : > { %v12315_v51 = vpop.f32.mrf.mxu3 }
 0x7d2   : > { %v12319_v44 = vpop.permute.xlu0 %4470 }
 0x7d3   : > { %15721 = vst [vmem:[#allocation17_spill] sm:$0xff] %v12319_v44  ;;  %4741 = vrot.lane.b32.xlu1 %v9801_v13, %s9925_s17 }
 0x7d6   : > { %8293 = vmatmul.msk.bf16.gmra.mxu3 %vm1986_vm1, %v15722_v41 }
 0x7d8   : > { %5452 = vrot.lane.b32.xlu0 %v12062_v45, %s9926_s18  ;;  %v12344_v45 = vpop.permute.xlu1 %4472  ;;  %v12346_v44 = vpop.permute.xlu2 %4759 }
 0x7d9   : > { %v12327_v55 = vpop.f32.mrf.mxu3  ;;  %15726 = vst [vmem:[#allocation19_spill] sm:$0xff] %v12344_v45  ;;  %v15729_v45 = vld [vmem:[#allocation9_spill] sm:$0xff] }
 0x7da   : > { %v12329_v59 = vpop.permute.xlu0 %4476 }
 0x7db   : > { %15723 = vst [vmem:[#allocation20_spill] sm:$0xff] %v12329_v59  ;;  %5474 = vrot.lane.b32.xlu1 %v15709_v47, %s9926_s18  ;;  %v15727_v59 = vld [vmem:[#allocation22_spill] sm:$0xff] }
 0x7e0   : > { %5450 = vrot.lane.b32.xlu0 %v12075_v3, %s9926_s18  ;;  %v12359_v2 = vpop.permute.xlu2 %4731 }
 0x7e1   : > { %v12339_v13 = vpop.f32.mrf.mxu3 }
 0x7e2   : > { %v12341_v41 = vpop.permute.xlu0 %4482 }
 0x7e3   : > { %15725 = vst [vmem:[#allocation24_spill] sm:$0xff] %v12341_v41  ;;  %5428 = vrot.lane.b32.xlu1 %v9795_v38, %s9926_s18  ;;  %v2848_v41 = vmax.f32 %v15729_v45, %v12228_v10 }
 0x7e6   : > { %8294 = vmatmul.msk.bf16.gmra.mxu3 %vm1986_vm1, %v15727_v59 }
 0x7e8   : > { %5448 = vrot.lane.b32.xlu0 %v12084_v48, %s9926_s18 }
 0x7e9   : > { %v12352_v47 = vpop.f32.mrf.mxu3 }
 0x7ea   : > { %15728 = vst [vmem:[#allocation22_spill] sm:$0xff] %v12352_v47  ;;  %v4758_v54 = vpop.permute.xlu0 %4757 }
 0x7eb   : > { %5432 = vrot.lane.b32.xlu1 %v12129_v35, %s9926_s18  ;;  %v4821_v3 = vsel %vm1986_vm1, %v4758_v54, 0 }
 0x7ec   : > { %4847 = vmatpush.bf16.xpose.msra.mxu2 %v4821_v3 }
 0x7ed   : > { %v2348_v38 = vpop.xlane.xlu1 %2347 }
 0x7ee   : > { %9088 = vrcp.f32 %v2348_v38  ;;  %v15730_v38 = vld [vmem:[#allocation31_spill] sm:$0xff] }
 0x7ef   : > { %v2857_v62 = vmax.f32 %v15730_v38, %v12265_v61 }
 0x7f0   : > { %5446 = vrot.lane.b32.xlu0 %v9797_v22, %s9926_s18  ;;  %2849 = vmax.xlane.f32.xlu2 %v2848_v41  ;;  %v12389_v41 = vpop.f32.mrf.mxu2 }
 0x7f1   : > { %v12362_v48 = vpop.f32.mrf.mxu3  ;;  %15733 = vst [vmem:[#allocation31_spill] sm:$0xff] %v12389_v41 }
 0x7f2   : > { %v4756_v59 = vpop.permute.xlu0 %4755 }
 0x7f3   : > { %5167 = vrot.lane.b32.xlu1 %v12104_v20, %s9925_s17  ;;  %v4818_v35 = vsel %vm1986_vm1, %v4756_v59, 0  ;;  %v12378_v20 = vpop.permute.xlu2 %4737 }
 0x7f4   : > { %v9089_v54 = vpop.eup %9088  ;;  %4848 = vmatpush.bf16.xpose.msra.mxu2 %v4818_v35 }
 0x7f5   : > { %v2590_v3 = vmul.f32 %v9089_v54, %v2557_v25 }
 0x7f6   : > { %8295 = vmatmul.msk.bf16.gmra.mxu3 %vm1986_vm1, %v15731_v32  ;;  %v2866_v32 = vmax.f32 %v11964_v31, %v12303_v49 }
 0x7f7   : > { %v2606_v22 = vpack.c.bf16 %v2590_v3, %v2590_v3 }
 0x7f8   : > { %5444 = vrot.lane.b32.xlu0 %v12280_v57, %s9926_s18  ;;  %2858 = vmax.xlane.f32.xlu2 %v2857_v62  ;;  %v12411_v3 = vpop.f32.mrf.mxu2 }
 0x7f9   : > { %v12375_v26 = vpop.f32.mrf.mxu3  ;;  %2623 = vst.msk [vmem:[#allocation6 + $0x3c] sm:$0xf] %vm2607_vm2, %v2606_v22 }
 0x7fa   : > { %v4754_v1 = vpop.permute.xlu0 %4753 }
 0x7fb   : > { %5183 = vrot.lane.b32.xlu1 %v12165_v24, %s9925_s17  ;;  %v4815_v25 = vsel %vm1986_vm1, %v4754_v1, 0  ;;  %v4812_v24 = vsel %vm1986_vm1, %v12284_v36, 0  ;;  %v12395_v59 = vpop.permute.xlu2 %5456  ;;  %v4809_v36 = vsel %vm1986_vm1, %v12301_v17, 0  ;;  %v4806_v17 = vsel %vm1986_vm1, %v12317_v60, 0 }
 0x7fc   : > { %4849 = vmatpush.bf16.xpose.msra.mxu2 %v4815_v25 }
 0x800   : > { %5165 = vrot.lane.b32.xlu0 %v12036_v5, %s9925_s17  ;;  %2867 = vmax.xlane.f32.xlu2 %v2866_v32  ;;  %v2875_v5 = vmax.f32 %v11995_v27, %v12339_v13 }
 0x801   : > { %v12387_v62 = vpop.f32.mrf.mxu3 }
 0x802   : > { %15732 = vst [vmem:[#allocation9_spill] sm:$0xff] %v12387_v62  ;;  %v4768_v57 = vpop.permute.xlu0 %4767 }
 0x803   : > { %5181 = vrot.lane.b32.xlu1 %v12050_v40, %s9925_s17  ;;  %v12415_v1 = vpop.permute.xlu2 %5470 }
 0x804   : > { %4850 = vmatpush.bf16.xpose.msra.mxu2 %v4812_v24 }
 0x805   : > { %v12397_v35 = vpop.permute.xlu1 %4478 }
 0x806   : > { %15734 = vst [vmem:[#allocation26_spill] sm:$0xff] %v12397_v35  ;;  %8304 = vmatmul.msk.bf16.vlgmr.msra.gmra.mxu3 %vm1986_vm1, %v11789_v9  ;;  %v2884_v9 = vmax.f32 %v12057_v43, %v12375_v26 }
 0x808   : > { %5177 = vrot.lane.b32.xlu0 %v12157_v29, %s9925_s17  ;;  %2876 = vmax.xlane.f32.xlu2 %v2875_v5  ;;  %v12431_v5 = vpop.f32.mrf.mxu2 }
 0x809   : > { %v12405_v54 = vpop.f32.mrf.mxu3  ;;  %15736 = vst [vmem:[#allocation43_spill] sm:$0xff] %v12431_v5 }
 0x80a   : > { %v4766_v40 = vpop.permute.xlu0 %4765 }
 0x80b   : > { %5179 = vrot.lane.b32.xlu1 %v12216_v37, %s9925_s17 }
 0x80c   : > { %4851 = vmatpush.bf16.xpose.msra.mxu2 %v4809_v36  ;;  %v12433_v36 = vpop.permute.xlu2 %5468 }
 0x80d   : > { %v4774_v22 = vpop.permute.xlu1 %4773 }
 0x80e   : > { %v4845_v29 = vsel %vm1986_vm1, %v4774_v22, 0 }
 0x80f   : > { %4896 = vmatpush.bf16.xpose.msrb.mxu3 %v4845_v29 }
 0x810   : > { %5159 = vrot.lane.b32.xlu0 %v12023_v7, %s9925_s17  ;;  %2885 = vmax.xlane.f32.xlu2 %v2884_v9  ;;  %v12446_v9 = vpop.f32.mrf.mxu2 }
 0x811   : > { %v12420_v37 = vpop.f32.mrf.mxu3  ;;  %15738 = vst [vmem:[#allocation45_spill] sm:$0xff] %v12446_v9 }
 0x812   : > { %15735 = vst [vmem:[#allocation42_spill] sm:$0xff] %v12420_v37  ;;  %v4764_v25 = vpop.permute.xlu0 %4763  ;;  %v3546_v24 = vmax.f32 %v12096_v30, %v12420_v37 }
 0x813   : > { %5161 = vrot.lane.b32.xlu1 %v12088_v58, %s9925_s17 }
 0x814   : > { %4852 = vmatpush.bf16.xpose.msra.mxu2 %v4806_v17 }
 0x815   : > { %v4772_v32 = vpop.permute.xlu1 %4771 }
 0x816   : > { %8305 = vmatmul.msk.bf16.gmra.mxu3 %vm1986_vm1, %v11880_v0  ;;  %v4842_v7 = vsel %vm1986_vm1, %v4772_v32, 0 }
 0x817   : > { %4897 = vmatpush.bf16.xpose.msrb.mxu3 %v4842_v7 }
 0x818   : > { %5173 = vrot.lane.b32.xlu0 %v12117_v11, %s9925_s17  ;;  %3547 = vmax.xlane.f32.xlu2 %v3546_v24  ;;  %v12450_v11 = vpop.permute.xlu2 %5466  ;;  %v4836_v24 = vsel %vm1986_vm1, %v4768_v57, 0  ;;  %v4833_v57 = vsel %vm1986_vm1, %v4766_v40, 0  ;;  %v4830_v40 = vsel %vm1986_vm1, %v4764_v25, 0 }
 0x819   : > { %v12437_v58 = vpop.f32.mrf.mxu3 }
 0x81a   : > { %15737 = vst [vmem:[#allocation44_spill] sm:$0xff] %v12437_v58  ;;  %v12439_v60 = vpop.permute.xlu0 %4727 }
 0x81b   : > { %5434 = vrot.lane.b32.xlu1 %v12261_v63, %s9926_s18 }
 0x81d   : > { %v4770_v22 = vpop.permute.xlu1 %4769 }
 0x81e   : > { %v4839_v0 = vsel %vm1986_vm1, %v4770_v22, 0 }
 0x81f   : > { %4898 = vmatpush.bf16.xpose.msrb.mxu3 %v4839_v0  ;;  %v12465_v0 = vpop.f32.mrf.mxu2 }
 0x820   : > { %5153 = vrot.lane.b32.xlu0 %v11977_v21, %s9925_s17  ;;  %v9802_v21 = vld [vmem:[#allocation4 + $0x48] sm:$0xff] }
 0x821   : > { %v12448_v29 = vpop.f32.mrf.mxu3 }
 0x822   : > { %v12452_v17 = vpop.permute.xlu0 %4733 }
 0x823   : > { %5157 = vrot.lane.b32.xlu1 %v11991_v6, %s9925_s17  ;;  %v12469_v6 = vpop.permute.xlu2 %5464 }
 0x825   : > { %v4746_v32 = vpop.permute.xlu1 %4745 }
 0x826   : > { %8306 = vmatmul.msk.bf16.gmra.mxu3 %vm1986_vm1, %v11877_v46  ;;  %v4803_v63 = vsel %vm1986_vm1, %v4746_v32, 0 }
 0x827   : > { %4853 = vmatpush.bf16.xpose.msra.mxu2 %v4803_v63  ;;  %4899 = vmatpush.bf16.xpose.msrb.mxu3 %v4836_v24  ;;  %v12478_v37 = vpop.f32.mrf.mxu2 }
 0x828   : > { %6159 = vrot.lane.b32.xlu0 %v9802_v21, %s9927_s19  ;;  %15740 = vst [vmem:[#allocation47_spill] sm:$0xff] %v12478_v37  ;;  %v15744_v37 = vld [vmem:[#allocation11_spill] sm:$0xff] }
 0x829   : > { %v12461_v7 = vpop.f32.mrf.mxu3 }
 0x82a   : > { %v12463_v22 = vpop.permute.xlu0 %4739 }
 0x82b   : > { %5171 = vrot.lane.b32.xlu1 %v12141_v8, %s9925_s17  ;;  %v12482_v30 = vpop.permute.xlu2 %5462 }
 0x82d   : > { %v4744_v46 = vpop.permute.xlu1 %4743 }
 0x82e   : > { %v4800_v32 = vsel %vm1986_vm1, %v4744_v46, 0 }
 0x82f   : > { %4854 = vmatpush.bf16.xpose.msra.mxu2 %v4800_v32  ;;  %4900 = vmatpush.bf16.xpose.msrb.mxu3 %v4833_v57  ;;  %v9803_v32 = vld [vmem:[#allocation4 + $0x8] sm:$0xff]  ;;  %v5519_v57 = vsel %vm1986_vm1, %v12395_v59, 0 }
 0x831   : > { %v12473_v63 = vpop.f32.mrf.mxu3 }
 0x832   : > { %15739 = vst [vmem:[#allocation46_spill] sm:$0xff] %v12473_v63  ;;  %v5459_v24 = vpop.permute.xlu0 %5458  ;;  %v2845_v63 = vmax.f32 %v15744_v37, %v12212_v56 }
 0x833   : > { %5436 = vrot.lane.b32.xlu1 %v12307_v19, %s9926_s18  ;;  %v5522_v21 = vsel %vm1986_vm1, %v5459_v24, 0  ;;  %v12500_v25 = vpop.permute.xlu2 %5460 }
 0x835   : > { %v12480_v8 = vpop.permute.xlu1 %4729 }
 0x836   : > { %8307 = vmatmul.msk.bf16.gmra.mxu3 %vm1986_vm1, %v11803_v42  ;;  %8312 = vmatmul.msk.bf16.vlgmr.msra.gmra.mxu2 %vm1986_vm1, %v12439_v60  ;;  %v4827_v42 = vsel %vm1986_vm1, %v12335_v16, 0  ;;  %v4824_v16 = vsel %vm1986_vm1, %v12346_v44, 0 }
 0x837   : > { %5548 = vmatpush.bf16.xpose.msrb.mxu2 %v5522_v21  ;;  %4901 = vmatpush.bf16.xpose.msrb.mxu3 %v4830_v40  ;;  %v12498_v21 = vpop.f32.mrf.mxu2 }
 0x838   : > { %15741 = vst [vmem:[#allocation48_spill] sm:$0xff] %v12498_v21 }
 0x839   : > { %v12489_v46 = vpop.f32.mrf.mxu3 }
 0x83a   : > { %v5473_v19 = vpop.permute.xlu0 %5472 }
 0x83b   : > { %6157 = vrot.lane.b32.xlu1 %v9803_v32, %s9927_s19 }
 0x83d   : > { %v12494_v24 = vpop.permute.xlu1 %4735 }
 0x83f   : > { %5549 = vmatpush.bf16.xpose.msrb.mxu2 %v5519_v57  ;;  %4902 = vmatpush.bf16.xpose.msrb.mxu3 %v4827_v42  ;;  %v12513_v59 = vpop.f32.mrf.mxu2  ;;  %v12515_v57 = vpop.permute.xlu2 %5430 }
 0x841   : > { %v12502_v40 = vpop.f32.mrf.mxu3 }
 0x842   : > { %15742 = vst [vmem:[#allocation49_spill] sm:$0xff] %v12502_v40  ;;  %v5455_v9 = vpop.permute.xlu0 %5454 }
 0x843   : > { %v5516_v41 = vsel %vm1986_vm1, %v5455_v9, 0 }
 0x845   : > { %v12505_v32 = vpop.permute.xlu1 %4741 }
 0x846   : > { %8308 = vmatmul.msk.bf16.gmra.mxu3 %vm1986_vm1, %v11894_v39  ;;  %8313 = vmatmul.msk.bf16.gmra.mxu2 %vm1986_vm1, %v12480_v8 }
 0x847   : > { %5550 = vmatpush.bf16.xpose.msrb.mxu2 %v5516_v41  ;;  %4903 = vmatpush.bf16.xpose.msrb.mxu3 %v4824_v16  ;;  %v12523_v5 = vpop.f32.mrf.mxu2  ;;  %v12526_v35 = vpop.permute.xlu2 %5163 }
 0x848   : > { %15745 = vst [vmem:[#allocation11_spill] sm:$0xff] %v12523_v5 }
 0x849   : > { %v12518_v41 = vpop.f32.mrf.mxu3  ;;  %15746 = vst [vmem:[#allocation51_spill] sm:$0xff] %v12526_v35 }
 0x84a   : > { %v5453_v42 = vpop.permute.xlu0 %5452  ;;  %15743 = vst [vmem:[#allocation50_spill] sm:$0xff] %v12518_v41 }
 0x84b   : > { %v5513_v9 = vsel %vm1986_vm1, %v5453_v42, 0 }
 0x84d   : > { %v5475_v21 = vpop.permute.xlu1 %5474 }
 0x84e   : > { %v5546_v39 = vsel %vm1986_vm1, %v5475_v21, 0  ;;  %v5543_v21 = vsel %vm1986_vm1, %v5473_v19, 0  ;;  %v15751_v19 = vld [vmem:[#allocation25_spill] sm:$0xff] }
 0x84f   : > { %5551 = vmatpush.bf16.xpose.msrb.mxu2 %v5513_v9  ;;  %5597 = vmatpush.bf16.xpose.msra.mxu3 %v5546_v39  ;;  %v12544_v5 = vpop.permute.xlu2 %5175 }
 0x850   : > { %15750 = vst [vmem:[#allocation53_spill] sm:$0xff] %v12544_v5 }
 0x851   : > { %v12530_v41 = vpop.f32.mrf.mxu3 }
 0x852   : > { %2846 = vmax.xlane.f32.xlu0 %v2845_v63  ;;  %v5451_v44 = vpop.permute.xlu0 %5450  ;;  %15747 = vst [vmem:[#allocation52_spill] sm:$0xff] %v12530_v41  ;;  %v15748_v63 = vld [vmem:[#allocation16_spill] sm:$0xff] }
 0x853   : > { %v5510_v16 = vsel %vm1986_vm1, %v5451_v44, 0  ;;  %v2854_v9 = vmax.f32 %v15748_v63, %v12250_v15  ;;  %v12539_v44 = vpop.f32.mrf.mxu2 }
 0x854   : > { %15749 = vst [vmem:[#allocation16_spill] sm:$0xff] %v12539_v44  ;;  %v15753_v44 = vld [vmem:[#allocation14_spill] sm:$0xff] }
 0x855   : > { %v12528_v42 = vpop.permute.xlu1 %5428  ;;  %v2842_v40 = vmax.f32 %v15753_v44, %v12204_v52 }
 0x856   : > { %8309 = vmatmul.msk.bf16.gmra.mxu3 %vm1986_vm1, %v11890_v14  ;;  %8314 = vmatmul.msk.bf16.gmra.mxu2 %vm1986_vm1, %v12359_v2  ;;  %v5540_v14 = vsel %vm1986_vm1, %v12415_v1, 0  ;;  %v5537_v1 = vsel %vm1986_vm1, %v12433_v36, 0  ;;  %v5534_v36 = vsel %vm1986_vm1, %v12450_v11, 0  ;;  %v5531_v11 = vsel %vm1986_vm1, %v12469_v6, 0 }
 0x857   : > { %5552 = vmatpush.bf16.xpose.msrb.mxu2 %v5510_v16  ;;  %5598 = vmatpush.bf16.xpose.msra.mxu3 %v5543_v21  ;;  %v2863_v21 = vmax.f32 %v15751_v19, %v12290_v12 }
 0x859   : > { %v12550_v58 = vpop.f32.mrf.mxu3 }
 0x85a   : > { %2855 = vmax.xlane.f32.xlu0 %v2854_v9  ;;  %v5449_v39 = vpop.permute.xlu0 %5448  ;;  %15752 = vst [vmem:[#allocation25_spill] sm:$0xff] %v12550_v58 }
 0x85b   : > { %v5507_v16 = vsel %vm1986_vm1, %v5449_v39, 0 }
 0x85d   : > { %v12542_v35 = vpop.permute.xlu1 %5432 }
 0x85f   : > { %5553 = vmatpush.bf16.xpose.msrb.mxu2 %v5507_v16  ;;  %5599 = vmatpush.bf16.xpose.msra.mxu3 %v5540_v14  ;;  %v12555_v16 = vpop.f32.mrf.mxu2  ;;  %v2872_v14 = vmax.f32 %v11981_v28, %v12327_v55 }
 0x862   : > { %2864 = vmax.xlane.f32.xlu0 %v2863_v21  ;;  %v5447_v9 = vpop.permute.xlu0 %5446  ;;  %v12567_v21 = vpop.permute.xlu2 %5155 }
 0x863   : > { %v5504_v39 = vsel %vm1986_vm1, %v5447_v9, 0  ;;  %15755 = vst [vmem:[#allocation54_spill] sm:$0xff] %v12567_v21  ;;  %v12569_v9 = vpop.f32.mrf.mxu3  ;;  %v2881_v21 = vmax.f32 %v12029_v50, %v12362_v48 }
 0x864   : > { %15756 = vst [vmem:[#allocation55_spill] sm:$0xff] %v12569_v9 }
 0x865   : > { %2843 = vmax.xlane.f32.xlu1 %v2842_v40  ;;  %v12557_v5 = vpop.permute.xlu1 %5167 }
 0x866   : > { %15754 = vst [vmem:[#allocation14_spill] sm:$0xff] %v12557_v5  ;;  %8310 = vmatmul.msk.bf16.gmra.mxu3 %vm1986_vm1, %v11882_v23  ;;  %8315 = vmatmul.msk.bf16.gmra.mxu2 %vm1986_vm1, %v12452_v17 }
 0x867   : > { %5554 = vmatpush.bf16.xpose.msrb.mxu2 %v5504_v39  ;;  %5600 = vmatpush.bf16.xpose.msra.mxu3 %v5537_v1  ;;  %v15757_v39 = vld [vmem:[#allocation15_spill] sm:$0xff]  ;;  %v12578_v1 = vpop.f32.mrf.mxu2 }
 0x868   : > { %v2851_v5 = vmax.f32 %v15757_v39, %v12239_v33  ;;  %15759 = vst [vmem:[#allocation56_spill] sm:$0xff] %v12578_v1  ;;  %v2869_v1 = vmax.f32 %v11972_v4, %v12315_v51 }
 0x86a   : > { %2873 = vmax.xlane.f32.xlu0 %v2872_v14  ;;  %v5445_v40 = vpop.permute.xlu0 %5444  ;;  %v12582_v14 = vpop.permute.xlu2 %5169 }
 0x86b   : > { %v5501_v23 = vsel %vm1986_vm1, %v5445_v40, 0  ;;  %15760 = vst [vmem:[#allocation57_spill] sm:$0xff] %v12582_v14  ;;  %v15762_v40 = vld [vmem:[#allocation23_spill] sm:$0xff] }
 0x86d   : > { %2852 = vmax.xlane.f32.xlu1 %v2851_v5  ;;  %v12574_v58 = vpop.permute.xlu1 %5183  ;;  %v12588_v5 = vpop.f32.mrf.mxu3 }
 0x86e   : > { %15758 = vst [vmem:[#allocation15_spill] sm:$0xff] %v12574_v58 }
 0x86f   : > { %5555 = vmatpush.bf16.xpose.msrb.mxu2 %v5501_v23  ;;  %5601 = vmatpush.bf16.xpose.msra.mxu3 %v5534_v36  ;;  %v2860_v23 = vmax.f32 %v15762_v40, %v12278_v53 }
 0x872   : > { %2882 = vmax.xlane.f32.xlu0 %v2881_v21  ;;  %v12584_v9 = vpop.permute.xlu0 %5165  ;;  %v12598_v21 = vpop.f32.mrf.mxu2 }
 0x873   : > { %15761 = vst [vmem:[#allocation58_spill] sm:$0xff] %v12584_v9 }
 0x874   : > { %15764 = vst [vmem:[#allocation59_spill] sm:$0xff] %v12598_v21 }
 0x875   : > { %2861 = vmax.xlane.f32.xlu1 %v2860_v23  ;;  %v12590_v58 = vpop.permute.xlu1 %5181  ;;  %v6176_v23 = vpop.permute.xlu2 %6175 }
 0x876   : > { %15763 = vst [vmem:[#allocation23_spill] sm:$0xff] %v12590_v58  ;;  %8311 = vmatmul.msk.bf16.gmra.mxu3 %vm1986_vm1, %v15701_v18  ;;  %8316 = vmatmul.msk.bf16.gmra.mxu2 %vm1986_vm1, %v12494_v24  ;;  %v12606_v58 = vpop.f32.mrf.mxu3  ;;  %v5528_v18 = vsel %vm1986_vm1, %v12482_v30, 0  ;;  %v6247_v21 = vsel %vm1986_vm1, %v6176_v23, 0  ;;  %v5525_v30 = vsel %vm1986_vm1, %v12500_v25, 0 }
 0x877   : > { %5602 = vmatpush.bf16.xpose.msra.mxu3 %v5531_v11  ;;  %v2878_v11 = vmax.f32 %v12009_v34, %v12352_v47 }
 0x87a   : > { %v12600_v36 = vpop.permute.xlu0 %5177  ;;  %v12612_v6 = vpop.f32.mrf.mxu2 }
 0x87b   : > { %15765 = vst [vmem:[#allocation60_spill] sm:$0xff] %v12600_v36 }
 0x87c   : > { %15768 = vst [vmem:[#allocation63_spill] sm:$0xff] %v12612_v6 }
 0x87d   : > { %2870 = vmax.xlane.f32.xlu1 %v2869_v1  ;;  %v12604_v14 = vpop.permute.xlu1 %5179  ;;  %v2850_v1 = vpop.xlane.xlu2 %2849 }
 0x87e   : > { %15766 = vst [vmem:[#allocation61_spill] sm:$0xff] %v12604_v14  ;;  %v2894_v6 = vsub.f32 %v15729_v45, %v2850_v1  ;;  %v2895_v23 = vsub.f32 %v12228_v10, %v2850_v1  ;;  %v15776_v10 = vld [vmem:[#allocation32_spill] sm:$0xff] }
 0x87f   : > { %5603 = vmatpush.bf16.xpose.msra.mxu3 %v5528_v18  ;;  %v12625_v18 = vpop.f32.mrf.mxu3  ;;  %v3543_v45 = vmax.f32 %v15776_v10, %v12405_v54 }
 0x880   : > { %15770 = vst [vmem:[#allocation65_spill] sm:$0xff] %v12625_v18  ;;  %v2930_v47 = vmul.f32 1.442695, %v2894_v6  ;;  %v2932_v25 = vmul.f32 1.442695, %v2895_v23 }
 0x882   : > { %v12610_v9 = vpop.permute.xlu0 %5159  ;;  %v12633_v14 = vpop.f32.mrf.mxu2  ;;  %9090 = vpow2.f32 %v2930_v47 }
 0x883   : > { %15767 = vst [vmem:[#allocation62_spill] sm:$0xff] %v12610_v9  ;;  %v15772_v9 = vld [vmem:[#allocation28_spill] sm:$0xff]  ;;  %9092 = vpow2.f32 %v2932_v25 }
 0x884   : > { %15773 = vst [vmem:[#allocation67_spill] sm:$0xff] %v12633_v14 }
 0x885   : > { %2879 = vmax.xlane.f32.xlu1 %v2878_v11  ;;  %v12617_v36 = vpop.permute.xlu1 %5161 }
 0x886   : > { %15769 = vst [vmem:[#allocation64_spill] sm:$0xff] %v12617_v36  ;;  %8317 = vmatmul.msk.bf16.gmra.mxu2 %vm1986_vm1, %v12378_v20  ;;  %8320 = vmatmul.msk.bf16.vlgmr.msrb.gmra.mxu3 %vm1986_vm1, %v12439_v60  ;;  %v2887_v36 = vmax.f32 %v15772_v9, %v12387_v62 }
 0x887   : > { %5604 = vmatpush.bf16.xpose.msra.mxu3 %v5525_v30  ;;  %v12637_v30 = vpop.f32.mrf.mxu3 }
 0x888   : > { %15774 = vst [vmem:[#allocation68_spill] sm:$0xff] %v12637_v30 }
 0x88a   : > { %v12629_v11 = vpop.permute.xlu0 %5173  ;;  %v12651_v47 = vpop.f32.mrf.mxu2 }
 0x88b   : > { %15771 = vst [vmem:[#allocation66_spill] sm:$0xff] %v12629_v11  ;;  %v2859_v11 = vpop.xlane.xlu2 %2858 }
 0x88c   : > { %15778 = vst [vmem:[#allocation70_spill] sm:$0xff] %v12651_v47  ;;  %v2900_v23 = vsub.f32 %v15730_v38, %v2859_v11  ;;  %v2901_v25 = vsub.f32 %v12265_v61, %v2859_v11  ;;  %v15782_v61 = vld [vmem:[#allocation37_spill] sm:$0xff] }
 0x88d   : > { %2888 = vmax.xlane.f32.xlu1 %v2887_v36  ;;  %v12635_v60 = vpop.permute.xlu1 %5434  ;;  %v12649_v36 = vpop.eup %9090  ;;  %v3552_v38 = vmax.f32 %v15782_v61, %v12448_v29 }
 0x88e   : > { %v12653_v6 = vpop.eup %9092  ;;  %v2944_v47 = vmul.f32 1.442695, %v2901_v25 }
 0x88f   : > { %6298 = vmatpush.bf16.xpose.msrb.mxu3 %v6247_v21  ;;  %v2992_v14 = vadd.f32 %v12653_v6, %v12649_v36 }
 0x892   : > { %v12639_v21 = vpop.permute.xlu0 %5153  ;;  %v12664_v62 = vpop.f32.mrf.mxu2 }
 0x893   : > { %15775 = vst [vmem:[#allocation69_spill] sm:$0xff] %v12639_v21  ;;  %v2868_v9 = vpop.xlane.xlu2 %2867 }
 0x894   : > { %15781 = vst [vmem:[#allocation73_spill] sm:$0xff] %v12664_v62 }
 0x895   : > { %3544 = vmax.xlane.f32.xlu1 %v3543_v45  ;;  %v12643_v1 = vpop.permute.xlu1 %5157 }
 0x896   : > { %15777 = vst [vmem:[#allocation32_spill] sm:$0xff] %v12643_v1  ;;  %8318 = vmatmul.msk.bf16.gmra.mxu2 %vm1986_vm1, %v12463_v22  ;;  %8321 = vmatmul.msk.bf16.gmra.mxu3 %vm1986_vm1, %v12480_v8  ;;  %v12660_v1 = vpop.f32.mrf.mxu3  ;;  %v2942_v8 = vmul.f32 1.442695, %v2900_v23  ;;  %v2907_v23 = vsub.f32 %v12303_v49, %v2868_v9 }
 0x897   : > { %15779 = vst [vmem:[#allocation71_spill] sm:$0xff] %v12660_v1 }
 0x898   : > { %9094 = vpow2.f32 %v2942_v8 }
 0x899   : > { %9096 = vpow2.f32 %v2944_v47  ;;  %v2906_v47 = vsub.f32 %v11964_v31, %v2868_v9  ;;  %v15786_v31 = vld [vmem:[#allocation41_spill] sm:$0xff] }
 0x89a   : > { %v6160_v45 = vpop.permute.xlu0 %6159  ;;  %v12682_v25 = vpop.f32.mrf.mxu2 }
 0x89b   : > { %v6223_v21 = vsel %vm1986_vm1, %v6160_v45, 0  ;;  %15784 = vst [vmem:[#allocation74_spill] sm:$0xff] %v12682_v25  ;;  %v2877_v9 = vpop.xlane.xlu2 %2876 }
 0x89c   : > { %6249 = vmatpush.bf16.xpose.msra.mxu2 %v6223_v21 }
 0x89d   : > { %2993 = vadd.xlane.f32.xlu1 %v2992_v14  ;;  %v12662_v18 = vpop.permute.xlu1 %5171 }
 0x89e   : > { %15780 = vst [vmem:[#allocation72_spill] sm:$0xff] %v12662_v18  ;;  %v12670_v45 = vpop.f32.mrf.mxu3  ;;  %v12676_v14 = vpop.eup %9094  ;;  %v2956_v18 = vmul.f32 1.442695, %v2907_v23 }
 0x89f   : > { %15783 = vst [vmem:[#allocation37_spill] sm:$0xff] %v12670_v45  ;;  %v12678_v21 = vpop.eup %9096  ;;  %v3561_v45 = vmax.f32 %v15786_v31, %v12489_v46 }
 0x8a0   : > { %v3001_v8 = vadd.f32 %v12678_v21, %v12676_v14 }
 0x8a2   : > { %v12691_v49 = vpop.f32.mrf.mxu2 }
 0x8a3   : > { %15787 = vst [vmem:[#allocation41_spill] sm:$0xff] %v12691_v49  ;;  %v3570_v49 = vmax.f32 %v12411_v3, %v12530_v41 }
 0x8a5   : > { %3553 = vmax.xlane.f32.xlu1 %v3552_v38  ;;  %v12668_v11 = vpop.permute.xlu1 %5436  ;;  %v2954_v38 = vmul.f32 1.442695, %v2906_v47 }
 0x8a6   : > { %8319 = vmatmul.msk.bf16.gmra.mxu2 %vm1986_vm1, %v12505_v32  ;;  %8322 = vmatmul.msk.bf16.gmra.mxu3 %vm1986_vm1, %v12359_v2  ;;  %v12687_v2 = vpop.f32.mrf.mxu3 }
 0x8a7   : > { %15785 = vst [vmem:[#allocation75_spill] sm:$0xff] %v12687_v2  ;;  %9098 = vpow2.f32 %v2954_v38 }
 0x8a8   : > { %9100 = vpow2.f32 %v2956_v18  ;;  %v2913_v18 = vsub.f32 %v12339_v13, %v2877_v9  ;;  %v2886_v13 = vpop.xlane.xlu2 %2885 }
 0x8aa   : > { %v2968_v38 = vmul.f32 1.442695, %v2913_v18 }
 0x8ad   : > { %3002 = vadd.xlane.f32.xlu1 %v3001_v8  ;;  %v6158_v62 = vpop.permute.xlu1 %6157  ;;  %v12697_v47 = vpop.eup %9098 }
 0x8ae   : > { %v6220_v1 = vsel %vm1986_vm1, %v6158_v62, 0  ;;  %v12699_v62 = vpop.eup %9100  ;;  %v12703_v23 = vpop.f32.mrf.mxu3 }
 0x8af   : > { %6250 = vmatpush.bf16.xpose.msra.mxu2 %v6220_v1  ;;  %v2912_v1 = vsub.f32 %v11995_v27, %v2877_v9  ;;  %15788 = vst [vmem:[#allocation76_spill] sm:$0xff] %v12703_v23 }
 0x8b1   : > { %v2966_v8 = vmul.f32 1.442695, %v2912_v1 }
 0x8b3   : > { %9102 = vpow2.f32 %v2966_v8 }
 0x8b4   : > { %9104 = vpow2.f32 %v2968_v38 }
 0x8b5   : > { %3562 = vmax.xlane.f32.xlu1 %v3561_v45  ;;  %v3010_v45 = vadd.f32 %v12699_v62, %v12697_v47 }
 0x8b6   : > { %8323 = vmatmul.msk.bf16.gmra.mxu3 %vm1986_vm1, %v12452_v17  ;;  %8328 = vmatmul.msk.bf16.vlgmr.msrb.gmra.mxu2 %vm1986_vm1, %v12528_v42  ;;  %v12707_v17 = vpop.f32.mrf.mxu2  ;;  %v12711_v25 = vpop.f32.mrf.mxu3 }
 0x8b7   : > { %15789 = vst [vmem:[#allocation77_spill] sm:$0xff] %v12707_v17 }
 0x8b8   : > { %15790 = vst [vmem:[#allocation78_spill] sm:$0xff] %v12711_v25 }
 0x8b9   : > { %v12719_v1 = vpop.eup %9102 }
 0x8ba   : > { %v12721_v18 = vpop.eup %9104 }
 0x8bd   : > { %3011 = vadd.xlane.f32.xlu1 %v3010_v45 }
 0x8be   : > { %v12723_v38 = vpop.f32.mrf.mxu2  ;;  %v12729_v25 = vpop.f32.mrf.mxu3 }
 0x8bf   : > { %15791 = vst [vmem:[#allocation79_spill] sm:$0xff] %v12723_v38 }
 0x8c0   : > { %15792 = vst [vmem:[#allocation80_spill] sm:$0xff] %v12729_v25 }
 0x8c5   : > { %v2847_v27 = vpop.xlane.xlu0 %2846  ;;  %3571 = vmax.xlane.f32.xlu1 %v3570_v49  ;;  %v2918_v49 = vsub.f32 %v12057_v43, %v2886_v13 }
 0x8c6   : > { %v2892_v9 = vsub.f32 %v15744_v37, %v2847_v27  ;;  %v2893_v23 = vsub.f32 %v12212_v56, %v2847_v27  ;;  %8324 = vmatmul.msk.bf16.gmra.mxu3 %vm1986_vm1, %v12494_v24  ;;  %8329 = vmatmul.msk.bf16.gmra.mxu2 %vm1986_vm1, %v12515_v57  ;;  %v2919_v37 = vsub.f32 %v12375_v26, %v2886_v13  ;;  %v12733_v13 = vpop.f32.mrf.mxu2 }
 0x8c7   : > { %v3019_v56 = vadd.f32 %v12721_v18, %v12719_v1  ;;  %v2978_v24 = vmul.f32 1.442695, %v2918_v49  ;;  %15793 = vst [vmem:[#allocation81_spill] sm:$0xff] %v12733_v13 }
 0x8c8   : > { %v2926_v45 = vmul.f32 1.442695, %v2892_v9  ;;  %v2928_v8 = vmul.f32 1.442695, %v2893_v23  ;;  %v2980_v17 = vmul.f32 1.442695, %v2919_v37 }
 0x8ca   : > { %9106 = vpow2.f32 %v2926_v45  ;;  %v3579_v45 = vmax.f32 %v12465_v0, %v12588_v5 }
 0x8cb   : > { %9108 = vpow2.f32 %v2928_v8 }
 0x8cc   : > { %9110 = vpow2.f32 %v2978_v24 }
 0x8cd   : > { %v2856_v27 = vpop.xlane.xlu0 %2855  ;;  %3020 = vadd.xlane.f32.xlu1 %v3019_v56  ;;  %9112 = vpow2.f32 %v2980_v17  ;;  %v12745_v17 = vpop.f32.mrf.mxu3 }
 0x8ce   : > { %v2898_v23 = vsub.f32 %v15748_v63, %v2856_v27  ;;  %v2899_v43 = vsub.f32 %v12250_v15, %v2856_v27  ;;  %15794 = vst [vmem:[#allocation82_spill] sm:$0xff] %v12745_v17  ;;  %v15795_v27 = vld [vmem:[#allocation38_spill] sm:$0xff] }
 0x8d0   : > { %v9107_v41 = vpop.eup %9106  ;;  %v2938_v8 = vmul.f32 1.442695, %v2898_v23  ;;  %v2940_v49 = vmul.f32 1.442695, %v2899_v43  ;;  %v3555_v23 = vmax.f32 %v15795_v27, %v12461_v7 }
 0x8d1   : > { %v9109_v9 = vpop.eup %9108 }
 0x8d2   : > { %v2989_v26 = vadd.f32 %v9109_v9, %v9107_v41  ;;  %v12741_v63 = vpop.eup %9110  ;;  %9114 = vpow2.f32 %v2938_v8 }
 0x8d3   : > { %v12743_v15 = vpop.eup %9112  ;;  %9116 = vpow2.f32 %v2940_v49 }
 0x8d4   : > { %2990 = vadd.xlane.f32.xlu2 %v2989_v26  ;;  %v3028_v26 = vadd.f32 %v12743_v15, %v12741_v63 }
 0x8d5   : > { %3580 = vmax.xlane.f32.xlu1 %v3579_v45  ;;  %v12753_v45 = vpop.f32.mrf.mxu2  ;;  %v2865_v49 = vpop.xlane.xlu0 %2864 }
 0x8d6   : > { %8325 = vmatmul.msk.bf16.gmra.mxu3 %vm1986_vm1, %v12378_v20  ;;  %8330 = vmatmul.msk.bf16.gmra.mxu2 %vm1986_vm1, %v12542_v35  ;;  %15796 = vst [vmem:[#allocation38_spill] sm:$0xff] %v12753_v45  ;;  %v12760_v13 = vpop.f32.mrf.mxu3 }
 0x8d7   : > { %15797 = vst [vmem:[#allocation83_spill] sm:$0xff] %v12760_v13 }
 0x8d8   : > { %v2844_v37 = vpop.xlane.xlu1 %2843  ;;  %v12755_v8 = vpop.eup %9114 }
 0x8d9   : > { %v2890_v56 = vsub.f32 %v15753_v44, %v2844_v37  ;;  %v2891_v24 = vsub.f32 %v12204_v52, %v2844_v37  ;;  %v12757_v44 = vpop.eup %9116  ;;  %v2904_v37 = vsub.f32 %v15751_v19, %v2865_v49 }
 0x8db   : > { %v2922_v20 = vmul.f32 1.442695, %v2890_v56  ;;  %v2924_v43 = vmul.f32 1.442695, %v2891_v24  ;;  %v2905_v56 = vsub.f32 %v12290_v12, %v2865_v49  ;;  %v2998_v24 = vadd.f32 %v12757_v44, %v12755_v8 }
 0x8dc   : > { %3556 = vmax.xlane.f32.xlu2 %v3555_v23  ;;  %v2950_v17 = vmul.f32 1.442695, %v2904_v37  ;;  %v15805_v37 = vld [vmem:[#allocation44_spill] sm:$0xff] }
 0x8dd   : > { %9118 = vpow2.f32 %v2922_v20  ;;  %3029 = vadd.xlane.f32.xlu1 %v3028_v26  ;;  %v3588_v20 = vmax.f32 %v12513_v59, %v12637_v30  ;;  %v2952_v25 = vmul.f32 1.442695, %v2905_v56  ;;  %v12771_v12 = vpop.f32.mrf.mxu2  ;;  %v15799_v30 = vld [vmem:[#allocation27_spill] sm:$0xff] }
 0x8de   : > { %9120 = vpow2.f32 %v2924_v43  ;;  %15798 = vst [vmem:[#allocation84_spill] sm:$0xff] %v12771_v12 }
 0x8df   : > { %9122 = vpow2.f32 %v2950_v17  ;;  %v15806_v17 = vld [vmem:[#allocation36_spill] sm:$0xff] }
 0x8e0   : > { %v2853_v52 = vpop.xlane.xlu1 %2852  ;;  %9124 = vpow2.f32 %v2952_v25  ;;  %v3549_v56 = vmax.f32 %v15806_v17, %v15805_v37  ;;  %v2874_v25 = vpop.xlane.xlu0 %2873 }
 0x8e1   : > { %v2896_v26 = vsub.f32 %v15757_v39, %v2853_v52  ;;  %v2897_v43 = vsub.f32 %v12239_v33, %v2853_v52  ;;  %v15800_v33 = vld [vmem:[#allocation24_spill] sm:$0xff]  ;;  %v12781_v52 = vpop.f32.mrf.mxu3 }
 0x8e3   : > { %v9119_v23 = vpop.eup %9118  ;;  %v2934_v49 = vmul.f32 1.442695, %v2896_v26  ;;  %v2936_v39 = vmul.f32 1.442695, %v2897_v43  ;;  %v15808_v26 = vld [vmem:[#allocation30_spill] sm:$0xff] }
 0x8e4   : > { %v9121_v45 = vpop.eup %9120  ;;  %2999 = vadd.xlane.f32.xlu2 %v2998_v24  ;;  %v3034_v38 = vpack.c.bf16 %v9107_v41, %v9119_v23  ;;  %v15809_v43 = vld [vmem:[#allocation26_spill] sm:$0xff] }
 0x8e5   : > { %3589 = vmax.xlane.f32.xlu1 %v3588_v20  ;;  %v2986_v19 = vadd.f32 %v9121_v45, %v9119_v23  ;;  %v3035_v13 = vpack.c.bf16 %v9109_v9, %v9121_v45  ;;  %v15802_v9 = vld [vmem:[#allocation12_spill] sm:$0xff]  ;;  %9126 = vpow2.f32 %v2934_v49  ;;  %v12787_v24 = vpop.eup %9122  ;;  %v12789_v23 = vpop.f32.mrf.mxu2 }
 0x8e6   : > { %3106 = vmatmul.bf16.vlgmr.msrb.gmra.mxu0 %v3034_v38  ;;  %8326 = vmatmul.msk.bf16.gmra.mxu3 %vm1986_vm1, %v12463_v22  ;;  %v15801_v38 = vld [vmem:[#allocation49_spill] sm:$0xff]  ;;  %v4250_v22 = vmax.f32 %v12555_v16, %v12687_v2  ;;  %9128 = vpow2.f32 %v2936_v39  ;;  %15807 = vst [vmem:[#allocation27_spill] sm:$0xff] %v12789_v23  ;;  %v12791_v20 = vpop.eup %9124  ;;  %v2910_v39 = vsub.f32 %v11981_v28, %v2874_v25 }
 0x8e7   : > { %2987 = vadd.xlane.f32.xlu0 %v2986_v19  ;;  %3155 = vmatmul.bf16.vlgmr.msrb.gmra.mxu1 %v3035_v13  ;;  %v3564_v45 = vmax.f32 %v15802_v9, %v15801_v38  ;;  %v15803_v13 = vld [vmem:[#allocation29_spill] sm:$0xff] }
 0x8e8   : > { %4500 = vmatpush.bf16.msrb.mxu0 %v15799_v30  ;;  %4549 = vmatpush.bf16.msrb.mxu1 %v15800_v33  ;;  %v2862_v41 = vpop.xlane.xlu1 %2861  ;;  %v15804_v30 = vld [vmem:[#allocation21_spill] sm:$0xff]  ;;  %v2962_v23 = vmul.f32 1.442695, %v2910_v39  ;;  %v15816_v39 = vld [vmem:[#allocation43_spill] sm:$0xff] }
 0x8e9   : > { %8331 = vmatmul.msk.bf16.gmra.mxu2 %vm1986_vm1, %v12635_v60  ;;  %v12807_v2 = vpop.f32.mrf.mxu3 }
 0x8ea   : > { %9130 = vpow2.f32 %v2962_v23 }
 0x8eb   : > { %v9127_v49 = vpop.eup %9126 }
 0x8ec   : > { %4501 = vmatpush.bf16.msrb.mxu0 %v15803_v13  ;;  %4550 = vmatpush.bf16.msrb.mxu1 %v15804_v30  ;;  %v9129_v33 = vpop.eup %9128  ;;  %v3007_v13 = vadd.f32 %v12791_v20, %v12787_v24  ;;  %v2903_v30 = vsub.f32 %v12278_v53, %v2862_v41 }
 0x8ed   : > { %3565 = vmax.xlane.f32.xlu2 %v3564_v45  ;;  %4251 = vmax.xlane.f32.xlu1 %v4250_v22  ;;  %v2911_v45 = vsub.f32 %v12327_v55, %v2874_v25  ;;  %v2902_v22 = vsub.f32 %v15762_v40, %v2862_v41  ;;  %v2995_v12 = vadd.f32 %v9129_v33, %v9127_v49  ;;  %v15812_v41 = vld [vmem:[#allocation8_spill] sm:$0xff]  ;;  %v15813_v25 = vld [vmem:[#allocation10_spill] sm:$0xff] }
 0x8ee   : > { %v3037_v28 = vpack.c.bf16 %v9129_v33, %v12653_v6  ;;  %v2948_v53 = vmul.f32 1.442695, %v2903_v30  ;;  %v15815_v6 = vld [vmem:[#allocation25_spill] sm:$0xff]  ;;  %v15818_v33 = vld [vmem:[#allocation19_spill] sm:$0xff]  ;;  %v2883_v30 = vpop.xlane.xlu0 %2882 }
 0x8ef   : > { %3550 = vmax.xlane.f32.xlu0 %v3549_v56  ;;  %v15810_v56 = vld [vmem:[#allocation34_spill] sm:$0xff]  ;;  %v2964_v55 = vmul.f32 1.442695, %v2911_v45  ;;  %v2946_v40 = vmul.f32 1.442695, %v2902_v22  ;;  %v15820_v22 = vld [vmem:[#allocation39_spill] sm:$0xff] }
 0x8f0   : > { %4502 = vmatpush.bf16.msrb.mxu0 %v15808_v26  ;;  %4551 = vmatpush.bf16.msrb.mxu1 %v15809_v43  ;;  %v12795_v19 = vpop.xlane.xlu1 %2870  ;;  %v15811_v26 = vld [vmem:[#allocation20_spill] sm:$0xff]  ;;  %v3036_v43 = vpack.c.bf16 %v9127_v49, %v12649_v36  ;;  %v12815_v49 = vpop.f32.mrf.mxu2  ;;  %v15819_v45 = vld [vmem:[#allocation46_spill] sm:$0xff] }
 0x8f1   : > { %15814 = vst [vmem:[#allocation24_spill] sm:$0xff] %v12815_v49  ;;  %9132 = vpow2.f32 %v2964_v55 }
 0x8f2   : > { %9134 = vpow2.f32 %v2946_v40 }
 0x8f3   : > { %9136 = vpow2.f32 %v2948_v53  ;;  %v2916_v53 = vsub.f32 %v12029_v50, %v2883_v30 }
 0x8f4   : > { %4503 = vmatpush.bf16.msrb.mxu0 %v15810_v56  ;;  %4552 = vmatpush.bf16.msrb.mxu1 %v15811_v26  ;;  %v12825_v56 = vpop.eup %9130  ;;  %v12829_v26 = vpop.f32.mrf.mxu3 }
 0x8f5   : > { %3008 = vadd.xlane.f32.xlu2 %v3007_v13  ;;  %v3558_v13 = vmax.f32 %v15820_v22, %v15819_v45  ;;  %v2974_v50 = vmul.f32 1.442695, %v2916_v53  ;;  %v15827_v53 = vld [vmem:[#allocation50_spill] sm:$0xff] }
 0x8f6   : > { %3111 = vmatmul.bf16.gmra.mxu0 %v3036_v43  ;;  %8327 = vmatmul.msk.bf16.gmra.mxu3 %vm1986_vm1, %v12505_v32  ;;  %v3573_v32 = vmax.f32 %v15816_v39, %v15815_v6  ;;  %v15821_v43 = vld [vmem:[#allocation40_spill] sm:$0xff] }
 0x8f7   : > { %2996 = vadd.xlane.f32.xlu0 %v2995_v12  ;;  %3160 = vmatmul.bf16.gmra.mxu1 %v3037_v28  ;;  %v15817_v12 = vld [vmem:[#allocation13_spill] sm:$0xff]  ;;  %v12827_v23 = vpop.eup %9132  ;;  %9138 = vpow2.f32 %v2974_v50 }
 0x8f8   : > { %4504 = vmatpush.bf16.msrb.mxu0 %v15812_v41  ;;  %4553 = vmatpush.bf16.msrb.mxu1 %v15813_v25  ;;  %v12813_v36 = vpop.xlane.xlu1 %2879  ;;  %v15822_v28 = vld [vmem:[#allocation17_spill] sm:$0xff]  ;;  %v9135_v40 = vpop.eup %9134  ;;  %v2917_v25 = vsub.f32 %v12362_v48, %v2883_v30  ;;  %v3039_v48 = vpack.c.bf16 %v12678_v21, %v12757_v44  ;;  %v15826_v21 = vld [vmem:[#allocation47_spill] sm:$0xff] }
 0x8f9   : > { %8332 = vmatmul.msk.bf16.gmra.mxu2 %vm1986_vm1, %v12668_v11  ;;  %v9137_v41 = vpop.eup %9136  ;;  %v3582_v44 = vmax.f32 %v15826_v21, %v12606_v58 }
 0x8fa   : > { %v3004_v49 = vadd.f32 %v9137_v41, %v9135_v40 }
 0x8fc   : > { %4505 = vmatpush.bf16.msrb.mxu0 %v15817_v12  ;;  %4554 = vmatpush.bf16.msrb.mxu1 %v15818_v33  ;;  %v3016_v12 = vadd.f32 %v12827_v23, %v12825_v56  ;;  %v2909_v33 = vsub.f32 %v12315_v51, %v12795_v19 }
 0x8fd   : > { %3574 = vmax.xlane.f32.xlu2 %v3573_v32  ;;  %v2908_v32 = vsub.f32 %v11972_v4, %v12795_v19  ;;  %v2976_v4 = vmul.f32 1.442695, %v2917_v25 }
 0x8fe   : > { %v2960_v51 = vmul.f32 1.442695, %v2909_v33 }
 0x8ff   : > { %3559 = vmax.xlane.f32.xlu0 %v3558_v13  ;;  %v15823_v13 = vld [vmem:[#allocation33_spill] sm:$0xff]  ;;  %v2958_v30 = vmul.f32 1.442695, %v2908_v32  ;;  %9140 = vpow2.f32 %v2976_v4  ;;  %v15830_v4 = vld [vmem:[#allocation22_spill] sm:$0xff] }
 0x900   : > { %4506 = vmatpush.bf16.msrb.mxu0 %v15821_v43  ;;  %4555 = vmatpush.bf16.msrb.mxu1 %v15822_v28  ;;  %v12833_v55 = vpop.xlane.xlu1 %2888  ;;  %v15824_v43 = vld [vmem:[#allocation18_spill] sm:$0xff]  ;;  %v3038_v28 = vpack.c.bf16 %v12676_v14, %v12755_v8  ;;  %v12852_v14 = vpop.f32.mrf.mxu3 }
 0x901   : > { %15825 = vst [vmem:[#allocation49_spill] sm:$0xff] %v12852_v14  ;;  %9142 = vpow2.f32 %v2958_v30  ;;  %v2915_v30 = vsub.f32 %v15830_v4, %v12813_v36 }
 0x902   : > { %9144 = vpow2.f32 %v2960_v51  ;;  %v3040_v51 = vpack.c.bf16 %v12787_v24, %v9135_v40  ;;  %v15831_v40 = vld [vmem:[#allocation55_spill] sm:$0xff] }
 0x904   : > { %4507 = vmatpush.bf16.msrb.mxu0 %v15823_v13  ;;  %4556 = vmatpush.bf16.msrb.mxu1 %v15824_v43 }
 0x905   : > { %3017 = vadd.xlane.f32.xlu2 %v3016_v12  ;;  %v12859_v12 = vpop.eup %9138 }
 0x906   : > { %3116 = vmatmul.bf16.gmra.mxu0 %v3038_v28  ;;  %8336 = vmatmul.msk.bf16.vlgmr.msra.gmra.mxu3 %vm1986_vm1, %v12528_v42  ;;  %v15828_v42 = vld [vmem:[#allocation31_spill] sm:$0xff]  ;;  %v2914_v28 = vsub.f32 %v12009_v34, %v12813_v36 }
 0x907   : > { %3005 = vadd.xlane.f32.xlu0 %v3004_v49  ;;  %3165 = vmatmul.bf16.gmra.mxu1 %v3039_v48  ;;  %v3567_v25 = vmax.f32 %v15828_v42, %v15827_v53 }
 0x908   : > { %v3545_v19 = vpop.xlane.xlu1 %3544  ;;  %v12869_v48 = vpop.f32.mrf.mxu3  ;;  %v2970_v34 = vmul.f32 1.442695, %v2914_v28 }
 0x909   : > { %v3591_v13 = vsub.f32 %v15776_v10, %v3545_v19  ;;  %v3592_v8 = vsub.f32 %v12405_v54, %v3545_v19  ;;  %v12861_v10 = vpop.eup %9140  ;;  %15829 = vst [vmem:[#allocation12_spill] sm:$0xff] %v12869_v48  ;;  %v3045_v48 = vpack.c.bf16 %v12721_v18, %v12827_v23 }
 0x90a   : > { %v9143_v43 = vpop.eup %9142  ;;  %v3025_v50 = vadd.f32 %v12861_v10, %v12859_v12 }
 0x90b   : > { %v3623_v49 = vmul.f32 1.442695, %v3591_v13  ;;  %v3625_v32 = vmul.f32 1.442695, %v3592_v8  ;;  %v9145_v54 = vpop.eup %9144  ;;  %v3041_v13 = vpack.c.bf16 %v12791_v20, %v9137_v41 }
 0x90c   : > { %v3013_v19 = vadd.f32 %v9145_v54, %v9143_v43 }
 0x90d   : > { %3583 = vmax.xlane.f32.xlu2 %v3582_v44  ;;  %9146 = vpow2.f32 %v3623_v49 }
 0x90e   : > { %9148 = vpow2.f32 %v3625_v32 }
 0x90f   : > { %3568 = vmax.xlane.f32.xlu0 %v3567_v25  ;;  %v2972_v25 = vmul.f32 1.442695, %v2915_v30  ;;  %9150 = vpow2.f32 %v2970_v34 }
 0x910   : > { %v12863_v33 = vpop.xlane.xlu1 %2993  ;;  %v12887_v28 = vpop.f32.mrf.mxu3 }
 0x911   : > { %9152 = vpow2.f32 %v2972_v25  ;;  %15833 = vst [vmem:[#allocation29_spill] sm:$0xff] %v12887_v28  ;;  %v15837_v25 = vld [vmem:[#allocation9_spill] sm:$0xff]  ;;  %v3044_v28 = vpack.c.bf16 %v12719_v1, %v12825_v56  ;;  %v15846_v1 = vld [vmem:[#allocation11_spill] sm:$0xff] }
 0x913   : > { %v12877_v8 = vpop.eup %9146 }
 0x914   : > { %v12879_v44 = vpop.eup %9148 }
 0x915   : > { %3026 = vadd.xlane.f32.xlu2 %v3025_v50  ;;  %v3687_v20 = vadd.f32 %v12879_v44, %v12877_v8  ;;  %v9151_v30 = vpop.eup %9150 }
 0x916   : > { %3121 = vmatmul.bf16.gmra.mxu0 %v3040_v51  ;;  %8337 = vmatmul.msk.bf16.gmra.mxu3 %vm1986_vm1, %v12515_v57  ;;  %v15832_v57 = vld [vmem:[#allocation45_spill] sm:$0xff]  ;;  %v15835_v51 = vld [vmem:[#allocation16_spill] sm:$0xff] }
 0x917   : > { %3014 = vadd.xlane.f32.xlu0 %v3013_v19  ;;  %3170 = vmatmul.bf16.gmra.mxu1 %v3041_v13  ;;  %v3576_v41 = vmax.f32 %v15832_v57, %v15831_v40  ;;  %v15836_v13 = vld [vmem:[#allocation28_spill] sm:$0xff] }
 0x918   : > { %v3554_v49 = vpop.xlane.xlu1 %3553  ;;  %v2920_v34 = vsub.f32 %v15836_v13, %v12833_v55  ;;  %v12905_v13 = vpop.f32.mrf.mxu3 }
 0x919   : > { %v3597_v36 = vsub.f32 %v15782_v61, %v3554_v49  ;;  %v3598_v24 = vsub.f32 %v12448_v29, %v3554_v49  ;;  %v9153_v61 = vpop.eup %9152  ;;  %v15834_v29 = vld [vmem:[#allocation37_spill] sm:$0xff]  ;;  %v2921_v49 = vsub.f32 %v15837_v25, %v12833_v55  ;;  %15838 = vst [vmem:[#allocation21_spill] sm:$0xff] %v12905_v13  ;;  %v15843_v13 = vld [vmem:[#allocation42_spill] sm:$0xff] }
 0x91a   : > { %v4247_v19 = vmax.f32 %v15835_v51, %v15834_v29 }
 0x91b   : > { %v3635_v32 = vmul.f32 1.442695, %v3597_v36  ;;  %v3637_v50 = vmul.f32 1.442695, %v3598_v24  ;;  %v3042_v36 = vpack.c.bf16 %v9143_v43, %v12697_v47  ;;  %v3022_v24 = vadd.f32 %v9153_v61, %v9151_v30  ;;  %v15840_v43 = vld [vmem:[#allocation48_spill] sm:$0xff] }
 0x91c   : > { %v2984_v55 = vmul.f32 1.442695, %v2921_v49  ;;  %v15842_v49 = vld [vmem:[#allocation35_spill] sm:$0xff] }
 0x91d   : > { %3688 = vadd.xlane.f32.xlu2 %v3687_v20  ;;  %9154 = vpow2.f32 %v3635_v32  ;;  %v3043_v20 = vpack.c.bf16 %v9145_v54, %v12699_v62  ;;  %v2982_v32 = vmul.f32 1.442695, %v2920_v34  ;;  %v15839_v62 = vld [vmem:[#allocation65_spill] sm:$0xff]  ;;  %v3548_v54 = vpop.xlane.xlu2 %3547 }
 0x91e   : > { %9156 = vpow2.f32 %v3637_v50 }
 0x91f   : > { %3577 = vmax.xlane.f32.xlu0 %v3576_v41  ;;  %9158 = vpow2.f32 %v2982_v32  ;;  %v3594_v32 = vsub.f32 %v15843_v13, %v3548_v54 }
 0x920   : > { %v12889_v4 = vpop.xlane.xlu1 %3002  ;;  %9160 = vpow2.f32 %v2984_v55 }
 0x923   : > { %v12901_v41 = vpop.eup %9154 }
 0x924   : > { %v12903_v50 = vpop.eup %9156 }
 0x925   : > { %4248 = vmax.xlane.f32.xlu2 %v4247_v19  ;;  %v3696_v47 = vadd.f32 %v12903_v50, %v12901_v41  ;;  %v9159_v34 = vpop.eup %9158 }
 0x926   : > { %3126 = vmatmul.bf16.gmra.mxu0 %v3042_v36  ;;  %8338 = vmatmul.msk.bf16.gmra.mxu3 %vm1986_vm1, %v12542_v35  ;;  %v3585_v35 = vmax.f32 %v15840_v43, %v15839_v62  ;;  %v9161_v36 = vpop.eup %9160 }
 0x927   : > { %3023 = vadd.xlane.f32.xlu0 %v3022_v24  ;;  %3175 = vmatmul.bf16.gmra.mxu1 %v3043_v20  ;;  %v12915_v24 = vpop.f32.mrf.mxu3  ;;  %v3593_v20 = vsub.f32 %v15842_v49, %v3548_v54  ;;  %v3031_v55 = vadd.f32 %v9161_v36, %v9159_v34  ;;  %v15845_v54 = vld [vmem:[#allocation71_spill] sm:$0xff] }
 0x928   : > { %v12907_v25 = vpop.xlane.xlu1 %3562  ;;  %15841 = vst [vmem:[#allocation44_spill] sm:$0xff] %v12915_v24  ;;  %v4244_v56 = vmax.f32 %v15846_v1, %v15845_v54 }
 0x92d   : > { %3697 = vadd.xlane.f32.xlu2 %v3696_v47  ;;  %v3627_v47 = vmul.f32 1.442695, %v3593_v20 }
 0x92f   : > { %3586 = vmax.xlane.f32.xlu0 %v3585_v35  ;;  %v3629_v35 = vmul.f32 1.442695, %v3594_v32  ;;  %9162 = vpow2.f32 %v3627_v47  ;;  %v12927_v13 = vpop.f32.mrf.mxu3 }
 0x930   : > { %v12913_v19 = vpop.xlane.xlu1 %3011  ;;  %15844 = vst [vmem:[#allocation36_spill] sm:$0xff] %v12927_v13 }
 0x931   : > { %9164 = vpow2.f32 %v3629_v35 }
 0x935   : > { %v9163_v18 = vpop.eup %9162 }
 0x936   : > { %3131 = vmatmul.bf16.gmra.mxu0 %v3044_v28  ;;  %8339 = vmatmul.msk.bf16.gmra.mxu3 %vm1986_vm1, %v12635_v60  ;;  %v3046_v60 = vpack.c.bf16 %v12859_v12, %v9151_v30 }
 0x937   : > { %3032 = vadd.xlane.f32.xlu0 %v3031_v55  ;;  %3180 = vmatmul.bf16.gmra.mxu1 %v3045_v48  ;;  %v9165_v23 = vpop.eup %9164  ;;  %v3047_v48 = vpack.c.bf16 %v12861_v10, %v9153_v61  ;;  %v12935_v20 = vpop.f32.mrf.mxu3 }
 0x938   : > { %v12925_v24 = vpop.xlane.xlu1 %3571  ;;  %v3690_v28 = vadd.f32 %v9165_v23, %v9163_v18  ;;  %15847 = vst [vmem:[#allocation30_spill] sm:$0xff] %v12935_v20 }
 0x93f   : > { %4245 = vmax.xlane.f32.xlu0 %v4244_v56 }
 0x940   : > { %v12931_v49 = vpop.xlane.xlu1 %3020 }
 0x946   : > { %3136 = vmatmul.bf16.gmra.mxu0 %v3046_v60  ;;  %8340 = vmatmul.msk.bf16.gmra.mxu3 %vm1986_vm1, %v12668_v11  ;;  %v3048_v11 = vpack.c.bf16 %v9159_v34, %v12741_v63  ;;  %v3049_v60 = vpack.c.bf16 %v9161_v36, %v12743_v15  ;;  %v3735_v36 = vpack.c.bf16 %v9163_v18, %v12877_v8  ;;  %v15850_v18 = vld [vmem:[#allocation58_spill] sm:$0xff] }
 0x947   : > { %v12939_v32 = vpop.xlane.xlu2 %2990  ;;  %3691 = vadd.xlane.f32.xlu0 %v3690_v28  ;;  %3185 = vmatmul.bf16.gmra.mxu1 %v3047_v48 }
 0x948   : > { %v3581_v55 = vpop.xlane.xlu1 %3580 }
 0x949   : > { %v3615_v47 = vsub.f32 %v12465_v0, %v3581_v55  ;;  %v3616_v35 = vsub.f32 %v12588_v5, %v3581_v55 }
 0x94b   : > { %v3671_v56 = vmul.f32 1.442695, %v3615_v47  ;;  %v3673_v12 = vmul.f32 1.442695, %v3616_v35 }
 0x94d   : > { %9166 = vpow2.f32 %v3671_v56 }
 0x94e   : > { %9168 = vpow2.f32 %v3673_v12 }
 0x94f   : > { %v12943_v10 = vpop.xlane.xlu2 %3556 }
 0x953   : > { %v12945_v30 = vpop.eup %9166 }
 0x954   : > { %v12947_v61 = vpop.eup %9168 }
 0x955   : > { %v12953_v28 = vadd.f32 %v12947_v61, %v12945_v30 }
 0x956   : > { %3141 = vmatmul.bf16.gmra.mxu0 %v3048_v11 }
 0x957   : > { %v12955_v0 = vpop.xlane.xlu2 %2999  ;;  %3190 = vmatmul.bf16.gmra.mxu1 %v3049_v60  ;;  %v3736_v60 = vpack.c.bf16 %v9165_v23, %v12879_v44 }
 0x95a   : > { %v2988_v5 = vpop.xlane.xlu0 %2987 }
 0x95b   : > { %9170 = vrcp.f32 %v2988_v5 }
 0x960   : > { %v3566_v48 = vpop.xlane.xlu2 %3565 }
 0x961   : > { %v3605_v55 = vsub.f32 %v15802_v9, %v3566_v48  ;;  %v3606_v47 = vsub.f32 %v15801_v38, %v3566_v48  ;;  %v9171_v13 = vpop.eup %9170  ;;  %v15848_v48 = vld [vmem:[#allocation14_spill] sm:$0xff] }
 0x962   : > { %v3551_v35 = vpop.xlane.xlu0 %3550 }
 0x963   : > { %v3651_v56 = vmul.f32 1.442695, %v3605_v55  ;;  %v3653_v63 = vmul.f32 1.442695, %v3606_v47  ;;  %v3595_v15 = vsub.f32 %v15806_v17, %v3551_v35  ;;  %v3107_v34 = vpop.f32.mrf.mxu0  ;;  %v3596_v12 = vsub.f32 %v15805_v37, %v3551_v35  ;;  %v15849_v55 = vld [vmem:[#allocation15_spill] sm:$0xff] }
 0x964   : > { %v3156_v11 = vpop.f32.mrf.mxu1 }
 0x965   : > { %9172 = vpow2.f32 %v3651_v56  ;;  %v3631_v5 = vmul.f32 1.442695, %v3595_v15  ;;  %v3157_v20 = vadd.f32 %v3156_v11, %v3107_v34  ;;  %v3633_v9 = vmul.f32 1.442695, %v3596_v12 }
 0x966   : > { %9174 = vpow2.f32 %v3653_v63  ;;  %3807 = vmatmul.bf16.vlgmr.msra.gmra.mxu0 %v3735_v36  ;;  %v15852_v63 = vld [vmem:[#allocation51_spill] sm:$0xff]  ;;  %v15853_v36 = vld [vmem:[#allocation61_spill] sm:$0xff] }
 0x967   : > { %v3212_v38 = vmul.f32 %v9171_v13, %v3157_v20  ;;  %3856 = vmatmul.bf16.vlgmr.msra.gmra.mxu1 %v3736_v60  ;;  %5201 = vmatpush.bf16.msra.mxu0 %v15848_v48  ;;  %9176 = vpow2.f32 %v3631_v5  ;;  %v15851_v20 = vld [vmem:[#allocation23_spill] sm:$0xff] }
 0x968   : > { %v12964_v17 = vpop.xlane.xlu2 %3008  ;;  %5250 = vmatpush.bf16.msra.mxu1 %v15849_v55  ;;  %9178 = vpow2.f32 %v3633_v9  ;;  %v15854_v55 = vld [vmem:[#allocation64_spill] sm:$0xff] }
 0x969   : > { %v3228_v37 = vpack.c.bf16 %v3212_v38, %v3212_v38  ;;  %9180 = vrcp.f32 %v12863_v33  ;;  %v15855_v33 = vld [vmem:[#allocation60_spill] sm:$0xff] }
 0x96a   : > { %v12967_v8 = vpop.xlane.xlu0 %2996 }
 0x96b   : > { %v12969_v44 = vpop.eup %9172  ;;  %5202 = vmatpush.bf16.msra.mxu0 %v15850_v18  ;;  %3260 = vrot.lane.b32.xlu0 %v3228_v37, %s9928_s20  ;;  %v12973_v13 = vpop.f32.mrf.mxu0 }
 0x96c   : > { %v12975_v23 = vpop.eup %9174  ;;  %5251 = vmatpush.bf16.msra.mxu1 %v15851_v20  ;;  %v3158_v47 = vpop.f32.mrf.mxu1 }
 0x96d   : > { %v12980_v35 = vadd.f32 %v12975_v23, %v12969_v44  ;;  %v9177_v56 = vpop.eup %9176 }
 0x96e   : > { %v9179_v15 = vpop.eup %9178 }
 0x96f   : > { %5203 = vmatpush.bf16.msra.mxu0 %v15852_v63  ;;  %v3693_v60 = vadd.f32 %v9179_v15, %v9177_v56  ;;  %v3737_v63 = vpack.c.bf16 %v12901_v41, %v9177_v56  ;;  %v15858_v56 = vld [vmem:[#allocation53_spill] sm:$0xff] }
 0x970   : > { %v3575_v34 = vpop.xlane.xlu2 %3574  ;;  %5252 = vmatpush.bf16.msra.mxu1 %v15853_v36  ;;  %v9181_v36 = vpop.eup %9180 }
 0x971   : > { %v3611_v12 = vsub.f32 %v15816_v39, %v3575_v34  ;;  %v3612_v11 = vsub.f32 %v15815_v6, %v3575_v34  ;;  %3694 = vadd.xlane.f32.xlu1 %v3693_v60  ;;  %v3599_v6 = vsub.f32 %v15795_v27, %v12943_v10  ;;  %v3738_v34 = vpack.c.bf16 %v12903_v50, %v9179_v15 }
 0x972   : > { %v3560_v5 = vpop.xlane.xlu0 %3559 }
 0x973   : > { %v3663_v9 = vmul.f32 1.442695, %v3611_v12  ;;  %v3665_v38 = vmul.f32 1.442695, %v3612_v11  ;;  %v3601_v48 = vsub.f32 %v15820_v22, %v3560_v5  ;;  %5204 = vmatpush.bf16.msra.mxu0 %v15854_v55  ;;  %v3112_v37 = vpop.f32.mrf.mxu0  ;;  %v3602_v18 = vsub.f32 %v15819_v45, %v3560_v5  ;;  %v15856_v11 = vld [vmem:[#allocation62_spill] sm:$0xff] }
 0x974   : > { %5253 = vmatpush.bf16.msra.mxu1 %v15855_v33  ;;  %v3161_v20 = vpop.f32.mrf.mxu1  ;;  %v3600_v22 = vsub.f32 %v12461_v7, %v12943_v10  ;;  %v3639_v27 = vmul.f32 1.442695, %v3599_v6  ;;  %v15859_v7 = vld [vmem:[#allocation32_spill] sm:$0xff] }
 0x975   : > { %9182 = vpow2.f32 %v3663_v9  ;;  %v3162_v39 = vadd.f32 %v3161_v20, %v3112_v37  ;;  %v3643_v12 = vmul.f32 1.442695, %v3601_v48  ;;  %v3645_v60 = vmul.f32 1.442695, %v3602_v18  ;;  %v15860_v48 = vld [vmem:[#allocation66_spill] sm:$0xff]  ;;  %v15862_v20 = vld [vmem:[#allocation72_spill] sm:$0xff] }
 0x976   : > { %9184 = vpow2.f32 %v3665_v38  ;;  %3812 = vmatmul.bf16.gmra.mxu0 %v3737_v63  ;;  %v3641_v9 = vmul.f32 1.442695, %v3600_v22  ;;  %v15861_v18 = vld [vmem:[#allocation54_spill] sm:$0xff] }
 0x977   : > { %v3214_v45 = vmul.f32 %v9181_v36, %v3162_v39  ;;  %3861 = vmatmul.bf16.gmra.mxu1 %v3738_v34  ;;  %5205 = vmatpush.bf16.msra.mxu0 %v15856_v11  ;;  %9186 = vpow2.f32 %v3643_v12  ;;  %v3159_v36 = vadd.f32 %v3158_v47, %v12973_v13 }
 0x978   : > { %v12998_v41 = vpop.xlane.xlu2 %3017  ;;  %5254 = vmatpush.bf16.msra.mxu1 %v15858_v56  ;;  %9188 = vpow2.f32 %v3645_v60  ;;  %v15863_v56 = vld [vmem:[#allocation69_spill] sm:$0xff] }
 0x979   : > { %15857 = vst [vmem:[#allocation26_spill] sm:$0xff] %v12998_v41  ;;  %v3230_v5 = vpack.c.bf16 %v3214_v45, %v3214_v45  ;;  %9190 = vpow2.f32 %v3639_v27 }
 0x97a   : > { %v13001_v50 = vpop.xlane.xlu0 %3005  ;;  %9192 = vpow2.f32 %v3641_v9 }
 0x97b   : > { %v13003_v15 = vpop.eup %9182  ;;  %5206 = vmatpush.bf16.msra.mxu0 %v15859_v7  ;;  %3264 = vrot.lane.b32.xlu2 %v3230_v5, %s9928_s20  ;;  %v13007_v10 = vpop.f32.mrf.mxu0  ;;  %9194 = vrcp.f32 %v12939_v32  ;;  %v15864_v5 = vld [vmem:[#allocation57_spill] sm:$0xff] }
 0x97c   : > { %v13009_v38 = vpop.eup %9184  ;;  %5255 = vmatpush.bf16.msra.mxu1 %v15860_v48  ;;  %v13012_v55 = vpop.f32.mrf.mxu1  ;;  %v3604_v48 = vsub.f32 %v12489_v46, %v12907_v25 }
 0x97d   : > { %v13016_v37 = vadd.f32 %v13009_v38, %v13003_v15  ;;  %v13021_v63 = vpop.eup %9186 }
 0x97e   : > { %v13025_v34 = vpop.eup %9188 }
 0x97f   : > { %5207 = vmatpush.bf16.msra.mxu0 %v15861_v18  ;;  %v13028_v12 = vpop.eup %9190 }
 0x980   : > { %v3584_v33 = vpop.xlane.xlu2 %3583  ;;  %5256 = vmatpush.bf16.msra.mxu1 %v15862_v20  ;;  %v3739_v47 = vpack.c.bf16 %v13021_v63, %v13028_v12  ;;  %v3649_v20 = vmul.f32 1.442695, %v3604_v48 }
 0x981   : > { %v3617_v6 = vsub.f32 %v15826_v21, %v3584_v33  ;;  %v3618_v39 = vsub.f32 %v12606_v58, %v3584_v33  ;;  %v13035_v21 = vpop.eup %9192  ;;  %v3603_v58 = vsub.f32 %v15786_v31, %v12907_v25 }
 0x982   : > { %v3569_v22 = vpop.xlane.xlu0 %3568  ;;  %v9195_v9 = vpop.eup %9194  ;;  %v3740_v7 = vpack.c.bf16 %v13025_v34, %v13035_v21 }
 0x983   : > { %v3675_v45 = vmul.f32 1.442695, %v3617_v6  ;;  %v3677_v32 = vmul.f32 1.442695, %v3618_v39  ;;  %v3607_v11 = vsub.f32 %v15828_v42, %v3569_v22  ;;  %v3608_v60 = vsub.f32 %v15827_v53, %v3569_v22  ;;  %5208 = vmatpush.bf16.msra.mxu0 %v15863_v56  ;;  %v13033_v27 = vpop.f32.mrf.mxu0 }
 0x984   : > { %5257 = vmatpush.bf16.msra.mxu1 %v15864_v5  ;;  %v13040_v13 = vpop.f32.mrf.mxu1  ;;  %v3213_v18 = vmul.f32 %v9195_v9, %v3159_v36  ;;  %v3647_v33 = vmul.f32 1.442695, %v3603_v58  ;;  %v15869_v9 = vld [vmem:[#allocation56_spill] sm:$0xff] }
 0x985   : > { %9196 = vpow2.f32 %v3675_v45  ;;  %v3655_v42 = vmul.f32 1.442695, %v3607_v11  ;;  %v3657_v53 = vmul.f32 1.442695, %v3608_v60 }
 0x986   : > { %9198 = vpow2.f32 %v3677_v32  ;;  %3817 = vmatmul.bf16.gmra.mxu0 %v3739_v47  ;;  %v3229_v6 = vpack.c.bf16 %v3213_v18, %v3213_v18  ;;  %v15868_v47 = vld [vmem:[#allocation76_spill] sm:$0xff] }
 0x987   : > { %9200 = vpow2.f32 %v3655_v42  ;;  %3866 = vmatmul.bf16.gmra.mxu1 %v3740_v7  ;;  %v4253_v42 = vmax.f32 %v15869_v9, %v15868_v47 }
 0x988   : > { %9202 = vpow2.f32 %v3657_v53  ;;  %v13048_v31 = vpop.xlane.xlu2 %3026  ;;  %v3609_v53 = vsub.f32 %v12411_v3, %v12925_v24 }
 0x989   : > { %15865 = vst [vmem:[#allocation34_spill] sm:$0xff] %v13048_v31  ;;  %9204 = vpow2.f32 %v3647_v33 }
 0x98a   : > { %v13050_v39 = vpop.xlane.xlu0 %3014  ;;  %3262 = vrot.lane.b32.xlu1 %v3229_v6, %s9928_s20  ;;  %9206 = vpow2.f32 %v3649_v20  ;;  %v15870_v20 = vld [vmem:[#allocation52_spill] sm:$0xff]  ;;  %v3659_v3 = vmul.f32 1.442695, %v3609_v53  ;;  %v15872_v53 = vld [vmem:[#allocation78_spill] sm:$0xff] }
 0x98b   : > { %v13052_v22 = vpop.eup %9196  ;;  %v13054_v45 = vpop.f32.mrf.mxu0  ;;  %v3610_v6 = vsub.f32 %v15870_v20, %v12925_v24 }
 0x98c   : > { %v13056_v11 = vpop.eup %9198  ;;  %v13059_v46 = vpop.f32.mrf.mxu1 }
 0x98d   : > { %v13061_v25 = vpop.eup %9200  ;;  %v13065_v36 = vadd.f32 %v13056_v11, %v13052_v22 }
 0x98e   : > { %v13067_v32 = vpop.eup %9202 }
 0x98f   : > { %15866 = vst [vmem:[#allocation20_spill] sm:$0xff] %v13065_v36  ;;  %v13071_v60 = vadd.f32 %v13067_v32, %v13061_v25  ;;  %v9205_v5 = vpop.eup %9204 }
 0x990   : > { %v13073_v56 = vpop.xlane.xlu2 %3688  ;;  %v9207_v33 = vpop.eup %9206 }
 0x991   : > { %15867 = vst [vmem:[#allocation8_spill] sm:$0xff] %v13073_v56  ;;  %v3741_v56 = vpack.c.bf16 %v12969_v44, %v9205_v5  ;;  %v3742_v14 = vpack.c.bf16 %v12975_v23, %v9207_v33  ;;  %v3699_v23 = vadd.f32 %v13035_v21, %v13028_v12 }
 0x992   : > { %v3578_v58 = vpop.xlane.xlu0 %3577 }
 0x993   : > { %v3613_v7 = vsub.f32 %v15832_v57, %v3578_v58  ;;  %v3614_v48 = vsub.f32 %v15831_v40, %v3578_v58  ;;  %v13081_v18 = vpop.f32.mrf.mxu0  ;;  %v3661_v40 = vmul.f32 1.442695, %v3610_v6  ;;  %v15873_v6 = vld [vmem:[#allocation59_spill] sm:$0xff] }
 0x994   : > { %v13085_v31 = vpop.f32.mrf.mxu1 }
 0x995   : > { %v3667_v36 = vmul.f32 1.442695, %v3613_v7  ;;  %v3669_v41 = vmul.f32 1.442695, %v3614_v48  ;;  %4254 = vmax.xlane.f32.xlu0 %v4253_v42 }
 0x996   : > { %3822 = vmatmul.bf16.gmra.mxu0 %v3741_v56 }
 0x997   : > { %9208 = vpow2.f32 %v3667_v36  ;;  %3871 = vmatmul.bf16.gmra.mxu1 %v3742_v14 }
 0x998   : > { %9210 = vpow2.f32 %v3669_v41  ;;  %v4249_v57 = vpop.xlane.xlu2 %4248 }
 0x999   : > { %v4294_v58 = vsub.f32 %v15835_v51, %v4249_v57  ;;  %v4295_v24 = vsub.f32 %v15834_v29, %v4249_v57  ;;  %9212 = vpow2.f32 %v3659_v3  ;;  %v4256_v3 = vmax.f32 %v15873_v6, %v15872_v53 }
 0x99a   : > { %v13091_v20 = vpop.xlane.xlu0 %3023  ;;  %9214 = vpow2.f32 %v3661_v40 }
 0x99b   : > { %15871 = vst [vmem:[#allocation10_spill] sm:$0xff] %v13091_v20  ;;  %v4328_v44 = vmul.f32 1.442695, %v4294_v58  ;;  %v4330_v7 = vmul.f32 1.442695, %v4295_v24  ;;  %v3124_v48 = vpop.f32.mrf.mxu0 }
 0x99c   : > { %v3173_v56 = vpop.f32.mrf.mxu1 }
 0x99d   : > { %v9209_v36 = vpop.eup %9208  ;;  %9216 = vpow2.f32 %v4328_v44  ;;  %v13095_v14 = vadd.f32 %v3173_v56, %v3124_v48  ;;  %3700 = vadd.xlane.f32.xlu0 %v3699_v23 }
 0x99e   : > { %v9211_v41 = vpop.eup %9210  ;;  %9218 = vpow2.f32 %v4330_v7 }
 0x99f   : > { %v13097_v51 = vadd.f32 %v9211_v41, %v9209_v36  ;;  %v13099_v29 = vpop.eup %9212  ;;  %9220 = vrcp.f32 %v12967_v8 }
 0x9a0   : > { %v13101_v42 = vpop.eup %9214  ;;  %v3743_v7 = vpack.c.bf16 %v13099_v29, %v13061_v25  ;;  %v3705_v25 = vadd.f32 %v9207_v33, %v9205_v5 }
 0x9a1   : > { %v3744_v56 = vpack.c.bf16 %v13101_v42, %v13067_v32 }
 0x9a2   : > { %v3587_v57 = vpop.xlane.xlu0 %3586 }
 0x9a3   : > { %v13105_v12 = vpop.eup %9216  ;;  %v3619_v21 = vsub.f32 %v15840_v43, %v3587_v57  ;;  %v3620_v40 = vsub.f32 %v15839_v62, %v3587_v57  ;;  %v13109_v58 = vpop.f32.mrf.mxu0  ;;  %v3164_v43 = vadd.f32 %v13012_v55, %v13007_v10 }
 0x9a4   : > { %v13111_v24 = vpop.eup %9218  ;;  %v13114_v44 = vpop.f32.mrf.mxu1  ;;  %4257 = vmax.xlane.f32.xlu2 %v4256_v3 }
 0x9a5   : > { %v3679_v48 = vmul.f32 1.442695, %v3619_v21  ;;  %v3681_v23 = vmul.f32 1.442695, %v3620_v40  ;;  %v13122_v62 = vadd.f32 %v13111_v24, %v13105_v12  ;;  %v9221_v8 = vpop.eup %9220 }
 0x9a6   : > { %3827 = vmatmul.bf16.gmra.mxu0 %v3743_v7  ;;  %v3215_v57 = vmul.f32 %v9221_v8, %v3164_v43 }
 0x9a7   : > { %15874 = vst [vmem:[#allocation25_spill] sm:$0xff] %v13122_v62  ;;  %9222 = vpow2.f32 %v3679_v48  ;;  %3876 = vmatmul.bf16.gmra.mxu1 %v3744_v56  ;;  %v15877_v56 = vld [vmem:[#allocation63_spill] sm:$0xff] }
 0x9a8   : > { %9224 = vpow2.f32 %v3681_v23  ;;  %v3231_v7 = vpack.c.bf16 %v3215_v57, %v3215_v57  ;;  %v15876_v23 = vld [vmem:[#allocation80_spill] sm:$0xff] }
 0x9a9   : > { %v4259_v43 = vmax.f32 %v15877_v56, %v15876_v23  ;;  %9226 = vrcp.f32 %v12889_v4 }
 0x9aa   : > { %v13126_v3 = vpop.xlane.xlu0 %3032 }
 0x9ab   : > { %15875 = vst [vmem:[#allocation43_spill] sm:$0xff] %v13126_v3  ;;  %v3129_v21 = vpop.f32.mrf.mxu0  ;;  %v3746_v3 = vpack.c.bf16 %v9211_v41, %v13009_v38 }
 0x9ac   : > { %v3178_v40 = vpop.f32.mrf.mxu1  ;;  %3706 = vadd.xlane.f32.xlu2 %v3705_v25  ;;  %v3745_v25 = vpack.c.bf16 %v9209_v36, %v13003_v15  ;;  %v3702_v36 = vadd.f32 %v13025_v34, %v13021_v63  ;;  %v3748_v34 = vpack.c.bf16 %v13056_v11, %v12947_v61 }
 0x9ad   : > { %v13128_v32 = vpop.eup %9222  ;;  %v13130_v20 = vadd.f32 %v3178_v40, %v3129_v21 }
 0x9ae   : > { %v13132_v62 = vpop.eup %9224 }
 0x9af   : > { %v13136_v10 = vadd.f32 %v13132_v62, %v13128_v32  ;;  %v9227_v15 = vpop.eup %9226 }
 0x9b1   : > { %3266 = vrot.lane.b32.xlu0 %v3231_v7, %s9928_s20 }
 0x9b2   : > { %v4246_v55 = vpop.xlane.xlu0 %4245 }
 0x9b3   : > { %v4292_v5 = vsub.f32 %v15846_v1, %v4246_v55  ;;  %v4293_v33 = vsub.f32 %v15845_v54, %v4246_v55  ;;  %v3132_v48 = vpop.f32.mrf.mxu0  ;;  %v13148_v54 = vpop.xlane.xlu1 %3029  ;;  %v3169_v1 = vadd.f32 %v13059_v46, %v13054_v45  ;;  %v3747_v45 = vpack.c.bf16 %v13052_v22, %v12945_v30 }
 0x9b4   : > { %v3181_v8 = vpop.f32.mrf.mxu1  ;;  %4260 = vmax.xlane.f32.xlu1 %v4259_v43  ;;  %v13176_v30 = vpop.xlane.xlu2 %3697 }
 0x9b5   : > { %v4324_v21 = vmul.f32 1.442695, %v4292_v5  ;;  %v4326_v57 = vmul.f32 1.442695, %v4293_v33  ;;  %v13144_v40 = vadd.f32 %v3181_v8, %v3132_v48  ;;  %v3217_v41 = vmul.f32 %v9227_v15, %v3169_v1  ;;  %v15878_v8 = vld [vmem:[#allocation68_spill] sm:$0xff]  ;;  %15879 = vst [vmem:[#allocation13_spill] sm:$0xff] %v13176_v30 }
 0x9b6   : > { %3832 = vmatmul.bf16.gmra.mxu0 %v3745_v25 }
 0x9b7   : > { %9228 = vpow2.f32 %v4324_v21  ;;  %3881 = vmatmul.bf16.gmra.mxu1 %v3746_v3  ;;  %v3233_v33 = vpack.c.bf16 %v3217_v41, %v3217_v41 }
 0x9b8   : > { %9230 = vpow2.f32 %v4326_v57 }
 0x9b9   : > { %9232 = vrcp.f32 %v12955_v0 }
 0x9bb   : > { %v13152_v7 = vpop.f32.mrf.mxu0  ;;  %v3590_v3 = vpop.xlane.xlu1 %3589 }
 0x9bc   : > { %v13156_v55 = vpop.f32.mrf.mxu1  ;;  %3703 = vadd.xlane.f32.xlu1 %v3702_v36  ;;  %v3621_v46 = vsub.f32 %v12513_v59, %v3590_v3  ;;  %v3622_v25 = vsub.f32 %v15878_v8, %v3590_v3  ;;  %v3167_v59 = vadd.f32 %v13040_v13, %v13033_v27 }
 0x9bd   : > { %v9229_v38 = vpop.eup %9228 }
 0x9be   : > { %v9231_v4 = vpop.eup %9230  ;;  %v3683_v21 = vmul.f32 1.442695, %v3621_v46  ;;  %v3685_v57 = vmul.f32 1.442695, %v3622_v25  ;;  %v4436_v25 = vpack.c.bf16 %v13105_v12, %v9229_v38 }
 0x9bf   : > { %v13158_v5 = vadd.f32 %v9231_v4, %v9229_v38  ;;  %v9233_v61 = vpop.eup %9232 }
 0x9c0   : > { %9234 = vpow2.f32 %v3683_v21  ;;  %v3216_v22 = vmul.f32 %v9233_v61, %v3167_v59  ;;  %v15882_v61 = vld [vmem:[#allocation83_spill] sm:$0xff] }
 0x9c1   : > { %9236 = vpow2.f32 %v3685_v57  ;;  %v4437_v57 = vpack.c.bf16 %v13111_v24, %v9231_v4 }
 0x9c2   : > { %9238 = vrcp.f32 %v13001_v50 }
 0x9c3   : > { %v3137_v48 = vpop.f32.mrf.mxu0  ;;  %v4252_v12 = vpop.xlane.xlu1 %4251  ;;  %9240 = vrcp.f32 %v12913_v19 }
 0x9c4   : > { %v3186_v43 = vpop.f32.mrf.mxu1  ;;  %3270 = vrot.lane.b32.xlu2 %v3233_v33, %s9928_s20  ;;  %v3232_v33 = vpack.c.bf16 %v3216_v22, %v3216_v22  ;;  %v15883_v22 = vld [vmem:[#allocation70_spill] sm:$0xff] }
 0x9c5   : > { %v13164_v63 = vadd.f32 %v3186_v43, %v3137_v48  ;;  %v13188_v48 = vpop.xlane.xlu0 %3691  ;;  %v15880_v43 = vld [vmem:[#allocation82_spill] sm:$0xff] }
 0x9c6   : > { %3837 = vmatmul.bf16.gmra.mxu0 %v3747_v45  ;;  %v13178_v11 = vpop.eup %9234  ;;  %v15881_v45 = vld [vmem:[#allocation67_spill] sm:$0xff] }
 0x9c7   : > { %3886 = vmatmul.bf16.gmra.mxu1 %v3748_v34  ;;  %v13182_v0 = vpop.eup %9236  ;;  %v3749_v3 = vpack.c.bf16 %v13178_v11, %v13128_v32  ;;  %v4262_v46 = vmax.f32 %v15881_v45, %v15880_v43 }
 0x9c8   : > { %v3750_v13 = vpack.c.bf16 %v13182_v0, %v13132_v62  ;;  %v9239_v38 = vpop.eup %9238 }
 0x9cb   : > { %v13170_v1 = vpop.f32.mrf.mxu0 }
 0x9cc   : > { %v13172_v15 = vpop.f32.mrf.mxu1 }
 0x9d3   : > { %v13180_v36 = vpop.f32.mrf.mxu0 }
 0x9d4   : > { %v13184_v41 = vpop.f32.mrf.mxu1 }
 0x9d5   : > { %v3265_v27 = vpop.permute.xlu2 %3264  ;;  %3268 = vrot.lane.b32.xlu1 %v3232_v33, %s9928_s20 }
 0x9d6   : > { %3311 = vst.msk [vmem:[#allocation6 + $0x8] sm:$0xf] %vm3308_vm3, %v3265_v27  ;;  %3842 = vmatmul.bf16.gmra.mxu0 %v3749_v3  ;;  %v4265_v3 = vmax.f32 %v15883_v22, %v15882_v61 }
 0x9d7   : > { %3891 = vmatmul.bf16.gmra.mxu1 %v3750_v13  ;;  %v3714_v13 = vadd.f32 %v13101_v42, %v13099_v29  ;;  %v4296_v29 = vsub.f32 %v12555_v16, %v4252_v12  ;;  %v3177_v42 = vadd.f32 %v13114_v44, %v13109_v58 }
 0x9db   : > { %4263 = vmax.xlane.f32.xlu0 %v4262_v46  ;;  %v13196_v34 = vpop.f32.mrf.mxu0 }
 0x9dc   : > { %v13198_v32 = vpop.f32.mrf.mxu1 }
 0x9dd   : > { %v3261_v8 = vpop.permute.xlu0 %3260 }
 0x9de   : > { %3309 = vst.msk [vmem:[#allocation6] sm:$0xf] %vm3308_vm3, %v3261_v8 }
 0x9e3   : > { %3709 = vadd.xlane.f32.xlu0 %v12980_v35  ;;  %v3808_v62 = vpop.f32.mrf.mxu0  ;;  %v3172_v35 = vadd.f32 %v13085_v31, %v13081_v18 }
 0x9e4   : > { %v3857_v21 = vpop.f32.mrf.mxu1  ;;  %v13221_v8 = vpop.xlane.xlu1 %3694 }
 0x9e5   : > { %v13204_v59 = vadd.f32 %v3857_v21, %v3808_v62  ;;  %v3218_v24 = vmul.f32 %v9239_v38, %v3172_v35 }
 0x9e6   : > { %4508 = vmatmul.bf16.vlgmr.msrb.gmra.mxu0 %v4436_v25  ;;  %v15886_v25 = vld [vmem:[#allocation73_spill] sm:$0xff] }
 0x9e7   : > { %4557 = vmatmul.bf16.vlgmr.msrb.gmra.mxu1 %v4437_v57  ;;  %v3234_v46 = vpack.c.bf16 %v3218_v24, %v3218_v24  ;;  %v4268_v21 = vmax.f32 %v15886_v25, %v12781_v52 }
 0x9eb   : > { %v13209_v33 = vpop.f32.mrf.mxu0 }
 0x9ec   : > { %v13211_v27 = vpop.f32.mrf.mxu1 }
 0x9ed   : > { %4266 = vmax.xlane.f32.xlu2 %v4265_v3  ;;  %v15887_v3 = vld [vmem:[#allocation75_spill] sm:$0xff] }
 0x9ee   : > { %v4297_v35 = vsub.f32 %v15887_v3, %v4252_v12 }
 0x9f3   : > { %v13215_v4 = vpop.f32.mrf.mxu0 }
 0x9f4   : > { %v13219_v50 = vpop.f32.mrf.mxu1 }
 0x9f5   : > { %3715 = vadd.xlane.f32.xlu2 %v3714_v13  ;;  %v9241_v13 = vpop.eup %9240 }
 0x9f7   : > { %3272 = vrot.lane.b32.xlu0 %v3234_v46, %s9928_s20  ;;  %v4332_v46 = vmul.f32 1.442695, %v4296_v29 }
 0x9f9   : > { %9242 = vpow2.f32 %v4332_v46 }
 0x9fb   : > { %v13224_v62 = vpop.f32.mrf.mxu0 }
 0x9fc   : > { %15884 = vst [vmem:[#allocation19_spill] sm:$0xff] %v13224_v62  ;;  %v13226_v31 = vpop.f32.mrf.mxu1  ;;  %v3263_v18 = vpop.permute.xlu1 %3262  ;;  %v4334_v62 = vmul.f32 1.442695, %v4297_v35 }
 0x9fd   : > { %15885 = vst [vmem:[#allocation46_spill] sm:$0xff] %v13226_v31  ;;  %v3220_v31 = vmul.f32 %v9241_v13, %v3177_v42 }
 0x9fe   : > { %3310 = vst.msk [vmem:[#allocation6 + $0x4] sm:$0xf] %vm3308_vm3, %v3263_v18  ;;  %9244 = vpow2.f32 %v4334_v62 }
 0x9ff   : > { %4269 = vmax.xlane.f32.xlu1 %v4268_v21  ;;  %v3236_v18 = vpack.c.bf16 %v3220_v31, %v3220_v31  ;;  %v13246_v29 = vpop.eup %9242 }
 0xa03   : > { %v3818_v57 = vpop.f32.mrf.mxu0 }
 0xa04   : > { %v3867_v38 = vpop.f32.mrf.mxu1 }
 0xa05   : > { %v13236_v24 = vadd.f32 %v3867_v38, %v3818_v57 }
 0xa07   : > { %3712 = vadd.xlane.f32.xlu1 %v13071_v60  ;;  %v13248_v60 = vpop.eup %9244 }
 0xa08   : > { %v4255_v30 = vpop.xlane.xlu0 %4254 }
 0xa09   : > { %v4298_v19 = vsub.f32 %v15869_v9, %v4255_v30  ;;  %v4299_v16 = vsub.f32 %v15868_v47, %v4255_v30 }
 0xa0b   : > { %v4336_v58 = vmul.f32 1.442695, %v4298_v19  ;;  %v4338_v44 = vmul.f32 1.442695, %v4299_v16  ;;  %v13241_v21 = vpop.f32.mrf.mxu0 }
 0xa0c   : > { %v13243_v12 = vpop.f32.mrf.mxu1 }
 0xa0d   : > { %9246 = vpow2.f32 %v4336_v58  ;;  %3276 = vrot.lane.b32.xlu2 %v3236_v18, %s9928_s20  ;;  %v15888_v58 = vld [vmem:[#allocation74_spill] sm:$0xff] }
 0xa0e   : > { %9248 = vpow2.f32 %v4338_v44  ;;  %v4271_v44 = vmax.f32 %v15888_v58, %v12807_v2 }
 0xa0f   : > { %9250 = vrcp.f32 %v12964_v17 }
 0xa10   : > { %v13259_v18 = vpop.xlane.xlu0 %3700 }
 0xa13   : > { %v9247_v9 = vpop.eup %9246  ;;  %v3823_v42 = vpop.f32.mrf.mxu0 }
 0xa14   : > { %v9249_v47 = vpop.eup %9248  ;;  %v3872_v30 = vpop.f32.mrf.mxu1  ;;  %v4438_v31 = vpack.c.bf16 %v9247_v9, %v13246_v29 }
 0xa15   : > { %v13252_v57 = vadd.f32 %v3872_v30, %v3823_v42  ;;  %v4439_v62 = vpack.c.bf16 %v9249_v47, %v13248_v60  ;;  %v13255_v3 = vadd.f32 %v9249_v47, %v9247_v9  ;;  %v9251_v16 = vpop.eup %9250 }
 0xa16   : > { %4513 = vmatmul.bf16.gmra.mxu0 %v4438_v31  ;;  %v3219_v17 = vmul.f32 %v9251_v16, %v13095_v14 }
 0xa17   : > { %4562 = vmatmul.bf16.gmra.mxu1 %v4439_v62  ;;  %v4258_v35 = vpop.xlane.xlu2 %4257 }
 0xa18   : > { %v4300_v38 = vsub.f32 %v15873_v6, %v4258_v35  ;;  %v4301_v13 = vsub.f32 %v15872_v53, %v4258_v35  ;;  %v3235_v42 = vpack.c.bf16 %v3219_v17, %v3219_v17 }
 0xa1a   : > { %v4340_v46 = vmul.f32 1.442695, %v4300_v38  ;;  %v4342_v19 = vmul.f32 1.442695, %v4301_v13 }
 0xa1c   : > { %9252 = vpow2.f32 %v4340_v46 }
 0xa1d   : > { %9254 = vpow2.f32 %v4342_v19  ;;  %v15889_v19 = vld [vmem:[#allocation41_spill] sm:$0xff] }
 0xa1e   : > { %v4274_v16 = vmax.f32 %v15889_v19, %v12829_v26 }
 0xa1f   : > { %v13264_v9 = vpop.xlane.xlu2 %3706 }
 0xa20   : > { %3274 = vrot.lane.b32.xlu1 %v3235_v42, %s9928_s20 }
 0xa21   : > { %4272 = vmax.xlane.f32.xlu0 %v4271_v44 }
 0xa22   : > { %v9253_v47 = vpop.eup %9252 }
 0xa23   : > { %v9255_v53 = vpop.eup %9254  ;;  %v3267_v6 = vpop.permute.xlu0 %3266 }
 0xa24   : > { %3312 = vst.msk [vmem:[#allocation6 + $0xc] sm:$0xf] %vm3308_vm3, %v3267_v6  ;;  %v13268_v30 = vadd.f32 %v9255_v53, %v9253_v47 }
 0xa27   : > { %v3271_v31 = vpop.permute.xlu2 %3270  ;;  %v4261_v14 = vpop.xlane.xlu1 %4260 }
 0xa28   : > { %3314 = vst.msk [vmem:[#allocation6 + $0x14] sm:$0xf] %vm3308_vm3, %v3271_v31  ;;  %v4302_v62 = vsub.f32 %v15877_v56, %v4261_v14  ;;  %v4303_v35 = vsub.f32 %v15876_v23, %v4261_v14  ;;  %v15891_v14 = vld [vmem:[#allocation77_spill] sm:$0xff] }
 0xa29   : > { %3718 = vadd.xlane.f32.xlu0 %v13016_v37 }
 0xa2a   : > { %v4344_v38 = vmul.f32 1.442695, %v4302_v62  ;;  %v4346_v13 = vmul.f32 1.442695, %v4303_v35 }
 0xa2c   : > { %9256 = vpow2.f32 %v4344_v38 }
 0xa2d   : > { %9258 = vpow2.f32 %v4346_v13 }
 0xa2e   : > { %9260 = vrcp.f32 %v13050_v39 }
 0xa2f   : > { %v13282_v39 = vpop.xlane.xlu1 %3703  ;;  %9262 = vrcp.f32 %v12931_v49 }
 0xa32   : > { %v9257_v46 = vpop.eup %9256 }
 0xa33   : > { %v9259_v17 = vpop.eup %9258  ;;  %v4440_v44 = vpack.c.bf16 %v9257_v46, %v9253_v47  ;;  %v15890_v47 = vld [vmem:[#allocation49_spill] sm:$0xff] }
 0xa34   : > { %v9261_v42 = vpop.eup %9260  ;;  %v4441_v6 = vpack.c.bf16 %v9259_v17, %v9255_v53  ;;  %v13277_v37 = vadd.f32 %v9259_v17, %v9257_v46  ;;  %v4277_v53 = vmax.f32 %v15891_v14, %v15890_v47 }
 0xa35   : > { %v3221_v56 = vmul.f32 %v9261_v42, %v13130_v20  ;;  %4518 = vmatmul.bf16.gmra.mxu0 %v4440_v44  ;;  %v3184_v20 = vadd.f32 %v13156_v55, %v13152_v7  ;;  %v9263_v35 = vpop.eup %9262  ;;  %v15892_v55 = vld [vmem:[#allocation26_spill] sm:$0xff] }
 0xa36   : > { %4275 = vmax.xlane.f32.xlu2 %v4274_v16  ;;  %4567 = vmatmul.bf16.gmra.mxu1 %v4441_v6 }
 0xa37   : > { %v3237_v23 = vpack.c.bf16 %v3221_v56, %v3221_v56  ;;  %v3223_v13 = vmul.f32 %v9263_v35, %v3184_v20 }
 0xa39   : > { %v3239_v49 = vpack.c.bf16 %v3223_v13, %v3223_v13 }
 0xa3d   : > { %3278 = vrot.lane.b32.xlu0 %v3237_v23, %s9928_s20 }
 0xa3e   : > { %3724 = vadd.xlane.f32.xlu2 %v12953_v28 }
 0xa47   : > { %v3269_v31 = vpop.permute.xlu1 %3268 }
 0xa48   : > { %3313 = vst.msk [vmem:[#allocation6 + $0x10] sm:$0xf] %vm3308_vm3, %v3269_v31  ;;  %v15893_v31 = vld [vmem:[#allocation12_spill] sm:$0xff] }
 0xa4a   : > { %4278 = vmax.xlane.f32.xlu1 %v4277_v53  ;;  %v15894_v53 = vld [vmem:[#allocation79_spill] sm:$0xff] }
 0xa4e   : > { %v4264_v62 = vpop.xlane.xlu0 %4263 }
 0xa4f   : > { %v4304_v38 = vsub.f32 %v15881_v45, %v4264_v62  ;;  %v4305_v28 = vsub.f32 %v15880_v43, %v4264_v62 }
 0xa51   : > { %v4348_v46 = vmul.f32 1.442695, %v4304_v38  ;;  %v4350_v16 = vmul.f32 1.442695, %v4305_v28 }
 0xa52   : > { %3721 = vadd.xlane.f32.xlu1 %v13097_v51  ;;  %v4280_v51 = vmax.f32 %v15894_v53, %v15893_v31 }
 0xa53   : > { %9264 = vpow2.f32 %v4348_v46 }
 0xa54   : > { %9266 = vpow2.f32 %v4350_v16 }
 0xa55   : > { %9268 = vrcp.f32 %v15892_v55 }
 0xa56   : > { %3282 = vrot.lane.b32.xlu2 %v3239_v49, %s9928_s20  ;;  %v13297_v45 = vpop.xlane.xlu0 %3709  ;;  %v15895_v49 = vld [vmem:[#allocation20_spill] sm:$0xff] }
 0xa59   : > { %v9265_v17 = vpop.eup %9264 }
 0xa5a   : > { %v9267_v44 = vpop.eup %9266 }
 0xa5b   : > { %v13294_v7 = vadd.f32 %v9267_v44, %v9265_v17  ;;  %v9269_v20 = vpop.eup %9268 }
 0xa5c   : > { %v3222_v62 = vmul.f32 %v9269_v20, %v13144_v40 }
 0xa60   : > { %v4267_v42 = vpop.xlane.xlu2 %4266 }
 0xa61   : > { %v4306_v43 = vsub.f32 %v15883_v22, %v4267_v42  ;;  %v4307_v6 = vsub.f32 %v15882_v61, %v4267_v42  ;;  %v3238_v22 = vpack.c.bf16 %v3222_v62, %v3222_v62 }
 0xa63   : > { %v4352_v56 = vmul.f32 1.442695, %v4306_v43  ;;  %v4354_v23 = vmul.f32 1.442695, %v4307_v6  ;;  %v15896_v6 = vld [vmem:[#allocation10_spill] sm:$0xff] }
 0xa65   : > { %9270 = vpow2.f32 %v4352_v56 }
 0xa66   : > { %9272 = vpow2.f32 %v4354_v23  ;;  %v15897_v23 = vld [vmem:[#allocation29_spill] sm:$0xff] }
 0xa67   : > { %4281 = vmax.xlane.f32.xlu0 %v4280_v51  ;;  %9274 = vrcp.f32 %v15896_v6  ;;  %v15898_v51 = vld [vmem:[#allocation81_spill] sm:$0xff] }
 0xa68   : > { %v13304_v35 = vpop.xlane.xlu2 %3715  ;;  %v4283_v20 = vmax.f32 %v15898_v51, %v15897_v23 }
 0xa69   : > { %v3273_v38 = vpop.permute.xlu0 %3272 }
 0xa6a   : > { %3315 = vst.msk [vmem:[#allocation6 + $0x18] sm:$0xf] %vm3308_vm3, %v3273_v38 }
 0xa6b   : > { %v9271_v28 = vpop.eup %9270  ;;  %3280 = vrot.lane.b32.xlu1 %v3238_v22, %s9928_s20 }
 0xa6c   : > { %v9273_v13 = vpop.eup %9272  ;;  %v4442_v61 = vpack.c.bf16 %v9271_v28, %v9265_v17 }
 0xa6d   : > { %v4443_v46 = vpack.c.bf16 %v9273_v13, %v9267_v44  ;;  %v13308_v16 = vadd.f32 %v9273_v13, %v9271_v28  ;;  %v9275_v44 = vpop.eup %9274 }
 0xa6e   : > { %4523 = vmatmul.bf16.gmra.mxu0 %v4442_v61  ;;  %v3224_v62 = vmul.f32 %v9275_v44, %v13164_v63 }
 0xa6f   : > { %4572 = vmatmul.bf16.gmra.mxu1 %v4443_v46  ;;  %3727 = vadd.xlane.f32.xlu0 %v15895_v49  ;;  %v15899_v46 = vld [vmem:[#allocation21_spill] sm:$0xff]  ;;  %v15900_v49 = vld [vmem:[#allocation38_spill] sm:$0xff] }
 0xa70   : > { %v3277_v40 = vpop.permute.xlu2 %3276  ;;  %v3240_v22 = vpack.c.bf16 %v3224_v62, %v3224_v62  ;;  %v4286_v63 = vmax.f32 %v15900_v49, %v15899_v46 }
 0xa71   : > { %3317 = vst.msk [vmem:[#allocation6 + $0x20] sm:$0xf] %vm3308_vm3, %v3277_v40  ;;  %v3192_v40 = vadd.f32 %v13184_v41, %v13180_v36 }
 0xa72   : > { %v4270_v55 = vpop.xlane.xlu1 %4269 }
 0xa73   : > { %v4308_v42 = vsub.f32 %v15886_v25, %v4270_v55  ;;  %v4309_v43 = vsub.f32 %v12781_v52, %v4270_v55  ;;  %v3732_v52 = vadd.f32 %v13182_v0, %v13178_v11 }
 0xa75   : > { %v4356_v17 = vmul.f32 1.442695, %v4308_v42  ;;  %v4358_v56 = vmul.f32 1.442695, %v4309_v43 }
 0xa77   : > { %9276 = vpow2.f32 %v4356_v17 }
 0xa78   : > { %9278 = vpow2.f32 %v4358_v56 }
 0xa79   : > { %9280 = vrcp.f32 %v13148_v54 }
 0xa7a   : > { %v13323_v25 = vpop.xlane.xlu1 %3712 }
 0xa7d   : > { %v9277_v38 = vpop.eup %9276 }
 0xa7e   : > { %v9279_v28 = vpop.eup %9278 }
 0xa7f   : > { %4284 = vmax.xlane.f32.xlu2 %v4283_v20  ;;  %v13318_v13 = vadd.f32 %v9279_v28, %v9277_v38  ;;  %v9281_v11 = vpop.eup %9280 }
 0xa80   : > { %v3226_v17 = vmul.f32 %v9281_v11, %v3192_v40  ;;  %v15904_v11 = vld [vmem:[#allocation43_spill] sm:$0xff] }
 0xa82   : > { %v3242_v54 = vpack.c.bf16 %v3226_v17, %v3226_v17 }
 0xa83   : > { %3284 = vrot.lane.b32.xlu0 %v3240_v22, %s9928_s20 }
 0xa87   : > { %3733 = vadd.xlane.f32.xlu2 %v3732_v52  ;;  %v15901_v52 = vld [vmem:[#allocation44_spill] sm:$0xff] }
 0xa92   : > { %v3275_v61 = vpop.permute.xlu1 %3274 }
 0xa93   : > { %3316 = vst.msk [vmem:[#allocation6 + $0x1c] sm:$0xf] %vm3308_vm3, %v3275_v61  ;;  %v15902_v61 = vld [vmem:[#allocation84_spill] sm:$0xff] }
 0xa94   : > { %v4273_v55 = vpop.xlane.xlu0 %4272 }
 0xa95   : > { %v4310_v42 = vsub.f32 %v15888_v58, %v4273_v55  ;;  %v4311_v43 = vsub.f32 %v12807_v2, %v4273_v55  ;;  %4287 = vmax.xlane.f32.xlu1 %v4286_v63  ;;  %v15903_v63 = vld [vmem:[#allocation34_spill] sm:$0xff] }
 0xa97   : > { %v4360_v0 = vmul.f32 1.442695, %v4310_v42  ;;  %v4362_v6 = vmul.f32 1.442695, %v4311_v43 }
 0xa99   : > { %9282 = vpow2.f32 %v4360_v0 }
 0xa9a   : > { %9284 = vpow2.f32 %v4362_v6 }
 0xa9b   : > { %9286 = vrcp.f32 %v15903_v63  ;;  %v13361_v63 = vpop.f32.mrf.mxu3 }
 0xa9c   : > { %v13337_v2 = vpop.xlane.xlu0 %3718 }
 0xa9d   : > { %3730 = vadd.xlane.f32.xlu1 %v13136_v10  ;;  %v4289_v10 = vmax.f32 %v15902_v61, %v15901_v52 }
 0xa9f   : > { %3288 = vrot.lane.b32.xlu2 %v3242_v54, %s9928_s20  ;;  %v9283_v36 = vpop.eup %9282  ;;  %v3194_v54 = vadd.f32 %v13198_v32, %v13196_v34  ;;  %v15905_v34 = vld [vmem:[#allocation36_spill] sm:$0xff]  ;;  %v15906_v32 = vld [vmem:[#allocation27_spill] sm:$0xff] }
 0xaa0   : > { %v9285_v41 = vpop.eup %9284  ;;  %v4444_v56 = vpack.c.bf16 %v9283_v36, %v9277_v38  ;;  %v3189_v38 = vadd.f32 %v13172_v15, %v13170_v1 }
 0xaa1   : > { %v4445_v44 = vpack.c.bf16 %v9285_v41, %v9279_v28  ;;  %v13335_v20 = vadd.f32 %v9285_v41, %v9283_v36  ;;  %v9287_v42 = vpop.eup %9286 }
 0xaa2   : > { %4528 = vmatmul.bf16.gmra.mxu0 %v4444_v56 }
 0xaa3   : > { %4577 = vmatmul.bf16.gmra.mxu1 %v4445_v44 }
 0xaa9   : > { %v4276_v58 = vpop.xlane.xlu2 %4275 }
 0xaaa   : > { %v4312_v62 = vsub.f32 %v15889_v19, %v4276_v58  ;;  %v4313_v22 = vsub.f32 %v12829_v26, %v4276_v58  ;;  %v3225_v26 = vmul.f32 %v9287_v42, %v3189_v38  ;;  %v13363_v38 = vpop.f32.mrf.mxu2 }
 0xaac   : > { %v4364_v40 = vmul.f32 1.442695, %v4312_v62  ;;  %v4366_v55 = vmul.f32 1.442695, %v4313_v22  ;;  %v3241_v6 = vpack.c.bf16 %v3225_v26, %v3225_v26 }
 0xaad   : > { %4290 = vmax.xlane.f32.xlu0 %v4289_v10  ;;  %v4945_v10 = vmax.f32 %v15906_v32, %v15905_v34 }
 0xaae   : > { %9288 = vpow2.f32 %v4364_v40 }
 0xaaf   : > { %9290 = vpow2.f32 %v4366_v55  ;;  %v3279_v28 = vpop.permute.xlu0 %3278 }
 0xab0   : > { %3318 = vst.msk [vmem:[#allocation6 + $0x24] sm:$0xf] %vm3308_vm3, %v3279_v28  ;;  %9292 = vrcp.f32 %v15904_v11 }
 0xab1   : > { %v13347_v19 = vpop.xlane.xlu2 %3724 }
 0xab2   : > { %v13370_v26 = vpop.f32.mrf.mxu2 }
 0xab4   : > { %v9289_v43 = vpop.eup %9288 }
 0xab5   : > { %v9291_v0 = vpop.eup %9290 }
 0xab6   : > { %v13350_v17 = vadd.f32 %v9291_v0, %v9289_v43  ;;  %3286 = vrot.lane.b32.xlu1 %v3241_v6, %s9928_s20  ;;  %v9293_v15 = vpop.eup %9292 }
 0xab7   : > { %v3227_v36 = vmul.f32 %v9293_v15, %v3194_v54 }
 0xab9   : > { %v3283_v1 = vpop.permute.xlu2 %3282  ;;  %v3243_v41 = vpack.c.bf16 %v3227_v36, %v3227_v36 }
 0xaba   : > { %3320 = vst.msk [vmem:[#allocation6 + $0x2c] sm:$0xf] %vm3308_vm3, %v3283_v1 }
 0xabd   : > { %v4279_v56 = vpop.xlane.xlu1 %4278 }
 0xabe   : > { %v4314_v44 = vsub.f32 %v15891_v14, %v4279_v56  ;;  %v4315_v58 = vsub.f32 %v15890_v47, %v4279_v56  ;;  %v13368_v47 = vpop.f32.mrf.mxu3 }
 0xabf   : > { %v4954_v11 = vmax.f32 %v13370_v26, %v13368_v47 }
 0xac0   : > { %v4368_v62 = vmul.f32 1.442695, %v4314_v44  ;;  %v4370_v22 = vmul.f32 1.442695, %v4315_v58  ;;  %v15908_v58 = vld [vmem:[#allocation30_spill] sm:$0xff] }
 0xac1   : > { %3290 = vrot.lane.b32.xlu0 %v3243_v41, %s9928_s20 }
 0xac2   : > { %9294 = vpow2.f32 %v4368_v62  ;;  %v15909_v62 = vld [vmem:[#allocation24_spill] sm:$0xff] }
 0xac3   : > { %9296 = vpow2.f32 %v4370_v22  ;;  %v15910_v22 = vld [vmem:[#allocation8_spill] sm:$0xff] }
 0xac5   : > { %v13374_v6 = vpop.xlane.xlu1 %3721 }
 0xac8   : > { %4946 = vmax.xlane.f32.xlu2 %v4945_v10  ;;  %v9295_v40 = vpop.eup %9294  ;;  %v3863_v10 = vadd.f32 %v13219_v50, %v13215_v4 }
 0xac9   : > { %v9297_v55 = vpop.eup %9296  ;;  %v4446_v28 = vpack.c.bf16 %v9295_v40, %v9289_v43 }
 0xaca   : > { %v4447_v14 = vpack.c.bf16 %v9297_v55, %v9291_v0  ;;  %v13365_v42 = vadd.f32 %v9297_v55, %v9295_v40  ;;  %v4394_v40 = vadd.f32 %v13248_v60, %v13246_v29 }
 0xacb   : > { %4533 = vmatmul.bf16.gmra.mxu0 %v4446_v28 }
 0xacc   : > { %4582 = vmatmul.bf16.gmra.mxu1 %v4447_v14 }
 0xad0   : > { %4389 = vadd.xlane.f32.xlu2 %v13158_v5  ;;  %v15907_v5 = vld [vmem:[#allocation25_spill] sm:$0xff] }
 0xad8   : > { %4955 = vmax.xlane.f32.xlu2 %v4954_v11 }
 0xada   : > { %v4282_v54 = vpop.xlane.xlu0 %4281 }
 0xadb   : > { %v4316_v43 = vsub.f32 %v15894_v53, %v4282_v54  ;;  %v4317_v0 = vsub.f32 %v15893_v31, %v4282_v54  ;;  %v4948_v53 = vmax.f32 %v15909_v62, %v15908_v58 }
 0xadd   : > { %v4372_v1 = vmul.f32 1.442695, %v4316_v43  ;;  %v4374_v15 = vmul.f32 1.442695, %v4317_v0  ;;  %v3281_v36 = vpop.permute.xlu1 %3280 }
 0xade   : > { %3319 = vst.msk [vmem:[#allocation6 + $0x28] sm:$0xf] %vm3308_vm3, %v3281_v36 }
 0xadf   : > { %9298 = vpow2.f32 %v4372_v1 }
 0xae0   : > { %9300 = vpow2.f32 %v4374_v15  ;;  %4398 = vadd.xlane.f32.xlu2 %v13255_v3  ;;  %4392 = vadd.xlane.f32.xlu1 %v15907_v5 }
 0xae1   : > { %9302 = vrcp.f32 %v13221_v8 }
 0xae2   : > { %v13386_v31 = vpop.xlane.xlu0 %3727  ;;  %9304 = vrcp.f32 %v15910_v22  ;;  %v13408_v22 = vpop.f32.mrf.mxu1 }
 0xae5   : > { %v9299_v41 = vpop.eup %9298 }
 0xae6   : > { %v9301_v56 = vpop.eup %9300 }
 0xae7   : > { %v13381_v44 = vadd.f32 %v9301_v56, %v9299_v41  ;;  %v9303_v3 = vpop.eup %9302 }
 0xae8   : > { %v3915_v55 = vmul.f32 %v9303_v3, %v3863_v10  ;;  %v9305_v8 = vpop.eup %9304 }
 0xae9   : > { %v3913_v54 = vmul.f32 %v9305_v8, %v13204_v59  ;;  %v3860_v59 = vadd.f32 %v13211_v27, %v13209_v33  ;;  %v13412_v33 = vpop.f32.mrf.mxu3  ;;  %v13414_v27 = vpop.f32.mrf.mxu2 }
 0xaea   : > { %v3931_v15 = vpack.c.bf16 %v3915_v55, %v3915_v55 }
 0xaeb   : > { %4949 = vmax.xlane.f32.xlu0 %v4948_v53  ;;  %v3929_v4 = vpack.c.bf16 %v3913_v54, %v3913_v54 }
 0xaf1   : > { %v13422_v8 = vpop.f32.mrf.mxu3 }
 0xaf2   : > { %v4285_v28 = vpop.xlane.xlu2 %4284 }
 0xaf3   : > { %v4318_v14 = vsub.f32 %v15898_v51, %v4285_v28  ;;  %v4319_v11 = vsub.f32 %v15897_v23, %v4285_v28  ;;  %4395 = vadd.xlane.f32.xlu0 %v4394_v40  ;;  %v13404_v51 = vpop.f32.mrf.mxu0 }
 0xaf5   : > { %v4376_v43 = vmul.f32 1.442695, %v4318_v14  ;;  %v4378_v0 = vmul.f32 1.442695, %v4319_v11  ;;  %v3285_v1 = vpop.permute.xlu0 %3284 }
 0xaf6   : > { %3321 = vst.msk [vmem:[#allocation6 + $0x30] sm:$0xf] %vm3308_vm3, %v3285_v1 }
 0xaf7   : > { %9306 = vpow2.f32 %v4376_v43  ;;  %v13426_v43 = vpop.f32.mrf.mxu2 }
 0xaf8   : > { %9308 = vpow2.f32 %v4378_v0  ;;  %3965 = vrot.lane.b32.xlu2 %v3931_v15, %s9927_s19 }
 0xaf9   : > { %9310 = vrcp.f32 %v13188_v48  ;;  %3961 = vrot.lane.b32.xlu1 %v3929_v4, %s9927_s19 }
 0xafa   : > { %v13399_v50 = vpop.xlane.xlu2 %3733 }
 0xafb   : > { %15911 = vst [vmem:[#allocation39_spill] sm:$0xff] %v13399_v50 }
 0xafd   : > { %v9307_v29 = vpop.eup %9306 }
 0xafe   : > { %v9309_v60 = vpop.eup %9308  ;;  %v4448_v23 = vpack.c.bf16 %v9307_v29, %v9299_v41  ;;  %v13416_v41 = vpop.f32.mrf.mxu0 }
 0xaff   : > { %v4449_v36 = vpack.c.bf16 %v9309_v60, %v9301_v56  ;;  %v13406_v5 = vadd.f32 %v9309_v60, %v9307_v29  ;;  %v9311_v53 = vpop.eup %9310  ;;  %v13418_v56 = vpop.f32.mrf.mxu1 }
 0xb00   : > { %4538 = vmatmul.bf16.gmra.mxu0 %v4448_v23  ;;  %v3914_v48 = vmul.f32 %v9311_v53, %v3860_v59  ;;  %v13432_v29 = vpop.f32.mrf.mxu3 }
 0xb01   : > { %4587 = vmatmul.bf16.gmra.mxu1 %v4449_v36 }
 0xb02   : > { %v3289_v10 = vpop.permute.xlu2 %3288  ;;  %v3930_v3 = vpack.c.bf16 %v3914_v48, %v3914_v48 }
 0xb03   : > { %3323 = vst.msk [vmem:[#allocation6 + $0x38] sm:$0xf] %vm3308_vm3, %v3289_v10  ;;  %v4951_v10 = vmax.f32 %v13363_v38, %v13361_v63 }
 0xb06   : > { %v13424_v54 = vpop.f32.mrf.mxu0 }
 0xb07   : > { %3963 = vrot.lane.b32.xlu0 %v3930_v3, %s9927_s19  ;;  %v13428_v0 = vpop.f32.mrf.mxu1 }
 0xb08   : > { %v4288_v40 = vpop.xlane.xlu1 %4287 }
 0xb09   : > { %v4320_v55 = vsub.f32 %v15900_v49, %v4288_v40  ;;  %v4321_v28 = vsub.f32 %v15899_v46, %v4288_v40  ;;  %v13436_v46 = vpop.f32.mrf.mxu2 }
 0xb0a   : > { %v4963_v60 = vmax.f32 %v13436_v46, %v13432_v29 }
 0xb0b   : > { %v4380_v14 = vmul.f32 1.442695, %v4320_v55  ;;  %v4382_v11 = vmul.f32 1.442695, %v4321_v28 }
 0xb0d   : > { %9312 = vpow2.f32 %v4380_v14 }
 0xb0e   : > { %9314 = vpow2.f32 %v4382_v11  ;;  %v13434_v49 = vpop.f32.mrf.mxu0 }
 0xb0f   : > { %v13438_v59 = vpop.f32.mrf.mxu1 }
 0xb10   : > { %v13444_v48 = vpop.xlane.xlu1 %3730 }
 0xb13   : > { %v9313_v1 = vpop.eup %9312 }
 0xb14   : > { %v9315_v15 = vpop.eup %9314 }
 0xb15   : > { %v13430_v4 = vadd.f32 %v9315_v15, %v9313_v1 }
 0xb16   : > { %v13448_v55 = vpop.f32.mrf.mxu0 }
 0xb17   : > { %v13450_v28 = vpop.f32.mrf.mxu1 }
 0xb20   : > { %v4291_v23 = vpop.xlane.xlu0 %4290 }
 0xb21   : > { %v4322_v36 = vsub.f32 %v15902_v61, %v4291_v23  ;;  %v4323_v53 = vsub.f32 %v15901_v52, %v4291_v23  ;;  %4964 = vmax.xlane.f32.xlu2 %v4963_v60 }
 0xb23   : > { %v4384_v3 = vmul.f32 1.442695, %v4322_v36  ;;  %v4386_v40 = vmul.f32 1.442695, %v4323_v53  ;;  %4952 = vmax.xlane.f32.xlu1 %v4951_v10  ;;  %v4957_v36 = vmax.f32 %v13414_v27, %v13412_v33  ;;  %v13459_v53 = vpop.f32.mrf.mxu0 }
 0xb25   : > { %9316 = vpow2.f32 %v4384_v3 }
 0xb26   : > { %9318 = vpow2.f32 %v4386_v40 }
 0xb27   : > { %9320 = vrcp.f32 %v13282_v39 }
 0xb28   : > { %v3287_v61 = vpop.permute.xlu1 %3286 }
 0xb29   : > { %4407 = vadd.xlane.f32.xlu2 %v13294_v7  ;;  %3322 = vst.msk [vmem:[#allocation6 + $0x34] sm:$0xf] %vm3308_vm3, %v3287_v61  ;;  %v13462_v7 = vpop.f32.mrf.mxu1 }
 0xb2b   : > { %v9317_v14 = vpop.eup %9316  ;;  %4401 = vadd.xlane.f32.xlu1 %v13268_v30  ;;  %v15912_v30 = vld [vmem:[#allocation13_spill] sm:$0xff]  ;;  %v13469_v3 = vpop.f32.mrf.mxu0 }
 0xb2c   : > { %v9319_v52 = vpop.eup %9318  ;;  %v4450_v11 = vpack.c.bf16 %v9317_v14, %v9313_v1  ;;  %9322 = vrcp.f32 %v15912_v30 }
 0xb2d   : > { %v4451_v60 = vpack.c.bf16 %v9319_v52, %v9315_v15  ;;  %v13455_v23 = vadd.f32 %v9319_v52, %v9317_v14  ;;  %v9321_v1 = vpop.eup %9320  ;;  %v3870_v15 = vadd.f32 %v13243_v12, %v13241_v21  ;;  %v15913_v14 = vld [vmem:[#allocation19_spill] sm:$0xff]  ;;  %v15914_v52 = vld [vmem:[#allocation46_spill] sm:$0xff]  ;;  %9324 = vrcp.f32 %v13259_v18 }
 0xb2e   : > { %4543 = vmatmul.bf16.gmra.mxu0 %v4450_v11  ;;  %v3865_v39 = vadd.f32 %v15914_v52, %v15913_v14 }
 0xb2f   : > { %4592 = vmatmul.bf16.gmra.mxu1 %v4451_v60  ;;  %v3918_v61 = vmul.f32 %v9321_v1, %v3870_v15 }
 0xb31   : > { %4958 = vmax.xlane.f32.xlu0 %v4957_v36  ;;  %v13473_v11 = vpop.f32.mrf.mxu1  ;;  %v3934_v12 = vpack.c.bf16 %v3918_v61, %v3918_v61 }
 0xb32   : > { %v9323_v21 = vpop.eup %9322 }
 0xb33   : > { %v3291_v10 = vpop.permute.xlu0 %3290  ;;  %v9325_v15 = vpop.eup %9324 }
 0xb34   : > { %3324 = vst.msk [vmem:[#allocation6 + $0x3c] sm:$0xf] %vm3308_vm3, %v3291_v10  ;;  %v13481_v52 = vpop.f32.mrf.mxu0 }
 0xb35   : > { %15916 = vst [vmem:[#allocation17_spill] sm:$0xff] %v13481_v52 }
 0xb39   : > { %4404 = vadd.xlane.f32.xlu0 %v13277_v37  ;;  %v3916_v37 = vmul.f32 %v9323_v21, %v3865_v39  ;;  %v13483_v50 = vpop.f32.mrf.mxu1 }
 0xb3a   : > { %15917 = vst [vmem:[#allocation33_spill] sm:$0xff] %v13483_v50 }
 0xb3b   : > { %v4947_v40 = vpop.xlane.xlu2 %4946  ;;  %v3932_v14 = vpack.c.bf16 %v3916_v37, %v3916_v37 }
 0xb3c   : > { %v4993_v60 = vsub.f32 %v15906_v32, %v4947_v40  ;;  %v4994_v36 = vsub.f32 %v15905_v34, %v4947_v40  ;;  %v3917_v34 = vmul.f32 %v9325_v15, %v13236_v24 }
 0xb3e   : > { %v5025_v10 = vmul.f32 1.442695, %v4993_v60  ;;  %v5027_v30 = vmul.f32 1.442695, %v4994_v36  ;;  %v3933_v39 = vpack.c.bf16 %v3917_v34, %v3917_v34  ;;  %v13492_v60 = vpop.f32.mrf.mxu0 }
 0xb3f   : > { %15919 = vst [vmem:[#allocation47_spill] sm:$0xff] %v13492_v60 }
 0xb40   : > { %9326 = vpow2.f32 %v5025_v10  ;;  %v13496_v10 = vpop.f32.mrf.mxu3 }
 0xb41   : > { %9328 = vpow2.f32 %v5027_v30  ;;  %3971 = vrot.lane.b32.xlu2 %v3934_v12, %s9927_s19  ;;  %v13494_v36 = vpop.f32.mrf.mxu1  ;;  %v13498_v30 = vpop.f32.mrf.mxu2 }
 0xb42   : > { %15920 = vst [vmem:[#allocation50_spill] sm:$0xff] %v13494_v36 }
 0xb43   : > { %v13479_v1 = vpop.xlane.xlu2 %4389 }
 0xb44   : > { %15915 = vst [vmem:[#allocation40_spill] sm:$0xff] %v13479_v1  ;;  %3967 = vrot.lane.b32.xlu1 %v3932_v14, %s9927_s19 }
 0xb46   : > { %v9327_v32 = vpop.eup %9326  ;;  %v13502_v12 = vpop.f32.mrf.mxu0 }
 0xb47   : > { %v9329_v18 = vpop.eup %9328  ;;  %15922 = vst [vmem:[#allocation22_spill] sm:$0xff] %v13502_v12 }
 0xb48   : > { %v13487_v40 = vadd.f32 %v9329_v18, %v9327_v32  ;;  %v13506_v37 = vpop.f32.mrf.mxu3 }
 0xb49   : > { %v13504_v24 = vpop.f32.mrf.mxu1  ;;  %v13509_v14 = vpop.f32.mrf.mxu2 }
 0xb4a   : > { %15918 = vst [vmem:[#allocation18_spill] sm:$0xff] %v13487_v40 }
 0xb4b   : > { %v13489_v61 = vpop.xlane.xlu2 %4955  ;;  %15923 = vst [vmem:[#allocation55_spill] sm:$0xff] %v13504_v24 }
 0xb4d   : > { %3969 = vrot.lane.b32.xlu0 %v3933_v39, %s9927_s19 }
 0xb50   : > { %v13517_v24 = vpop.f32.mrf.mxu3 }
 0xb51   : > { %v13515_v12 = vpop.f32.mrf.mxu1 }
 0xb52   : > { %15925 = vst [vmem:[#allocation37_spill] sm:$0xff] %v13515_v12  ;;  %v4960_v12 = vmax.f32 %v13426_v43, %v13422_v8 }
 0xb53   : > { %v13500_v21 = vpop.xlane.xlu2 %4398  ;;  %v13519_v60 = vpop.xlane.xlu1 %4392 }
 0xb54   : > { %15921 = vst [vmem:[#allocation31_spill] sm:$0xff] %v13500_v21  ;;  %v13513_v21 = vpop.f32.mrf.mxu0 }
 0xb55   : > { %15924 = vst [vmem:[#allocation45_spill] sm:$0xff] %v13513_v21 }
 0xb5b   : > { %v3966_v15 = vpop.permute.xlu2 %3965 }
 0xb5c   : > { %4012 = vst.msk [vmem:[#allocation6 + $0x8] sm:$0xf] %vm4009_vm4, %v3966_v15  ;;  %v13521_v15 = vpop.f32.mrf.mxu2 }
 0xb5d   : > { %v4972_v50 = vmax.f32 %v13521_v15, %v13517_v24 }
 0xb5e   : > { %v4950_v34 = vpop.xlane.xlu0 %4949 }
 0xb5f   : > { %v4995_v39 = vsub.f32 %v15909_v62, %v4950_v34  ;;  %v4996_v40 = vsub.f32 %v15908_v58, %v4950_v34 }
 0xb61   : > { %v5029_v1 = vmul.f32 1.442695, %v4995_v39  ;;  %v5031_v36 = vmul.f32 1.442695, %v4996_v40  ;;  %v13525_v40 = vpop.f32.mrf.mxu0  ;;  %v13529_v39 = vpop.f32.mrf.mxu1 }
 0xb63   : > { %9330 = vpow2.f32 %v5029_v1 }
 0xb64   : > { %9332 = vpow2.f32 %v5031_v36 }
 0xb65   : > { %9334 = vrcp.f32 %v13323_v25 }
 0xb66   : > { %v13534_v21 = vpop.xlane.xlu0 %4395  ;;  %9336 = vrcp.f32 %v13264_v9 }
 0xb67   : > { %9338 = vrcp.f32 %v13297_v45 }
 0xb69   : > { %v9331_v62 = vpop.eup %9330 }
 0xb6a   : > { %v9333_v52 = vpop.eup %9332  ;;  %v5137_v58 = vpack.c.bf16 %v9331_v62, %v9327_v32  ;;  %4973 = vmax.xlane.f32.xlu2 %v4972_v50  ;;  %v4966_v50 = vmax.f32 %v13498_v30, %v13496_v10  ;;  %v13541_v32 = vpop.f32.mrf.mxu1 }
 0xb6b   : > { %v5138_v34 = vpack.c.bf16 %v9333_v52, %v9329_v18  ;;  %v13527_v1 = vadd.f32 %v9333_v52, %v9331_v62  ;;  %v3962_v36 = vpop.permute.xlu1 %3961  ;;  %v13539_v52 = vpop.f32.mrf.mxu0  ;;  %15928 = vst [vmem:[#allocation9_spill] sm:$0xff] %v13541_v32 }
 0xb6c   : > { %5209 = vmatmul.bf16.vlgmr.msra.gmra.mxu0 %v5137_v58  ;;  %4010 = vst.msk [vmem:[#allocation6] sm:$0xf] %vm4009_vm4, %v3962_v36  ;;  %v3878_v58 = vadd.f32 %v13418_v56, %v13416_v41 }
 0xb6d   : > { %15926 = vst [vmem:[#allocation16_spill] sm:$0xff] %v13527_v1  ;;  %5258 = vmatmul.bf16.vlgmr.msra.gmra.mxu1 %v5138_v34 }
 0xb6e   : > { %4961 = vmax.xlane.f32.xlu1 %v4960_v12  ;;  %15927 = vst [vmem:[#allocation28_spill] sm:$0xff] %v13539_v52 }
 0xb72   : > { %4416 = vadd.xlane.f32.xlu2 %v13335_v20  ;;  %v13548_v62 = vpop.f32.mrf.mxu1  ;;  %v9335_v20 = vpop.eup %9334 }
 0xb73   : > { %v13546_v12 = vpop.f32.mrf.mxu0  ;;  %v9337_v36 = vpop.eup %9336 }
 0xb74   : > { %v3919_v9 = vmul.f32 %v9337_v36, %v13252_v57  ;;  %v5000_v57 = vsub.f32 %v13368_v47, %v13489_v61 }
 0xb76   : > { %4410 = vadd.xlane.f32.xlu1 %v13308_v16  ;;  %v3921_v16 = vmul.f32 %v9335_v20, %v3878_v58  ;;  %v3935_v45 = vpack.c.bf16 %v3919_v9, %v3919_v9  ;;  %v9804_v58 = vld [vmem:[%s11058_s11 + $0x28] sm:$0xff]  ;;  %v5039_v36 = vmul.f32 1.442695, %v5000_v57  ;;  %v13595_v57 = vpop.f32.mrf.mxu2 }
 0xb77   : > { %4967 = vmax.xlane.f32.xlu0 %v4966_v50 }
 0xb78   : > { %v3937_v50 = vpack.c.bf16 %v3921_v16, %v3921_v16  ;;  %v4999_v16 = vsub.f32 %v13370_v26, %v13489_v61 }
 0xb79   : > { %v3964_v18 = vpop.permute.xlu0 %3963 }
 0xb7a   : > { %4011 = vst.msk [vmem:[#allocation6 + $0x4] sm:$0xf] %vm4009_vm4, %v3964_v18  ;;  %v13557_v25 = vpop.f32.mrf.mxu1  ;;  %v9339_v18 = vpop.eup %9338 }
 0xb7b   : > { %v13555_v34 = vpop.f32.mrf.mxu0 }
 0xb7f   : > { %4413 = vadd.xlane.f32.xlu0 %v13318_v13  ;;  %v3875_v13 = vadd.f32 %v13408_v22, %v13404_v51  ;;  %v5037_v22 = vmul.f32 1.442695, %v4999_v16  ;;  %v13591_v16 = vpop.f32.mrf.mxu3 }
 0xb81   : > { %v3920_v1 = vmul.f32 %v9339_v18, %v3875_v13  ;;  %9340 = vpow2.f32 %v5037_v22 }
 0xb82   : > { %v13565_v56 = vpop.f32.mrf.mxu1  ;;  %9342 = vpow2.f32 %v5039_v36 }
 0xb83   : > { %v13563_v41 = vpop.f32.mrf.mxu0  ;;  %15930 = vst [vmem:[#allocation48_spill] sm:$0xff] %v13565_v56  ;;  %v3936_v20 = vpack.c.bf16 %v3920_v1, %v3920_v1 }
 0xb84   : > { %15929 = vst [vmem:[#allocation65_spill] sm:$0xff] %v13563_v41 }
 0xb87   : > { %v13585_v47 = vpop.eup %9340 }
 0xb88   : > { %15932 = vst [vmem:[#allocation42_spill] sm:$0xff] %v13585_v47 }
 0xb8a   : > { %3977 = vrot.lane.b32.xlu2 %v3937_v50, %s9927_s19  ;;  %v13581_v9 = vpop.f32.mrf.mxu1 }
 0xb8b   : > { %v13577_v18 = vpop.f32.mrf.mxu0 }
 0xb8f   : > { %3973 = vrot.lane.b32.xlu1 %v3935_v45, %s9927_s19 }
 0xb92   : > { %5438 = vrot.lane.b32.xlu2 %v9804_v58, %s9926_s18  ;;  %v13589_v58 = vpop.eup %9342 }
 0xb93   : > { %3975 = vrot.lane.b32.xlu0 %v3936_v20, %s9927_s19  ;;  %v13587_v61 = vpop.f32.mrf.mxu0  ;;  %15933 = vst [vmem:[#allocation71_spill] sm:$0xff] %v13589_v58 }
 0xb94   : > { %v13575_v51 = vpop.xlane.xlu2 %4964 }
 0xb96   : > { %v4953_v50 = vpop.xlane.xlu1 %4952 }
 0xb97   : > { %v4997_v1 = vsub.f32 %v13363_v38, %v4953_v50  ;;  %v4998_v13 = vsub.f32 %v13361_v63, %v4953_v50  ;;  %v13593_v38 = vpop.f32.mrf.mxu1 }
 0xb99   : > { %v5033_v26 = vmul.f32 1.442695, %v4997_v1  ;;  %v5035_v45 = vmul.f32 1.442695, %v4998_v13 }
 0xb9b   : > { %9344 = vpow2.f32 %v5033_v26  ;;  %v13604_v32 = vpop.f32.mrf.mxu0 }
 0xb9c   : > { %v13583_v20 = vpop.xlane.xlu2 %4407  ;;  %9346 = vpow2.f32 %v5035_v45  ;;  %15935 = vst [vmem:[#allocation14_spill] sm:$0xff] %v13604_v32 }
 0xb9d   : > { %15931 = vst [vmem:[#allocation35_spill] sm:$0xff] %v13583_v20 }
 0xb9f   : > { %v13608_v52 = vpop.f32.mrf.mxu1 }
 0xba0   : > { %15936 = vst [vmem:[#allocation15_spill] sm:$0xff] %v13608_v52 }
 0xba1   : > { %v9345_v63 = vpop.eup %9344 }
 0xba2   : > { %v9347_v22 = vpop.eup %9346  ;;  %v5139_v36 = vpack.c.bf16 %v13585_v47, %v9345_v63  ;;  %v13606_v47 = vpop.f32.mrf.mxu3 }
 0xba3   : > { %v5140_v13 = vpack.c.bf16 %v13589_v58, %v9347_v22  ;;  %v13602_v56 = vadd.f32 %v9347_v22, %v9345_v63  ;;  %v13610_v58 = vpop.f32.mrf.mxu2 }
 0xba4   : > { %v3972_v50 = vpop.permute.xlu2 %3971  ;;  %v4959_v1 = vpop.xlane.xlu0 %4958  ;;  %5214 = vmatmul.bf16.gmra.mxu0 %v5139_v36 }
 0xba5   : > { %4015 = vst.msk [vmem:[#allocation6 + $0x14] sm:$0xf] %vm4009_vm4, %v3972_v50  ;;  %v5001_v26 = vsub.f32 %v13414_v27, %v4959_v1  ;;  %v5002_v45 = vsub.f32 %v13412_v33, %v4959_v1  ;;  %5263 = vmatmul.bf16.gmra.mxu1 %v5140_v13  ;;  %v13616_v33 = vpop.xlane.xlu1 %4401 }
 0xba6   : > { %15934 = vst [vmem:[#allocation11_spill] sm:$0xff] %v13602_v56 }
 0xba7   : > { %v5041_v41 = vmul.f32 1.442695, %v5001_v26  ;;  %v5043_v20 = vmul.f32 1.442695, %v5002_v45  ;;  %v4969_v26 = vmax.f32 %v13509_v14, %v13506_v37 }
 0xba9   : > { %9348 = vpow2.f32 %v5041_v41  ;;  %v13622_v41 = vpop.f32.mrf.mxu0 }
 0xbaa   : > { %9350 = vpow2.f32 %v5043_v20  ;;  %v13624_v20 = vpop.f32.mrf.mxu1  ;;  %v13626_v22 = vpop.f32.mrf.mxu3 }
 0xbab   : > { %15938 = vst [vmem:[#allocation23_spill] sm:$0xff] %v13624_v20  ;;  %v13630_v1 = vpop.f32.mrf.mxu2  ;;  %v4975_v20 = vmax.f32 %v13595_v57, %v13591_v16  ;;  %9352 = vrcp.f32 %v13337_v2 }
 0xbac   : > { %15939 = vst [vmem:[#allocation51_spill] sm:$0xff] %v13626_v22  ;;  %v13628_v36 = vpop.xlane.xlu0 %4404  ;;  %v4981_v45 = vmax.f32 %v13630_v1, %v13626_v22  ;;  %9354 = vrcp.f32 %v13374_v6 }
 0xbad   : > { %15940 = vst [vmem:[#allocation61_spill] sm:$0xff] %v13630_v1  ;;  %9356 = vrcp.f32 %v13304_v35  ;;  %v13676_v35 = vld [vmem:[#allocation4 + $0x78] sm:$0xff] }
 0xbae   : > { %15943 = vst [vmem:[#allocation62_spill] sm:$0xff] %v13676_v35 }
 0xbaf   : > { %v13612_v50 = vpop.eup %9348 }
 0xbb0   : > { %v13614_v27 = vpop.eup %9350 }
 0xbb1   : > { %v13620_v63 = vadd.f32 %v13614_v27, %v13612_v50  ;;  %v13639_v56 = vpop.f32.mrf.mxu0 }
 0xbb2   : > { %v13641_v52 = vpop.f32.mrf.mxu1 }
 0xbb3   : > { %15937 = vst [vmem:[#allocation58_spill] sm:$0xff] %v13620_v63  ;;  %v4978_v63 = vmax.f32 %v13610_v58, %v13606_v47 }
 0xbb6   : > { %v3968_v13 = vpop.permute.xlu1 %3967 }
 0xbb7   : > { %4013 = vst.msk [vmem:[#allocation6 + $0xc] sm:$0xf] %vm4009_vm4, %v3968_v13 }
 0xbb9   : > { %4970 = vmax.xlane.f32.xlu1 %v4969_v26  ;;  %v13647_v13 = vpop.f32.mrf.mxu0 }
 0xbba   : > { %v13650_v26 = vpop.f32.mrf.mxu1 }
 0xbbb   : > { %4982 = vmax.xlane.f32.xlu2 %v4981_v45 }
 0xbbd   : > { %4979 = vmax.xlane.f32.xlu0 %v4978_v63 }
 0xbbf   : > { %v3970_v32 = vpop.permute.xlu0 %3969 }
 0xbc0   : > { %4014 = vst.msk [vmem:[#allocation6 + $0x10] sm:$0xf] %vm4009_vm4, %v3970_v32  ;;  %v9353_v32 = vpop.eup %9352 }
 0xbc1   : > { %4976 = vmax.xlane.f32.xlu1 %v4975_v20  ;;  %v13655_v63 = vpop.f32.mrf.mxu0  ;;  %v9355_v20 = vpop.eup %9354 }
 0xbc2   : > { %15941 = vst [vmem:[#allocation64_spill] sm:$0xff] %v13655_v63  ;;  %v13657_v45 = vpop.f32.mrf.mxu1 }
 0xbc3   : > { %4425 = vadd.xlane.f32.xlu2 %v13381_v44  ;;  %15942 = vst [vmem:[#allocation60_spill] sm:$0xff] %v13657_v45  ;;  %v3883_v44 = vadd.f32 %v13438_v59, %v13434_v49  ;;  %v9357_v45 = vpop.eup %9356  ;;  %v3880_v49 = vadd.f32 %v13428_v0, %v13424_v54 }
 0xbc5   : > { %4422 = vadd.xlane.f32.xlu0 %v13365_v42  ;;  %v3885_v42 = vadd.f32 %v13450_v28, %v13448_v55  ;;  %v3923_v22 = vmul.f32 %v9353_v32, %v3883_v44  ;;  %v3922_v55 = vmul.f32 %v9357_v45, %v3880_v49 }
 0xbc7   : > { %v3924_v2 = vmul.f32 %v9355_v20, %v3885_v42  ;;  %v3938_v32 = vpack.c.bf16 %v3922_v55, %v3922_v55  ;;  %v9806_v20 = vld [vmem:[#allocation4 + $0x50] sm:$0xff] }
 0xbc9   : > { %4419 = vadd.xlane.f32.xlu1 %v13350_v17  ;;  %v13664_v1 = vpop.f32.mrf.mxu0  ;;  %v3939_v17 = vpack.c.bf16 %v3923_v22, %v3923_v22  ;;  %v3940_v63 = vpack.c.bf16 %v3924_v2, %v3924_v2 }
 0xbca   : > { %v13666_v6 = vpop.f32.mrf.mxu1 }
 0xbd1   : > { %v13674_v28 = vpop.f32.mrf.mxu0 }
 0xbd2   : > { %v13680_v22 = vpop.f32.mrf.mxu1 }
 0xbd9   : > { %3981 = vrot.lane.b32.xlu0 %v3939_v17, %s9927_s19 }
 0xbdb   : > { %3983 = vrot.lane.b32.xlu2 %v3940_v63, %s9927_s19 }
 0xbdd   : > { %v13672_v59 = vpop.xlane.xlu2 %4973 }
 0xbe1   : > { %6173 = vrot.lane.b32.xlu0 %v13676_v35, %s9927_s19  ;;  %v4962_v44 = vpop.xlane.xlu1 %4961 }
 0xbe2   : > { %v5003_v63 = vsub.f32 %v13426_v43, %v4962_v44  ;;  %v5004_v54 = vsub.f32 %v13422_v8, %v4962_v44  ;;  %3979 = vrot.lane.b32.xlu1 %v3938_v32, %s9927_s19  ;;  %v13692_v43 = vld [vmem:[#allocation4 + $0x18] sm:$0xff]  ;;  %v13696_v8 = vld [vmem:[#allocation4 + $0x68] sm:$0xff] }
 0xbe3   : > { %6153 = vrot.lane.b32.xlu2 %v9806_v20, %s9927_s19 }
 0xbe4   : > { %v5045_v45 = vmul.f32 1.442695, %v5003_v63  ;;  %v5047_v42 = vmul.f32 1.442695, %v5004_v54 }
 0xbe5   : > { %v13686_v0 = vpop.xlane.xlu2 %4416 }
 0xbe6   : > { %9358 = vpow2.f32 %v5045_v45 }
 0xbe7   : > { %9360 = vpow2.f32 %v5047_v42 }
 0xbe9   : > { %v5210_v2 = vpop.f32.mrf.mxu0 }
 0xbea   : > { %v5259_v17 = vpop.f32.mrf.mxu1  ;;  %v4968_v49 = vpop.xlane.xlu0 %4967  ;;  %6155 = vrot.lane.b32.xlu1 %v13696_v8, %s9927_s19 }
 0xbeb   : > { %v13688_v55 = vadd.f32 %v5259_v17, %v5210_v2  ;;  %v5007_v35 = vsub.f32 %v13498_v30, %v4968_v49  ;;  %v5008_v20 = vsub.f32 %v13496_v10, %v4968_v49  ;;  %6151 = vrot.lane.b32.xlu2 %v13692_v43, %s9927_s19  ;;  %v5005_v30 = vsub.f32 %v13436_v46, %v13575_v51  ;;  %v9809_v17 = vld [vmem:[#allocation4 + $0x10] sm:$0xff] }
 0xbec   : > { %v9359_v54 = vpop.eup %9358 }
 0xbed   : > { %15944 = vst [vmem:[#allocation53_spill] sm:$0xff] %v13688_v55  ;;  %v5053_v32 = vmul.f32 1.442695, %v5007_v35  ;;  %v5055_v44 = vmul.f32 1.442695, %v5008_v20  ;;  %v3978_v63 = vpop.permute.xlu2 %3977  ;;  %v9361_v45 = vpop.eup %9360  ;;  %v5141_v10 = vpack.c.bf16 %v9359_v54, %v13612_v50  ;;  %v5006_v35 = vsub.f32 %v13432_v29, %v13575_v51 }
 0xbee   : > { %4018 = vst.msk [vmem:[#allocation6 + $0x20] sm:$0xf] %vm4009_vm4, %v3978_v63  ;;  %v5142_v42 = vpack.c.bf16 %v9361_v45, %v13614_v27  ;;  %v13705_v2 = vadd.f32 %v9361_v45, %v9359_v54  ;;  %v5049_v49 = vmul.f32 1.442695, %v5005_v30  ;;  %v13714_v27 = vpop.xlane.xlu1 %4410 }
 0xbef   : > { %9362 = vpow2.f32 %v5053_v32  ;;  %5219 = vmatmul.bf16.gmra.mxu0 %v5141_v10  ;;  %v5051_v32 = vmul.f32 1.442695, %v5006_v35  ;;  %v3890_v35 = vadd.f32 %v13473_v11, %v13469_v3  ;;  %v3888_v3 = vadd.f32 %v13462_v7, %v13459_v53  ;;  %v13743_v11 = vld [vmem:[#allocation4 + $0x70] sm:$0xff] }
 0xbf0   : > { %9364 = vpow2.f32 %v5055_v44  ;;  %5268 = vmatmul.bf16.gmra.mxu1 %v5142_v42 }
 0xbf1   : > { %9366 = vpow2.f32 %v5049_v49  ;;  %v13731_v49 = vpop.f32.mrf.mxu0 }
 0xbf2   : > { %9368 = vpow2.f32 %v5051_v32  ;;  %v13716_v29 = vpop.xlane.xlu0 %4413  ;;  %15945 = vst [vmem:[#allocation32_spill] sm:$0xff] %v13731_v49  ;;  %v15981_v49 = vld [vmem:[#allocation60_spill] sm:$0xff] }
 0xbf3   : > { %6165 = vrot.lane.b32.xlu2 %v9809_v17, %s9927_s19  ;;  %9370 = vrcp.f32 %v13386_v31 }
 0xbf4   : > { %9372 = vrcp.f32 %v13347_v19 }
 0xbf5   : > { %v9363_v20 = vpop.eup %9362  ;;  %v5439_v50 = vpop.permute.xlu2 %5438  ;;  %9374 = vrcp.f32 %v13444_v48 }
 0xbf6   : > { %v9365_v63 = vpop.eup %9364  ;;  %8333 = vmatmul.msk.bf16.gmra.mxu2 %vm1986_vm1, %v5439_v50  ;;  %8341 = vmatmul.msk.bf16.gmra.mxu3 %vm1986_vm1, %v5439_v50 }
 0xbf7   : > { %v13712_v46 = vadd.f32 %v9365_v63, %v9363_v20  ;;  %v13718_v51 = vpop.eup %9366 }
 0xbf8   : > { %v13720_v44 = vpop.eup %9368  ;;  %v5143_v54 = vpack.c.bf16 %v9363_v20, %v13718_v51  ;;  %v13733_v20 = vpop.f32.mrf.mxu1 }
 0xbf9   : > { %v5144_v45 = vpack.c.bf16 %v9365_v63, %v13720_v44  ;;  %v9371_v42 = vpop.eup %9370  ;;  %15946 = vst [vmem:[#allocation66_spill] sm:$0xff] %v13733_v20  ;;  %v5012_v63 = vsub.f32 %v13517_v24, %v13672_v59 }
 0xbfa   : > { %v3926_v17 = vmul.f32 %v9371_v42, %v3890_v35  ;;  %v9373_v50 = vpop.eup %9372 }
 0xbfb   : > { %v3925_v19 = vmul.f32 %v9373_v50, %v3888_v3  ;;  %v9375_v48 = vpop.eup %9374  ;;  %v5063_v53 = vmul.f32 1.442695, %v5012_v63 }
 0xbfc   : > { %v3942_v32 = vpack.c.bf16 %v3926_v17, %v3926_v17 }
 0xbfd   : > { %v3941_v42 = vpack.c.bf16 %v3925_v19, %v3925_v19 }
 0xbff   : > { %5224 = vmatmul.bf16.gmra.mxu0 %v5143_v54  ;;  %v15948_v54 = vld [vmem:[#allocation17_spill] sm:$0xff] }
 0xc00   : > { %5273 = vmatmul.bf16.gmra.mxu1 %v5144_v45  ;;  %v15949_v45 = vld [vmem:[#allocation33_spill] sm:$0xff] }
 0xc01   : > { %v3974_v10 = vpop.permute.xlu1 %3973 }
 0xc02   : > { %4016 = vst.msk [vmem:[#allocation6 + $0x18] sm:$0xf] %vm4009_vm4, %v3974_v10  ;;  %v3893_v10 = vadd.f32 %v15949_v45, %v15948_v54 }
 0xc04   : > { %v3927_v17 = vmul.f32 %v9375_v48, %v3893_v10  ;;  %v13779_v10 = vld [vmem:[#allocation4 + $0x58] sm:$0xff] }
 0xc05   : > { %v3976_v30 = vpop.permute.xlu0 %3975 }
 0xc06   : > { %4017 = vst.msk [vmem:[#allocation6 + $0x1c] sm:$0xf] %vm4009_vm4, %v3976_v30 }
 0xc0b   : > { %4431 = vadd.xlane.f32.xlu0 %v13430_v4 }
 0xc14   : > { %4428 = vadd.xlane.f32.xlu1 %v13406_v5 }
 0xc1c   : > { %4434 = vadd.xlane.f32.xlu2 %v13455_v23  ;;  %v5011_v23 = vsub.f32 %v13521_v15, %v13672_v59  ;;  %v13759_v15 = vld [vmem:[%s11058_s11 + $0x30] sm:$0xff] }
 0xc1e   : > { %v5061_v30 = vmul.f32 1.442695, %v5011_v23  ;;  %v3943_v23 = vpack.c.bf16 %v3927_v17, %v3927_v17 }
 0xc1f   : > { %3987 = vrot.lane.b32.xlu0 %v3942_v32, %s9927_s19 }
 0xc20   : > { %9376 = vpow2.f32 %v5061_v30 }
 0xc21   : > { %v5215_v4 = vpop.f32.mrf.mxu0  ;;  %9378 = vpow2.f32 %v5063_v53 }
 0xc22   : > { %v5264_v31 = vpop.f32.mrf.mxu1 }
 0xc23   : > { %v13739_v5 = vadd.f32 %v5264_v31, %v5215_v4 }
 0xc25   : > { %15947 = vst [vmem:[#allocation54_spill] sm:$0xff] %v13739_v5 }
 0xc26   : > { %v13769_v48 = vpop.eup %9376 }
 0xc27   : > { %6171 = vrot.lane.b32.xlu0 %v13743_v11, %s9927_s19  ;;  %v13777_v45 = vpop.eup %9378 }
 0xc28   : > { %15950 = vst [vmem:[#allocation72_spill] sm:$0xff] %v13777_v45 }
 0xc2c   : > { %v4971_v7 = vpop.xlane.xlu1 %4970 }
 0xc2d   : > { %v5009_v32 = vsub.f32 %v13509_v14, %v4971_v7  ;;  %v5010_v4 = vsub.f32 %v13506_v37, %v4971_v7  ;;  %3985 = vrot.lane.b32.xlu1 %v3941_v42, %s9927_s19 }
 0xc2e   : > { %v13753_v35 = vpop.xlane.xlu2 %4982 }
 0xc2f   : > { %5440 = vrot.lane.b32.xlu0 %v13759_v15, %s9926_s18  ;;  %v5057_v59 = vmul.f32 1.442695, %v5009_v32  ;;  %v5059_v31 = vmul.f32 1.442695, %v5010_v4  ;;  %v15951_v32 = vld [vmem:[#allocation45_spill] sm:$0xff] }
 0xc30   : > { %v4980_v24 = vpop.xlane.xlu0 %4979  ;;  %v15952_v4 = vld [vmem:[#allocation37_spill] sm:$0xff] }
 0xc31   : > { %v5015_v50 = vsub.f32 %v13610_v58, %v4980_v24  ;;  %v5016_v3 = vsub.f32 %v13606_v47, %v4980_v24  ;;  %9380 = vpow2.f32 %v5057_v59  ;;  %v13773_v47 = vld [vmem:[#allocation4 + $0x60] sm:$0xff]  ;;  %v4561_v24 = vadd.f32 %v15952_v4, %v15951_v32  ;;  %v15957_v32 = vld [vmem:[#allocation50_spill] sm:$0xff] }
 0xc32   : > { %9382 = vpow2.f32 %v5059_v31  ;;  %v13790_v59 = vld [vmem:[#allocation4 + $0x20] sm:$0xff] }
 0xc33   : > { %v5069_v14 = vmul.f32 1.442695, %v5015_v50  ;;  %v5071_v37 = vmul.f32 1.442695, %v5016_v3  ;;  %9384 = vrcp.f32 %v13519_v60 }
 0xc34   : > { %3989 = vrot.lane.b32.xlu2 %v3943_v23, %s9927_s19  ;;  %v4977_v19 = vpop.xlane.xlu1 %4976 }
 0xc35   : > { %9386 = vpow2.f32 %v5069_v14  ;;  %v5013_v58 = vsub.f32 %v13595_v57, %v4977_v19  ;;  %v5014_v54 = vsub.f32 %v13591_v16, %v4977_v19  ;;  %6169 = vrot.lane.b32.xlu1 %v13773_v47, %s9927_s19  ;;  %v13794_v14 = vld [vmem:[#allocation4 + $0x38] sm:$0xff]  ;;  %v4564_v19 = vadd.f32 %v13529_v39, %v13525_v40 }
 0xc36   : > { %v13767_v63 = vpop.xlane.xlu2 %4425  ;;  %9388 = vpow2.f32 %v5071_v37 }
 0xc37   : > { %6149 = vrot.lane.b32.xlu0 %v13779_v10, %s9927_s19  ;;  %v9381_v60 = vpop.eup %9380  ;;  %9390 = vrcp.f32 %v13534_v21  ;;  %v5065_v30 = vmul.f32 1.442695, %v5013_v58  ;;  %v5067_v57 = vmul.f32 1.442695, %v5014_v54  ;;  %v15954_v58 = vld [vmem:[#allocation39_spill] sm:$0xff]  ;;  %v13804_v54 = vld [vmem:[#allocation4] sm:$0xff] }
 0xc38   : > { %v9383_v42 = vpop.eup %9382  ;;  %v5145_v16 = vpack.c.bf16 %v13769_v48, %v9381_v60 }
 0xc39   : > { %v9385_v53 = vpop.eup %9384  ;;  %9392 = vpow2.f32 %v5065_v30  ;;  %v5146_v7 = vpack.c.bf16 %v13777_v45, %v9383_v42  ;;  %v13786_v17 = vadd.f32 %v9383_v42, %v9381_v60 }
 0xc3a   : > { %9394 = vpow2.f32 %v5067_v57  ;;  %5229 = vmatmul.bf16.gmra.mxu0 %v5145_v16  ;;  %v4615_v3 = vmul.f32 %v9385_v53, %v4561_v24  ;;  %v13808_v16 = vpop.xlane.xlu0 %4422  ;;  %v13817_v24 = vld [vmem:[%s11058_s11 + $0x38] sm:$0xff] }
 0xc3b   : > { %v9387_v21 = vpop.eup %9386  ;;  %5278 = vmatmul.bf16.gmra.mxu1 %v5146_v7  ;;  %9396 = vrcp.f32 %v15954_v58  ;;  %v15956_v7 = vld [vmem:[#allocation47_spill] sm:$0xff] }
 0xc3c   : > { %6163 = vrot.lane.b32.xlu2 %v13790_v59, %s9927_s19  ;;  %v9389_v31 = vpop.eup %9388  ;;  %v4631_v57 = vpack.c.bf16 %v4615_v3, %v4615_v3  ;;  %9398 = vrcp.f32 %v13616_v33  ;;  %v3895_v4 = vadd.f32 %v15957_v32, %v15956_v7 }
 0xc3d   : > { %v9391_v23 = vpop.eup %9390  ;;  %6167 = vrot.lane.b32.xlu1 %v13794_v14, %s9927_s19  ;;  %v13799_v37 = vadd.f32 %v9389_v31, %v9387_v21 }
 0xc3e   : > { %v3984_v50 = vpop.permute.xlu2 %3983  ;;  %v4616_v42 = vmul.f32 %v9391_v23, %v4564_v19 }
 0xc3f   : > { %4021 = vst.msk [vmem:[#allocation6 + $0x2c] sm:$0xf] %vm4009_vm4, %v3984_v50  ;;  %6147 = vrot.lane.b32.xlu0 %v13804_v54, %s9927_s19  ;;  %v9393_v60 = vpop.eup %9392  ;;  %v15958_v50 = vld [vmem:[#allocation40_spill] sm:$0xff] }
 0xc40   : > { %15953 = vst [vmem:[#allocation69_spill] sm:$0xff] %v13799_v37  ;;  %v9395_v30 = vpop.eup %9394  ;;  %v4632_v39 = vpack.c.bf16 %v4616_v42, %v4616_v42  ;;  %9400 = vrcp.f32 %v15958_v50  ;;  %v5147_v23 = vpack.c.bf16 %v9387_v21, %v9393_v60  ;;  %v13828_v42 = vld [vmem:[%s11058_s11] sm:$0xff]  ;;  %v4420_v21 = vpop.xlane.xlu1 %4419 }
 0xc41   : > { %v13810_v53 = vadd.f32 %v9395_v30, %v9393_v60  ;;  %v9397_v40 = vpop.eup %9396  ;;  %9402 = vrcp.f32 %v13628_v36  ;;  %v5148_v19 = vpack.c.bf16 %v9389_v31, %v9395_v30  ;;  %v15959_v30 = vld [vmem:[#allocation22_spill] sm:$0xff] }
 0xc42   : > { %v3928_v3 = vmul.f32 %v9397_v40, %v3895_v4  ;;  %v9399_v33 = vpop.eup %9398  ;;  %9404 = vrcp.f32 %v13714_v27 }
 0xc43   : > { %15955 = vst [vmem:[#allocation57_spill] sm:$0xff] %v13810_v53  ;;  %9406 = vrcp.f32 %v13716_v29  ;;  %v4579_v29 = vadd.f32 %v13593_v38, %v13587_v61  ;;  %v13861_v38 = vld [vmem:[%s11058_s11 + $0x10] sm:$0xff] }
 0xc44   : > { %4664 = vrot.lane.b32.xlu2 %v4631_v57, %s9926_s18  ;;  %v4569_v57 = vadd.f32 %v13548_v62, %v13546_v12  ;;  %v3944_v36 = vpack.c.bf16 %v3928_v3, %v3928_v3  ;;  %v4571_v12 = vadd.f32 %v13557_v25, %v13555_v34  ;;  %v13838_v62 = vld [vmem:[#allocation4 + $0x40] sm:$0xff] }
 0xc45   : > { %5442 = vrot.lane.b32.xlu1 %v13817_v24, %s9926_s18 }
 0xc46   : > { %v9401_v40 = vpop.eup %9400  ;;  %v4618_v60 = vmul.f32 %v9399_v33, %v4569_v57  ;;  %v6154_v61 = vpop.permute.xlu2 %6153 }
 0xc47   : > { %4666 = vrot.lane.b32.xlu0 %v4632_v39, %s9926_s18  ;;  %v9403_v31 = vpop.eup %9402  ;;  %v15960_v39 = vld [vmem:[#allocation55_spill] sm:$0xff] }
 0xc48   : > { %v4559_v7 = vadd.f32 %v15960_v39, %v15959_v30  ;;  %v4634_v32 = vpack.c.bf16 %v4618_v60, %v4618_v60  ;;  %v4619_v4 = vmul.f32 %v9403_v31, %v4571_v12  ;;  %v9405_v50 = vpop.eup %9404  ;;  %v13853_v60 = vld [vmem:[#allocation4 + $0x30] sm:$0xff]  ;;  %v15961_v30 = vld [vmem:[#allocation31_spill] sm:$0xff]  ;;  %v15963_v12 = vld [vmem:[#allocation28_spill] sm:$0xff] }
 0xc49   : > { %v9407_v57 = vpop.eup %9406  ;;  %9408 = vrcp.f32 %v15961_v30 }
 0xc4a   : > { %5234 = vmatmul.bf16.gmra.mxu0 %v5147_v23  ;;  %v4614_v27 = vmul.f32 %v9401_v40, %v4559_v7  ;;  %v4576_v23 = vadd.f32 %v13581_v9, %v13577_v18  ;;  %v4622_v9 = vmul.f32 %v9407_v57, %v4579_v29  ;;  %9410 = vrcp.f32 %v4420_v21  ;;  %v13865_v7 = vpop.f32.mrf.mxu0 }
 0xc4b   : > { %v3982_v58 = vpop.permute.xlu0 %3981  ;;  %5283 = vmatmul.bf16.gmra.mxu1 %v5148_v19  ;;  %v4635_v19 = vpack.c.bf16 %v4619_v4, %v4619_v4  ;;  %15962 = vst [vmem:[#allocation76_spill] sm:$0xff] %v13865_v7  ;;  %v13869_v4 = vpop.f32.mrf.mxu1 }
 0xc4c   : > { %4020 = vst.msk [vmem:[#allocation6 + $0x28] sm:$0xf] %vm4009_vm4, %v3982_v58  ;;  %6129 = vrot.lane.b32.xlu2 %v13828_v42, %s9927_s19  ;;  %v4630_v34 = vpack.c.bf16 %v4614_v27, %v4614_v27  ;;  %v4621_v58 = vmul.f32 %v9405_v50, %v4576_v23  ;;  %v4638_v40 = vpack.c.bf16 %v4622_v9, %v4622_v9  ;;  %v15964_v27 = vld [vmem:[#allocation9_spill] sm:$0xff]  ;;  %v15966_v23 = vld [vmem:[#allocation35_spill] sm:$0xff] }
 0xc4d   : > { %3991 = vrot.lane.b32.xlu1 %v3944_v36, %s9927_s19  ;;  %15965 = vst [vmem:[#allocation56_spill] sm:$0xff] %v13869_v4  ;;  %v13872_v50 = vld [vmem:[%s11058_s11 + $0x8] sm:$0xff]  ;;  %9412 = vrcp.f32 %v15966_v23  ;;  %v14114_v4 = vld [vmem:[#allocation5 + $0x20] sm:$0xff] }
 0xc4e   : > { %v4637_v18 = vpack.c.bf16 %v4621_v58, %v4621_v58  ;;  %v13880_v58 = vld [vmem:[#allocation5 + $0x50] sm:$0xff]  ;;  %9414 = vrcp.f32 %v13808_v16  ;;  %v4586_v16 = vadd.f32 %v13641_v52, %v13639_v56 }
 0xc4f   : > { %6161 = vrot.lane.b32.xlu0 %v13838_v62, %s9927_s19  ;;  %v9409_v39 = vpop.eup %9408  ;;  %9416 = vrcp.f32 %v13767_v63 }
 0xc50   : > { %v9411_v21 = vpop.eup %9410  ;;  %9418 = vrcp.f32 %v13686_v0 }
 0xc53   : > { %v6174_v3 = vpop.permute.xlu0 %6173  ;;  %v9413_v29 = vpop.eup %9412 }
 0xc54   : > { %4670 = vrot.lane.b32.xlu2 %v4634_v32, %s9926_s18  ;;  %v6244_v33 = vsel %vm1986_vm1, %v6174_v3, 0  ;;  %v3980_v25 = vpop.permute.xlu1 %3979  ;;  %v4566_v32 = vadd.f32 %v15964_v27, %v15963_v12  ;;  %v6214_v3 = vsel %vm1986_vm1, %v6154_v61, 0  ;;  %v9415_v27 = vpop.eup %9414 }
 0xc55   : > { %6299 = vmatpush.bf16.xpose.msrb.mxu3 %v6244_v33  ;;  %4019 = vst.msk [vmem:[#allocation6 + $0x24] sm:$0xf] %vm4009_vm4, %v3980_v25  ;;  %4662 = vrot.lane.b32.xlu1 %v4630_v34, %s9926_s18  ;;  %v15967_v34 = vld [vmem:[#allocation23_spill] sm:$0xff]  ;;  %v4625_v23 = vmul.f32 %v9415_v27, %v4586_v16 }
 0xc56   : > { %v4617_v33 = vmul.f32 %v9409_v39, %v4566_v32  ;;  %v4584_v25 = vadd.f32 %v15967_v34, %v13622_v41  ;;  %v9417_v34 = vpop.eup %9416 }
 0xc57   : > { %4672 = vrot.lane.b32.xlu0 %v4635_v19, %s9926_s18  ;;  %v6152_v19 = vpop.permute.xlu2 %6151  ;;  %v9419_v52 = vpop.eup %9418 }
 0xc58   : > { %v4633_v57 = vpack.c.bf16 %v4617_v33, %v4617_v33  ;;  %v4624_v9 = vmul.f32 %v9411_v21, %v4584_v25  ;;  %v6211_v41 = vsel %vm1986_vm1, %v6152_v19, 0  ;;  %v4641_v21 = vpack.c.bf16 %v4625_v23, %v4625_v23  ;;  %v15973_v19 = vld [vmem:[#allocation14_spill] sm:$0xff] }
 0xc59   : > { %v4589_v25 = vadd.f32 %v13650_v26, %v13647_v13  ;;  %v13913_v13 = vpop.f32.mrf.mxu3 }
 0xc5a   : > { %v4640_v12 = vpack.c.bf16 %v4624_v9, %v4624_v9  ;;  %v13906_v9 = vld [vmem:[#allocation5 + $0x38] sm:$0xff] }
 0xc5b   : > { %v4626_v63 = vmul.f32 %v9417_v34, %v4589_v25  ;;  %v13929_v25 = vld [vmem:[#allocation5 + $0x70] sm:$0xff] }
 0xc5c   : > { %4676 = vrot.lane.b32.xlu2 %v4637_v18, %s9926_s18  ;;  %v6156_v36 = vpop.permute.xlu1 %6155 }
 0xc5d   : > { %6145 = vrot.lane.b32.xlu1 %v13853_v60, %s9927_s19  ;;  %v6217_v31 = vsel %vm1986_vm1, %v6156_v36, 0  ;;  %v15968_v36 = vld [vmem:[#allocation65_spill] sm:$0xff] }
 0xc5e   : > { %6251 = vmatpush.bf16.xpose.msra.mxu2 %v6217_v31 }
 0xc5f   : > { %4678 = vrot.lane.b32.xlu0 %v4638_v40, %s9926_s18  ;;  %v15969_v40 = vld [vmem:[#allocation48_spill] sm:$0xff] }
 0xc60   : > { %v4574_v31 = vadd.f32 %v15969_v40, %v15968_v36  ;;  %v4642_v40 = vpack.c.bf16 %v4626_v63, %v4626_v63 }
 0xc61   : > { %v13927_v34 = vpop.f32.mrf.mxu3 }
 0xc62   : > { %v4620_v39 = vmul.f32 %v9413_v29, %v4574_v31  ;;  %v13915_v31 = vpop.f32.mrf.mxu2 }
 0xc64   : > { %6133 = vrot.lane.b32.xlu2 %v13861_v38, %s9927_s19  ;;  %v4636_v32 = vpack.c.bf16 %v4620_v39, %v4620_v39 }
 0xc65   : > { %6131 = vrot.lane.b32.xlu1 %v13872_v50, %s9927_s19 }
 0xc66   : > { %6252 = vmatpush.bf16.xpose.msra.mxu2 %v6214_v3 }
 0xc6c   : > { %5884 = vrot.lane.b32.xlu2 %v13880_v58, %s9926_s18  ;;  %v5220_v18 = vpop.f32.mrf.mxu0 }
 0xc6d   : > { %v5269_v30 = vpop.f32.mrf.mxu1  ;;  %4668 = vrot.lane.b32.xlu1 %v4633_v57, %s9926_s18  ;;  %v15974_v57 = vld [vmem:[#allocation15_spill] sm:$0xff] }
 0xc6e   : > { %v13889_v61 = vadd.f32 %v5269_v30, %v5220_v18  ;;  %6253 = vmatpush.bf16.xpose.msra.mxu2 %v6211_v41  ;;  %v4581_v29 = vadd.f32 %v15974_v57, %v15973_v19  ;;  %v13917_v30 = vpop.permute.xlu2 %6165  ;;  %v4984_v41 = vmax.f32 %v13915_v31, %v13913_v13 }
 0xc70   : > { %15970 = vst [vmem:[#allocation52_spill] sm:$0xff] %v13889_v61  ;;  %v4623_v36 = vmul.f32 %v9419_v52, %v4581_v29  ;;  %v4596_v29 = vadd.f32 %v13680_v22, %v13674_v28 }
 0xc72   : > { %v4639_v26 = vpack.c.bf16 %v4623_v36, %v4623_v36 }
 0xc74   : > { %4682 = vrot.lane.b32.xlu2 %v4640_v12, %s9926_s18  ;;  %v13895_v3 = vpop.f32.mrf.mxu0 }
 0xc75   : > { %15971 = vst [vmem:[#allocation78_spill] sm:$0xff] %v13895_v3  ;;  %v13897_v33 = vpop.f32.mrf.mxu1  ;;  %4674 = vrot.lane.b32.xlu1 %v4636_v32, %s9926_s18  ;;  %v15985_v3 = vld [vmem:[#allocation51_spill] sm:$0xff] }
 0xc76   : > { %15972 = vst [vmem:[#allocation59_spill] sm:$0xff] %v13897_v33  ;;  %v5018_v53 = vsub.f32 %v15985_v3, %v13753_v35 }
 0xc7c   : > { %4684 = vrot.lane.b32.xlu2 %v4641_v21, %s9926_s18  ;;  %v5225_v56 = vpop.f32.mrf.mxu0 }
 0xc7d   : > { %v5274_v18 = vpop.f32.mrf.mxu1  ;;  %5868 = vrot.lane.b32.xlu1 %v13906_v9, %s9926_s18 }
 0xc7e   : > { %v13910_v0 = vadd.f32 %v5274_v18, %v5225_v56  ;;  %v13922_v39 = vpop.xlane.xlu0 %4431  ;;  %v13935_v56 = vpop.f32.mrf.mxu2  ;;  %v13942_v18 = vld [vmem:[#allocation5 + $0x8] sm:$0xff] }
 0xc80   : > { %15975 = vst [vmem:[#allocation80_spill] sm:$0xff] %v13910_v0 }
 0xc84   : > { %4686 = vrot.lane.b32.xlu2 %v4642_v40, %s9926_s18  ;;  %v13946_v40 = vpop.f32.mrf.mxu3 }
 0xc85   : > { %4680 = vrot.lane.b32.xlu1 %v4639_v26, %s9926_s18 }
 0xc87   : > { %v4429_v32 = vpop.xlane.xlu1 %4428 }
 0xc89   : > { %4985 = vmax.xlane.f32.xlu0 %v4984_v41 }
 0xc8f   : > { %v4435_v12 = vpop.xlane.xlu2 %4434 }
 0xc90   : > { %9420 = vrcp.f32 %v4435_v12  ;;  %v13949_v12 = vpop.f32.mrf.mxu2 }
 0xc91   : > { %v3988_v27 = vpop.permute.xlu0 %3987  ;;  %v4990_v28 = vmax.f32 %v13949_v12, %v13946_v40  ;;  %9422 = vrcp.f32 %v4429_v32 }
 0xc92   : > { %4023 = vst.msk [vmem:[#allocation6 + $0x34] sm:$0xf] %vm4009_vm4, %v3988_v27  ;;  %9424 = vrcp.f32 %v13922_v39  ;;  %v4594_v39 = vadd.f32 %v13666_v6, %v13664_v1  ;;  %v14015_v1 = vld [vmem:[#allocation5 + $0x10] sm:$0xff] }
 0xc96   : > { %v9421_v57 = vpop.eup %9420 }
 0xc97   : > { %v3990_v16 = vpop.permute.xlu2 %3989  ;;  %v4629_v26 = vmul.f32 %v9421_v57, %v4596_v29  ;;  %v13962_v29 = vpop.f32.mrf.mxu1 }
 0xc98   : > { %4024 = vst.msk [vmem:[#allocation6 + $0x38] sm:$0xf] %vm4009_vm4, %v3990_v16 }
 0xc99   : > { %v6172_v23 = vpop.permute.xlu0 %6171  ;;  %15977 = vst [vmem:[#allocation68_spill] sm:$0xff] %v13962_v29 }
 0xc9a   : > { %v6241_v21 = vsel %vm1986_vm1, %v6172_v23, 0  ;;  %v4645_v23 = vpack.c.bf16 %v4629_v26, %v4629_v26 }
 0xc9b   : > { %6300 = vmatpush.bf16.xpose.msrb.mxu3 %v6241_v21  ;;  %v4987_v21 = vmax.f32 %v13935_v56, %v13927_v34 }
 0xc9d   : > { %5866 = vrot.lane.b32.xlu0 %v13929_v25, %s9926_s18 }
 0xc9f   : > { %v13933_v52 = vpop.permute.xlu2 %6163  ;;  %v3986_v63 = vpop.permute.xlu1 %3985 }
 0xca0   : > { %4022 = vst.msk [vmem:[#allocation6 + $0x30] sm:$0xf] %vm4009_vm4, %v3986_v63 }
 0xca1   : > { %v5441_v19 = vpop.permute.xlu0 %5440 }
 0xca2   : > { %8334 = vmatmul.msk.bf16.gmra.mxu2 %vm1986_vm1, %v5441_v19  ;;  %8342 = vmatmul.msk.bf16.gmra.mxu3 %vm1986_vm1, %v5441_v19  ;;  %v13960_v19 = vpop.f32.mrf.mxu0 }
 0xca3   : > { %15976 = vst [vmem:[#allocation63_spill] sm:$0xff] %v13960_v19  ;;  %v14011_v19 = vld [vmem:[#allocation5 + $0x40] sm:$0xff] }
 0xca5   : > { %5880 = vrot.lane.b32.xlu0 %v13942_v18, %s9926_s18 }
 0xca7   : > { %v4665_v36 = vpop.permute.xlu2 %4664  ;;  %v6170_v41 = vpop.permute.xlu1 %6169 }
 0xca8   : > { %4712 = vst.msk [vmem:[#allocation6 + $0x4] sm:$0xf] %vm4710_vm5, %v4665_v36  ;;  %v6238_v27 = vsel %vm1986_vm1, %v6170_v41, 0 }
 0xca9   : > { %v6150_v16 = vpop.permute.xlu0 %6149  ;;  %6301 = vmatpush.bf16.xpose.msrb.mxu3 %v6238_v27  ;;  %v13966_v27 = vld [vmem:[#allocation5 + $0x48] sm:$0xff] }
 0xcaa   : > { %v6208_v22 = vsel %vm1986_vm1, %v6150_v16, 0 }
 0xcab   : > { %6254 = vmatpush.bf16.xpose.msra.mxu2 %v6208_v22 }
 0xcad   : > { %4991 = vmax.xlane.f32.xlu2 %v4990_v28  ;;  %4692 = vrot.lane.b32.xlu0 %v4645_v23, %s9926_s18 }
 0xcaf   : > { %v13958_v63 = vpop.permute.xlu2 %6129  ;;  %v6168_v57 = vpop.permute.xlu1 %6167  ;;  %4988 = vmax.xlane.f32.xlu1 %v4987_v21  ;;  %v6232_v21 = vsel %vm1986_vm1, %v13917_v30, 0  ;;  %v15980_v30 = vld [vmem:[#allocation64_spill] sm:$0xff] }
 0xcb0   : > { %v6235_v36 = vsel %vm1986_vm1, %v6168_v57, 0  ;;  %v4591_v32 = vadd.f32 %v15981_v49, %v15980_v30 }
 0xcb1   : > { %v6148_v41 = vpop.permute.xlu0 %6147  ;;  %6302 = vmatpush.bf16.xpose.msrb.mxu3 %v6235_v36 }
 0xcb2   : > { %v6205_v26 = vsel %vm1986_vm1, %v6148_v41, 0  ;;  %v13978_v41 = vld [vmem:[#allocation5] sm:$0xff] }
 0xcb3   : > { %6255 = vmatpush.bf16.xpose.msra.mxu2 %v6205_v26 }
 0xcb5   : > { %5862 = vrot.lane.b32.xlu0 %v13966_v27, %s9926_s18 }
 0xcb7   : > { %v4671_v16 = vpop.permute.xlu2 %4670  ;;  %v5443_v28 = vpop.permute.xlu1 %5442 }
 0xcb8   : > { %4715 = vst.msk [vmem:[#allocation6 + $0x10] sm:$0xf] %vm4710_vm5, %v4671_v16  ;;  %v5230_v22 = vpop.f32.mrf.mxu0  ;;  %v5279_v23 = vpop.f32.mrf.mxu1  ;;  %8335 = vmatmul.msk.bf16.gmra.mxu2 %vm1986_vm1, %v5443_v28  ;;  %8343 = vmatmul.msk.bf16.gmra.mxu3 %vm1986_vm1, %v5443_v28 }
 0xcb9   : > { %v4667_v57 = vpop.permute.xlu0 %4666  ;;  %v13975_v36 = vadd.f32 %v5279_v23, %v5230_v22  ;;  %6303 = vmatpush.bf16.xpose.msrb.mxu3 %v6232_v21  ;;  %v9423_v16 = vpop.eup %9422  ;;  %v6229_v23 = vsel %vm1986_vm1, %v13933_v52, 0 }
 0xcba   : > { %4713 = vst.msk [vmem:[#allocation6 + $0x8] sm:$0xf] %vm4710_vm5, %v4667_v57  ;;  %v4627_v57 = vmul.f32 %v9423_v16, %v4591_v32  ;;  %v9425_v30 = vpop.eup %9424 }
 0xcbb   : > { %15978 = vst [vmem:[#allocation82_spill] sm:$0xff] %v13975_v36  ;;  %v5075_v36 = vmul.f32 1.442695, %v5018_v53 }
 0xcbd   : > { %5878 = vrot.lane.b32.xlu0 %v13978_v41, %s9926_s18 }
 0xcbf   : > { %v4677_v26 = vpop.permute.xlu2 %4676  ;;  %v3992_v28 = vpop.permute.xlu1 %3991 }
 0xcc0   : > { %4718 = vst.msk [vmem:[#allocation6 + $0x1c] sm:$0xf] %vm4710_vm5, %v4677_v26  ;;  %v13983_v20 = vpop.f32.mrf.mxu0  ;;  %v13988_v22 = vpop.f32.mrf.mxu1  ;;  %v13993_v26 = vld [vmem:[#allocation5 + $0x30] sm:$0xff] }
 0xcc1   : > { %15979 = vst [vmem:[#allocation67_spill] sm:$0xff] %v13983_v20  ;;  %v6162_v21 = vpop.permute.xlu0 %6161  ;;  %6304 = vmatpush.bf16.xpose.msrb.mxu3 %v6229_v23  ;;  %v13997_v20 = vld [vmem:[#allocation5 + $0x58] sm:$0xff] }
 0xcc2   : > { %4025 = vst.msk [vmem:[#allocation6 + $0x3c] sm:$0xf] %vm4009_vm4, %v3992_v28  ;;  %v4643_v28 = vpack.c.bf16 %v4627_v57, %v4627_v57  ;;  %v6226_v32 = vsel %vm1986_vm1, %v6162_v21, 0  ;;  %v4628_v57 = vmul.f32 %v9425_v30, %v4594_v39 }
 0xcc3   : > { %15982 = vst [vmem:[#allocation83_spill] sm:$0xff] %v13988_v22 }
 0xcc5   : > { %5864 = vrot.lane.b32.xlu2 %v13993_v26, %s9926_s18  ;;  %5876 = vrot.lane.b32.xlu0 %v13997_v20, %s9926_s18 }
 0xcc7   : > { %v14001_v49 = vpop.permute.xlu2 %6133  ;;  %v4663_v52 = vpop.permute.xlu1 %4662 }
 0xcc8   : > { %v5235_v22 = vpop.f32.mrf.mxu0  ;;  %4711 = vst.msk [vmem:[#allocation6] sm:$0xf] %vm4710_vm5, %v4663_v52  ;;  %v5284_v16 = vpop.f32.mrf.mxu1  ;;  %4688 = vrot.lane.b32.xlu1 %v4643_v28, %s9926_s18  ;;  %v4644_v28 = vpack.c.bf16 %v4628_v57, %v4628_v57  ;;  %v14024_v52 = vld [vmem:[#allocation5 + $0x18] sm:$0xff] }
 0xcc9   : > { %v4673_v23 = vpop.permute.xlu0 %4672  ;;  %v14008_v29 = vadd.f32 %v5284_v16, %v5235_v22  ;;  %6305 = vmatpush.bf16.xpose.msrb.mxu3 %v6226_v32  ;;  %v14029_v32 = vld [vmem:[#allocation5 + $0x60] sm:$0xff] }
 0xcca   : > { %4716 = vst.msk [vmem:[#allocation6 + $0x14] sm:$0xf] %vm4710_vm5, %v4673_v23  ;;  %v14035_v23 = vld [vmem:[#allocation5 + $0x68] sm:$0xff] }
 0xccb   : > { %15983 = vst [vmem:[#allocation70_spill] sm:$0xff] %v14008_v29 }
 0xccd   : > { %5860 = vrot.lane.b32.xlu2 %v14011_v19, %s9926_s18  ;;  %5858 = vrot.lane.b32.xlu0 %v14015_v1, %s9926_s18 }
 0xccf   : > { %v5885_v6 = vpop.permute.xlu2 %5884  ;;  %v6146_v21 = vpop.permute.xlu1 %6145 }
 0xcd0   : > { %5951 = vmatpush.bf16.msrb.mxu1 %v5885_v6  ;;  %4690 = vrot.lane.b32.xlu1 %v4644_v28, %s9926_s18  ;;  %v6202_v22 = vsel %vm1986_vm1, %v6146_v21, 0  ;;  %v14042_v28 = vld [vmem:[%s11058_s11 + $0x18] sm:$0xff] }
 0xcd1   : > { %8352 = vmatmul.msk.bf16.vlgmr.msrb.gmra.mxu3 %vm1986_vm1, %v13958_v63  ;;  %v4679_v30 = vpop.permute.xlu0 %4678  ;;  %6256 = vmatpush.bf16.xpose.msra.mxu2 %v6202_v22  ;;  %v14047_v21 = vld [vmem:[#allocation5 + $0x78] sm:$0xff] }
 0xcd2   : > { %4719 = vst.msk [vmem:[#allocation6 + $0x20] sm:$0xf] %vm4710_vm5, %v4679_v30  ;;  %v14054_v30 = vpop.f32.mrf.mxu2 }
 0xcd5   : > { %5874 = vrot.lane.b32.xlu0 %v14024_v52, %s9926_s18 }
 0xcd7   : > { %v4683_v39 = vpop.permute.xlu2 %4682  ;;  %v6132_v16 = vpop.permute.xlu1 %6131 }
 0xcd8   : > { %4721 = vst.msk [vmem:[#allocation6 + $0x28] sm:$0xf] %vm4710_vm5, %v4683_v39  ;;  %5882 = vrot.lane.b32.xlu1 %v14029_v32, %s9926_s18  ;;  %8344 = vmatmul.msk.bf16.vlgmr.msra.gmra.mxu2 %vm1986_vm1, %v13958_v63  ;;  %v14051_v63 = vpop.f32.mrf.mxu3 }
 0xcdd   : > { %5856 = vrot.lane.b32.xlu0 %v14035_v23, %s9926_s18 }
 0xcdf   : > { %v4685_v57 = vpop.permute.xlu2 %4684  ;;  %v4669_v6 = vpop.permute.xlu1 %4668 }
 0xce0   : > { %4722 = vst.msk [vmem:[#allocation6 + $0x2c] sm:$0xf] %vm4710_vm5, %v4685_v57  ;;  %6135 = vrot.lane.b32.xlu1 %v14042_v28, %s9927_s19  ;;  %v14058_v57 = vld [vmem:[#allocation5 + $0x28] sm:$0xff] }
 0xce1   : > { %4714 = vst.msk [vmem:[#allocation6 + $0xc] sm:$0xf] %vm4710_vm5, %v4669_v6  ;;  %8353 = vmatmul.msk.bf16.gmra.mxu3 %vm1986_vm1, %v6132_v16  ;;  %v14062_v6 = vpop.f32.mrf.mxu3 }
 0xce5   : > { %5872 = vrot.lane.b32.xlu0 %v14047_v21, %s9926_s18 }
 0xce7   : > { %v4687_v22 = vpop.permute.xlu2 %4686  ;;  %v4675_v39 = vpop.permute.xlu1 %4674 }
 0xce8   : > { %4723 = vst.msk [vmem:[#allocation6 + $0x30] sm:$0xf] %vm4710_vm5, %v4687_v22  ;;  %8345 = vmatmul.msk.bf16.gmra.mxu2 %vm1986_vm1, %v6132_v16  ;;  %v14066_v22 = vpop.f32.mrf.mxu2  ;;  %v15984_v16 = vld [vmem:[#allocation61_spill] sm:$0xff] }
 0xce9   : > { %4717 = vst.msk [vmem:[#allocation6 + $0x18] sm:$0xf] %vm4710_vm5, %v4675_v39  ;;  %v5649_v55 = vmax.f32 %v14066_v22, %v14062_v6  ;;  %v9839_v39 = vld [vmem:[#allocation4 + $0x48] sm:$0xff]  ;;  %v5017_v33 = vsub.f32 %v15984_v16, %v13753_v35 }
 0xced   : > { %5854 = vrot.lane.b32.xlu0 %v14058_v57, %s9926_s18 }
 0xcef   : > { %v5869_v29 = vpop.permute.xlu1 %5868 }
 0xcf0   : > { %5902 = vmatpush.bf16.msrb.mxu0 %v5869_v29  ;;  %v5073_v29 = vmul.f32 1.442695, %v5017_v33 }
 0xcf1   : > { %8354 = vmatmul.msk.bf16.gmra.mxu3 %vm1986_vm1, %v14001_v49 }
 0xcf2   : > { %9426 = vpow2.f32 %v5073_v29  ;;  %v9842_v29 = vld [vmem:[#allocation4 + $0x8] sm:$0xff] }
 0xcf3   : > { %9428 = vpow2.f32 %v5075_v36 }
 0xcf5   : > { %6860 = vrot.lane.b32.xlu0 %v9839_v39, %s9928_s20 }
 0xcf6   : > { %5650 = vmax.xlane.f32.xlu2 %v5649_v55  ;;  %v9840_v55 = vld [vmem:[#allocation4 + $0x28] sm:$0xff] }
 0xcf7   : > { %v4681_v37 = vpop.permute.xlu1 %4680 }
 0xcf8   : > { %4720 = vst.msk [vmem:[#allocation6 + $0x24] sm:$0xf] %vm4710_vm5, %v4681_v37  ;;  %8346 = vmatmul.msk.bf16.gmra.mxu2 %vm1986_vm1, %v14001_v49  ;;  %v14081_v37 = vpop.eup %9426 }
 0xcf9   : > { %15986 = vst [vmem:[#allocation73_spill] sm:$0xff] %v14081_v37  ;;  %v14083_v3 = vpop.eup %9428 }
 0xcfa   : > { %15987 = vst [vmem:[#allocation75_spill] sm:$0xff] %v14083_v3 }
 0xcfc   : > { %v4986_v0 = vpop.xlane.xlu0 %4985 }
 0xcfd   : > { %v5019_v61 = vsub.f32 %v13915_v31, %v4986_v0  ;;  %v5020_v39 = vsub.f32 %v13913_v13, %v4986_v0  ;;  %6876 = vrot.lane.b32.xlu0 %v9840_v55, %s9928_s20  ;;  %v5646_v0 = vmax.f32 %v14054_v30, %v14051_v63 }
 0xcff   : > { %v5077_v16 = vmul.f32 1.442695, %v5019_v61  ;;  %v5079_v35 = vmul.f32 1.442695, %v5020_v39  ;;  %v14092_v61 = vld [vmem:[%s11058_s11 + $0x20] sm:$0xff]  ;;  %v14097_v39 = vpop.f32.mrf.mxu3 }
 0xd01   : > { %9430 = vpow2.f32 %v5077_v16  ;;  %v14101_v16 = vpop.f32.mrf.mxu2 }
 0xd02   : > { %9432 = vpow2.f32 %v5079_v35  ;;  %v15989_v35 = vld [vmem:[#allocation62_spill] sm:$0xff] }
 0xd07   : > { %v9431_v53 = vpop.eup %9430 }
 0xd08   : > { %v9433_v33 = vpop.eup %9432  ;;  %v5149_v31 = vpack.c.bf16 %v9431_v53, %v14081_v37 }
 0xd09   : > { %v5150_v13 = vpack.c.bf16 %v9433_v33, %v14083_v3  ;;  %v14089_v49 = vadd.f32 %v9433_v33, %v9431_v53 }
 0xd0a   : > { %5239 = vmatmul.bf16.gmra.mxu0 %v5149_v31  ;;  %5647 = vmax.xlane.f32.xlu1 %v5646_v0  ;;  %v14105_v31 = vpop.f32.mrf.mxu3 }
 0xd0b   : > { %15988 = vst [vmem:[#allocation74_spill] sm:$0xff] %v14089_v49  ;;  %5288 = vmatmul.bf16.gmra.mxu1 %v5150_v13 }
 0xd0e   : > { %6137 = vrot.lane.b32.xlu2 %v14092_v61, %s9927_s19 }
 0xd0f   : > { %v5867_v36 = vpop.permute.xlu0 %5866 }
 0xd10   : > { %5903 = vmatpush.bf16.msrb.mxu0 %v5867_v36  ;;  %v14110_v36 = vpop.f32.mrf.mxu2 }
 0xd16   : > { %6858 = vrot.lane.b32.xlu2 %v9842_v29, %s9928_s20 }
 0xd17   : > { %v14099_v55 = vpop.permute.xlu0 %5880 }
 0xd1e   : > { %6874 = vrot.lane.b32.xlu2 %v15989_v35, %s9928_s20 }
 0xd1f   : > { %v4693_v53 = vpop.permute.xlu0 %4692 }
 0xd20   : > { %v4992_v33 = vpop.xlane.xlu2 %4991  ;;  %4726 = vst.msk [vmem:[#allocation6 + $0x3c] sm:$0xf] %vm4710_vm5, %v4693_v53 }
 0xd21   : > { %v5023_v0 = vsub.f32 %v13949_v12, %v4992_v33  ;;  %v5024_v13 = vsub.f32 %v13946_v40, %v4992_v33  ;;  %v5652_v12 = vmax.f32 %v14101_v16, %v14097_v39  ;;  %v14121_v40 = vld [vmem:[%s11058_s11 + $0x28] sm:$0xff] }
 0xd22   : > { %v4989_v37 = vpop.xlane.xlu1 %4988 }
 0xd23   : > { %v5085_v29 = vmul.f32 1.442695, %v5023_v0  ;;  %v5087_v3 = vmul.f32 1.442695, %v5024_v13  ;;  %v5021_v49 = vsub.f32 %v13935_v56, %v4989_v37  ;;  %v5022_v35 = vsub.f32 %v13927_v34, %v4989_v37  ;;  %5870 = vrot.lane.b32.xlu1 %v14114_v4, %s9926_s18  ;;  %v14125_v37 = vpop.f32.mrf.mxu3 }
 0xd25   : > { %9434 = vpow2.f32 %v5085_v29  ;;  %v5081_v53 = vmul.f32 1.442695, %v5021_v49  ;;  %v5083_v33 = vmul.f32 1.442695, %v5022_v35  ;;  %v14127_v29 = vpop.f32.mrf.mxu2 }
 0xd26   : > { %9436 = vpow2.f32 %v5087_v3  ;;  %6139 = vrot.lane.b32.xlu2 %v14121_v40, %s9927_s19  ;;  %v5658_v7 = vmax.f32 %v14127_v29, %v14125_v37 }
 0xd27   : > { %5653 = vmax.xlane.f32.xlu0 %v5652_v12  ;;  %v5863_v0 = vpop.permute.xlu0 %5862  ;;  %9438 = vpow2.f32 %v5081_v53 }
 0xd28   : > { %v5865_v56 = vpop.permute.xlu2 %5864  ;;  %9440 = vpow2.f32 %v5083_v33 }
 0xd29   : > { %5904 = vmatpush.bf16.msrb.mxu0 %v5865_v56 }
 0xd2b   : > { %v9435_v34 = vpop.eup %9434 }
 0xd2c   : > { %v9437_v13 = vpop.eup %9436 }
 0xd2d   : > { %5905 = vmatpush.bf16.msrb.mxu0 %v5863_v0  ;;  %v14129_v3 = vadd.f32 %v9437_v13, %v9435_v34  ;;  %v9439_v49 = vpop.eup %9438 }
 0xd2e   : > { %6856 = vrot.lane.b32.xlu2 %v13696_v8, %s9928_s20  ;;  %v9441_v35 = vpop.eup %9440  ;;  %v5151_v12 = vpack.c.bf16 %v9435_v34, %v9439_v49 }
 0xd2f   : > { %15990 = vst [vmem:[#allocation41_spill] sm:$0xff] %v14129_v3  ;;  %5659 = vmax.xlane.f32.xlu0 %v5658_v7  ;;  %v5879_v33 = vpop.permute.xlu0 %5878  ;;  %v5152_v56 = vpack.c.bf16 %v9437_v13, %v9441_v35  ;;  %v14135_v5 = vadd.f32 %v9441_v35, %v9439_v49 }
 0xd30   : > { %v5861_v53 = vpop.permute.xlu2 %5860  ;;  %5244 = vmatmul.bf16.gmra.mxu0 %v5151_v12 }
 0xd31   : > { %5906 = vmatpush.bf16.msrb.mxu0 %v5861_v53  ;;  %15991 = vst [vmem:[#allocation49_spill] sm:$0xff] %v14135_v5  ;;  %5293 = vmatmul.bf16.gmra.mxu1 %v5152_v56 }
 0xd36   : > { %6872 = vrot.lane.b32.xlu2 %v13743_v11, %s9928_s20  ;;  %v5655_v11 = vmax.f32 %v14110_v36, %v14105_v31 }
 0xd37   : > { %v5877_v0 = vpop.permute.xlu0 %5876 }
 0xd3a   : > { %v4689_v3 = vpop.permute.xlu1 %4688 }
 0xd3b   : > { %4724 = vst.msk [vmem:[#allocation6 + $0x34] sm:$0xf] %vm4710_vm5, %v4689_v3 }
 0xd3f   : > { %v5859_v8 = vpop.permute.xlu0 %5858 }
 0xd40   : > { %5907 = vmatpush.bf16.msrb.mxu0 %v5859_v8 }
 0xd42   : > { %v4691_v45 = vpop.permute.xlu1 %4690 }
 0xd43   : > { %6870 = vrot.lane.b32.xlu0 %v13773_v47, %s9928_s20  ;;  %4725 = vst.msk [vmem:[#allocation6 + $0x38] sm:$0xf] %vm4710_vm5, %v4691_v45  ;;  %v14154_v45 = vpop.f32.mrf.mxu2 }
 0xd47   : > { %v5875_v7 = vpop.permute.xlu0 %5874 }
 0xd4a   : > { %v5883_v34 = vpop.permute.xlu1 %5882 }
 0xd4b   : > { %6141 = vrot.lane.b32.xlu0 %v13759_v15, %s9927_s19  ;;  %5952 = vmatpush.bf16.msrb.mxu1 %v5883_v34  ;;  %v14152_v15 = vpop.f32.mrf.mxu3 }
 0xd4c   : > { %v5661_v49 = vmax.f32 %v14154_v45, %v14152_v15 }
 0xd4d   : > { %5656 = vmax.xlane.f32.xlu1 %v5655_v11  ;;  %v14166_v11 = vpop.f32.mrf.mxu2 }
 0xd4f   : > { %v5857_v13 = vpop.permute.xlu0 %5856  ;;  %5953 = vmatpush.bf16.msrb.mxu1 %v14099_v55 }
 0xd50   : > { %5908 = vmatpush.bf16.msrb.mxu0 %v5857_v13 }
 0xd52   : > { %v6136_v3 = vpop.permute.xlu1 %6135 }
 0xd53   : > { %6868 = vrot.lane.b32.xlu0 %v13794_v14, %s9928_s20  ;;  %5954 = vmatpush.bf16.msrb.mxu1 %v5879_v33  ;;  %v9845_v14 = vld [vmem:[#allocation4 + $0x50] sm:$0xff] }
 0xd54   : > { %8347 = vmatmul.msk.bf16.gmra.mxu2 %vm1986_vm1, %v6136_v3  ;;  %8355 = vmatmul.msk.bf16.gmra.mxu3 %vm1986_vm1, %v6136_v3 }
 0xd57   : > { %v5873_v47 = vpop.permute.xlu0 %5872  ;;  %5955 = vmatpush.bf16.msrb.mxu1 %v5877_v0 }
 0xd5b   : > { %5956 = vmatpush.bf16.msrb.mxu1 %v5875_v7  ;;  %v14162_v7 = vpop.f32.mrf.mxu3 }
 0xd5f   : > { %5662 = vmax.xlane.f32.xlu2 %v5661_v49  ;;  %v5855_v55 = vpop.permute.xlu0 %5854  ;;  %5957 = vmatpush.bf16.msrb.mxu1 %v5873_v47 }
 0xd60   : > { %5909 = vmatpush.bf16.msrb.mxu0 %v5855_v55 }
 0xd63   : > { %v14175_v49 = vpop.f32.mrf.mxu3 }
 0xd66   : > { %6854 = vrot.lane.b32.xlu1 %v9845_v14, %s9928_s20  ;;  %v14178_v14 = vpop.f32.mrf.mxu2 }
 0xd67   : > { %v6861_v35 = vpop.permute.xlu0 %6860 }
 0xd68   : > { %v6924_v53 = vsel %vm1986_vm1, %v6861_v35, 0  ;;  %v5667_v35 = vmax.f32 %v14178_v14, %v14175_v49 }
 0xd69   : > { %v5651_v12 = vpop.xlane.xlu2 %5650  ;;  %6950 = vmatpush.bf16.xpose.msrb.mxu2 %v6924_v53  ;;  %v9846_v53 = vld [vmem:[#allocation4 + $0x10] sm:$0xff] }
 0xd6a   : > { %v5696_v33 = vsub.f32 %v14066_v22, %v5651_v12  ;;  %v5697_v56 = vsub.f32 %v14062_v6, %v5651_v12 }
 0xd6c   : > { %v5730_v0 = vmul.f32 1.442695, %v5696_v33  ;;  %v5732_v8 = vmul.f32 1.442695, %v5697_v56  ;;  %v14183_v33 = vpop.f32.mrf.mxu0 }
 0xd6d   : > { %15993 = vst [vmem:[#allocation26_spill] sm:$0xff] %v14183_v33 }
 0xd6e   : > { %9442 = vpow2.f32 %v5730_v0  ;;  %6852 = vrot.lane.b32.xlu1 %v13692_v43, %s9928_s20  ;;  %v14187_v0 = vpop.f32.mrf.mxu1 }
 0xd6f   : > { %9444 = vpow2.f32 %v5732_v8  ;;  %v6877_v34 = vpop.permute.xlu0 %6876  ;;  %15994 = vst [vmem:[#allocation12_spill] sm:$0xff] %v14187_v0 }
 0xd70   : > { %v6948_v3 = vsel %vm1986_vm1, %v6877_v34, 0 }
 0xd71   : > { %v6138_v13 = vpop.permute.xlu2 %6137  ;;  %6999 = vmatpush.bf16.xpose.msra.mxu3 %v6948_v3 }
 0xd72   : > { %8348 = vmatmul.msk.bf16.gmra.mxu2 %vm1986_vm1, %v6138_v13  ;;  %8356 = vmatmul.msk.bf16.gmra.mxu3 %vm1986_vm1, %v6138_v13 }
 0xd74   : > { %v9443_v6 = vpop.eup %9442 }
 0xd75   : > { %v9445_v22 = vpop.eup %9444 }
 0xd76   : > { %v14171_v47 = vadd.f32 %v9445_v22, %v9443_v6 }
 0xd77   : > { %6850 = vrot.lane.b32.xlu2 %v13779_v10, %s9928_s20 }
 0xd78   : > { %15992 = vst [vmem:[#allocation77_spill] sm:$0xff] %v14171_v47 }
 0xd79   : > { %v6859_v43 = vpop.permute.xlu2 %6858 }
 0xd7a   : > { %v6921_v55 = vsel %vm1986_vm1, %v6859_v43, 0 }
 0xd7b   : > { %6951 = vmatpush.bf16.xpose.msrb.mxu2 %v6921_v55 }
 0xd7d   : > { %5668 = vmax.xlane.f32.xlu0 %v5667_v35  ;;  %v5648_v12 = vpop.xlane.xlu1 %5647 }
 0xd7e   : > { %v5694_v10 = vsub.f32 %v14054_v30, %v5648_v12  ;;  %v5695_v56 = vsub.f32 %v14051_v63, %v5648_v12 }
 0xd7f   : > { %6866 = vrot.lane.b32.xlu2 %v9846_v53, %s9928_s20 }
 0xd80   : > { %v5726_v34 = vmul.f32 1.442695, %v5694_v10  ;;  %v5728_v13 = vmul.f32 1.442695, %v5695_v56 }
 0xd81   : > { %v6875_v8 = vpop.permute.xlu2 %6874 }
 0xd82   : > { %v6945_v3 = vsel %vm1986_vm1, %v6875_v8, 0  ;;  %9446 = vpow2.f32 %v5726_v34  ;;  %v14201_v34 = vpop.f32.mrf.mxu2 }
 0xd83   : > { %7000 = vmatpush.bf16.xpose.msra.mxu3 %v6945_v3  ;;  %9448 = vpow2.f32 %v5728_v13  ;;  %v5664_v13 = vmax.f32 %v14166_v11, %v14162_v7  ;;  %v14205_v3 = vpop.f32.mrf.mxu3 }
 0xd87   : > { %6143 = vrot.lane.b32.xlu2 %v13817_v24, %s9927_s19  ;;  %v5240_v43 = vpop.f32.mrf.mxu0 }
 0xd88   : > { %v5289_v55 = vpop.f32.mrf.mxu1  ;;  %v9447_v53 = vpop.eup %9446 }
 0xd89   : > { %v6140_v35 = vpop.permute.xlu2 %6139  ;;  %v14192_v30 = vadd.f32 %v5289_v55, %v5240_v43  ;;  %v9449_v63 = vpop.eup %9448  ;;  %v5838_v12 = vpack.c.bf16 %v9443_v6, %v9447_v53 }
 0xd8a   : > { %8349 = vmatmul.msk.bf16.gmra.mxu2 %vm1986_vm1, %v6140_v35  ;;  %8357 = vmatmul.msk.bf16.gmra.mxu3 %vm1986_vm1, %v6140_v35  ;;  %v14196_v10 = vadd.f32 %v9449_v63, %v9447_v53  ;;  %v5839_v6 = vpack.c.bf16 %v9445_v22, %v9449_v63 }
 0xd8b   : > { %15995 = vst [vmem:[#allocation79_spill] sm:$0xff] %v14192_v30  ;;  %5910 = vmatmul.bf16.vlgmr.msrb.gmra.mxu0 %v5838_v12 }
 0xd8c   : > { %15996 = vst [vmem:[#allocation20_spill] sm:$0xff] %v14196_v10 }
 0xd91   : > { %v6857_v56 = vpop.permute.xlu2 %6856  ;;  %6864 = vrot.lane.b32.xlu0 %v13790_v59, %s9928_s20 }
 0xd92   : > { %v6918_v24 = vsel %vm1986_vm1, %v6857_v56, 0 }
 0xd93   : > { %6952 = vmatpush.bf16.xpose.msrb.mxu2 %v6918_v24  ;;  %v14210_v24 = vpop.f32.mrf.mxu2 }
 0xd95   : > { %v5871_v8 = vpop.permute.xlu1 %5870 }
 0xd96   : > { %5958 = vmatpush.bf16.msrb.mxu1 %v5871_v8  ;;  %v14212_v8 = vpop.f32.mrf.mxu3 }
 0xd98   : > { %5665 = vmax.xlane.f32.xlu1 %v5664_v13 }
 0xd99   : > { %v6873_v43 = vpop.permute.xlu2 %6872  ;;  %5959 = vmatmul.bf16.vlgmr.msrb.gmra.mxu1 %v5839_v6 }
 0xd9a   : > { %v6942_v55 = vsel %vm1986_vm1, %v6873_v43, 0  ;;  %v5654_v35 = vpop.xlane.xlu0 %5653 }
 0xd9b   : > { %7001 = vmatpush.bf16.xpose.msra.mxu3 %v6942_v55  ;;  %v5698_v59 = vsub.f32 %v14101_v16, %v5654_v35  ;;  %v5699_v53 = vsub.f32 %v14097_v39, %v5654_v35  ;;  %v14216_v16 = vpop.f32.mrf.mxu0  ;;  %v14218_v39 = vpop.f32.mrf.mxu1 }
 0xd9c   : > { %15997 = vst [vmem:[#allocation10_spill] sm:$0xff] %v14216_v16 }
 0xd9d   : > { %v5734_v12 = vmul.f32 1.442695, %v5698_v59  ;;  %v5736_v56 = vmul.f32 1.442695, %v5699_v53  ;;  %15998 = vst [vmem:[#allocation29_spill] sm:$0xff] %v14218_v39  ;;  %v14222_v59 = vpop.f32.mrf.mxu2 }
 0xd9e   : > { %v14224_v53 = vpop.f32.mrf.mxu3 }
 0xd9f   : > { %9450 = vpow2.f32 %v5734_v12  ;;  %v5676_v0 = vmax.f32 %v14222_v59, %v14224_v53 }
 0xda0   : > { %9452 = vpow2.f32 %v5736_v56 }
 0xda2   : > { %v5660_v22 = vpop.xlane.xlu0 %5659 }
 0xda3   : > { %v5702_v63 = vsub.f32 %v14127_v29, %v5660_v22  ;;  %v5703_v13 = vsub.f32 %v14125_v37, %v5660_v22  ;;  %v5670_v37 = vmax.f32 %v14201_v34, %v14205_v3 }
 0xda5   : > { %v9451_v6 = vpop.eup %9450  ;;  %v5742_v43 = vmul.f32 1.442695, %v5702_v63  ;;  %v5744_v55 = vmul.f32 1.442695, %v5703_v13 }
 0xda6   : > { %v9453_v30 = vpop.eup %9452 }
 0xda7   : > { %9454 = vpow2.f32 %v5742_v43  ;;  %v14220_v35 = vadd.f32 %v9453_v30, %v9451_v6  ;;  %v14240_v43 = vpop.f32.mrf.mxu2 }
 0xda8   : > { %9456 = vpow2.f32 %v5744_v55  ;;  %v14242_v55 = vpop.f32.mrf.mxu3 }
 0xdad   : > { %v14226_v12 = vpop.eup %9454  ;;  %v5245_v56 = vpop.f32.mrf.mxu0 }
 0xdae   : > { %v14230_v29 = vpop.eup %9456  ;;  %v5294_v22 = vpop.f32.mrf.mxu1 }
 0xdaf   : > { %v14234_v63 = vadd.f32 %v14230_v29, %v14226_v12  ;;  %v14236_v13 = vadd.f32 %v5294_v22, %v5245_v56 }
 0xdb0   : > { %5671 = vmax.xlane.f32.xlu2 %v5670_v37  ;;  %v5673_v37 = vmax.f32 %v14210_v24, %v14212_v8  ;;  %v14253_v56 = vpop.f32.mrf.mxu3 }
 0xdb1   : > { %15999 = vst [vmem:[#allocation81_spill] sm:$0xff] %v14236_v13  ;;  %6848 = vrot.lane.b32.xlu1 %v13804_v54, %s9928_s20  ;;  %v14251_v54 = vpop.f32.mrf.mxu2 }
 0xdb5   : > { %v6871_v33 = vpop.permute.xlu0 %6870 }
 0xdb6   : > { %v6939_v39 = vsel %vm1986_vm1, %v6871_v33, 0  ;;  %v5682_v33 = vmax.f32 %v14251_v54, %v14253_v56 }
 0xdb7   : > { %7002 = vmatpush.bf16.xpose.msra.mxu3 %v6939_v39 }
 0xdb8   : > { %5677 = vmax.xlane.f32.xlu2 %v5676_v0  ;;  %v14265_v10 = vpop.f32.mrf.mxu3 }
 0xdb9   : > { %6846 = vrot.lane.b32.xlu1 %v13853_v60, %s9928_s20  ;;  %v14263_v5 = vpop.f32.mrf.mxu2 }
 0xdbb   : > { %5674 = vmax.xlane.f32.xlu0 %v5673_v37 }
 0xdbd   : > { %v6142_v22 = vpop.permute.xlu0 %6141 }
 0xdbe   : > { %8350 = vmatmul.msk.bf16.gmra.mxu2 %vm1986_vm1, %v6142_v22  ;;  %8358 = vmatmul.msk.bf16.gmra.mxu3 %vm1986_vm1, %v6142_v22 }
 0xdc0   : > { %v5657_v0 = vpop.xlane.xlu1 %5656 }
 0xdc1   : > { %v5700_v39 = vsub.f32 %v14110_v36, %v5657_v0  ;;  %v5701_v13 = vsub.f32 %v14105_v31, %v5657_v0  ;;  %6862 = vrot.lane.b32.xlu1 %v13838_v62, %s9928_s20  ;;  %v5685_v36 = vmax.f32 %v14263_v5, %v14265_v10 }
 0xdc3   : > { %5683 = vmax.xlane.f32.xlu0 %v5682_v33  ;;  %v5738_v60 = vmul.f32 1.442695, %v5700_v39  ;;  %v5740_v37 = vmul.f32 1.442695, %v5701_v13 }
 0xdc5   : > { %v6869_v16 = vpop.permute.xlu0 %6868  ;;  %9458 = vpow2.f32 %v5738_v60 }
 0xdc6   : > { %v6936_v22 = vsel %vm1986_vm1, %v6869_v16, 0  ;;  %9460 = vpow2.f32 %v5740_v37 }
 0xdc7   : > { %7003 = vmatpush.bf16.xpose.msra.mxu3 %v6936_v22 }
 0xdc9   : > { %6830 = vrot.lane.b32.xlu1 %v13828_v42, %s9928_s20 }
 0xdcb   : > { %5686 = vmax.xlane.f32.xlu0 %v5685_v36  ;;  %v9459_v62 = vpop.eup %9458 }
 0xdcc   : > { %v9461_v31 = vpop.eup %9460  ;;  %v5840_v13 = vpack.c.bf16 %v9459_v62, %v9451_v6 }
 0xdcd   : > { %v5841_v33 = vpack.c.bf16 %v9461_v31, %v9453_v30  ;;  %v14272_v0 = vadd.f32 %v9461_v31, %v9459_v62 }
 0xdce   : > { %5915 = vmatmul.bf16.gmra.mxu0 %v5840_v13 }
 0xdcf   : > { %5964 = vmatmul.bf16.gmra.mxu1 %v5841_v33 }
 0xdd0   : > { %6832 = vrot.lane.b32.xlu2 %v13872_v50, %s9928_s20 }
 0xdd2   : > { %v5663_v16 = vpop.xlane.xlu2 %5662 }
 0xdd3   : > { %v5704_v39 = vsub.f32 %v14154_v45, %v5663_v16  ;;  %v5705_v60 = vsub.f32 %v14152_v15, %v5663_v16 }
 0xdd5   : > { %v5746_v37 = vmul.f32 1.442695, %v5704_v39  ;;  %v5748_v22 = vmul.f32 1.442695, %v5705_v60  ;;  %v5679_v39 = vmax.f32 %v14240_v43, %v14242_v55 }
 0xdd7   : > { %9462 = vpow2.f32 %v5746_v37  ;;  %v14302_v37 = vpop.f32.mrf.mxu2 }
 0xdd8   : > { %9464 = vpow2.f32 %v5748_v22  ;;  %6834 = vrot.lane.b32.xlu2 %v13861_v38, %s9928_s20  ;;  %v6855_v42 = vpop.permute.xlu1 %6854  ;;  %v14304_v22 = vpop.f32.mrf.mxu3 }
 0xdd9   : > { %v6915_v6 = vsel %vm1986_vm1, %v6855_v42, 0 }
 0xdda   : > { %v6851_v30 = vpop.permute.xlu2 %6850  ;;  %6953 = vmatpush.bf16.xpose.msrb.mxu2 %v6915_v6 }
 0xddd   : > { %v9463_v36 = vpop.eup %9462 }
 0xdde   : > { %v9465_v50 = vpop.eup %9464  ;;  %v5842_v62 = vpack.c.bf16 %v9463_v36, %v14226_v12 }
 0xddf   : > { %v5843_v45 = vpack.c.bf16 %v9465_v50, %v14230_v29  ;;  %v14283_v31 = vadd.f32 %v9465_v50, %v9463_v36  ;;  %6569 = vrot.lane.b32.xlu0 %v13906_v9, %s9927_s19  ;;  %v6909_v29 = vsel %vm1986_vm1, %v6851_v30, 0  ;;  %v14314_v30 = vpop.f32.mrf.mxu2 }
 0xde0   : > { %6585 = vrot.lane.b32.xlu2 %v13880_v58, %s9927_s19  ;;  %5920 = vmatmul.bf16.gmra.mxu0 %v5842_v62  ;;  %v6853_v38 = vpop.permute.xlu1 %6852  ;;  %v14316_v6 = vpop.f32.mrf.mxu3 }
 0xde1   : > { %5969 = vmatmul.bf16.gmra.mxu1 %v5843_v45  ;;  %v6912_v13 = vsel %vm1986_vm1, %v6853_v38, 0  ;;  %v14325_v38 = vpop.f32.mrf.mxu0 }
 0xde2   : > { %v6867_v15 = vpop.permute.xlu2 %6866  ;;  %6954 = vmatpush.bf16.xpose.msrb.mxu2 %v6912_v13  ;;  %16000 = vst [vmem:[#allocation21_spill] sm:$0xff] %v14325_v38 }
 0xde3   : > { %v6933_v33 = vsel %vm1986_vm1, %v6867_v15, 0  ;;  %v14327_v15 = vpop.f32.mrf.mxu1 }
 0xde4   : > { %7004 = vmatpush.bf16.xpose.msra.mxu3 %v6933_v33  ;;  %16001 = vst [vmem:[#allocation38_spill] sm:$0xff] %v14327_v15 }
 0xde7   : > { %6583 = vrot.lane.b32.xlu0 %v14029_v32, %s9927_s19 }
 0xdea   : > { %v6144_v12 = vpop.permute.xlu2 %6143  ;;  %6955 = vmatpush.bf16.xpose.msrb.mxu2 %v6909_v29 }
 0xdeb   : > { %8351 = vmatmul.msk.bf16.gmra.mxu2 %vm1986_vm1, %v6144_v12  ;;  %8359 = vmatmul.msk.bf16.gmra.mxu3 %vm1986_vm1, %v6144_v12 }
 0xdef   : > { %6565 = vrot.lane.b32.xlu0 %v13993_v26, %s9927_s19  ;;  %v5688_v26 = vmax.f32 %v14302_v37, %v14304_v22 }
 0xdf0   : > { %v5669_v58 = vpop.xlane.xlu0 %5668 }
 0xdf1   : > { %v5708_v9 = vsub.f32 %v14178_v14, %v5669_v58  ;;  %v5709_v16 = vsub.f32 %v14175_v49, %v5669_v58 }
 0xdf3   : > { %v5754_v32 = vmul.f32 1.442695, %v5708_v9  ;;  %v5756_v60 = vmul.f32 1.442695, %v5709_v16  ;;  %5680 = vmax.xlane.f32.xlu1 %v5679_v39  ;;  %v14339_v39 = vpop.f32.mrf.mxu2 }
 0xdf5   : > { %9466 = vpow2.f32 %v5754_v32  ;;  %v14341_v32 = vpop.f32.mrf.mxu3 }
 0xdf6   : > { %9468 = vpow2.f32 %v5756_v60 }
 0xdf7   : > { %6581 = vrot.lane.b32.xlu0 %v13942_v18, %s9927_s19  ;;  %v5691_v18 = vmax.f32 %v14314_v30, %v14316_v6 }
 0xdfb   : > { %v9467_v14 = vpop.eup %9466  ;;  %5689 = vmax.xlane.f32.xlu1 %v5688_v26 }
 0xdfc   : > { %v9469_v49 = vpop.eup %9468 }
 0xdfd   : > { %v14310_v42 = vadd.f32 %v9469_v49, %v9467_v14 }
 0xdff   : > { %6579 = vrot.lane.b32.xlu0 %v13978_v41, %s9927_s19 }
 0xe03   : > { %v6865_v36 = vpop.permute.xlu0 %6864 }
 0xe04   : > { %v6930_v50 = vsel %vm1986_vm1, %v6865_v36, 0 }
 0xe05   : > { %7005 = vmatpush.bf16.xpose.msra.mxu3 %v6930_v50  ;;  %v14350_v50 = vpop.f32.mrf.mxu2 }
 0xe07   : > { %6561 = vrot.lane.b32.xlu0 %v14011_v19, %s9927_s19 }
 0xe08   : > { %v5911_v29 = vpop.f32.mrf.mxu0 }
 0xe09   : > { %5692 = vmax.xlane.f32.xlu2 %v5691_v18 }
 0xe0b   : > { %v5666_v62 = vpop.xlane.xlu1 %5665 }
 0xe0c   : > { %v5706_v45 = vsub.f32 %v14166_v11, %v5666_v62  ;;  %v5707_v41 = vsub.f32 %v14162_v7, %v5666_v62 }
 0xe0e   : > { %v5750_v13 = vmul.f32 1.442695, %v5706_v45  ;;  %v5752_v33 = vmul.f32 1.442695, %v5707_v41  ;;  %v14354_v45 = vpop.f32.mrf.mxu3 }
 0xe10   : > { %9470 = vpow2.f32 %v5750_v13 }
 0xe11   : > { %9472 = vpow2.f32 %v5752_v33 }
 0xe14   : > { %6567 = vrot.lane.b32.xlu1 %v13929_v25, %s9927_s19 }
 0xe16   : > { %v9471_v12 = vpop.eup %9470  ;;  %v5960_v19 = vpop.f32.mrf.mxu1 }
 0xe17   : > { %v9473_v58 = vpop.eup %9472  ;;  %v14331_v9 = vadd.f32 %v5960_v19, %v5911_v29  ;;  %v5844_v11 = vpack.c.bf16 %v9467_v14, %v9471_v12 }
 0xe18   : > { %v5845_v16 = vpack.c.bf16 %v9469_v49, %v9473_v58  ;;  %v14333_v7 = vadd.f32 %v9473_v58, %v9471_v12  ;;  %v6350_v12 = vmax.f32 %v14350_v50, %v14354_v45 }
 0xe19   : > { %16002 = vst [vmem:[#allocation44_spill] sm:$0xff] %v14331_v9  ;;  %5925 = vmatmul.bf16.gmra.mxu0 %v5844_v11 }
 0xe1a   : > { %5974 = vmatmul.bf16.gmra.mxu1 %v5845_v16 }
 0xe1c   : > { %6563 = vrot.lane.b32.xlu1 %v13966_v27, %s9927_s19 }
 0xe21   : > { %6577 = vrot.lane.b32.xlu2 %v13997_v20, %s9927_s19 }
 0xe23   : > { %v5672_v25 = vpop.xlane.xlu2 %5671  ;;  %v6849_v14 = vpop.permute.xlu1 %6848 }
 0xe24   : > { %v5710_v60 = vsub.f32 %v14201_v34, %v5672_v25  ;;  %v5711_v26 = vsub.f32 %v14205_v3, %v5672_v25  ;;  %6836 = vrot.lane.b32.xlu1 %v14042_v28, %s9928_s20  ;;  %v6906_v27 = vsel %vm1986_vm1, %v6849_v14, 0 }
 0xe25   : > { %6956 = vmatpush.bf16.xpose.msrb.mxu2 %v6906_v27 }
 0xe26   : > { %v5758_v49 = vmul.f32 1.442695, %v5710_v60  ;;  %v5760_v36 = vmul.f32 1.442695, %v5711_v26 }
 0xe28   : > { %9474 = vpow2.f32 %v5758_v49 }
 0xe29   : > { %9476 = vpow2.f32 %v5760_v36  ;;  %6559 = vrot.lane.b32.xlu2 %v14015_v1, %s9927_s19 }
 0xe2b   : > { %v5678_v20 = vpop.xlane.xlu2 %5677  ;;  %v6847_v18 = vpop.permute.xlu1 %6846 }
 0xe2c   : > { %v5714_v34 = vsub.f32 %v14222_v59, %v5678_v20  ;;  %v5715_v3 = vsub.f32 %v14224_v53, %v5678_v20  ;;  %v6903_v13 = vsel %vm1986_vm1, %v6847_v18, 0 }
 0xe2d   : > { %6957 = vmatpush.bf16.xpose.msrb.mxu2 %v6903_v13 }
 0xe2e   : > { %v9475_v62 = vpop.eup %9474  ;;  %v5766_v28 = vmul.f32 1.442695, %v5714_v34  ;;  %v5768_v41 = vmul.f32 1.442695, %v5715_v3  ;;  %v5675_v1 = vpop.xlane.xlu0 %5674 }
 0xe2f   : > { %v9477_v33 = vpop.eup %9476  ;;  %v5712_v29 = vsub.f32 %v14210_v24, %v5675_v1  ;;  %v5713_v59 = vsub.f32 %v14212_v8, %v5675_v1 }
 0xe30   : > { %9478 = vpow2.f32 %v5766_v28  ;;  %v14361_v53 = vadd.f32 %v9477_v33, %v9475_v62 }
 0xe31   : > { %9480 = vpow2.f32 %v5768_v41  ;;  %6575 = vrot.lane.b32.xlu2 %v14024_v52, %s9927_s19  ;;  %v5762_v19 = vmul.f32 1.442695, %v5712_v29  ;;  %v5764_v58 = vmul.f32 1.442695, %v5713_v59  ;;  %6351 = vmax.xlane.f32.xlu0 %v6350_v12 }
 0xe33   : > { %v6833_v11 = vpop.permute.xlu2 %6832  ;;  %9482 = vpow2.f32 %v5762_v19  ;;  %v6863_v16 = vpop.permute.xlu1 %6862 }
 0xe34   : > { %9484 = vpow2.f32 %v5764_v58  ;;  %v6927_v60 = vsel %vm1986_vm1, %v6863_v16, 0  ;;  %v14398_v58 = vpop.f32.mrf.mxu0 }
 0xe35   : > { %7006 = vmatpush.bf16.xpose.msra.mxu3 %v6927_v60  ;;  %16005 = vst [vmem:[#allocation43_spill] sm:$0xff] %v14398_v58 }
 0xe36   : > { %v14365_v25 = vpop.eup %9478  ;;  %v5684_v8 = vpop.xlane.xlu0 %5683 }
 0xe37   : > { %v14368_v24 = vpop.eup %9480  ;;  %v5718_v26 = vsub.f32 %v14251_v54, %v5684_v8  ;;  %v5719_v14 = vsub.f32 %v14253_v56, %v5684_v8  ;;  %v14380_v56 = vpop.f32.mrf.mxu2 }
 0xe38   : > { %v14374_v52 = vadd.f32 %v14368_v24, %v14365_v25 }
 0xe39   : > { %6557 = vrot.lane.b32.xlu2 %v14035_v23, %s9927_s19  ;;  %v9483_v49 = vpop.eup %9482  ;;  %v5774_v36 = vmul.f32 1.442695, %v5718_v26  ;;  %v5776_v27 = vmul.f32 1.442695, %v5719_v14  ;;  %v14384_v23 = vpop.f32.mrf.mxu3  ;;  %v6347_v14 = vmax.f32 %v14339_v39, %v14341_v32 }
 0xe3a   : > { %16003 = vst [vmem:[#allocation84_spill] sm:$0xff] %v14374_v52  ;;  %v9485_v20 = vpop.eup %9484  ;;  %v5846_v34 = vpack.c.bf16 %v9483_v49, %v9475_v62 }
 0xe3b   : > { %v6835_v3 = vpop.permute.xlu2 %6834  ;;  %9486 = vpow2.f32 %v5774_v36  ;;  %v5847_v18 = vpack.c.bf16 %v9485_v20, %v9477_v33  ;;  %v14378_v28 = vadd.f32 %v9485_v20, %v9483_v49  ;;  %v6831_v54 = vpop.permute.xlu1 %6830 }
 0xe3c   : > { %9488 = vpow2.f32 %v5776_v27  ;;  %5930 = vmatmul.bf16.gmra.mxu0 %v5846_v34  ;;  %8360 = vmatmul.msk.bf16.vlgmr.msrb.gmra.mxu2 %vm1986_vm1, %v6831_v54 }
 0xe3d   : > { %8368 = vmatmul.msk.bf16.vlgmr.msra.gmra.mxu3 %vm1986_vm1, %v6831_v54  ;;  %5979 = vmatmul.bf16.gmra.mxu1 %v5847_v18 }
 0xe3e   : > { %v5687_v41 = vpop.xlane.xlu0 %5686 }
 0xe3f   : > { %v5720_v62 = vsub.f32 %v14263_v5, %v5687_v41  ;;  %v5721_v13 = vsub.f32 %v14265_v10, %v5687_v41  ;;  %v14400_v5 = vpop.f32.mrf.mxu1 }
 0xe40   : > { %16006 = vst [vmem:[#allocation36_spill] sm:$0xff] %v14400_v5 }
 0xe41   : > { %6555 = vrot.lane.b32.xlu2 %v14058_v57, %s9927_s19  ;;  %v14390_v33 = vpop.eup %9486  ;;  %v5778_v12 = vmul.f32 1.442695, %v5720_v62  ;;  %v5780_v1 = vmul.f32 1.442695, %v5721_v13  ;;  %v14404_v57 = vpop.f32.mrf.mxu2 }
 0xe42   : > { %v14392_v29 = vpop.eup %9488  ;;  %v14406_v10 = vpop.f32.mrf.mxu3 }
 0xe43   : > { %v6586_v59 = vpop.permute.xlu2 %6585  ;;  %9490 = vpow2.f32 %v5778_v12  ;;  %v14396_v19 = vadd.f32 %v14392_v29, %v14390_v33 }
 0xe44   : > { %6652 = vmatpush.bf16.msra.mxu1 %v6586_v59  ;;  %9492 = vpow2.f32 %v5780_v1 }
 0xe45   : > { %16004 = vst [vmem:[#allocation34_spill] sm:$0xff] %v14396_v19  ;;  %6571 = vrot.lane.b32.xlu0 %v14114_v4, %s9927_s19 }
 0xe49   : > { %6838 = vrot.lane.b32.xlu2 %v14092_v61, %s9928_s20  ;;  %v14410_v16 = vpop.eup %9490  ;;  %v14424_v61 = vpop.f32.mrf.mxu2 }
 0xe4a   : > { %v14412_v60 = vpop.eup %9492  ;;  %v14426_v27 = vpop.f32.mrf.mxu3 }
 0xe4b   : > { %v14416_v8 = vadd.f32 %v14412_v60, %v14410_v16  ;;  %v5916_v26 = vpop.f32.mrf.mxu0 }
 0xe4c   : > { %v5965_v4 = vpop.f32.mrf.mxu1  ;;  %8361 = vmatmul.msk.bf16.gmra.mxu2 %vm1986_vm1, %v6833_v11 }
 0xe4d   : > { %16007 = vst [vmem:[#allocation27_spill] sm:$0xff] %v14416_v8  ;;  %8369 = vmatmul.msk.bf16.gmra.mxu3 %vm1986_vm1, %v6833_v11  ;;  %v14422_v49 = vadd.f32 %v5965_v4, %v5916_v26 }
 0xe4e   : > { %6348 = vmax.xlane.f32.xlu1 %v6347_v14 }
 0xe4f   : > { %16008 = vst [vmem:[#allocation25_spill] sm:$0xff] %v14422_v49 }
 0xe51   : > { %v6570_v36 = vpop.permute.xlu0 %6569  ;;  %v14432_v54 = vpop.f32.mrf.mxu2 }
 0xe52   : > { %6603 = vmatpush.bf16.msra.mxu0 %v6570_v36  ;;  %v14434_v41 = vpop.f32.mrf.mxu3 }
 0xe53   : > { %v14428_v20 = vpop.f32.mrf.mxu0 }
 0xe54   : > { %v14430_v34 = vpop.f32.mrf.mxu1 }
 0xe59   : > { %v6584_v18 = vpop.permute.xlu0 %6583  ;;  %v14442_v1 = vpop.f32.mrf.mxu2 }
 0xe5a   : > { %6653 = vmatpush.bf16.msra.mxu1 %v6584_v18  ;;  %v14444_v59 = vpop.f32.mrf.mxu3 }
 0xe5c   : > { %8362 = vmatmul.msk.bf16.gmra.mxu2 %vm1986_vm1, %v6835_v3 }
 0xe5d   : > { %8370 = vmatmul.msk.bf16.gmra.mxu3 %vm1986_vm1, %v6835_v3  ;;  %v5921_v11 = vpop.f32.mrf.mxu0 }
 0xe5e   : > { %v5970_v62 = vpop.f32.mrf.mxu1 }
 0xe5f   : > { %v14438_v13 = vadd.f32 %v5970_v62, %v5921_v11  ;;  %v6356_v11 = vmax.f32 %v14404_v57, %v14406_v10 }
 0xe61   : > { %16009 = vst [vmem:[#allocation30_spill] sm:$0xff] %v14438_v13  ;;  %v14440_v12 = vpop.permute.xlu0 %6565  ;;  %v14452_v62 = vpop.f32.mrf.mxu2 }
 0xe62   : > { %v14454_v15 = vpop.f32.mrf.mxu3 }
 0xe66   : > { %v5681_v26 = vpop.xlane.xlu1 %5680 }
 0xe67   : > { %v5716_v14 = vsub.f32 %v14240_v43, %v5681_v26  ;;  %v5717_v4 = vsub.f32 %v14242_v55, %v5681_v26  ;;  %6573 = vrot.lane.b32.xlu1 %v14047_v21, %s9927_s19  ;;  %v6353_v43 = vmax.f32 %v14380_v56, %v14384_v23 }
 0xe69   : > { %v6582_v36 = vpop.permute.xlu0 %6581  ;;  %v5770_v3 = vmul.f32 1.442695, %v5716_v14  ;;  %v5772_v18 = vmul.f32 1.442695, %v5717_v4 }
 0xe6a   : > { %6654 = vmatpush.bf16.msra.mxu1 %v6582_v36 }
 0xe6b   : > { %9494 = vpow2.f32 %v5770_v3 }
 0xe6c   : > { %9496 = vpow2.f32 %v5772_v18 }
 0xe6e   : > { %v5690_v55 = vpop.xlane.xlu1 %5689 }
 0xe6f   : > { %6357 = vmax.xlane.f32.xlu0 %v6356_v11  ;;  %v5722_v21 = vsub.f32 %v14302_v37, %v5690_v55  ;;  %v5723_v26 = vsub.f32 %v14304_v22, %v5690_v55  ;;  %6840 = vrot.lane.b32.xlu1 %v14121_v40, %s9928_s20  ;;  %v14466_v37 = vpop.f32.mrf.mxu2  ;;  %v14468_v22 = vpop.f32.mrf.mxu3  ;;  %v6362_v40 = vmax.f32 %v14432_v54, %v14434_v41 }
 0xe71   : > { %v6580_v14 = vpop.permute.xlu0 %6579  ;;  %v9495_v4 = vpop.eup %9494  ;;  %v5782_v36 = vmul.f32 1.442695, %v5722_v21  ;;  %v5784_v3 = vmul.f32 1.442695, %v5723_v26 }
 0xe72   : > { %6354 = vmax.xlane.f32.xlu2 %v6353_v43  ;;  %6655 = vmatpush.bf16.msra.mxu1 %v6580_v14  ;;  %v9497_v18 = vpop.eup %9496  ;;  %v5848_v38 = vpack.c.bf16 %v9495_v4, %v14365_v25 }
 0xe73   : > { %9498 = vpow2.f32 %v5782_v36  ;;  %v5849_v5 = vpack.c.bf16 %v9497_v18, %v14368_v24  ;;  %v14464_v11 = vadd.f32 %v9497_v18, %v9495_v4  ;;  %v5851_v18 = vpack.c.bf16 %v14412_v60, %v14392_v29 }
 0xe74   : > { %9500 = vpow2.f32 %v5784_v3  ;;  %5935 = vmatmul.bf16.gmra.mxu0 %v5848_v38  ;;  %v6365_v38 = vmax.f32 %v14442_v1, %v14444_v59  ;;  %v9847_v3 = vld [vmem:[%s11058_s11 + $0x30] sm:$0xff]  ;;  %v6371_v29 = vmax.f32 %v14466_v37, %v14468_v22 }
 0xe75   : > { %16010 = vst [vmem:[#allocation24_spill] sm:$0xff] %v14464_v11  ;;  %5984 = vmatmul.bf16.gmra.mxu1 %v5849_v5 }
 0xe77   : > { %v14478_v5 = vpop.f32.mrf.mxu2  ;;  %v14480_v36 = vpop.f32.mrf.mxu3 }
 0xe79   : > { %v9499_v43 = vpop.eup %9498 }
 0xe7a   : > { %6363 = vmax.xlane.f32.xlu2 %v6362_v40  ;;  %v9501_v55 = vpop.eup %9500 }
 0xe7b   : > { %v14474_v26 = vadd.f32 %v9501_v55, %v9499_v43 }
 0xe7c   : > { %v5693_v25 = vpop.xlane.xlu2 %5692 }
 0xe7d   : > { %v5724_v21 = vsub.f32 %v14314_v30, %v5693_v25  ;;  %v5725_v24 = vsub.f32 %v14316_v6, %v5693_v25  ;;  %16011 = vst [vmem:[#allocation8_spill] sm:$0xff] %v14474_v26  ;;  %v5850_v30 = vpack.c.bf16 %v14410_v16, %v14390_v33  ;;  %v14499_v16 = vpop.f32.mrf.mxu0 }
 0xe7e   : > { %16013 = vst [vmem:[#allocation19_spill] sm:$0xff] %v14499_v16 }
 0xe7f   : > { %v5786_v14 = vmul.f32 1.442695, %v5724_v21  ;;  %v5788_v4 = vmul.f32 1.442695, %v5725_v24  ;;  %v6368_v21 = vmax.f32 %v14452_v62, %v14454_v15  ;;  %v14490_v24 = vpop.f32.mrf.mxu2 }
 0xe81   : > { %9502 = vpow2.f32 %v5786_v14 }
 0xe82   : > { %9504 = vpow2.f32 %v5788_v4  ;;  %6366 = vmax.xlane.f32.xlu2 %v6365_v38  ;;  %v14492_v4 = vpop.f32.mrf.mxu3 }
 0xe83   : > { %6842 = vrot.lane.b32.xlu0 %v9847_v3, %s9928_s20  ;;  %v14501_v3 = vpop.f32.mrf.mxu1 }
 0xe84   : > { %v6578_v6 = vpop.permute.xlu2 %6577  ;;  %5940 = vmatmul.bf16.gmra.mxu0 %v5850_v30  ;;  %16014 = vst [vmem:[#allocation46_spill] sm:$0xff] %v14501_v3 }
 0xe85   : > { %6656 = vmatpush.bf16.msra.mxu1 %v6578_v6 }
 0xe86   : > { %5989 = vmatmul.bf16.gmra.mxu1 %v5851_v18  ;;  %v6568_v14 = vpop.permute.xlu1 %6567 }
 0xe87   : > { %v9503_v40 = vpop.eup %9502  ;;  %6604 = vmatpush.bf16.msra.mxu0 %v6568_v14  ;;  %v14503_v30 = vpop.f32.mrf.mxu2 }
 0xe88   : > { %v9505_v25 = vpop.eup %9504  ;;  %v5852_v18 = vpack.c.bf16 %v9503_v40, %v9499_v43  ;;  %v6562_v14 = vpop.permute.xlu0 %6561 }
 0xe89   : > { %v14494_v38 = vadd.f32 %v9505_v25, %v9503_v40  ;;  %v5853_v58 = vpack.c.bf16 %v9505_v25, %v9501_v55 }
 0xe8a   : > { %6369 = vmax.xlane.f32.xlu2 %v6368_v21  ;;  %v14505_v6 = vpop.f32.mrf.mxu3 }
 0xe8b   : > { %16012 = vst [vmem:[#allocation13_spill] sm:$0xff] %v14494_v38  ;;  %6605 = vmatpush.bf16.msra.mxu0 %v14440_v12  ;;  %v6377_v12 = vmax.f32 %v14490_v24, %v14492_v4  ;;  %v6380_v25 = vmax.f32 %v14503_v30, %v14505_v6 }
 0xe8c   : > { %v6560_v33 = vpop.permute.xlu2 %6559 }
 0xe8e   : > { %v6564_v60 = vpop.permute.xlu1 %6563 }
 0xe8f   : > { %6606 = vmatpush.bf16.msra.mxu0 %v6564_v60  ;;  %v6359_v60 = vmax.f32 %v14424_v61, %v14426_v27  ;;  %v14513_v43 = vpop.f32.mrf.mxu2 }
 0xe92   : > { %6372 = vmax.xlane.f32.xlu2 %v6371_v29 }
 0xe93   : > { %6607 = vmatpush.bf16.msra.mxu0 %v6562_v14 }
 0xe94   : > { %v6576_v21 = vpop.permute.xlu2 %6575  ;;  %5945 = vmatmul.bf16.gmra.mxu0 %v5852_v18 }
 0xe95   : > { %6657 = vmatpush.bf16.msra.mxu1 %v6576_v21 }
 0xe96   : > { %5994 = vmatmul.bf16.gmra.mxu1 %v5853_v58  ;;  %v6837_v26 = vpop.permute.xlu1 %6836  ;;  %v5926_v38 = vpop.f32.mrf.mxu0 }
 0xe97   : > { %v5975_v9 = vpop.f32.mrf.mxu1  ;;  %8363 = vmatmul.msk.bf16.gmra.mxu2 %vm1986_vm1, %v6837_v26  ;;  %8371 = vmatmul.msk.bf16.gmra.mxu3 %vm1986_vm1, %v6837_v26  ;;  %v14517_v58 = vpop.f32.mrf.mxu3 }
 0xe98   : > { %v14515_v55 = vadd.f32 %v5975_v9, %v5926_v38  ;;  %6608 = vmatpush.bf16.msra.mxu0 %v6560_v33  ;;  %v14521_v29 = vpop.f32.mrf.mxu2 }
 0xe99   : > { %6360 = vmax.xlane.f32.xlu1 %v6359_v60  ;;  %v6374_v60 = vmax.f32 %v14478_v5, %v14480_v36 }
 0xe9a   : > { %16015 = vst [vmem:[#allocation17_spill] sm:$0xff] %v14515_v55  ;;  %6378 = vmax.xlane.f32.xlu2 %v6377_v12 }
 0xe9c   : > { %v6558_v40 = vpop.permute.xlu2 %6557 }
 0xe9d   : > { %6609 = vmatpush.bf16.msra.mxu0 %v6558_v40 }
 0xe9f   : > { %v14523_v14 = vpop.f32.mrf.mxu3 }
 0xea0   : > { %v6386_v33 = vmax.f32 %v14521_v29, %v14523_v14 }
 0xea2   : > { %6381 = vmax.xlane.f32.xlu2 %v6380_v25  ;;  %v14533_v25 = vpop.f32.mrf.mxu0 }
 0xea3   : > { %16016 = vst [vmem:[#allocation33_spill] sm:$0xff] %v14533_v25 }
 0xea4   : > { %v6556_v18 = vpop.permute.xlu2 %6555  ;;  %v6352_v26 = vpop.xlane.xlu0 %6351 }
 0xea5   : > { %6610 = vmatpush.bf16.msra.mxu0 %v6556_v18  ;;  %v6397_v9 = vsub.f32 %v14350_v50, %v6352_v26  ;;  %v6398_v38 = vsub.f32 %v14354_v45, %v6352_v26  ;;  %v14537_v26 = vpop.f32.mrf.mxu1 }
 0xea6   : > { %16018 = vst [vmem:[#allocation37_spill] sm:$0xff] %v14537_v26 }
 0xea7   : > { %v6431_v21 = vmul.f32 1.442695, %v6397_v9  ;;  %v6433_v12 = vmul.f32 1.442695, %v6398_v38  ;;  %v9848_v9 = vld [vmem:[%s11058_s11 + $0x38] sm:$0xff] }
 0xea9   : > { %9506 = vpow2.f32 %v6431_v21 }
 0xeaa   : > { %6387 = vmax.xlane.f32.xlu2 %v6386_v33  ;;  %9508 = vpow2.f32 %v6433_v12  ;;  %v9849_v12 = vld [vmem:[#allocation5 + $0x50] sm:$0xff] }
 0xeac   : > { %v6839_v40 = vpop.permute.xlu2 %6838 }
 0xead   : > { %8364 = vmatmul.msk.bf16.gmra.mxu2 %vm1986_vm1, %v6839_v40  ;;  %8372 = vmatmul.msk.bf16.gmra.mxu3 %vm1986_vm1, %v6839_v40  ;;  %v9850_v40 = vld [vmem:[#allocation5 + $0x38] sm:$0xff] }
 0xeae   : > { %6375 = vmax.xlane.f32.xlu0 %v6374_v60 }
 0xeaf   : > { %v9507_v50 = vpop.eup %9506 }
 0xeb0   : > { %v9509_v45 = vpop.eup %9508 }
 0xeb1   : > { %v14535_v18 = vadd.f32 %v9509_v45, %v9507_v50 }
 0xeb2   : > { %6844 = vrot.lane.b32.xlu1 %v9848_v9, %s9928_s20  ;;  %v9851_v9 = vld [vmem:[#allocation5 + $0x70] sm:$0xff] }
 0xeb3   : > { %16017 = vst [vmem:[#allocation45_spill] sm:$0xff] %v14535_v18 }
 0xeb9   : > { %v5931_v38 = vpop.f32.mrf.mxu0 }
 0xeba   : > { %v5980_v33 = vpop.f32.mrf.mxu1 }
 0xebb   : > { %v14541_v21 = vadd.f32 %v5980_v33, %v5931_v38 }
 0xebd   : > { %16019 = vst [vmem:[#allocation39_spill] sm:$0xff] %v14541_v21 }
 0xec1   : > { %v6349_v60 = vpop.xlane.xlu1 %6348 }
 0xec2   : > { %7286 = vrot.lane.b32.xlu0 %v9849_v12, %s9928_s20  ;;  %7270 = vrot.lane.b32.xlu2 %v9850_v40, %s9928_s20  ;;  %v6395_v25 = vsub.f32 %v14339_v39, %v6349_v60  ;;  %v6396_v19 = vsub.f32 %v14341_v32, %v6349_v60  ;;  %v9852_v12 = vld [vmem:[#allocation5 + $0x30] sm:$0xff]  ;;  %v14551_v40 = vpop.f32.mrf.mxu2  ;;  %v14553_v39 = vpop.f32.mrf.mxu3  ;;  %v9853_v32 = vld [vmem:[#allocation5 + $0x8] sm:$0xff] }
 0xec3   : > { %v9854_v60 = vld [vmem:[#allocation5 + $0x48] sm:$0xff]  ;;  %v6389_v11 = vmax.f32 %v14551_v40, %v14553_v39 }
 0xec4   : > { %v6427_v8 = vmul.f32 1.442695, %v6395_v25  ;;  %v6429_v26 = vmul.f32 1.442695, %v6396_v19  ;;  %v6572_v19 = vpop.permute.xlu0 %6571  ;;  %v6383_v25 = vmax.f32 %v14513_v43, %v14517_v58 }
 0xec6   : > { %9510 = vpow2.f32 %v6427_v8 }
 0xec7   : > { %9512 = vpow2.f32 %v6429_v26 }
 0xeca   : > { %7268 = vrot.lane.b32.xlu0 %v9851_v9, %s9928_s20  ;;  %v14560_v26 = vpop.f32.mrf.mxu3 }
 0xecc   : > { %v9511_v38 = vpop.eup %9510 }
 0xecd   : > { %v9513_v33 = vpop.eup %9512  ;;  %v6539_v21 = vpack.c.bf16 %v9507_v50, %v9511_v38  ;;  %v14558_v50 = vpop.f32.mrf.mxu2 }
 0xece   : > { %v14548_v3 = vadd.f32 %v9513_v33, %v9511_v38 }
 0xecf   : > { %6611 = vmatmul.bf16.vlgmr.msra.gmra.mxu0 %v6539_v21  ;;  %v6540_v21 = vpack.c.bf16 %v9509_v45, %v9513_v33 }
 0xed0   : > { %16020 = vst [vmem:[#allocation47_spill] sm:$0xff] %v14548_v3 }
 0xed2   : > { %7266 = vrot.lane.b32.xlu0 %v9852_v12, %s9928_s20  ;;  %v6392_v12 = vmax.f32 %v14558_v50, %v14560_v26 }
 0xed9   : > { %v6574_v8 = vpop.permute.xlu1 %6573 }
 0xeda   : > { %7282 = vrot.lane.b32.xlu0 %v9853_v32, %s9928_s20  ;;  %6658 = vmatpush.bf16.msra.mxu1 %v6574_v8 }
 0xedc   : > { %6384 = vmax.xlane.f32.xlu1 %v6383_v25 }
 0xede   : > { %6659 = vmatpush.bf16.msra.mxu1 %v6572_v19 }
 0xee1   : > { %v6841_v9 = vpop.permute.xlu1 %6840  ;;  %6660 = vmatmul.bf16.vlgmr.msra.gmra.mxu1 %v6540_v21 }
 0xee2   : > { %7264 = vrot.lane.b32.xlu0 %v9854_v60, %s9928_s20  ;;  %v6358_v38 = vpop.xlane.xlu0 %6357  ;;  %8365 = vmatmul.msk.bf16.gmra.mxu2 %vm1986_vm1, %v6841_v9 }
 0xee3   : > { %8373 = vmatmul.msk.bf16.gmra.mxu3 %vm1986_vm1, %v6841_v9  ;;  %v6401_v32 = vsub.f32 %v14404_v57, %v6358_v38  ;;  %v6402_v19 = vsub.f32 %v14406_v10, %v6358_v38  ;;  %v9855_v9 = vld [vmem:[#allocation5 + $0x40] sm:$0xff]  ;;  %v14574_v57 = vpop.f32.mrf.mxu0  ;;  %v14576_v10 = vpop.f32.mrf.mxu1 }
 0xee4   : > { %6393 = vmax.xlane.f32.xlu1 %v6392_v12  ;;  %16021 = vst [vmem:[#allocation50_spill] sm:$0xff] %v14574_v57 }
 0xee5   : > { %v6355_v8 = vpop.xlane.xlu2 %6354  ;;  %v6439_v25 = vmul.f32 1.442695, %v6401_v32  ;;  %v6441_v45 = vmul.f32 1.442695, %v6402_v19  ;;  %16022 = vst [vmem:[#allocation40_spill] sm:$0xff] %v14576_v10 }
 0xee6   : > { %v6399_v33 = vsub.f32 %v14380_v56, %v6355_v8  ;;  %v6400_v21 = vsub.f32 %v14384_v23, %v6355_v8 }
 0xee7   : > { %9514 = vpow2.f32 %v6439_v25 }
 0xee8   : > { %v6435_v60 = vmul.f32 1.442695, %v6399_v33  ;;  %v6437_v16 = vmul.f32 1.442695, %v6400_v21  ;;  %9516 = vpow2.f32 %v6441_v45 }
 0xeea   : > { %9518 = vpow2.f32 %v6435_v60  ;;  %7262 = vrot.lane.b32.xlu0 %v9855_v9, %s9928_s20 }
 0xeeb   : > { %9520 = vpow2.f32 %v6437_v16  ;;  %6390 = vmax.xlane.f32.xlu2 %v6389_v11 }
 0xeed   : > { %v6364_v56 = vpop.xlane.xlu2 %6363  ;;  %v9515_v38 = vpop.eup %9514 }
 0xeee   : > { %v6405_v23 = vsub.f32 %v14432_v54, %v6364_v56  ;;  %v6406_v12 = vsub.f32 %v14434_v41, %v6364_v56  ;;  %v9517_v32 = vpop.eup %9516 }
 0xeef   : > { %v14580_v45 = vadd.f32 %v9517_v32, %v9515_v38 }
 0xef0   : > { %v9519_v19 = vpop.eup %9518  ;;  %v6447_v8 = vmul.f32 1.442695, %v6405_v23  ;;  %v6449_v25 = vmul.f32 1.442695, %v6406_v12 }
 0xef1   : > { %v9521_v33 = vpop.eup %9520  ;;  %v6541_v21 = vpack.c.bf16 %v9515_v38, %v9519_v19  ;;  %v5936_v11 = vpop.f32.mrf.mxu0 }
 0xef2   : > { %9522 = vpow2.f32 %v6447_v8  ;;  %v6542_v60 = vpack.c.bf16 %v9517_v32, %v9521_v33  ;;  %v14582_v16 = vadd.f32 %v9521_v33, %v9519_v19  ;;  %v5985_v9 = vpop.f32.mrf.mxu1 }
 0xef3   : > { %9524 = vpow2.f32 %v6449_v25  ;;  %6616 = vmatmul.bf16.gmra.mxu0 %v6541_v21  ;;  %v14584_v54 = vadd.f32 %v5985_v9, %v5936_v11  ;;  %v9856_v11 = vld [vmem:[#allocation5 + $0x60] sm:$0xff] }
 0xef4   : > { %6665 = vmatmul.bf16.gmra.mxu1 %v6542_v60 }
 0xef5   : > { %16023 = vst [vmem:[#allocation22_spill] sm:$0xff] %v14584_v54  ;;  %v6367_v41 = vpop.xlane.xlu2 %6366  ;;  %v6843_v12 = vpop.permute.xlu0 %6842 }
 0xef6   : > { %v6407_v56 = vsub.f32 %v14442_v1, %v6367_v41  ;;  %v6408_v23 = vsub.f32 %v14444_v59, %v6367_v41  ;;  %8366 = vmatmul.msk.bf16.gmra.mxu2 %vm1986_vm1, %v6843_v12  ;;  %8374 = vmatmul.msk.bf16.gmra.mxu3 %vm1986_vm1, %v6843_v12 }
 0xef8   : > { %v14590_v38 = vpop.eup %9522  ;;  %v6451_v32 = vmul.f32 1.442695, %v6407_v56  ;;  %v6453_v19 = vmul.f32 1.442695, %v6408_v23 }
 0xef9   : > { %v14592_v8 = vpop.eup %9524  ;;  %v14598_v1 = vpop.f32.mrf.mxu0 }
 0xefa   : > { %9526 = vpow2.f32 %v6451_v32  ;;  %v14596_v25 = vadd.f32 %v14592_v8, %v14590_v38  ;;  %16024 = vst [vmem:[#allocation55_spill] sm:$0xff] %v14598_v1  ;;  %v14600_v59 = vpop.f32.mrf.mxu1 }
 0xefb   : > { %9528 = vpow2.f32 %v6453_v19  ;;  %16025 = vst [vmem:[#allocation31_spill] sm:$0xff] %v14600_v59  ;;  %v9857_v19 = vld [vmem:[#allocation5 + $0x58] sm:$0xff]  ;;  %v9858_v59 = vld [vmem:[#allocation5] sm:$0xff] }
 0xefd   : > { %v6370_v33 = vpop.xlane.xlu2 %6369  ;;  %7284 = vrot.lane.b32.xlu1 %v9856_v11, %s9928_s20 }
 0xefe   : > { %v6409_v21 = vsub.f32 %v14452_v62, %v6370_v33  ;;  %v6410_v60 = vsub.f32 %v14454_v15, %v6370_v33  ;;  %v14614_v15 = vpop.f32.mrf.mxu2  ;;  %v14616_v33 = vpop.f32.mrf.mxu3 }
 0xf00   : > { %v14605_v9 = vpop.eup %9526  ;;  %v6455_v41 = vmul.f32 1.442695, %v6409_v21  ;;  %v6457_v56 = vmul.f32 1.442695, %v6410_v60 }
 0xf01   : > { %v14607_v23 = vpop.eup %9528  ;;  %v5941_v32 = vpop.f32.mrf.mxu0 }
 0xf02   : > { %9530 = vpow2.f32 %v6455_v41  ;;  %v14611_v12 = vadd.f32 %v14607_v23, %v14605_v9 }
 0xf03   : > { %9532 = vpow2.f32 %v6457_v56  ;;  %7278 = vrot.lane.b32.xlu2 %v9857_v19, %s9928_s20  ;;  %v5990_v62 = vpop.f32.mrf.mxu1 }
 0xf04   : > { %v14618_v11 = vadd.f32 %v5990_v62, %v5941_v32 }
 0xf05   : > { %v6373_v21 = vpop.xlane.xlu2 %6372  ;;  %7280 = vrot.lane.b32.xlu1 %v9858_v59, %s9928_s20 }
 0xf06   : > { %16026 = vst [vmem:[#allocation28_spill] sm:$0xff] %v14618_v11  ;;  %v6411_v60 = vsub.f32 %v14466_v37, %v6373_v21  ;;  %v6412_v41 = vsub.f32 %v14468_v22, %v6373_v21  ;;  %v9859_v37 = vld [vmem:[#allocation5 + $0x10] sm:$0xff] }
 0xf08   : > { %v14623_v56 = vpop.eup %9530  ;;  %v6459_v1 = vmul.f32 1.442695, %v6411_v60  ;;  %v6461_v10 = vmul.f32 1.442695, %v6412_v41  ;;  %v14638_v41 = vpop.f32.mrf.mxu2 }
 0xf09   : > { %v14625_v19 = vpop.eup %9532  ;;  %v14631_v32 = vpop.f32.mrf.mxu0 }
 0xf0a   : > { %9534 = vpow2.f32 %v6459_v1  ;;  %v14629_v57 = vadd.f32 %v14625_v19, %v14623_v56  ;;  %16027 = vst [vmem:[#allocation9_spill] sm:$0xff] %v14631_v32  ;;  %v14640_v1 = vpop.f32.mrf.mxu3 }
 0xf0b   : > { %9536 = vpow2.f32 %v6461_v10  ;;  %7260 = vrot.lane.b32.xlu2 %v9859_v37, %s9928_s20  ;;  %v14634_v22 = vpop.f32.mrf.mxu1 }
 0xf0c   : > { %16028 = vst [vmem:[#allocation35_spill] sm:$0xff] %v14634_v22  ;;  %v6361_v62 = vpop.xlane.xlu1 %6360 }
 0xf0d   : > { %v6379_v59 = vpop.xlane.xlu2 %6378  ;;  %v6403_v11 = vsub.f32 %v14424_v61, %v6361_v62  ;;  %v6404_v10 = vsub.f32 %v14426_v27, %v6361_v62 }
 0xf0e   : > { %v6415_v21 = vsub.f32 %v14490_v24, %v6379_v59  ;;  %v6416_v60 = vsub.f32 %v14492_v4, %v6379_v59  ;;  %v7051_v24 = vmax.f32 %v14638_v41, %v14640_v1  ;;  %v9860_v59 = vld [vmem:[#allocation5 + $0x18] sm:$0xff] }
 0xf0f   : > { %v6443_v22 = vmul.f32 1.442695, %v6403_v11  ;;  %v6445_v52 = vmul.f32 1.442695, %v6404_v10 }
 0xf10   : > { %v14644_v32 = vpop.eup %9534  ;;  %v6467_v54 = vmul.f32 1.442695, %v6415_v21  ;;  %v6469_v18 = vmul.f32 1.442695, %v6416_v60 }
 0xf11   : > { %v14646_v37 = vpop.eup %9536  ;;  %v5946_v61 = vpop.f32.mrf.mxu0 }
 0xf12   : > { %9538 = vpow2.f32 %v6467_v54  ;;  %v14652_v4 = vadd.f32 %v14646_v37, %v14644_v32 }
 0xf13   : > { %9540 = vpow2.f32 %v6443_v22  ;;  %7276 = vrot.lane.b32.xlu2 %v9860_v59, %s9928_s20  ;;  %v5995_v27 = vpop.f32.mrf.mxu1 }
 0xf14   : > { %9542 = vpow2.f32 %v6445_v52  ;;  %7052 = vmax.xlane.f32.xlu0 %v7051_v24  ;;  %v14655_v11 = vadd.f32 %v5995_v27, %v5946_v61  ;;  %v9861_v24 = vld [vmem:[#allocation5 + $0x68] sm:$0xff]  ;;  %v14674_v27 = vpop.f32.mrf.mxu3 }
 0xf15   : > { %9544 = vpow2.f32 %v6469_v18  ;;  %v6382_v62 = vpop.xlane.xlu2 %6381 }
 0xf16   : > { %16029 = vst [vmem:[#allocation23_spill] sm:$0xff] %v14655_v11  ;;  %v6417_v21 = vsub.f32 %v14503_v30, %v6382_v62  ;;  %v6418_v54 = vsub.f32 %v14505_v6, %v6382_v62  ;;  %v14668_v6 = vpop.f32.mrf.mxu2 }
 0xf18   : > { %v14659_v60 = vpop.eup %9538  ;;  %v6471_v10 = vmul.f32 1.442695, %v6417_v21  ;;  %v6473_v3 = vmul.f32 1.442695, %v6418_v54 }
 0xf19   : > { %v9541_v22 = vpop.eup %9540 }
 0xf1a   : > { %v9543_v47 = vpop.eup %9542  ;;  %9546 = vpow2.f32 %v6471_v10  ;;  %v6543_v59 = vpack.c.bf16 %v14590_v38, %v9541_v22 }
 0xf1b   : > { %v14662_v52 = vpop.eup %9544  ;;  %9548 = vpow2.f32 %v6473_v3  ;;  %v6544_v18 = vpack.c.bf16 %v14592_v8, %v9543_v47  ;;  %7258 = vrot.lane.b32.xlu2 %v9861_v24, %s9928_s20  ;;  %v14666_v30 = vadd.f32 %v9543_v47, %v9541_v22  ;;  %v9862_v24 = vld [vmem:[#allocation5 + $0x28] sm:$0xff] }
 0xf1c   : > { %6621 = vmatmul.bf16.gmra.mxu0 %v6543_v59  ;;  %v14672_v61 = vadd.f32 %v14662_v52, %v14659_v60 }
 0xf1d   : > { %6670 = vmatmul.bf16.gmra.mxu1 %v6544_v18  ;;  %v6388_v38 = vpop.xlane.xlu2 %6387 }
 0xf1e   : > { %16030 = vst [vmem:[#allocation65_spill] sm:$0xff] %v14672_v61  ;;  %v6421_v3 = vsub.f32 %v14521_v29, %v6388_v38  ;;  %v6422_v8 = vsub.f32 %v14523_v14, %v6388_v38  ;;  %v14683_v38 = vpop.f32.mrf.mxu2 }
 0xf20   : > { %v9547_v62 = vpop.eup %9546  ;;  %v6479_v21 = vmul.f32 1.442695, %v6421_v3  ;;  %v6481_v54 = vmul.f32 1.442695, %v6422_v8  ;;  %v14685_v3 = vpop.f32.mrf.mxu3 }
 0xf21   : > { %v9549_v47 = vpop.eup %9548  ;;  %v6376_v10 = vpop.xlane.xlu0 %6375 }
 0xf22   : > { %9550 = vpow2.f32 %v6479_v21  ;;  %v6413_v22 = vsub.f32 %v14478_v5, %v6376_v10  ;;  %v6414_v59 = vsub.f32 %v14480_v36, %v6376_v10  ;;  %v14681_v18 = vadd.f32 %v9549_v47, %v9547_v62  ;;  %v9863_v36 = vld [vmem:[#allocation5 + $0x20] sm:$0xff] }
 0xf23   : > { %9552 = vpow2.f32 %v6481_v54  ;;  %7256 = vrot.lane.b32.xlu2 %v9862_v24, %s9928_s20  ;;  %v6546_v21 = vpack.c.bf16 %v14625_v19, %v14607_v23 }
 0xf24   : > { %16031 = vst [vmem:[#allocation48_spill] sm:$0xff] %v14681_v18  ;;  %v6463_v11 = vmul.f32 1.442695, %v6413_v22  ;;  %v6465_v29 = vmul.f32 1.442695, %v6414_v59  ;;  %v6845_v14 = vpop.permute.xlu1 %6844  ;;  %v7048_v59 = vmax.f32 %v14614_v15, %v14616_v33  ;;  %v14743_v18 = vpop.f32.mrf.mxu1 }
 0xf25   : > { %v7271_v61 = vpop.permute.xlu2 %7270  ;;  %8367 = vmatmul.msk.bf16.gmra.mxu2 %vm1986_vm1, %v6845_v14  ;;  %8375 = vmatmul.msk.bf16.gmra.mxu3 %vm1986_vm1, %v6845_v14  ;;  %16035 = vst [vmem:[#allocation60_spill] sm:$0xff] %v14743_v18 }
 0xf26   : > { %9554 = vpow2.f32 %v6463_v11  ;;  %7304 = vmatpush.bf16.msrb.mxu0 %v7271_v61  ;;  %v6545_v11 = vpack.c.bf16 %v14623_v56, %v14605_v9  ;;  %v14706_v24 = vpop.f32.mrf.mxu2 }
 0xf27   : > { %9556 = vpow2.f32 %v6465_v29 }
 0xf28   : > { %v14689_v5 = vpop.eup %9550  ;;  %7272 = vrot.lane.b32.xlu0 %v9863_v36, %s9928_s20  ;;  %v14708_v29 = vpop.f32.mrf.mxu3 }
 0xf29   : > { %v14692_v8 = vpop.eup %9552 }
 0xf2a   : > { %v14698_v61 = vadd.f32 %v14692_v8, %v14689_v5 }
 0xf2c   : > { %16032 = vst [vmem:[#allocation14_spill] sm:$0xff] %v14698_v61  ;;  %v9555_v54 = vpop.eup %9554  ;;  %6626 = vmatmul.bf16.gmra.mxu0 %v6545_v11 }
 0xf2d   : > { %v9557_v10 = vpop.eup %9556  ;;  %6675 = vmatmul.bf16.gmra.mxu1 %v6546_v21  ;;  %v6547_v56 = vpack.c.bf16 %v9555_v54, %v14644_v32  ;;  %v9864_v32 = vld [vmem:[#allocation5 + $0x78] sm:$0xff] }
 0xf2e   : > { %v14702_v22 = vadd.f32 %v9557_v10, %v9555_v54  ;;  %v14711_v14 = vpop.f32.mrf.mxu2  ;;  %v6548_v19 = vpack.c.bf16 %v9557_v10, %v14646_v37  ;;  %v6549_v54 = vpack.c.bf16 %v9547_v62, %v14659_v60  ;;  %v6550_v37 = vpack.c.bf16 %v9549_v47, %v14662_v52 }
 0xf2f   : > { %7049 = vmax.xlane.f32.xlu1 %v7048_v59  ;;  %v7054_v59 = vmax.f32 %v14668_v6, %v14674_v27 }
 0xf30   : > { %16033 = vst [vmem:[#allocation15_spill] sm:$0xff] %v14702_v22  ;;  %v14713_v23 = vpop.f32.mrf.mxu3 }
 0xf34   : > { %v7287_v9 = vpop.permute.xlu0 %7286 }
 0xf35   : > { %7353 = vmatpush.bf16.msrb.mxu1 %v7287_v9 }
 0xf36   : > { %v14716_v11 = vpop.f32.mrf.mxu2 }
 0xf38   : > { %v14718_v21 = vpop.f32.mrf.mxu3 }
 0xf3c   : > { %6631 = vmatmul.bf16.gmra.mxu0 %v6547_v56  ;;  %v7269_v36 = vpop.permute.xlu0 %7268 }
 0xf3d   : > { %6680 = vmatmul.bf16.gmra.mxu1 %v6548_v19  ;;  %7305 = vmatpush.bf16.msrb.mxu0 %v7269_v36  ;;  %v7063_v36 = vmax.f32 %v14711_v14, %v14713_v23 }
 0xf3e   : > { %v14727_v9 = vpop.f32.mrf.mxu2 }
 0xf40   : > { %v14729_v56 = vpop.f32.mrf.mxu3 }
 0xf44   : > { %v7267_v61 = vpop.permute.xlu0 %7266 }
 0xf45   : > { %7306 = vmatpush.bf16.msrb.mxu0 %v7267_v61  ;;  %v7057_v61 = vmax.f32 %v14683_v38, %v14685_v3 }
 0xf48   : > { %7274 = vrot.lane.b32.xlu1 %v9864_v32, %s9928_s20  ;;  %v14737_v32 = vpop.f32.mrf.mxu2 }
 0xf4c   : > { %6636 = vmatmul.bf16.gmra.mxu0 %v6549_v54  ;;  %7055 = vmax.xlane.f32.xlu2 %v7054_v59  ;;  %v14725_v10 = vpop.permute.xlu0 %7282  ;;  %v14739_v54 = vpop.f32.mrf.mxu3 }
 0xf4d   : > { %6685 = vmatmul.bf16.gmra.mxu1 %v6550_v37  ;;  %v14741_v37 = vpop.f32.mrf.mxu0 }
 0xf4e   : > { %16034 = vst [vmem:[#allocation64_spill] sm:$0xff] %v14741_v37 }
 0xf4f   : > { %v6385_v19 = vpop.xlane.xlu1 %6384 }
 0xf50   : > { %v6419_v60 = vsub.f32 %v14513_v43, %v6385_v19  ;;  %v6420_v52 = vsub.f32 %v14517_v58, %v6385_v19  ;;  %v7069_v43 = vmax.f32 %v14727_v9, %v14729_v56 }
 0xf52   : > { %7058 = vmax.xlane.f32.xlu0 %v7057_v61  ;;  %v6475_v62 = vmul.f32 1.442695, %v6419_v60  ;;  %v6477_v47 = vmul.f32 1.442695, %v6420_v52  ;;  %v7066_v61 = vmax.f32 %v14716_v11, %v14718_v21 }
 0xf54   : > { %7064 = vmax.xlane.f32.xlu2 %v7063_v36  ;;  %v7265_v59 = vpop.permute.xlu0 %7264  ;;  %9558 = vpow2.f32 %v6475_v62 }
 0xf55   : > { %7307 = vmatpush.bf16.msrb.mxu0 %v7265_v59  ;;  %9560 = vpow2.f32 %v6477_v47  ;;  %v6612_v37 = vpop.f32.mrf.mxu0 }
 0xf57   : > { %v6394_v58 = vpop.xlane.xlu1 %6393 }
 0xf58   : > { %v6425_v19 = vsub.f32 %v14558_v50, %v6394_v58  ;;  %v6426_v36 = vsub.f32 %v14560_v26, %v6394_v58  ;;  %v14755_v50 = vpop.f32.mrf.mxu2  ;;  %v14757_v26 = vpop.f32.mrf.mxu3 }
 0xf5a   : > { %7070 = vmax.xlane.f32.xlu0 %v7069_v43  ;;  %v9559_v60 = vpop.eup %9558  ;;  %v6487_v52 = vmul.f32 1.442695, %v6425_v19  ;;  %v6489_v59 = vmul.f32 1.442695, %v6426_v36 }
 0xf5b   : > { %v9561_v47 = vpop.eup %9560  ;;  %v6551_v18 = vpack.c.bf16 %v14689_v5, %v9559_v60 }
 0xf5c   : > { %7067 = vmax.xlane.f32.xlu2 %v7066_v61  ;;  %v7263_v62 = vpop.permute.xlu0 %7262  ;;  %9562 = vpow2.f32 %v6487_v52  ;;  %v6552_v55 = vpack.c.bf16 %v14692_v8, %v9561_v47  ;;  %v14753_v49 = vadd.f32 %v9561_v47, %v9559_v60  ;;  %v7075_v8 = vmax.f32 %v14755_v50, %v14757_v26 }
 0xf5d   : > { %7308 = vmatpush.bf16.msrb.mxu0 %v7263_v62  ;;  %9564 = vpow2.f32 %v6489_v59 }
 0xf5e   : > { %v6391_v13 = vpop.xlane.xlu2 %6390  ;;  %16036 = vst [vmem:[#allocation61_spill] sm:$0xff] %v14753_v49  ;;  %6641 = vmatmul.bf16.gmra.mxu0 %v6551_v18  ;;  %6690 = vmatmul.bf16.gmra.mxu1 %v6552_v55  ;;  %v6661_v5 = vpop.f32.mrf.mxu1 }
 0xf5f   : > { %v6423_v43 = vsub.f32 %v14551_v40, %v6391_v13  ;;  %v6424_v58 = vsub.f32 %v14553_v39, %v6391_v13  ;;  %v14761_v61 = vadd.f32 %v6661_v5, %v6612_v37  ;;  %v14771_v55 = vpop.f32.mrf.mxu0 }
 0xf60   : > { %16039 = vst [vmem:[#allocation85_spill] sm:$0xff] %v14771_v55  ;;  %v7060_v55 = vmax.f32 %v14706_v24, %v14708_v29 }
 0xf61   : > { %16037 = vst [vmem:[#allocation51_spill] sm:$0xff] %v14761_v61  ;;  %v6483_v19 = vmul.f32 1.442695, %v6423_v43  ;;  %v6485_v36 = vmul.f32 1.442695, %v6424_v58 }
 0xf62   : > { %v9563_v60 = vpop.eup %9562 }
 0xf63   : > { %9566 = vpow2.f32 %v6483_v19  ;;  %v9565_v52 = vpop.eup %9564 }
 0xf64   : > { %9568 = vpow2.f32 %v6485_v36  ;;  %7076 = vmax.xlane.f32.xlu2 %v7075_v8  ;;  %v14765_v18 = vadd.f32 %v9565_v52, %v9563_v60 }
 0xf65   : > { %v14767_v40 = vpop.f32.mrf.mxu2 }
 0xf66   : > { %v7279_v59 = vpop.permute.xlu2 %7278  ;;  %16038 = vst [vmem:[#allocation62_spill] sm:$0xff] %v14765_v18  ;;  %v14769_v13 = vpop.f32.mrf.mxu3 }
 0xf67   : > { %v7078_v39 = vmax.f32 %v14767_v40, %v14769_v13  ;;  %v14775_v62 = vpop.f32.mrf.mxu1 }
 0xf68   : > { %16040 = vst [vmem:[#allocation86_spill] sm:$0xff] %v14775_v62  ;;  %v16043_v62 = vld [vmem:[#allocation11_spill] sm:$0xff] }
 0xf69   : > { %v9567_v37 = vpop.eup %9566  ;;  %7079 = vmax.xlane.f32.xlu0 %v7078_v39 }
 0xf6a   : > { %v9569_v47 = vpop.eup %9568  ;;  %v6553_v43 = vpack.c.bf16 %v9563_v60, %v9567_v37 }
 0xf6b   : > { %v14777_v58 = vadd.f32 %v9569_v47, %v9567_v37  ;;  %v6554_v5 = vpack.c.bf16 %v9565_v52, %v9569_v47  ;;  %v7072_v37 = vmax.f32 %v14737_v32, %v14739_v54 }
 0xf6d   : > { %16041 = vst [vmem:[#allocation87_spill] sm:$0xff] %v14777_v58  ;;  %v14781_v61 = vpop.f32.mrf.mxu2 }
 0xf6e   : > { %v7261_v19 = vpop.permute.xlu2 %7260  ;;  %6646 = vmatmul.bf16.gmra.mxu0 %v6553_v43  ;;  %6695 = vmatmul.bf16.gmra.mxu1 %v6554_v5  ;;  %v14783_v49 = vpop.f32.mrf.mxu3 }
 0xf6f   : > { %7309 = vmatpush.bf16.msrb.mxu0 %v7261_v19  ;;  %v7285_v8 = vpop.permute.xlu1 %7284 }
 0xf70   : > { %v6617_v36 = vpop.f32.mrf.mxu0  ;;  %7354 = vmatpush.bf16.msrb.mxu1 %v7285_v8 }
 0xf71   : > { %v6666_v18 = vpop.f32.mrf.mxu1 }
 0xf72   : > { %v14785_v39 = vadd.f32 %v6666_v18, %v6617_v36  ;;  %7061 = vmax.xlane.f32.xlu1 %v7060_v55 }
 0xf74   : > { %16042 = vst [vmem:[#allocation88_spill] sm:$0xff] %v14785_v39  ;;  %7355 = vmatpush.bf16.msrb.mxu1 %v14725_v10  ;;  %v7081_v10 = vmax.f32 %v14781_v61, %v14783_v49 }
 0xf76   : > { %v7277_v60 = vpop.permute.xlu2 %7276 }
 0xf77   : > { %v7281_v52 = vpop.permute.xlu1 %7280 }
 0xf78   : > { %7356 = vmatpush.bf16.msrb.mxu1 %v7281_v52  ;;  %v14807_v58 = vpop.f32.mrf.mxu0 }
 0xf79   : > { %v14790_v47 = vpop.f32.mrf.mxu2  ;;  %v14792_v43 = vpop.f32.mrf.mxu3  ;;  %16044 = vst [vmem:[#allocation11_spill] sm:$0xff] %v14807_v58 }
 0xf7a   : > { %v7084_v5 = vmax.f32 %v14790_v47, %v14792_v43  ;;  %7073 = vmax.xlane.f32.xlu1 %v7072_v37  ;;  %v14809_v39 = vpop.f32.mrf.mxu1 }
 0xf7b   : > { %16045 = vst [vmem:[#allocation89_spill] sm:$0xff] %v14809_v39 }
 0xf7c   : > { %7085 = vmax.xlane.f32.xlu2 %v7084_v5  ;;  %7357 = vmatpush.bf16.msrb.mxu1 %v7279_v59 }
 0xf7e   : > { %v7259_v18 = vpop.permute.xlu2 %7258 }
 0xf7f   : > { %7310 = vmatpush.bf16.msrb.mxu0 %v7259_v18 }
 0xf80   : > { %7358 = vmatpush.bf16.msrb.mxu1 %v7277_v60 }
 0xf81   : > { %v14798_v55 = vpop.f32.mrf.mxu2  ;;  %v14800_v19 = vpop.f32.mrf.mxu3 }
 0xf82   : > { %v7087_v36 = vmax.f32 %v14798_v55, %v14800_v19  ;;  %7082 = vmax.xlane.f32.xlu1 %v7081_v10 }
 0xf84   : > { %7088 = vmax.xlane.f32.xlu0 %v7087_v36 }
 0xf86   : > { %v7257_v8 = vpop.permute.xlu2 %7256 }
 0xf87   : > { %v7053_v52 = vpop.xlane.xlu0 %7052  ;;  %7311 = vmatpush.bf16.msrb.mxu0 %v7257_v8 }
 0xf88   : > { %v7098_v59 = vsub.f32 %v14638_v41, %v7053_v52  ;;  %v7099_v37 = vsub.f32 %v14640_v1, %v7053_v52 }
 0xf8a   : > { %v7132_v5 = vmul.f32 1.442695, %v7098_v59  ;;  %v7134_v18 = vmul.f32 1.442695, %v7099_v37 }
 0xf8c   : > { %9570 = vpow2.f32 %v7132_v5  ;;  %5096 = vadd.xlane.f32.xlu0 %v16043_v62 }
 0xf8d   : > { %9572 = vpow2.f32 %v7134_v18 }
 0xf92   : > { %v9571_v60 = vpop.eup %9570 }
 0xf93   : > { %v9573_v10 = vpop.eup %9572 }
 0xf94   : > { %v14811_v36 = vadd.f32 %v9573_v10, %v9571_v60  ;;  %5800 = vadd.xlane.f32.xlu0 %v14272_v0 }
 0xf96   : > { %16046 = vst [vmem:[#allocation90_spill] sm:$0xff] %v14811_v36 }
 0xf99   : > { %v6622_v8 = vpop.f32.mrf.mxu0 }
 0xf9a   : > { %v6671_v41 = vpop.f32.mrf.mxu1 }
 0xf9b   : > { %v14814_v22 = vadd.f32 %v6671_v41, %v6622_v8 }
 0xf9d   : > { %16047 = vst [vmem:[#allocation91_spill] sm:$0xff] %v14814_v22 }
 0xfa1   : > { %v14816_v1 = vpop.f32.mrf.mxu0 }
 0xfa2   : > { %16048 = vst [vmem:[#allocation92_spill] sm:$0xff] %v14816_v1  ;;  %v14818_v52 = vpop.f32.mrf.mxu1  ;;  %v7050_v59 = vpop.xlane.xlu1 %7049 }
 0xfa3   : > { %16049 = vst [vmem:[#allocation93_spill] sm:$0xff] %v14818_v52  ;;  %v7096_v62 = vsub.f32 %v14614_v15, %v7050_v59  ;;  %v7097_v37 = vsub.f32 %v14616_v33, %v7050_v59 }
 0xfa5   : > { %v7128_v5 = vmul.f32 1.442695, %v7096_v62  ;;  %v7130_v18 = vmul.f32 1.442695, %v7097_v37 }
 0xfa7   : > { %9574 = vpow2.f32 %v7128_v5  ;;  %v16055_v5 = vld [vmem:[#allocation42_spill] sm:$0xff] }
 0xfa8   : > { %9576 = vpow2.f32 %v7130_v18  ;;  %v14822_v0 = vpop.f32.mrf.mxu2  ;;  %v14826_v8 = vpop.f32.mrf.mxu3  ;;  %v16056_v18 = vld [vmem:[#allocation71_spill] sm:$0xff] }
 0xfa9   : > { %v6627_v39 = vpop.f32.mrf.mxu0  ;;  %v7090_v41 = vmax.f32 %v14822_v0, %v14826_v8 }
 0xfaa   : > { %v6676_v36 = vpop.f32.mrf.mxu1 }
 0xfab   : > { %v14824_v58 = vadd.f32 %v6676_v36, %v6627_v39  ;;  %7091 = vmax.xlane.f32.xlu1 %v7090_v41  ;;  %v5098_v41 = vadd.f32 %v16056_v18, %v16055_v5 }
 0xfad   : > { %16050 = vst [vmem:[#allocation94_spill] sm:$0xff] %v14824_v58  ;;  %v9575_v52 = vpop.eup %9574 }
 0xfae   : > { %v9577_v15 = vpop.eup %9576  ;;  %v7240_v1 = vpack.c.bf16 %v9571_v60, %v9575_v52 }
 0xfaf   : > { %v14832_v59 = vadd.f32 %v9577_v15, %v9575_v52 }
 0xfb0   : > { %v14836_v37 = vpop.f32.mrf.mxu2  ;;  %7312 = vmatmul.bf16.vlgmr.msrb.gmra.mxu0 %v7240_v1  ;;  %v14838_v39 = vpop.f32.mrf.mxu3 }
 0xfb1   : > { %v14830_v33 = vpop.f32.mrf.mxu0  ;;  %16052 = vst [vmem:[#allocation96_spill] sm:$0xff] %v14832_v59  ;;  %v7093_v36 = vmax.f32 %v14836_v37, %v14838_v39  ;;  %v7273_v59 = vpop.permute.xlu0 %7272 }
 0xfb2   : > { %16051 = vst [vmem:[#allocation95_spill] sm:$0xff] %v14830_v33  ;;  %v14834_v62 = vpop.f32.mrf.mxu1 }
 0xfb3   : > { %16053 = vst [vmem:[#allocation97_spill] sm:$0xff] %v14834_v62  ;;  %5099 = vadd.xlane.f32.xlu1 %v5098_v41  ;;  %7094 = vmax.xlane.f32.xlu2 %v7093_v36  ;;  %v7241_v36 = vpack.c.bf16 %v9573_v10, %v9577_v15 }
 0xfb4   : > { %16054 = vst [vmem:[#allocation98_spill] sm:$0xff] %v14838_v39 }
 0xfb9   : > { %v6632_v60 = vpop.f32.mrf.mxu0 }
 0xfba   : > { %v6681_v58 = vpop.f32.mrf.mxu1  ;;  %v7275_v52 = vpop.permute.xlu1 %7274 }
 0xfbb   : > { %v14844_v33 = vadd.f32 %v6681_v58, %v6632_v60  ;;  %7359 = vmatpush.bf16.msrb.mxu1 %v7275_v52  ;;  %6498 = vadd.xlane.f32.xlu1 %v14582_v16 }
 0xfbc   : > { %5797 = vadd.xlane.f32.xlu2 %v14220_v35 }
 0xfbf   : > { %v7056_v1 = vpop.xlane.xlu2 %7055  ;;  %7360 = vmatpush.bf16.msrb.mxu1 %v7273_v59 }
 0xfc0   : > { %v7100_v62 = vsub.f32 %v14668_v6, %v7056_v1  ;;  %v7101_v22 = vsub.f32 %v14674_v27, %v7056_v1 }
 0xfc1   : > { %v14850_v39 = vpop.f32.mrf.mxu0 }
 0xfc2   : > { %v14852_v5 = vpop.f32.mrf.mxu1  ;;  %v7136_v58 = vmul.f32 1.442695, %v7100_v62  ;;  %v7138_v18 = vmul.f32 1.442695, %v7101_v22  ;;  %7361 = vmatmul.bf16.vlgmr.msrb.gmra.mxu1 %v7241_v36  ;;  %v16057_v62 = vld [vmem:[#allocation58_spill] sm:$0xff] }
 0xfc4   : > { %9578 = vpow2.f32 %v7136_v58  ;;  %6501 = vadd.xlane.f32.xlu2 %v14580_v45 }
 0xfc5   : > { %9580 = vpow2.f32 %v7138_v18  ;;  %v7059_v41 = vpop.xlane.xlu0 %7058 }
 0xfc6   : > { %v7102_v35 = vsub.f32 %v14683_v38, %v7059_v41  ;;  %v7103_v16 = vsub.f32 %v14685_v3, %v7059_v41 }
 0xfc7   : > { %v7065_v1 = vpop.xlane.xlu2 %7064 }
 0xfc8   : > { %v7140_v6 = vmul.f32 1.442695, %v7102_v35  ;;  %v7142_v27 = vmul.f32 1.442695, %v7103_v16  ;;  %v7106_v3 = vsub.f32 %v14711_v14, %v7065_v1  ;;  %v7107_v35 = vsub.f32 %v14713_v23, %v7065_v1 }
 0xfc9   : > { %v6637_v60 = vpop.f32.mrf.mxu0 }
 0xfca   : > { %v9579_v52 = vpop.eup %9578  ;;  %9582 = vpow2.f32 %v7140_v6  ;;  %v6686_v10 = vpop.f32.mrf.mxu1 }
 0xfcb   : > { %v9581_v15 = vpop.eup %9580  ;;  %9584 = vpow2.f32 %v7142_v27  ;;  %v14857_v59 = vadd.f32 %v6686_v10, %v6637_v60  ;;  %v7148_v60 = vmul.f32 1.442695, %v7106_v3 }
 0xfcc   : > { %v7198_v22 = vadd.f32 %v9581_v15, %v9579_v52  ;;  %5102 = vadd.xlane.f32.xlu2 %v16057_v62 }
 0xfcd   : > { %v14864_v27 = vpop.xlane.xlu0 %7070  ;;  %9586 = vpow2.f32 %v7148_v60 }
 0xfce   : > { %7199 = vadd.xlane.f32.xlu0 %v7198_v22 }
 0xfd0   : > { %v9583_v45 = vpop.eup %9582 }
 0xfd1   : > { %v9585_v36 = vpop.eup %9584  ;;  %v6639_v38 = vpop.f32.mrf.mxu0  ;;  %v7242_v58 = vpack.c.bf16 %v9583_v45, %v9579_v52  ;;  %v7150_v52 = vmul.f32 1.442695, %v7107_v35 }
 0xfd2   : > { %v6688_v18 = vpop.f32.mrf.mxu1  ;;  %v7243_v41 = vpack.c.bf16 %v9585_v36, %v9581_v15  ;;  %v7201_v6 = vadd.f32 %v9585_v36, %v9583_v45  ;;  %v7068_v15 = vpop.xlane.xlu2 %7067 }
 0xfd3   : > { %v14862_v16 = vadd.f32 %v6688_v18, %v6639_v38  ;;  %7317 = vmatmul.bf16.gmra.mxu0 %v7242_v58  ;;  %9588 = vpow2.f32 %v7150_v52  ;;  %v7109_v60 = vsub.f32 %v14718_v21, %v7068_v15 }
 0xfd4   : > { %7366 = vmatmul.bf16.gmra.mxu1 %v7243_v41  ;;  %7202 = vadd.xlane.f32.xlu1 %v7201_v6  ;;  %v7108_v6 = vsub.f32 %v14716_v11, %v7068_v15 }
 0xfd5   : > { %5806 = vadd.xlane.f32.xlu2 %v14283_v31  ;;  %v9587_v31 = vpop.eup %9586 }
 0xfd6   : > { %5105 = vadd.xlane.f32.xlu0 %v13705_v2 }
 0xfd9   : > { %v9589_v36 = vpop.eup %9588 }
 0xfda   : > { %v7207_v58 = vadd.f32 %v9589_v36, %v9587_v31 }
 0xfdb   : > { %v6642_v14 = vpop.f32.mrf.mxu0  ;;  %v6691_v10 = vpop.f32.mrf.mxu1 }
 0xfdc   : > { %5803 = vadd.xlane.f32.xlu1 %v14234_v63  ;;  %v7080_v23 = vpop.xlane.xlu0 %7079  ;;  %v14869_v22 = vadd.f32 %v6691_v10, %v6642_v14  ;;  %v5107_v10 = vadd.f32 %v13720_v44, %v13718_v51  ;;  %v7110_v44 = vsub.f32 %v14727_v9, %v14864_v27 }
 0xfdd   : > { %v7116_v62 = vsub.f32 %v14767_v40, %v7080_v23  ;;  %v7117_v1 = vsub.f32 %v14769_v13, %v7080_v23  ;;  %v14879_v13 = vpop.xlane.xlu2 %7076 }
 0xfde   : > { %6504 = vadd.xlane.f32.xlu0 %v14666_v30 }
 0xfdf   : > { %v7168_v45 = vmul.f32 1.442695, %v7116_v62  ;;  %v7170_v2 = vmul.f32 1.442695, %v7117_v1  ;;  %v7154_v62 = vmul.f32 1.442695, %v7109_v60 }
 0xfe1   : > { %9590 = vpow2.f32 %v7168_v45 }
 0xfe2   : > { %9592 = vpow2.f32 %v7170_v2 }
 0xfe3   : > { %v6644_v38 = vpop.f32.mrf.mxu0  ;;  %v6693_v3 = vpop.f32.mrf.mxu1 }
 0xfe4   : > { %6507 = vadd.xlane.f32.xlu1 %v14596_v25  ;;  %v14875_v63 = vadd.f32 %v6693_v3, %v6644_v38  ;;  %v7111_v38 = vsub.f32 %v14729_v56, %v14864_v27 }
 0xfe5   : > { %v7062_v18 = vpop.xlane.xlu1 %7061 }
 0xfe6   : > { %7208 = vadd.xlane.f32.xlu0 %v7207_v58  ;;  %v7104_v30 = vsub.f32 %v14706_v24, %v7062_v18  ;;  %v7105_v41 = vsub.f32 %v14708_v29, %v7062_v18  ;;  %v7152_v24 = vmul.f32 1.442695, %v7108_v6 }
 0xfe7   : > { %v14877_v40 = vpop.eup %9590 }
 0xfe8   : > { %v14883_v35 = vpop.eup %9592  ;;  %v7144_v52 = vmul.f32 1.442695, %v7104_v30  ;;  %v7146_v25 = vmul.f32 1.442695, %v7105_v41  ;;  %v7158_v41 = vmul.f32 1.442695, %v7111_v38 }
 0xfe9   : > { %v14889_v14 = vadd.f32 %v14883_v35, %v14877_v40 }
 0xfea   : > { %9594 = vpow2.f32 %v7144_v52 }
 0xfeb   : > { %v6647_v23 = vpop.f32.mrf.mxu0  ;;  %9596 = vpow2.f32 %v7146_v25  ;;  %v6696_v29 = vpop.f32.mrf.mxu1 }
 0xfec   : > { %5108 = vadd.xlane.f32.xlu1 %v5107_v10  ;;  %v14893_v1 = vadd.f32 %v6696_v29, %v6647_v23  ;;  %9598 = vpow2.f32 %v7152_v24 }
 0xfed   : > { %v14896_v11 = vpop.xlane.xlu1 %7073  ;;  %9600 = vpow2.f32 %v7154_v62 }
 0xfee   : > { %5809 = vadd.xlane.f32.xlu0 %v14333_v7  ;;  %v7112_v62 = vsub.f32 %v14737_v32, %v14896_v11 }
 0xfef   : > { %v7086_v21 = vpop.xlane.xlu2 %7085 }
 0xff0   : > { %v7120_v15 = vsub.f32 %v14790_v47, %v7086_v21  ;;  %v7121_v45 = vsub.f32 %v14792_v43, %v7086_v21  ;;  %v9595_v51 = vpop.eup %9594  ;;  %v7156_v47 = vmul.f32 1.442695, %v7110_v44  ;;  %v7160_v32 = vmul.f32 1.442695, %v7112_v62 }
 0xff1   : > { %v9597_v2 = vpop.eup %9596  ;;  %v7244_v7 = vpack.c.bf16 %v9587_v31, %v9595_v51 }
 0xff2   : > { %v7176_v58 = vmul.f32 1.442695, %v7120_v15  ;;  %v7178_v3 = vmul.f32 1.442695, %v7121_v45  ;;  %v7204_v18 = vadd.f32 %v9597_v2, %v9595_v51  ;;  %v7245_v30 = vpack.c.bf16 %v9589_v36, %v9597_v2  ;;  %v9599_v43 = vpop.eup %9598  ;;  %v16058_v15 = vld [vmem:[#allocation72_spill] sm:$0xff] }
 0xff3   : > { %7322 = vmatmul.bf16.gmra.mxu0 %v7244_v7  ;;  %v9601_v6 = vpop.eup %9600  ;;  %v5116_v45 = vadd.f32 %v16058_v15, %v13769_v48  ;;  %v16063_v15 = vld [vmem:[#allocation56_spill] sm:$0xff] }
 0xff4   : > { %5812 = vadd.xlane.f32.xlu1 %v14310_v42  ;;  %9602 = vpow2.f32 %v7176_v58  ;;  %7205 = vadd.xlane.f32.xlu2 %v7204_v18  ;;  %v7210_v23 = vadd.f32 %v9601_v6, %v9599_v43 }
 0xff5   : > { %7371 = vmatmul.bf16.gmra.mxu1 %v7245_v30  ;;  %9604 = vpow2.f32 %v7178_v3  ;;  %v7083_v9 = vpop.xlane.xlu1 %7082 }
 0xff6   : > { %6513 = vadd.xlane.f32.xlu0 %v14629_v57  ;;  %v7118_v56 = vsub.f32 %v14781_v61, %v7083_v9  ;;  %v7119_v27 = vsub.f32 %v14783_v49, %v7083_v9  ;;  %9606 = vpow2.f32 %v7156_v47 }
 0xff7   : > { %v7089_v31 = vpop.xlane.xlu0 %7088  ;;  %9608 = vpow2.f32 %v7158_v41 }
 0xff8   : > { %v7122_v36 = vsub.f32 %v14798_v55, %v7089_v31  ;;  %v7123_v42 = vsub.f32 %v14800_v19, %v7089_v31  ;;  %v7172_v60 = vmul.f32 1.442695, %v7118_v56  ;;  %v7174_v52 = vmul.f32 1.442695, %v7119_v27  ;;  %v16060_v31 = vld [vmem:[#allocation15_spill] sm:$0xff] }
 0xff9   : > { %v7114_v19 = vsub.f32 %v14755_v50, %v14879_v13  ;;  %v7115_v50 = vsub.f32 %v14757_v26, %v14879_v13 }
 0xffa   : > { %v7180_v25 = vmul.f32 1.442695, %v7122_v36  ;;  %v7182_v10 = vmul.f32 1.442695, %v7123_v42  ;;  %v14910_v24 = vpop.eup %9602  ;;  %9610 = vpow2.f32 %v7172_v60 }
 0xffb   : > { %v14912_v57 = vpop.eup %9604  ;;  %9612 = vpow2.f32 %v7174_v52  ;;  %v7164_v58 = vmul.f32 1.442695, %v7114_v19  ;;  %v7166_v3 = vmul.f32 1.442695, %v7115_v50 }
 0xffc   : > { %7211 = vadd.xlane.f32.xlu1 %v7210_v23  ;;  %9614 = vpow2.f32 %v7180_v25  ;;  %5111 = vadd.xlane.f32.xlu2 %v13712_v46  ;;  %v14917_v49 = vadd.f32 %v14912_v57, %v14910_v24  ;;  %v9607_v61 = vpop.eup %9606  ;;  %v7113_v46 = vsub.f32 %v14739_v54, %v14896_v11 }
 0xffd   : > { %9616 = vpow2.f32 %v7182_v10  ;;  %v9609_v55 = vpop.eup %9608  ;;  %v7246_v51 = vpack.c.bf16 %v9607_v61, %v9599_v43 }
 0xffe   : > { %5114 = vadd.xlane.f32.xlu0 %v13786_v17  ;;  %v7247_v17 = vpack.c.bf16 %v9609_v55, %v9601_v6  ;;  %v7162_v54 = vmul.f32 1.442695, %v7113_v46  ;;  %9618 = vpow2.f32 %v7164_v58  ;;  %v7213_v26 = vadd.f32 %v9609_v55, %v9607_v61 }
 0xfff   : > { %v5097_v11 = vpop.xlane.xlu0 %5096  ;;  %9620 = vpow2.f32 %v7160_v32 }
0x1000   : > { %v9611_v29 = vpop.eup %9610  ;;  %9622 = vpow2.f32 %v7162_v54 }
0x1001   : > { %v9613_v21 = vpop.eup %9612  ;;  %9624 = vrcp.f32 %v5097_v11 }
0x1002   : > { %v14928_v44 = vpop.eup %9614  ;;  %v14930_v2 = vadd.f32 %v9613_v21, %v9611_v29  ;;  %9626 = vpow2.f32 %v7166_v3 }
0x1003   : > { %v14932_v38 = vpop.eup %9616  ;;  %7327 = vmatmul.bf16.gmra.mxu0 %v7246_v51  ;;  %v7252_v32 = vpack.c.bf16 %v14928_v44, %v14910_v24 }
0x1004   : > { %5117 = vadd.xlane.f32.xlu1 %v5116_v45  ;;  %6510 = vadd.xlane.f32.xlu2 %v14611_v12  ;;  %v14939_v48 = vadd.f32 %v14932_v38, %v14928_v44  ;;  %v9619_v12 = vpop.eup %9618  ;;  %v7253_v11 = vpack.c.bf16 %v14932_v38, %v14912_v57  ;;  %v16065_v38 = vld [vmem:[#allocation11_spill] sm:$0xff] }
0x1005   : > { %7376 = vmatmul.bf16.gmra.mxu1 %v7247_v17  ;;  %v9621_v13 = vpop.eup %9620 }
0x1006   : > { %5818 = vadd.xlane.f32.xlu0 %v14378_v28  ;;  %v9623_v7 = vpop.eup %9622  ;;  %v7248_v43 = vpack.c.bf16 %v9619_v12, %v9621_v13  ;;  %v16059_v28 = vld [vmem:[#allocation54_spill] sm:$0xff] }
0x1007   : > { %v5801_v18 = vpop.xlane.xlu0 %5800  ;;  %v9625_v30 = vpop.eup %9624  ;;  %v7216_v23 = vadd.f32 %v9623_v7, %v9621_v13 }
0x1008   : > { %v9627_v47 = vpop.eup %9626  ;;  %9628 = vrcp.f32 %v5801_v18  ;;  %v5317_v9 = vmul.f32 %v9625_v30, %v16059_v28  ;;  %v16064_v18 = vld [vmem:[#allocation88_spill] sm:$0xff] }
0x1009   : > { %v7249_v41 = vpack.c.bf16 %v9627_v47, %v9623_v7  ;;  %v14969_v7 = vpop.f32.mrf.mxu1 }
0x100a   : > { %v5333_v6 = vpack.c.bf16 %v5317_v9, %v5317_v9  ;;  %v16067_v9 = vld [vmem:[#allocation25_spill] sm:$0xff] }
0x100c   : > { %6516 = vadd.xlane.f32.xlu1 %v14652_v4  ;;  %7214 = vadd.xlane.f32.xlu2 %v7213_v26  ;;  %v5968_v4 = vadd.f32 %v14430_v34, %v14428_v20  ;;  %v7251_v20 = vpack.c.bf16 %v9613_v21, %v14883_v35  ;;  %v16062_v21 = vld [vmem:[#allocation76_spill] sm:$0xff]  ;;  %v14965_v26 = vpop.f32.mrf.mxu0 }
0x100d   : > { %v5267_v45 = vadd.f32 %v16063_v15, %v16062_v21 }
0x100e   : > { %v9629_v56 = vpop.eup %9628 }
0x100f   : > { %v6019_v27 = vmul.f32 %v9629_v56, %v5968_v4 }
0x1011   : > { %v6035_v42 = vpack.c.bf16 %v6019_v27, %v6019_v27 }
0x1013   : > { %7332 = vmatmul.bf16.gmra.mxu0 %v7248_v43  ;;  %v16066_v43 = vld [vmem:[#allocation89_spill] sm:$0xff] }
0x1014   : > { %5815 = vadd.xlane.f32.xlu2 %v14361_v53  ;;  %v7250_v53 = vpack.c.bf16 %v9611_v29, %v14877_v40  ;;  %v7219_v29 = vadd.f32 %v9627_v47, %v9619_v12 }
0x1015   : > { %7381 = vmatmul.bf16.gmra.mxu1 %v7249_v41  ;;  %v6669_v41 = vadd.f32 %v16066_v43, %v16065_v38  ;;  %v16071_v43 = vld [vmem:[#allocation80_spill] sm:$0xff] }
0x101a   : > { %5367 = vrot.lane.b32.xlu0 %v5333_v6, %s9925_s17 }
0x101c   : > { %6519 = vadd.xlane.f32.xlu2 %v16060_v31 }
0x101e   : > { %v7092_v36 = vpop.xlane.xlu1 %7091 }
0x101f   : > { %v7124_v60 = vsub.f32 %v14822_v0, %v7092_v36  ;;  %v7125_v52 = vsub.f32 %v14826_v8, %v7092_v36  ;;  %v16061_v8 = vld [vmem:[#allocation98_spill] sm:$0xff] }
0x1021   : > { %v7184_v25 = vmul.f32 1.442695, %v7124_v60  ;;  %v7186_v10 = vmul.f32 1.442695, %v7125_v52 }
0x1022   : > { %6070 = vrot.lane.b32.xlu0 %v6035_v42, %s9924_s15 }
0x1023   : > { %7337 = vmatmul.bf16.gmra.mxu0 %v7250_v53  ;;  %9630 = vpow2.f32 %v7184_v25 }
0x1024   : > { %7217 = vadd.xlane.f32.xlu2 %v7216_v23  ;;  %9632 = vpow2.f32 %v7186_v10 }
0x1025   : > { %7386 = vmatmul.bf16.gmra.mxu1 %v7251_v20  ;;  %v16068_v20 = vld [vmem:[#allocation52_spill] sm:$0xff] }
0x1026   : > { %v5100_v34 = vpop.xlane.xlu1 %5099  ;;  %v7095_v61 = vpop.xlane.xlu2 %7094 }
0x1027   : > { %9634 = vrcp.f32 %v5100_v34  ;;  %v7126_v0 = vsub.f32 %v14836_v37, %v7095_v61  ;;  %v7127_v55 = vsub.f32 %v16061_v8, %v7095_v61 }
0x1029   : > { %v9631_v19 = vpop.eup %9630  ;;  %v7188_v62 = vmul.f32 1.442695, %v7126_v0  ;;  %v7190_v40 = vmul.f32 1.442695, %v7127_v55 }
0x102a   : > { %v9633_v46 = vpop.eup %9632 }
0x102b   : > { %9636 = vpow2.f32 %v7188_v62  ;;  %v14956_v35 = vadd.f32 %v9633_v46, %v9631_v19 }
0x102c   : > { %7220 = vadd.xlane.f32.xlu2 %v7219_v29  ;;  %9638 = vpow2.f32 %v7190_v40 }
0x102d   : > { %v9635_v51 = vpop.eup %9634  ;;  %v7313_v57 = vpop.f32.mrf.mxu0 }
0x102e   : > { %v5318_v17 = vmul.f32 %v9635_v51, %v5267_v45  ;;  %v6499_v50 = vpop.xlane.xlu1 %6498  ;;  %v16069_v51 = vld [vmem:[#allocation30_spill] sm:$0xff] }
0x102f   : > { %v5798_v58 = vpop.xlane.xlu2 %5797  ;;  %9640 = vrcp.f32 %v6499_v50 }
0x1030   : > { %v5334_v37 = vpack.c.bf16 %v5318_v17, %v5318_v17  ;;  %9642 = vrcp.f32 %v5798_v58 }
0x1031   : > { %v9637_v54 = vpop.eup %9636 }
0x1032   : > { %v9639_v3 = vpop.eup %9638  ;;  %5369 = vrot.lane.b32.xlu1 %v5334_v37, %s9925_s17  ;;  %v7254_v60 = vpack.c.bf16 %v9637_v54, %v9631_v19 }
0x1033   : > { %7342 = vmatmul.bf16.gmra.mxu0 %v7252_v32  ;;  %v14967_v12 = vadd.f32 %v9639_v3, %v9637_v54  ;;  %v7255_v53 = vpack.c.bf16 %v9639_v3, %v9633_v46  ;;  %v16070_v54 = vld [vmem:[#allocation91_spill] sm:$0xff] }
0x1035   : > { %7391 = vmatmul.bf16.gmra.mxu1 %v7253_v11  ;;  %v9641_v13 = vpop.eup %9640  ;;  %v7315_v10 = vpop.f32.mrf.mxu0 }
0x1036   : > { %v6719_v30 = vmul.f32 %v9641_v13, %v16064_v18  ;;  %v9643_v47 = vpop.eup %9642 }
0x1037   : > { %v6502_v24 = vpop.xlane.xlu2 %6501  ;;  %v6018_v6 = vmul.f32 %v9643_v47, %v16067_v9 }
0x1038   : > { %9644 = vrcp.f32 %v6502_v24  ;;  %v6735_v44 = vpack.c.bf16 %v6719_v30, %v6719_v30 }
0x1039   : > { %v6034_v52 = vpack.c.bf16 %v6018_v6, %v6018_v6 }
0x103a   : > { %6769 = vrot.lane.b32.xlu1 %v6735_v44, %s9923_s14 }
0x103e   : > { %v9645_v28 = vpop.eup %9644 }
0x103f   : > { %v6720_v56 = vmul.f32 %v9645_v28, %v6669_v41  ;;  %v5103_v4 = vpop.xlane.xlu2 %5102  ;;  %v7362_v27 = vpop.f32.mrf.mxu1 }
0x1040   : > { %9646 = vrcp.f32 %v5103_v4  ;;  %v14976_v31 = vadd.f32 %v7362_v27, %v7313_v57 }
0x1041   : > { %v7200_v36 = vpop.xlane.xlu0 %7199  ;;  %v6736_v42 = vpack.c.bf16 %v6720_v56, %v6720_v56  ;;  %v16072_v56 = vld [vmem:[#allocation17_spill] sm:$0xff] }
0x1042   : > { %9648 = vrcp.f32 %v7200_v36  ;;  %v16073_v36 = vld [vmem:[#allocation18_spill] sm:$0xff] }
0x1043   : > { %6771 = vrot.lane.b32.xlu0 %v6736_v42, %s9923_s14  ;;  %7347 = vmatmul.bf16.gmra.mxu0 %v7254_v60 }
0x1044   : > { %6068 = vrot.lane.b32.xlu2 %v6034_v52, %s9924_s15 }
0x1045   : > { %7396 = vmatmul.bf16.gmra.mxu1 %v7255_v53  ;;  %v16074_v53 = vld [vmem:[#allocation77_spill] sm:$0xff] }
0x1046   : > { %v9647_v25 = vpop.eup %9646 }
0x1047   : > { %v7203_v23 = vpop.xlane.xlu1 %7202  ;;  %v14981_v34 = vmul.f32 %v9647_v25, %v16068_v20  ;;  %v7364_v61 = vpop.f32.mrf.mxu1  ;;  %v16075_v20 = vld [vmem:[#allocation82_spill] sm:$0xff] }
0x1048   : > { %v14983_v0 = vadd.f32 %v7364_v61, %v7315_v10  ;;  %v9649_v46 = vpop.eup %9648  ;;  %v14999_v47 = vpop.xlane.xlu2 %5806 }
0x1049   : > { %v14985_v8 = vpop.xlane.xlu0 %5105 }
0x104f   : > { %v5804_v55 = vpop.xlane.xlu1 %5803 }
0x1050   : > { %v7318_v19 = vpop.f32.mrf.mxu0  ;;  %9650 = vrcp.f32 %v5804_v55  ;;  %v16076_v55 = vld [vmem:[#allocation96_spill] sm:$0xff] }
0x1051   : > { %v7367_v62 = vpop.f32.mrf.mxu1  ;;  %v6505_v29 = vpop.xlane.xlu0 %6504 }
0x1052   : > { %v7368_v40 = vadd.f32 %v7367_v62, %v7318_v19  ;;  %9652 = vrcp.f32 %v6505_v29 }
0x1053   : > { %9654 = vrcp.f32 %v7203_v23 }
0x1054   : > { %v7420_v21 = vmul.f32 %v9649_v46, %v7368_v40  ;;  %v16077_v40 = vld [vmem:[#allocation94_spill] sm:$0xff] }
0x1056   : > { %v7436_v15 = vpack.c.bf16 %v7420_v21, %v7420_v21  ;;  %v9651_v45 = vpop.eup %9650  ;;  %v16078_v21 = vld [vmem:[#allocation16_spill] sm:$0xff] }
0x1057   : > { %v14988_v17 = vmul.f32 %v9651_v45, %v16069_v51  ;;  %v14990_v50 = vpop.xlane.xlu1 %6507  ;;  %v16079_v51 = vld [vmem:[#allocation69_spill] sm:$0xff] }
0x1058   : > { %7470 = vrot.lane.b32.xlu1 %v7436_v15, %s9922_s13  ;;  %v7320_v58 = vpop.f32.mrf.mxu0  ;;  %v9653_v37 = vpop.eup %9652 }
0x1059   : > { %v7369_v32 = vpop.f32.mrf.mxu1  ;;  %v14994_v11 = vmul.f32 %v9653_v37, %v16070_v54  ;;  %v14996_v13 = vpop.xlane.xlu0 %7208  ;;  %v16081_v54 = vld [vmem:[#allocation47_spill] sm:$0xff] }
0x105a   : > { %v7370_v3 = vadd.f32 %v7369_v32, %v7320_v58  ;;  %v9655_v18 = vpop.eup %9654  ;;  %v16080_v32 = vld [vmem:[#allocation20_spill] sm:$0xff] }
0x105c   : > { %v7421_v30 = vmul.f32 %v9655_v18, %v7370_v3  ;;  %v16082_v18 = vld [vmem:[#allocation65_spill] sm:$0xff] }
0x105e   : > { %v7437_v24 = vpack.c.bf16 %v7421_v30, %v7421_v30 }
0x105f   : > { %v5109_v44 = vpop.xlane.xlu1 %5108 }
0x1060   : > { %7472 = vrot.lane.b32.xlu0 %v7437_v24, %s9922_s13  ;;  %9656 = vrcp.f32 %v5109_v44  ;;  %v16083_v24 = vld [vmem:[#allocation45_spill] sm:$0xff]  ;;  %v16084_v44 = vld [vmem:[#allocation90_spill] sm:$0xff] }
0x1061   : > { %v5810_v57 = vpop.xlane.xlu0 %5809 }
0x1062   : > { %9658 = vrcp.f32 %v5810_v57 }
0x1066   : > { %v9657_v38 = vpop.eup %9656 }
0x1067   : > { %v15002_v41 = vmul.f32 %v9657_v38, %v16071_v43  ;;  %v15004_v28 = vpop.xlane.xlu1 %5812  ;;  %v15006_v6 = vpop.xlane.xlu2 %7205 }
0x1068   : > { %v9659_v9 = vpop.eup %9658 }
0x1069   : > { %v15009_v4 = vmul.f32 %v9659_v9, %v16072_v56  ;;  %v15011_v27 = vpop.xlane.xlu0 %6513  ;;  %v16085_v9 = vld [vmem:[#allocation57_spill] sm:$0xff]  ;;  %v16086_v56 = vld [vmem:[#allocation84_spill] sm:$0xff] }
0x106d   : > { %5090 = vadd.xlane.f32.xlu2 %v16073_v36  ;;  %v8525_v36 = vld [vmem:[%s15492_s5 + $0x38] sm:$0xff] }
0x106e   : > { %8843 = vmatpush.bf16.msra.mxu2 %v8525_v36  ;;  %7659 = vmatpush.bf16.msra.mxu0 %v8525_v36 }
0x106f   : > { %v15014_v42 = vpop.xlane.xlu1 %7211  ;;  %v15016_v60 = vpop.xlane.xlu2 %5111 }
0x1071   : > { %v5115_v52 = vpop.xlane.xlu0 %5114 }
0x1072   : > { %9660 = vrcp.f32 %v5115_v52 }
0x1075   : > { %5794 = vadd.xlane.f32.xlu2 %v16074_v53  ;;  %v16087_v53 = vld [vmem:[#allocation78_spill] sm:$0xff] }
0x1077   : > { %v15019_v25 = vpop.xlane.xlu1 %5117  ;;  %v6511_v23 = vpop.xlane.xlu2 %6510 }
0x1078   : > { %v9661_v10 = vpop.eup %9660  ;;  %9662 = vrcp.f32 %v6511_v23 }
0x1079   : > { %v15022_v61 = vmul.f32 %v9661_v10, %v16075_v20  ;;  %v15031_v15 = vpop.xlane.xlu0 %5818  ;;  %v15062_v10 = vpop.f32.mrf.mxu1 }
0x107d   : > { %7193 = vadd.xlane.f32.xlu2 %v16076_v55  ;;  %v16089_v55 = vld [vmem:[#allocation24_spill] sm:$0xff] }
0x107e   : > { %v9663_v19 = vpop.eup %9662 }
0x107f   : > { %v6517_v62 = vpop.xlane.xlu1 %6516  ;;  %v15026_v29 = vmul.f32 %v9663_v19, %v16077_v40  ;;  %v15028_v46 = vpop.xlane.xlu2 %7214  ;;  %v16090_v19 = vld [vmem:[#allocation48_spill] sm:$0xff] }
0x1080   : > { %9664 = vrcp.f32 %v6517_v62  ;;  %v8524_v62 = vld [vmem:[%s15492_s5 + $0x30] sm:$0xff] }
0x1081   : > { %8844 = vmatpush.bf16.msra.mxu2 %v8524_v62  ;;  %7660 = vmatpush.bf16.msra.mxu0 %v8524_v62  ;;  %v16094_v62 = vld [vmem:[#allocation46_spill] sm:$0xff] }
0x1082   : > { %5093 = vadd.xlane.f32.xlu1 %v16078_v21 }
0x1085   : > { %5123 = vadd.xlane.f32.xlu2 %v16079_v51  ;;  %v16092_v51 = vld [vmem:[#allocation93_spill] sm:$0xff] }
0x1086   : > { %v9665_v45 = vpop.eup %9664 }
0x1087   : > { %v15035_v58 = vmul.f32 %v9665_v45, %v14844_v33  ;;  %v15037_v37 = vpop.xlane.xlu2 %5815  ;;  %v6684_v33 = vadd.f32 %v14852_v5, %v14850_v39  ;;  %v16088_v39 = vld [vmem:[#allocation59_spill] sm:$0xff]  ;;  %v16091_v45 = vld [vmem:[#allocation92_spill] sm:$0xff] }
0x1088   : > { %v5272_v5 = vadd.f32 %v16088_v39, %v16087_v53  ;;  %v5335_v53 = vpack.c.bf16 %v14981_v34, %v14981_v34  ;;  %v8519_v39 = vld [vmem:[%s15492_s5 + $0x8] sm:$0xff]  ;;  %v6036_v34 = vpack.c.bf16 %v14988_v17, %v14988_v17 }
0x108a   : > { %5791 = vadd.xlane.f32.xlu0 %v16080_v32  ;;  %6492 = vadd.xlane.f32.xlu1 %v16081_v54  ;;  %v6674_v32 = vadd.f32 %v16092_v51, %v16091_v45 }
0x108c   : > { %v5368_v3 = vpop.permute.xlu0 %5367 }
0x108d   : > { %5414 = vst.msk [vmem:[#allocation6 + $0x8] sm:$0xf] %vm5411_vm6, %v5368_v3  ;;  %6522 = vadd.xlane.f32.xlu2 %v16082_v18 }
0x108f   : > { %v6520_v30 = vpop.xlane.xlu2 %6519 }
0x1090   : > { %9666 = vrcp.f32 %v6520_v30 }
0x1091   : > { %9668 = vrcp.f32 %v14985_v8  ;;  %v15060_v8 = vpop.f32.mrf.mxu0 }
0x1092   : > { %6495 = vadd.xlane.f32.xlu0 %v16083_v24  ;;  %7196 = vadd.xlane.f32.xlu1 %v16084_v44  ;;  %9670 = vrcp.f32 %v14990_v50  ;;  %v8523_v50 = vld [vmem:[%s15492_s5 + $0x28] sm:$0xff]  ;;  %v7374_v44 = vpop.f32.mrf.mxu1 }
0x1093   : > { %8845 = vmatpush.bf16.msra.mxu2 %v8523_v50  ;;  %7661 = vmatpush.bf16.msra.mxu0 %v8523_v50  ;;  %9672 = vrcp.f32 %v14996_v13 }
0x1094   : > { %v6071_v3 = vpop.permute.xlu0 %6070  ;;  %9674 = vrcp.f32 %v14999_v47 }
0x1095   : > { %9676 = vrcp.f32 %v15006_v6 }
0x1096   : > { %v9667_v57 = vpop.eup %9666 }
0x1097   : > { %v15048_v38 = vmul.f32 %v9667_v57, %v6684_v33  ;;  %v15050_v43 = vpop.xlane.xlu2 %7217  ;;  %v9669_v52 = vpop.eup %9668  ;;  %v8522_v33 = vld [vmem:[%s15492_s5 + $0x20] sm:$0xff]  ;;  %v8521_v57 = vld [vmem:[%s15492_s5 + $0x18] sm:$0xff] }
0x1098   : > { %v5320_v23 = vmul.f32 %v9669_v52, %v5272_v5  ;;  %v9671_v21 = vpop.eup %9670  ;;  %8846 = vmatpush.bf16.msra.mxu2 %v8522_v33  ;;  %7662 = vmatpush.bf16.msra.mxu0 %v8522_v33 }
0x1099   : > { %v6722_v18 = vmul.f32 %v9671_v21, %v6674_v32  ;;  %v7325_v24 = vpop.f32.mrf.mxu0  ;;  %v9673_v36 = vpop.eup %9672  ;;  %v6737_v21 = vpack.c.bf16 %v14994_v11, %v14994_v11  ;;  %v16095_v11 = vld [vmem:[#allocation74_spill] sm:$0xff] }
0x109a   : > { %5120 = vadd.xlane.f32.xlu0 %v16085_v9  ;;  %5821 = vadd.xlane.f32.xlu1 %v16086_v56  ;;  %v5336_v40 = vpack.c.bf16 %v5320_v23, %v5320_v23  ;;  %v7375_v9 = vadd.f32 %v7374_v44, %v7325_v24 }
0x109b   : > { %v6738_v56 = vpack.c.bf16 %v6722_v18, %v6722_v18 }
0x109c   : > { %8847 = vmatpush.bf16.msra.mxu2 %v8521_v57  ;;  %7663 = vmatpush.bf16.msra.mxu0 %v8521_v57  ;;  %v7423_v52 = vmul.f32 %v9673_v36, %v7375_v9  ;;  %v16098_v57 = vld [vmem:[#allocation34_spill] sm:$0xff] }
0x109e   : > { %v7439_v5 = vpack.c.bf16 %v7423_v52, %v7423_v52 }
0x109f   : > { %v15064_v20 = vpop.xlane.xlu2 %7220 }
0x10a2   : > { %5824 = vadd.xlane.f32.xlu0 %v16089_v55  ;;  %6525 = vadd.xlane.f32.xlu1 %v16090_v19  ;;  %v9675_v55 = vpop.eup %9674  ;;  %v16093_v19 = vld [vmem:[#allocation19_spill] sm:$0xff] }
0x10a3   : > { %v5973_v50 = vadd.f32 %v16094_v62, %v16093_v19  ;;  %v9677_v17 = vpop.eup %9676  ;;  %v7377_v19 = vpop.f32.mrf.mxu1 }
0x10a4   : > { %v5370_v54 = vpop.permute.xlu1 %5369 }
0x10a5   : > { %5373 = vrot.lane.b32.xlu2 %v5336_v40, %s9925_s17  ;;  %5415 = vst.msk [vmem:[#allocation6 + $0xc] sm:$0xf] %vm5411_vm6, %v5370_v54  ;;  %v7373_v40 = vadd.f32 %v15062_v10, %v15060_v8  ;;  %v6021_v47 = vmul.f32 %v9675_v55, %v5973_v50 }
0x10a6   : > { %6116 = vst.msk [vmem:[#allocation6 + $0xc] sm:$0xf] %vm6112_vm7, %v6071_v3  ;;  %v16096_v3 = vld [vmem:[#allocation27_spill] sm:$0xff] }
0x10a7   : > { %v6069_v30 = vpop.permute.xlu2 %6068  ;;  %v7422_v45 = vmul.f32 %v9677_v17, %v7373_v40  ;;  %v6037_v51 = vpack.c.bf16 %v6021_v47, %v6021_v47  ;;  %v16103_v40 = vld [vmem:[#allocation51_spill] sm:$0xff] }
0x10a8   : > { %6115 = vst.msk [vmem:[#allocation6 + $0x8] sm:$0xf] %vm6112_vm7, %v6069_v30  ;;  %v16097_v30 = vld [vmem:[#allocation53_spill] sm:$0xff] }
0x10a9   : > { %v7438_v6 = vpack.c.bf16 %v7422_v45, %v7422_v45  ;;  %v16104_v45 = vld [vmem:[#allocation44_spill] sm:$0xff] }
0x10aa   : > { %7223 = vadd.xlane.f32.xlu1 %v14889_v14  ;;  %v8520_v14 = vld [vmem:[%s15492_s5 + $0x10] sm:$0xff] }
0x10ab   : > { %8848 = vmatpush.bf16.msra.mxu2 %v8520_v14  ;;  %7664 = vmatpush.bf16.msra.mxu0 %v8520_v14 }
0x10ac   : > { %v6770_v13 = vpop.permute.xlu1 %6769 }
0x10ad   : > { %6775 = vrot.lane.b32.xlu2 %v6738_v56, %s9923_s14  ;;  %6816 = vst.msk [vmem:[#allocation6 + $0x8] sm:$0xf] %vm6813_vm8, %v6770_v13  ;;  %v16099_v56 = vld [vmem:[#allocation73_spill] sm:$0xff]  ;;  %v16100_v13 = vld [vmem:[#allocation75_spill] sm:$0xff] }
0x10ae   : > { %v5125_v36 = vadd.f32 %v16100_v13, %v16099_v56 }
0x10af   : > { %8849 = vmatpush.bf16.msra.mxu2 %v8519_v39  ;;  %7665 = vmatpush.bf16.msra.mxu0 %v8519_v39  ;;  %v16101_v39 = vld [vmem:[#allocation14_spill] sm:$0xff] }
0x10b2   : > { %7226 = vadd.xlane.f32.xlu1 %v14930_v2  ;;  %v8518_v2 = vld [vmem:[%s15492_s5] sm:$0xff] }
0x10b3   : > { %8850 = vmatpush.bf16.msra.mxu2 %v8518_v2  ;;  %7666 = vmatpush.bf16.msra.mxu0 %v8518_v2  ;;  %v5337_v2 = vpack.c.bf16 %v15002_v41, %v15002_v41 }
0x10b5   : > { %7476 = vrot.lane.b32.xlu2 %v7439_v5, %s9922_s13  ;;  %v6772_v23 = vpop.permute.xlu0 %6771 }
0x10b6   : > { %5371 = vrot.lane.b32.xlu0 %v5335_v53, %s9925_s17  ;;  %6817 = vst.msk [vmem:[#allocation6 + $0xc] sm:$0xf] %vm6813_vm8, %v6772_v23 }
0x10be   : > { %6072 = vrot.lane.b32.xlu0 %v6036_v34, %s9924_s15  ;;  %v16102_v34 = vld [vmem:[#allocation61_spill] sm:$0xff] }
0x10c6   : > { %6773 = vrot.lane.b32.xlu0 %v6737_v21, %s9923_s14 }
0x10ca   : > { %v7471_v32 = vpop.permute.xlu1 %7470 }
0x10cb   : > { %7517 = vst.msk [vmem:[#allocation6 + $0x8] sm:$0xf] %vm7514_vm9, %v7471_v32  ;;  %6074 = vrot.lane.b32.xlu1 %v6037_v51, %s9924_s15 }
0x10ce   : > { %7474 = vrot.lane.b32.xlu0 %v7438_v6, %s9922_s13 }
0x10d2   : > { %v7473_v54 = vpop.permute.xlu0 %7472 }
0x10d3   : > { %7518 = vst.msk [vmem:[#allocation6 + $0xc] sm:$0xf] %vm7514_vm9, %v7473_v54 }
0x10da   : > { %v8511_v8 = vld [vmem:[#allocation6 + $0x8] sm:$0xff] }
0x10db   : > { %7672 = vmatmul.bf16.vlgmr.msra.gmra.mxu2 %v8511_v8 }
0x10de   : > { %5129 = vadd.xlane.f32.xlu2 %v16095_v11 }
0x10e0   : > { %v5091_v10 = vpop.xlane.xlu2 %5090 }
0x10e1   : > { %9678 = vrcp.f32 %v5091_v10  ;;  %v16105_v10 = vld [vmem:[#allocation63_spill] sm:$0xff] }
0x10e6   : > { %5830 = vadd.xlane.f32.xlu2 %v16096_v3  ;;  %v16106_v3 = vld [vmem:[#allocation68_spill] sm:$0xff] }
0x10e7   : > { %v9679_v18 = vpop.eup %9678 }
0x10e8   : > { %v15124_v24 = vmul.f32 %v9679_v18, %v16097_v30  ;;  %v15126_v44 = vpop.xlane.xlu2 %5794  ;;  %v5277_v18 = vadd.f32 %v16106_v3, %v16105_v10 }
0x10f0   : > { %v7194_v33 = vpop.xlane.xlu2 %7193 }
0x10f1   : > { %9680 = vrcp.f32 %v7194_v33 }
0x10f5   : > { %5827 = vadd.xlane.f32.xlu1 %v16098_v57  ;;  %v15129_v9 = vpop.xlane.xlu1 %5093 }
0x10f7   : > { %v9681_v14 = vpop.eup %9680 }
0x10f8   : > { %5126 = vadd.xlane.f32.xlu0 %v5125_v36  ;;  %v15134_v52 = vmul.f32 %v9681_v14, %v14976_v31  ;;  %v15136_v53 = vpop.xlane.xlu2 %5123  ;;  %v7328_v31 = vpop.f32.mrf.mxu0  ;;  %v16107_v14 = vld [vmem:[#allocation33_spill] sm:$0xff] }
0x10f9   : > { %v7378_v17 = vadd.f32 %v7377_v19, %v7328_v31 }
0x10fd   : > { %6531 = vadd.xlane.f32.xlu1 %v16101_v39  ;;  %v6493_v5 = vpop.xlane.xlu1 %6492  ;;  %v5792_v23 = vpop.xlane.xlu0 %5791  ;;  %v16108_v39 = vld [vmem:[#allocation37_spill] sm:$0xff] }
0x10fe   : > { %9682 = vrcp.f32 %v6493_v5  ;;  %5375 = vrot.lane.b32.xlu2 %v5337_v2, %s9925_s17  ;;  %v5978_v5 = vadd.f32 %v16108_v39, %v16107_v14  ;;  %v16115_v14 = vld [vmem:[#allocation8_spill] sm:$0xff] }
0x10ff   : > { %9684 = vrcp.f32 %v5792_v23 }
0x1100   : > { %6528 = vadd.xlane.f32.xlu0 %v16102_v34  ;;  %9686 = vrcp.f32 %v15014_v42  ;;  %v6523_v55 = vpop.xlane.xlu2 %6522  ;;  %v6739_v42 = vpack.c.bf16 %v15026_v29, %v15026_v29  ;;  %v16110_v34 = vld [vmem:[#allocation70_spill] sm:$0xff] }
0x1101   : > { %9688 = vrcp.f32 %v6523_v55 }
0x1102   : > { %9690 = vrcp.f32 %v15016_v60 }
0x1104   : > { %v9683_v62 = vpop.eup %9682 }
0x1105   : > { %v9685_v50 = vpop.eup %9684  ;;  %v15146_v21 = vmul.f32 %v9683_v62, %v16103_v40  ;;  %7229 = vadd.xlane.f32.xlu1 %v14917_v49  ;;  %v7197_v41 = vpop.xlane.xlu1 %7196  ;;  %v16112_v40 = vld [vmem:[#allocation97_spill] sm:$0xff] }
0x1106   : > { %v15149_v47 = vpop.xlane.xlu0 %6495  ;;  %v15152_v51 = vmul.f32 %v9685_v50, %v16104_v45  ;;  %9692 = vrcp.f32 %v7197_v41  ;;  %v9687_v32 = vpop.eup %9686  ;;  %6777 = vrot.lane.b32.xlu2 %v6739_v42, %s9923_s14  ;;  %v16111_v50 = vld [vmem:[#allocation95_spill] sm:$0xff] }
0x1107   : > { %v9689_v60 = vpop.eup %9688  ;;  %v7424_v6 = vmul.f32 %v9687_v32, %v7378_v17  ;;  %9694 = vrcp.f32 %v15004_v28  ;;  %v6679_v41 = vadd.f32 %v16112_v40, %v16111_v50  ;;  %v7330_v45 = vpop.f32.mrf.mxu0  ;;  %v16120_v40 = vld [vmem:[#allocation87_spill] sm:$0xff] }
0x1108   : > { %v15158_v54 = vmul.f32 %v9689_v60, %v14857_v59  ;;  %v5374_v49 = vpop.permute.xlu2 %5373  ;;  %v9691_v8 = vpop.eup %9690 }
0x1109   : > { %5417 = vst.msk [vmem:[#allocation6 + $0x14] sm:$0xf] %vm5411_vm6, %v5374_v49  ;;  %v5322_v57 = vmul.f32 %v9691_v8, %v5277_v18  ;;  %v7440_v59 = vpack.c.bf16 %v7424_v6, %v7424_v6  ;;  %v7379_v42 = vpop.f32.mrf.mxu1  ;;  %v6038_v49 = vpack.c.bf16 %v15009_v4, %v15009_v4  ;;  %v16113_v4 = vld [vmem:[#allocation49_spill] sm:$0xff] }
0x110a   : > { %v7380_v60 = vadd.f32 %v7379_v42, %v7330_v45  ;;  %v6742_v42 = vpack.c.bf16 %v15048_v38, %v15048_v38 }
0x110b   : > { %v5338_v56 = vpack.c.bf16 %v5322_v57, %v5322_v57 }
0x110c   : > { %v9693_v11 = vpop.eup %9692 }
0x110d   : > { %v15165_v29 = vmul.f32 %v9693_v11, %v14983_v0  ;;  %7232 = vadd.xlane.f32.xlu1 %v14939_v48  ;;  %v5822_v30 = vpop.xlane.xlu1 %5821  ;;  %v9695_v13 = vpop.eup %9694  ;;  %v16109_v48 = vld [vmem:[#allocation22_spill] sm:$0xff] }
0x110e   : > { %v5121_v33 = vpop.xlane.xlu0 %5120  ;;  %9696 = vrcp.f32 %v5822_v30  ;;  %7478 = vrot.lane.b32.xlu2 %v7440_v59, %s9922_s13  ;;  %v6023_v2 = vmul.f32 %v9695_v13, %v5978_v5  ;;  %v16114_v13 = vld [vmem:[#allocation13_spill] sm:$0xff] }
0x110f   : > { %9698 = vrcp.f32 %v5121_v33  ;;  %v16116_v5 = vld [vmem:[#allocation41_spill] sm:$0xff]  ;;  %v7333_v50 = vpop.f32.mrf.mxu0 }
0x1110   : > { %9700 = vrcp.f32 %v15011_v27  ;;  %v6039_v31 = vpack.c.bf16 %v6023_v2, %v6023_v2  ;;  %v6776_v18 = vpop.permute.xlu2 %6775  ;;  %v16118_v2 = vld [vmem:[#allocation50_spill] sm:$0xff] }
0x1114   : > { %v9697_v36 = vpop.eup %9696  ;;  %5377 = vrot.lane.b32.xlu0 %v5338_v56, %s9925_s17 }
0x1115   : > { %v9699_v0 = vpop.eup %9698  ;;  %v15174_v28 = vmul.f32 %v9697_v36, %v16109_v48  ;;  %v6526_v23 = vpop.xlane.xlu1 %6525 }
0x1116   : > { %v15177_v55 = vmul.f32 %v9699_v0, %v16110_v34  ;;  %9702 = vrcp.f32 %v6526_v23  ;;  %v9701_v19 = vpop.eup %9700  ;;  %v15186_v32 = vpop.xlane.xlu0 %5824  ;;  %v5339_v0 = vpack.c.bf16 %v15022_v61, %v15022_v61  ;;  %v16117_v23 = vld [vmem:[#allocation62_spill] sm:$0xff]  ;;  %v16119_v34 = vld [vmem:[#allocation40_spill] sm:$0xff] }
0x1117   : > { %v6724_v27 = vmul.f32 %v9701_v19, %v6679_v41  ;;  %9704 = vrcp.f32 %v15028_v46 }
0x1118   : > { %v7477_v59 = vpop.permute.xlu2 %7476  ;;  %9706 = vrcp.f32 %v15031_v15  ;;  %v7382_v15 = vpop.f32.mrf.mxu1 }
0x1119   : > { %v6740_v6 = vpack.c.bf16 %v6724_v27, %v6724_v27  ;;  %9708 = vrcp.f32 %v15064_v20  ;;  %v7335_v27 = vpop.f32.mrf.mxu0 }
0x111a   : > { %9710 = vrcp.f32 %v15019_v25 }
0x111b   : > { %9712 = vrcp.f32 %v15037_v37  ;;  %v6741_v37 = vpack.c.bf16 %v15035_v58, %v15035_v58 }
0x111c   : > { %v9703_v62 = vpop.eup %9702  ;;  %6078 = vrot.lane.b32.xlu0 %v6039_v31, %s9924_s15  ;;  %v5983_v31 = vadd.f32 %v16119_v34, %v16118_v2  ;;  %9714 = vrcp.f32 %v15149_v47  ;;  %v16126_v2 = vld [vmem:[#allocation32_spill] sm:$0xff]  ;;  %v16127_v34 = vld [vmem:[#allocation66_spill] sm:$0xff] }
0x111d   : > { %v15183_v17 = vmul.f32 %v9703_v62, %v14862_v16  ;;  %v9705_v8 = vpop.eup %9704  ;;  %v15193_v46 = vpop.xlane.xlu1 %7223  ;;  %9716 = vrcp.f32 %v15050_v43 }
0x111e   : > { %v7425_v11 = vmul.f32 %v9705_v8, %v7380_v60  ;;  %v9707_v48 = vpop.eup %9706  ;;  %v16122_v8 = vld [vmem:[#allocation83_spill] sm:$0xff]  ;;  %9718 = vrcp.f32 %v15129_v9 }
0x111f   : > { %v6025_v19 = vmul.f32 %v9707_v48, %v5983_v31  ;;  %v9709_v60 = vpop.eup %9708  ;;  %v5262_v31 = vadd.f32 %v16127_v34, %v16126_v2  ;;  %9720 = vrcp.f32 %v15186_v32  ;;  %v5331_v32 = vpack.c.bf16 %v15124_v24, %v15124_v24 }
0x1120   : > { %v7441_v10 = vpack.c.bf16 %v7425_v11, %v7425_v11  ;;  %v7384_v45 = vpop.f32.mrf.mxu1  ;;  %9722 = vrcp.f32 %v15126_v44 }
0x1121   : > { %v6041_v41 = vpack.c.bf16 %v6025_v19, %v6025_v19  ;;  %9724 = vrcp.f32 %v15193_v46 }
0x1124   : > { %6779 = vrot.lane.b32.xlu0 %v6740_v6, %s9923_s14  ;;  %v9711_v6 = vpop.eup %9710 }
0x1125   : > { %v15197_v30 = vpop.xlane.xlu1 %7226 }
0x1126   : > { %6076 = vrot.lane.b32.xlu1 %v6038_v49, %s9924_s15  ;;  %v7385_v49 = vadd.f32 %v7384_v45, %v7335_v27 }
0x1128   : > { %v5372_v16 = vpop.permute.xlu0 %5371  ;;  %v7427_v11 = vmul.f32 %v9709_v60, %v7385_v49  ;;  %v7387_v27 = vpop.f32.mrf.mxu1  ;;  %v16129_v60 = vld [vmem:[#allocation31_spill] sm:$0xff]  ;;  %v16131_v49 = vld [vmem:[#allocation36_spill] sm:$0xff] }
0x1129   : > { %5416 = vst.msk [vmem:[#allocation6 + $0x10] sm:$0xf] %vm5411_vm6, %v5372_v16 }
0x112a   : > { %v7443_v16 = vpack.c.bf16 %v7427_v11, %v7427_v11  ;;  %v6733_v11 = vpack.c.bf16 %v15146_v21, %v15146_v21 }
0x112c   : > { %7480 = vrot.lane.b32.xlu0 %v7441_v10, %s9922_s13 }
0x1130   : > { %v6073_v3 = vpop.permute.xlu0 %6072 }
0x1131   : > { %6117 = vst.msk [vmem:[#allocation6 + $0x10] sm:$0xf] %vm6112_vm7, %v6073_v3  ;;  %v9713_v3 = vpop.eup %9712 }
0x1137   : > { %5132 = vadd.xlane.f32.xlu2 %v16113_v4 }
0x1138   : > { %v6774_v33 = vpop.permute.xlu0 %6773 }
0x1139   : > { %6818 = vst.msk [vmem:[#allocation6 + $0x10] sm:$0xf] %vm6813_vm8, %v6774_v33  ;;  %v9715_v33 = vpop.eup %9714 }
0x113a   : > { %v9717_v4 = vpop.eup %9716 }
0x113b   : > { %v9719_v48 = vpop.eup %9718 }
0x113c   : > { %v5316_v9 = vmul.f32 %v9719_v48, %v5262_v31  ;;  %v6042_v31 = vpack.c.bf16 %v15174_v28, %v15174_v28 }
0x113d   : > { %v6075_v57 = vpop.permute.xlu1 %6074 }
0x113e   : > { %6118 = vst.msk [vmem:[#allocation6 + $0x14] sm:$0xf] %vm6112_vm7, %v6075_v57  ;;  %v16123_v57 = vld [vmem:[#allocation85_spill] sm:$0xff] }
0x113f   : > { %6819 = vst.msk [vmem:[#allocation6 + $0x14] sm:$0xf] %vm6813_vm8, %v6776_v18  ;;  %5836 = vadd.xlane.f32.xlu2 %v16114_v13  ;;  %v6032_v18 = vpack.c.bf16 %v15152_v51, %v15152_v51  ;;  %v16125_v13 = vld [vmem:[#allocation39_spill] sm:$0xff] }
0x1140   : > { %7520 = vst.msk [vmem:[#allocation6 + $0x14] sm:$0xf] %vm7514_vm9, %v7477_v59  ;;  %v7475_v56 = vpop.permute.xlu0 %7474  ;;  %v16124_v59 = vld [vmem:[#allocation86_spill] sm:$0xff] }
0x1141   : > { %7519 = vst.msk [vmem:[#allocation6 + $0x10] sm:$0xf] %vm7514_vm9, %v7475_v56  ;;  %v6664_v47 = vadd.f32 %v16124_v59, %v16123_v57  ;;  %v7383_v56 = vadd.f32 %v7382_v15, %v7333_v50  ;;  %v5341_v15 = vpack.c.bf16 %v15177_v55, %v15177_v55  ;;  %v7435_v57 = vpack.c.bf16 %v15165_v29, %v15165_v29 }
0x1143   : > { %v6718_v43 = vmul.f32 %v9715_v33, %v6664_v47  ;;  %v7389_v33 = vpop.f32.mrf.mxu1 }
0x1148   : > { %v8512_v36 = vld [vmem:[#allocation6 + $0x10] sm:$0xff] }
0x1149   : > { %7677 = vmatmul.bf16.gmra.mxu2 %v8512_v36  ;;  %v6024_v36 = vmul.f32 %v9713_v3, %v16125_v13  ;;  %v16132_v13 = vld [vmem:[#allocation10_spill] sm:$0xff] }
0x114b   : > { %v6040_v58 = vpack.c.bf16 %v6024_v36, %v6024_v36  ;;  %v7392_v48 = vpop.f32.mrf.mxu1 }
0x1150   : > { %5833 = vadd.xlane.f32.xlu1 %v16115_v14  ;;  %v7426_v14 = vmul.f32 %v9717_v4, %v7383_v56  ;;  %v7434_v56 = vpack.c.bf16 %v15134_v52, %v15134_v52 }
0x1151   : > { %v15208_v39 = vpop.xlane.xlu2 %5129 }
0x1152   : > { %9726 = vrcp.f32 %v15208_v39  ;;  %v16133_v39 = vld [vmem:[#allocation29_spill] sm:$0xff] }
0x1153   : > { %9728 = vrcp.f32 %v15136_v53  ;;  %v5292_v36 = vadd.f32 %v16133_v39, %v16132_v13  ;;  %v16134_v53 = vld [vmem:[#allocation26_spill] sm:$0xff] }
0x1156   : > { %5135 = vadd.xlane.f32.xlu0 %v16116_v5 }
0x1157   : > { %5379 = vrot.lane.b32.xlu2 %v5339_v0, %s9925_s17  ;;  %v6734_v0 = vpack.c.bf16 %v6718_v43, %v6718_v43 }
0x1158   : > { %6537 = vadd.xlane.f32.xlu1 %v16117_v23  ;;  %v7442_v23 = vpack.c.bf16 %v7426_v14, %v7426_v14  ;;  %v16135_v14 = vld [vmem:[#allocation12_spill] sm:$0xff] }
0x1159   : > { %v15217_v62 = vpop.xlane.xlu2 %5830 }
0x115e   : > { %6534 = vadd.xlane.f32.xlu0 %v16120_v40  ;;  %v5332_v40 = vpack.c.bf16 %v5316_v9, %v5316_v9 }
0x115f   : > { %6082 = vrot.lane.b32.xlu2 %v6041_v41, %s9924_s15  ;;  %v9721_v41 = vpop.eup %9720 }
0x1160   : > { %7235 = vadd.xlane.f32.xlu1 %v14956_v35  ;;  %v16121_v35 = vld [vmem:[#allocation67_spill] sm:$0xff]  ;;  %v9723_v45 = vpop.eup %9722 }
0x1161   : > { %v5376_v61 = vpop.permute.xlu2 %5375  ;;  %v5282_v20 = vadd.f32 %v16122_v8, %v16121_v35 }
0x1162   : > { %5418 = vst.msk [vmem:[#allocation6 + $0x18] sm:$0xf] %vm5411_vm6, %v5376_v61  ;;  %v7338_v61 = vpop.f32.mrf.mxu0 }
0x1163   : > { %v5324_v25 = vmul.f32 %v9711_v6, %v5282_v20  ;;  %v16130_v6 = vld [vmem:[#allocation43_spill] sm:$0xff] }
0x1164   : > { %v5963_v35 = vadd.f32 %v16131_v49, %v16130_v6 }
0x1165   : > { %v5340_v10 = vpack.c.bf16 %v5324_v25, %v5324_v25  ;;  %v9725_v25 = vpop.eup %9724 }
0x1166   : > { %v6017_v8 = vmul.f32 %v9723_v45, %v5963_v35  ;;  %v9727_v59 = vpop.eup %9726 }
0x1167   : > { %6783 = vrot.lane.b32.xlu2 %v6742_v42, %s9923_s14  ;;  %v16128_v42 = vld [vmem:[#allocation55_spill] sm:$0xff]  ;;  %v9729_v43 = vpop.eup %9728  ;;  %v5328_v52 = vmul.f32 %v9727_v59, %v5292_v36 }
0x1168   : > { %7238 = vadd.xlane.f32.xlu1 %v14967_v12  ;;  %v15234_v38 = vpop.xlane.xlu1 %5827  ;;  %v5988_v44 = vadd.f32 %v16129_v60, %v16128_v42  ;;  %v6033_v3 = vpack.c.bf16 %v6017_v8, %v6017_v8 }
0x1169   : > { %v5344_v34 = vpack.c.bf16 %v5328_v52, %v5328_v52 }
0x116a   : > { %v6027_v55 = vmul.f32 %v9721_v41, %v5988_v44  ;;  %v7340_v46 = vpop.f32.mrf.mxu0 }
0x116b   : > { %v15238_v12 = vpop.xlane.xlu0 %5126 }
0x116c   : > { %v6043_v24 = vpack.c.bf16 %v6027_v55, %v6027_v55 }
0x116f   : > { %7484 = vrot.lane.b32.xlu2 %v7443_v16, %s9922_s13  ;;  %v6778_v16 = vpop.permute.xlu2 %6777 }
0x1170   : > { %v15250_v51 = vpop.xlane.xlu1 %6531 }
0x1172   : > { %5381 = vrot.lane.b32.xlu0 %v5340_v10, %s9925_s17  ;;  %v7343_v29 = vpop.f32.mrf.mxu0 }
0x1173   : > { %v6529_v5 = vpop.xlane.xlu0 %6528 }
0x1174   : > { %9730 = vrcp.f32 %v6529_v5 }
0x1175   : > { %9732 = vrcp.f32 %v15238_v12 }
0x1177   : > { %6064 = vrot.lane.b32.xlu2 %v6032_v18, %s9924_s15  ;;  %v7388_v18 = vadd.f32 %v7387_v27, %v7338_v61  ;;  %v6744_v27 = vpack.c.bf16 %v15183_v17, %v15183_v17 }
0x1178   : > { %v15259_v19 = vpop.xlane.xlu1 %7229 }
0x117a   : > { %6781 = vrot.lane.b32.xlu0 %v6741_v37, %s9923_s14  ;;  %v7428_v37 = vmul.f32 %v9725_v25, %v7388_v18  ;;  %v9731_v9 = vpop.eup %9730 }
0x117b   : > { %v6729_v5 = vmul.f32 %v9731_v9, %v14869_v22  ;;  %v9733_v61 = vpop.eup %9732  ;;  %v7390_v22 = vadd.f32 %v7389_v33, %v7340_v46  ;;  %v7393_v33 = vadd.f32 %v7392_v48, %v7343_v29 }
0x117c   : > { %v7444_v21 = vpack.c.bf16 %v7428_v37, %v7428_v37 }
0x117d   : > { %v6745_v28 = vpack.c.bf16 %v6729_v5, %v6729_v5 }
0x117f   : > { %6767 = vrot.lane.b32.xlu2 %v6734_v0, %s9923_s14  ;;  %v5287_v0 = vadd.f32 %v16135_v14, %v16134_v53  ;;  %v16141_v53 = vld [vmem:[#allocation64_spill] sm:$0xff] }
0x1180   : > { %v7233_v10 = vpop.xlane.xlu1 %7232  ;;  %v16142_v14 = vld [vmem:[#allocation60_spill] sm:$0xff] }
0x1181   : > { %6080 = vrot.lane.b32.xlu1 %v6040_v58, %s9924_s15  ;;  %v7479_v58 = vpop.permute.xlu2 %7478  ;;  %9734 = vrcp.f32 %v7233_v10 }
0x1182   : > { %7482 = vrot.lane.b32.xlu0 %v7442_v23, %s9922_s13  ;;  %v5326_v23 = vmul.f32 %v9729_v43, %v5287_v0  ;;  %9736 = vrcp.f32 %v15197_v30  ;;  %v16136_v30 = vld [vmem:[#allocation79_spill] sm:$0xff]  ;;  %v5998_v0 = vadd.f32 %v16142_v14, %v16141_v53 }
0x1183   : > { %9738 = vrcp.f32 %v15217_v62  ;;  %v5327_v17 = vmul.f32 %v9733_v61, %v16136_v30 }
0x1184   : > { %9740 = vrcp.f32 %v15234_v38  ;;  %v16139_v38 = vld [vmem:[#allocation28_spill] sm:$0xff] }
0x1185   : > { %9742 = vrcp.f32 %v15259_v19 }
0x1186   : > { %v5378_v50 = vpop.permute.xlu0 %5377  ;;  %9744 = vrcp.f32 %v15250_v51 }
0x1187   : > { %5419 = vst.msk [vmem:[#allocation6 + $0x1c] sm:$0xf] %vm5411_vm6, %v5378_v50  ;;  %5383 = vrot.lane.b32.xlu2 %v5341_v15, %s9925_s17  ;;  %v5342_v50 = vpack.c.bf16 %v5326_v23, %v5326_v23  ;;  %v7345_v15 = vpop.f32.mrf.mxu0  ;;  %v9735_v12 = vpop.eup %9734 }
0x1188   : > { %v9737_v45 = vpop.eup %9736 }
0x1189   : > { %5365 = vrot.lane.b32.xlu1 %v5332_v40, %s9925_s17  ;;  %v7394_v40 = vpop.f32.mrf.mxu1  ;;  %v7429_v44 = vmul.f32 %v9737_v45, %v7390_v22  ;;  %v9739_v35 = vpop.eup %9738 }
0x118a   : > { %5363 = vrot.lane.b32.xlu0 %v5331_v32, %s9925_s17  ;;  %v6743_v32 = vpack.c.bf16 %v15158_v54, %v15158_v54  ;;  %v7395_v42 = vadd.f32 %v7394_v40, %v7345_v15  ;;  %v5343_v54 = vpack.c.bf16 %v5327_v17, %v5327_v17  ;;  %v9741_v8 = vpop.eup %9740  ;;  %v6699_v15 = vadd.f32 %v14969_v7, %v14965_v26 }
0x118b   : > { %v7445_v55 = vpack.c.bf16 %v7429_v44, %v7429_v44  ;;  %v6028_v25 = vmul.f32 %v9741_v8, %v16139_v38 }
0x118c   : > { %v7431_v60 = vmul.f32 %v9735_v12, %v7395_v42 }
0x118d   : > { %v6044_v18 = vpack.c.bf16 %v6028_v25, %v6028_v25 }
0x118e   : > { %v6079_v20 = vpop.permute.xlu0 %6078  ;;  %v7447_v49 = vpack.c.bf16 %v7431_v60, %v7431_v60 }
0x118f   : > { %6120 = vst.msk [vmem:[#allocation6 + $0x1c] sm:$0xf] %vm6112_vm7, %v6079_v20  ;;  %6086 = vrot.lane.b32.xlu2 %v6043_v24, %s9924_s15  ;;  %v16137_v20 = vld [vmem:[#allocation9_spill] sm:$0xff]  ;;  %v16138_v24 = vld [vmem:[#allocation35_spill] sm:$0xff] }
0x1191   : > { %6765 = vrot.lane.b32.xlu1 %v6733_v11, %s9923_s14  ;;  %v5993_v11 = vadd.f32 %v16138_v24, %v16137_v20  ;;  %v7397_v45 = vpop.f32.mrf.mxu1 }
0x1192   : > { %6066 = vrot.lane.b32.xlu0 %v6033_v3, %s9924_s15  ;;  %v9743_v3 = vpop.eup %9742 }
0x1193   : > { %v6029_v62 = vmul.f32 %v9739_v35, %v5993_v11  ;;  %v9745_v46 = vpop.eup %9744  ;;  %v7430_v37 = vmul.f32 %v9743_v3, %v7393_v33 }
0x1194   : > { %v6730_v19 = vmul.f32 %v9745_v46, %v14875_v63 }
0x1195   : > { %v6045_v10 = vpack.c.bf16 %v6029_v62, %v6029_v62  ;;  %v7446_v51 = vpack.c.bf16 %v7430_v37, %v7430_v37 }
0x1196   : > { %v6780_v4 = vpop.permute.xlu0 %6779 }
0x1197   : > { %6821 = vst.msk [vmem:[#allocation6 + $0x1c] sm:$0xf] %vm6813_vm8, %v6780_v4  ;;  %7486 = vrot.lane.b32.xlu2 %v7444_v21, %s9922_s13  ;;  %v6746_v21 = vpack.c.bf16 %v6730_v19, %v6730_v19 }
0x1198   : > { %v6077_v47 = vpop.permute.xlu1 %6076 }
0x1199   : > { %6119 = vst.msk [vmem:[#allocation6 + $0x18] sm:$0xf] %vm6112_vm7, %v6077_v47  ;;  %7468 = vrot.lane.b32.xlu1 %v7435_v57, %s9922_s13  ;;  %v16140_v47 = vld [vmem:[#allocation81_spill] sm:$0xff] }
0x119a   : > { %6820 = vst.msk [vmem:[#allocation6 + $0x18] sm:$0xf] %vm6813_vm8, %v6778_v16  ;;  %7466 = vrot.lane.b32.xlu0 %v7434_v56, %s9922_s13 }
0x119b   : > { %7521 = vst.msk [vmem:[#allocation6 + $0x18] sm:$0xf] %vm7514_vm9, %v7479_v58  ;;  %v16143_v58 = vld [vmem:[#allocation23_spill] sm:$0xff] }
0x119e   : > { %v7481_v2 = vpop.permute.xlu0 %7480 }
0x119f   : > { %7522 = vst.msk [vmem:[#allocation6 + $0x1c] sm:$0xf] %vm7514_vm9, %v7481_v2  ;;  %5389 = vrot.lane.b32.xlu2 %v5344_v34, %s9925_s17  ;;  %v16144_v34 = vld [vmem:[#allocation21_spill] sm:$0xff] }
0x11a1   : > { %6084 = vrot.lane.b32.xlu1 %v6042_v31, %s9924_s15  ;;  %v16145_v31 = vld [vmem:[#allocation38_spill] sm:$0xff] }
0x11a2   : > { %5385 = vrot.lane.b32.xlu0 %v5342_v50, %s9925_s17  ;;  %v5297_v9 = vadd.f32 %v16145_v31, %v16144_v34 }
0x11a6   : > { %v8513_v41 = vld [vmem:[#allocation6 + $0x18] sm:$0xff] }
0x11a7   : > { %7682 = vmatmul.bf16.gmra.mxu2 %v8513_v41  ;;  %6789 = vrot.lane.b32.xlu2 %v6745_v28, %s9923_s14  ;;  %v7348_v28 = vpop.f32.mrf.mxu0 }
0x11a8   : > { %v7398_v26 = vadd.f32 %v7397_v45, %v7348_v28 }
0x11a9   : > { %6787 = vrot.lane.b32.xlu1 %v6744_v27, %s9923_s14 }
0x11aa   : > { %6785 = vrot.lane.b32.xlu0 %v6743_v32, %s9923_s14  ;;  %v5133_v6 = vpop.xlane.xlu2 %5132 }
0x11ab   : > { %9746 = vrcp.f32 %v5133_v6 }
0x11af   : > { %7492 = vrot.lane.b32.xlu2 %v7447_v49, %s9922_s13  ;;  %v7350_v35 = vpop.f32.mrf.mxu0 }
0x11b1   : > { %5387 = vrot.lane.b32.xlu1 %v5343_v54, %s9925_s17  ;;  %v9747_v57 = vpop.eup %9746 }
0x11b2   : > { %7488 = vrot.lane.b32.xlu0 %v7445_v55, %s9922_s13  ;;  %v5837_v16 = vpop.xlane.xlu2 %5836  ;;  %v5329_v56 = vmul.f32 %v9747_v57, %v16140_v47  ;;  %v7399_v55 = vpop.f32.mrf.mxu1 }
0x11b3   : > { %9748 = vrcp.f32 %v5837_v16  ;;  %v7400_v8 = vadd.f32 %v7399_v55, %v7350_v35 }
0x11b4   : > { %v5345_v13 = vpack.c.bf16 %v5329_v56, %v5329_v56 }
0x11b9   : > { %6090 = vrot.lane.b32.xlu1 %v6045_v10, %s9924_s15  ;;  %v9749_v39 = vpop.eup %9748 }
0x11ba   : > { %6088 = vrot.lane.b32.xlu0 %v6044_v18, %s9924_s15  ;;  %v5380_v4 = vpop.permute.xlu2 %5379  ;;  %v6031_v48 = vmul.f32 %v9749_v39, %v5998_v0 }
0x11bb   : > { %5420 = vst.msk [vmem:[#allocation6 + $0x20] sm:$0xf] %vm5411_vm6, %v5380_v4 }
0x11bc   : > { %v6047_v5 = vpack.c.bf16 %v6031_v48, %v6031_v48 }
0x11c1   : > { %7490 = vrot.lane.b32.xlu1 %v7446_v51, %s9922_s13 }
0x11c2   : > { %6791 = vrot.lane.b32.xlu0 %v6746_v21, %s9923_s14  ;;  %v6083_v43 = vpop.permute.xlu2 %6082 }
0x11c3   : > { %v5834_v59 = vpop.xlane.xlu1 %5833 }
0x11c4   : > { %9750 = vrcp.f32 %v5834_v59 }
0x11c9   : > { %v5136_v36 = vpop.xlane.xlu0 %5135 }
0x11ca   : > { %v9751_v63 = vpop.eup %9750  ;;  %9752 = vrcp.f32 %v5136_v36  ;;  %5391 = vrot.lane.b32.xlu0 %v5345_v13, %s9925_s17  ;;  %v6784_v23 = vpop.permute.xlu2 %6783 }
0x11cb   : > { %v6030_v52 = vmul.f32 %v9751_v63, %v16143_v58  ;;  %v6538_v29 = vpop.xlane.xlu1 %6537 }
0x11cc   : > { %9754 = vrcp.f32 %v6538_v29 }
0x11cd   : > { %v6046_v2 = vpack.c.bf16 %v6030_v52, %v6030_v52 }
0x11cf   : > { %6092 = vrot.lane.b32.xlu2 %v6046_v2, %s9924_s15 }
0x11d0   : > { %v9753_v50 = vpop.eup %9752 }
0x11d1   : > { %v5330_v40 = vmul.f32 %v9753_v50, %v5297_v9  ;;  %v6535_v41 = vpop.xlane.xlu0 %6534 }
0x11d2   : > { %v9755_v61 = vpop.eup %9754  ;;  %9756 = vrcp.f32 %v6535_v41  ;;  %6094 = vrot.lane.b32.xlu0 %v6047_v5, %s9924_s15  ;;  %v7485_v42 = vpop.permute.xlu2 %7484 }
0x11d3   : > { %v6732_v27 = vmul.f32 %v9755_v61, %v6699_v15  ;;  %v7236_v12 = vpop.xlane.xlu1 %7235  ;;  %v5346_v32 = vpack.c.bf16 %v5330_v40, %v5330_v40  ;;  %v7673_v41 = vpop.f32.mrf.mxu2 }
0x11d4   : > { %9758 = vrcp.f32 %v7236_v12 }
0x11d5   : > { %5393 = vrot.lane.b32.xlu1 %v5346_v32, %s9925_s17  ;;  %v6748_v22 = vpack.c.bf16 %v6732_v27, %v6732_v27  ;;  %v15394_v27 = vld [vmem:[%s15493_s6] ss:$0 sm:$0xff] }
0x11d7   : > { %6795 = vrot.lane.b32.xlu2 %v6748_v22, %s9923_s14 }
0x11d8   : > { %v9757_v30 = vpop.eup %9756 }
0x11d9   : > { %v6731_v7 = vmul.f32 %v9757_v30, %v14893_v1 }
0x11da   : > { %v9759_v17 = vpop.eup %9758  ;;  %v6065_v49 = vpop.permute.xlu2 %6064 }
0x11db   : > { %v7432_v60 = vmul.f32 %v9759_v17, %v7398_v26  ;;  %v7239_v44 = vpop.xlane.xlu1 %7238  ;;  %v6747_v6 = vpack.c.bf16 %v6731_v7, %v6731_v7  ;;  %v7675_v45 = vpop.f32.mrf.mxu2 }
0x11dc   : > { %9760 = vrcp.f32 %v7239_v44 }
0x11dd   : > { %6793 = vrot.lane.b32.xlu1 %v6747_v6, %s9923_s14  ;;  %v7448_v54 = vpack.c.bf16 %v7432_v60, %v7432_v60 }
0x11df   : > { %7494 = vrot.lane.b32.xlu0 %v7448_v54, %s9922_s13 }
0x11e2   : > { %v9761_v20 = vpop.eup %9760  ;;  %v6768_v11 = vpop.permute.xlu2 %6767 }
0x11e3   : > { %v7433_v24 = vmul.f32 %v9761_v20, %v7400_v8  ;;  %v7678_v17 = vpop.f32.mrf.mxu2 }
0x11e4   : > { %v5382_v62 = vpop.permute.xlu0 %5381 }
0x11e5   : > { %5421 = vst.msk [vmem:[#allocation6 + $0x24] sm:$0xf] %vm5411_vm6, %v5382_v62  ;;  %v7449_v1 = vpack.c.bf16 %v7433_v24, %v7433_v24 }
0x11e6   : > { %6122 = vst.msk [vmem:[#allocation6 + $0x24] sm:$0xf] %vm6112_vm7, %v6083_v43 }
0x11e7   : > { %6823 = vst.msk [vmem:[#allocation6 + $0x24] sm:$0xf] %vm6813_vm8, %v6784_v23  ;;  %7496 = vrot.lane.b32.xlu1 %v7449_v1, %s9922_s13  ;;  %s15388_s13 = scalar_lea.vmem [#allocation2], %s8086_s22  ;;  %s8441_s22 = sshll.u32 (%p10015_p5), %s9907_s27, 5 }
0x11e8   : > { %7524 = vst.msk [vmem:[#allocation6 + $0x24] sm:$0xf] %vm7514_vm9, %v7485_v42  ;;  %v7709_v61 = vld [vmem:[%s15388_s13] sm:$0xff]  ;;  %v7710_v42 = vld [vmem:[%s15388_s13 + $0x8] sm:$0xff]  ;;  %v7711_v7 = vld [vmem:[%s15388_s13 + $0x10] sm:$0xff]  ;;  %s7817_s17 = sadd.s32 (%p10015_p5), %s9903_s26, %s8441_s22 }
0x11e9   : > { %v7727_v60 = vadd.f32 %v7711_v7, %v7673_v41  ;;  %v7712_v6 = vld [vmem:[%s15388_s13 + $0x18] sm:$0xff]  ;;  %v7713_v55 = vld [vmem:[%s15388_s13 + $0x20] sm:$0xff]  ;;  %s8442_s24 = sshll.u32 (%p10015_p5), %s7817_s17, 3 }
0x11ea   : > { %v5384_v38 = vpop.permute.xlu2 %5383  ;;  %v7729_v8 = vadd.f32 %v7713_v55, %v7678_v17  ;;  %s7819_s12 = scalar_lea.vmem (%p10015_p5), %s15494_s7, %s8442_s24 }
0x11eb   : > { %5422 = vst.msk [vmem:[#allocation6 + $0x28] sm:$0xf] %vm5411_vm6, %v5384_v38  ;;  %v7747_v44 = vadd.f32 %v15394_v27, %v7727_v60  ;;  %v7680_v54 = vpop.f32.mrf.mxu2 }
0x11ec   : > { %v6782_v25 = vpop.permute.xlu0 %6781  ;;  %v7749_v24 = vadd.f32 %v15394_v27, %v7729_v8 }
0x11f2   : > { %v6087_v10 = vpop.permute.xlu2 %6086 }
0x11f3   : > { %v6081_v16 = vpop.permute.xlu1 %6080 }
0x11f4   : > { %6121 = vst.msk [vmem:[#allocation6 + $0x20] sm:$0xf] %vm6112_vm7, %v6081_v16  ;;  %v7483_v3 = vpop.permute.xlu0 %7482 }
0x11f5   : > { %6822 = vst.msk [vmem:[#allocation6 + $0x20] sm:$0xf] %vm6813_vm8, %v6782_v25  ;;  %v7715_v25 = vld [vmem:[%s15388_s13 + $0x30] sm:$0xff] }
0x11f6   : > { %7523 = vst.msk [vmem:[#allocation6 + $0x20] sm:$0xf] %vm7514_vm9, %v7483_v3 }
0x11fa   : > { %v7487_v46 = vpop.permute.xlu2 %7486 }
0x11fb   : > { %v5366_v18 = vpop.permute.xlu1 %5365 }
0x11fc   : > { %5413 = vst.msk [vmem:[#allocation6 + $0x4] sm:$0xf] %vm5411_vm6, %v5366_v18  ;;  %v5364_v33 = vpop.permute.xlu0 %5363  ;;  %v7716_v18 = vld [vmem:[%s15388_s13 + $0x38] sm:$0xff] }
0x11fd   : > { %5412 = vst.msk [vmem:[#allocation6] sm:$0xf] %vm5411_vm6, %v5364_v33  ;;  %v8514_v37 = vld [vmem:[#allocation6 + $0x20] sm:$0xff] }
0x11fe   : > { %6113 = vst.msk [vmem:[#allocation6] sm:$0xf] %vm6112_vm7, %v6065_v49  ;;  %7687 = vmatmul.bf16.gmra.mxu2 %v8514_v37  ;;  %v7728_v49 = vadd.f32 %v7712_v6, %v7675_v45  ;;  %v7717_v37 = vld [vmem:[%s15388_s13 + $0x40] sm:$0xff] }
0x1200   : > { %v7748_v35 = vadd.f32 %v15394_v27, %v7728_v49 }
0x1202   : > { %v5390_v4 = vpop.permute.xlu2 %5389 }
0x1203   : > { %v6766_v19 = vpop.permute.xlu1 %6765  ;;  %5425 = vst.msk [vmem:[#allocation6 + $0x34] sm:$0xf] %vm5411_vm6, %v5390_v4 }
0x1204   : > { %6814 = vst.msk [vmem:[#allocation6] sm:$0xf] %vm6813_vm8, %v6766_v19  ;;  %v6067_v51 = vpop.permute.xlu0 %6066 }
0x1205   : > { %6114 = vst.msk [vmem:[#allocation6 + $0x4] sm:$0xf] %vm6112_vm7, %v6067_v51 }
0x1206   : > { %6815 = vst.msk [vmem:[#allocation6 + $0x4] sm:$0xf] %vm6813_vm8, %v6768_v11  ;;  %v7714_v11 = vld [vmem:[%s15388_s13 + $0x28] sm:$0xff] }
0x1207   : > { %v7730_v62 = vadd.f32 %v7714_v11, %v7680_v54 }
0x1209   : > { %v7750_v38 = vadd.f32 %v15394_v27, %v7730_v62 }
0x120a   : > { %v6790_v63 = vpop.permute.xlu2 %6789 }
0x120b   : > { %v7469_v21 = vpop.permute.xlu1 %7468 }
0x120c   : > { %7516 = vst.msk [vmem:[#allocation6 + $0x4] sm:$0xf] %vm7514_vm9, %v7469_v21  ;;  %v7467_v57 = vpop.permute.xlu0 %7466  ;;  %v7718_v21 = vld [vmem:[%s15388_s13 + $0x48] sm:$0xff] }
0x120d   : > { %7515 = vst.msk [vmem:[#allocation6] sm:$0xf] %vm7514_vm9, %v7467_v57 }
0x1212   : > { %v7493_v29 = vpop.permute.xlu2 %7492 }
0x1213   : > { %v6085_v59 = vpop.permute.xlu1 %6084 }
0x1214   : > { %6123 = vst.msk [vmem:[#allocation6 + $0x28] sm:$0xf] %vm6112_vm7, %v6085_v59  ;;  %v5386_v47 = vpop.permute.xlu0 %5385  ;;  %v8510_v56 = vld [vmem:[#allocation6] sm:$0xff] }
0x1215   : > { %5423 = vst.msk [vmem:[#allocation6 + $0x2c] sm:$0xf] %vm5411_vm6, %v5386_v47  ;;  %7667 = vmatmul.bf16.vlgmr.msra.gmra.mxu0 %v8510_v56  ;;  %v7719_v56 = vld [vmem:[%s15388_s13 + $0x50] sm:$0xff] }
0x1216   : > { %6124 = vst.msk [vmem:[#allocation6 + $0x2c] sm:$0xf] %vm6112_vm7, %v6087_v10 }
0x121b   : > { %v6788_v43 = vpop.permute.xlu1 %6787 }
0x121c   : > { %6825 = vst.msk [vmem:[#allocation6 + $0x2c] sm:$0xf] %vm6813_vm8, %v6788_v43  ;;  %v6786_v13 = vpop.permute.xlu0 %6785 }
0x121d   : > { %6824 = vst.msk [vmem:[#allocation6 + $0x28] sm:$0xf] %vm6813_vm8, %v6786_v13 }
0x121e   : > { %7525 = vst.msk [vmem:[#allocation6 + $0x28] sm:$0xf] %vm7514_vm9, %v7487_v46 }
0x1223   : > { %v5388_v39 = vpop.permute.xlu1 %5387 }
0x1224   : > { %5424 = vst.msk [vmem:[#allocation6 + $0x30] sm:$0xf] %vm5411_vm6, %v5388_v39  ;;  %v7489_v36 = vpop.permute.xlu0 %7488 }
0x1225   : > { %7526 = vst.msk [vmem:[#allocation6 + $0x2c] sm:$0xf] %vm7514_vm9, %v7489_v36  ;;  %v7720_v36 = vld [vmem:[%s15388_s13 + $0x58] sm:$0xff] }
0x1229   : > { %v6093_v23 = vpop.permute.xlu2 %6092 }
0x122a   : > { %v7683_v20 = vpop.f32.mrf.mxu2 }
0x122b   : > { %v6091_v53 = vpop.permute.xlu1 %6090  ;;  %v7731_v16 = vadd.f32 %v7715_v25, %v7683_v20 }
0x122c   : > { %6126 = vst.msk [vmem:[#allocation6 + $0x34] sm:$0xf] %vm6112_vm7, %v6091_v53  ;;  %v6089_v14 = vpop.permute.xlu0 %6088  ;;  %v8515_v0 = vld [vmem:[#allocation6 + $0x28] sm:$0xff] }
0x122d   : > { %6125 = vst.msk [vmem:[#allocation6 + $0x30] sm:$0xf] %vm6112_vm7, %v6089_v14  ;;  %7692 = vmatmul.bf16.gmra.mxu2 %v8515_v0  ;;  %v7751_v3 = vadd.f32 %v15394_v27, %v7731_v16  ;;  %v7721_v0 = vld [vmem:[%s15388_s13 + $0x60] sm:$0xff] }
0x122e   : > { %6826 = vst.msk [vmem:[#allocation6 + $0x30] sm:$0xf] %vm6813_vm8, %v6790_v63 }
0x1231   : > { %v6796_v9 = vpop.permute.xlu2 %6795 }
0x1232   : > { %v7685_v1 = vpop.f32.mrf.mxu2 }
0x1233   : > { %v7491_v58 = vpop.permute.xlu1 %7490  ;;  %v7732_v46 = vadd.f32 %v7716_v18, %v7685_v1 }
0x1234   : > { %7527 = vst.msk [vmem:[#allocation6 + $0x30] sm:$0xf] %vm7514_vm9, %v7491_v58  ;;  %v6792_v52 = vpop.permute.xlu0 %6791 }
0x1235   : > { %6827 = vst.msk [vmem:[#allocation6 + $0x34] sm:$0xf] %vm6813_vm8, %v6792_v52  ;;  %v7752_v33 = vadd.f32 %v15394_v27, %v7732_v46 }
0x1236   : > { %7528 = vst.msk [vmem:[#allocation6 + $0x34] sm:$0xf] %vm7514_vm9, %v7493_v29 }
0x123c   : > { %v5392_v48 = vpop.permute.xlu0 %5391 }
0x123d   : > { %5426 = vst.msk [vmem:[#allocation6 + $0x38] sm:$0xf] %vm5411_vm6, %v5392_v48  ;;  %v8516_v2 = vld [vmem:[#allocation6 + $0x30] sm:$0xff]  ;;  %v7722_v48 = vld [vmem:[%s15388_s13 + $0x68] sm:$0xff] }
0x123e   : > { %6127 = vst.msk [vmem:[#allocation6 + $0x38] sm:$0xf] %vm6112_vm7, %v6093_v23  ;;  %7697 = vmatmul.bf16.gmra.mxu2 %v8516_v2 }
0x1244   : > { %v6095_v31 = vpop.permute.xlu0 %6094 }
0x1247   : > { %v5394_v34 = vpop.permute.xlu1 %5393 }
0x1248   : > { %5427 = vst.msk [vmem:[#allocation6 + $0x3c] sm:$0xf] %vm5411_vm6, %v5394_v34 }
0x1249   : > { %6128 = vst.msk [vmem:[#allocation6 + $0x3c] sm:$0xf] %vm6112_vm7, %v6095_v31  ;;  %v7723_v31 = vld [vmem:[%s15388_s13 + $0x70] sm:$0xff] }
0x124a   : > { %6829 = vst.msk [vmem:[#allocation6 + $0x3c] sm:$0xf] %vm6813_vm8, %v6796_v9 }
0x124f   : > { %v6794_v50 = vpop.permute.xlu1 %6793 }
0x1250   : > { %6828 = vst.msk [vmem:[#allocation6 + $0x38] sm:$0xf] %vm6813_vm8, %v6794_v50 }
0x1251   : > { %v7495_v5 = vpop.permute.xlu0 %7494 }
0x1252   : > { %7529 = vst.msk [vmem:[#allocation6 + $0x38] sm:$0xf] %vm7514_vm9, %v7495_v5 }
0x1259   : > { %v7497_v15 = vpop.permute.xlu1 %7496 }
0x125a   : > { %7530 = vst.msk [vmem:[#allocation6 + $0x3c] sm:$0xf] %vm7514_vm9, %v7497_v15  ;;  %v7724_v15 = vld [vmem:[%s15388_s13 + $0x78] sm:$0xff] }
0x1261   : > { %v8517_v40 = vld [vmem:[#allocation6 + $0x38] sm:$0xff] }
0x1262   : > { %7702 = vmatmul.bf16.gmra.mxu2 %v8517_v40 }
0x1281   : > { %v7688_v10 = vpop.f32.mrf.mxu2 }
0x1282   : > { %v7733_v4 = vadd.f32 %v7717_v37, %v7688_v10 }
0x1284   : > { %v7753_v51 = vadd.f32 %v15394_v27, %v7733_v4 }
0x1289   : > { %v7690_v19 = vpop.f32.mrf.mxu2 }
0x128a   : > { %v7734_v59 = vadd.f32 %v7718_v21, %v7690_v19 }
0x128c   : > { %v7754_v47 = vadd.f32 %v15394_v27, %v7734_v59 }
0x1292   : > { %v7668_v28 = vpop.f32.mrf.mxu0 }
0x1293   : > { %v7725_v12 = vadd.f32 %v7709_v61, %v7668_v28 }
0x1295   : > { %v7745_v32 = vadd.f32 %v15394_v27, %v7725_v12 }
0x1297   : > { %7761 = vxpose.xlu2.b32.start [1/16] %v7745_v32, 128 }
0x129a   : > { %v7670_v22 = vpop.f32.mrf.mxu0 }
0x129b   : > { %v7726_v30 = vadd.f32 %v7710_v42, %v7670_v22 }
0x129d   : > { %v7746_v26 = vadd.f32 %v15394_v27, %v7726_v30 }
0x129f   : > { %7762 = vxpose.xlu2.b32.cont [2/16] %v7746_v26, 128 }
0x12a7   : > { %7763 = vxpose.xlu2.b32.cont [3/16] %v7747_v44, 128 }
0x12af   : > { %7764 = vxpose.xlu2.b32.cont [4/16] %v7748_v35, 128 }
0x12b0   : > { %v7693_v57 = vpop.f32.mrf.mxu2 }
0x12b1   : > { %v7735_v13 = vadd.f32 %v7719_v56, %v7693_v57 }
0x12b3   : > { %v7755_v39 = vadd.f32 %v15394_v27, %v7735_v13 }
0x12b7   : > { %7765 = vxpose.xlu2.b32.cont [5/16] %v7749_v24, 128 }
0x12b8   : > { %v7695_v43 = vpop.f32.mrf.mxu2 }
0x12b9   : > { %v7736_v63 = vadd.f32 %v7720_v36, %v7695_v43 }
0x12bb   : > { %v7756_v14 = vadd.f32 %v15394_v27, %v7736_v63 }
0x12bf   : > { %7766 = vxpose.xlu2.b32.cont [6/16] %v7750_v38, 128 }
0x12c1   : > { %v7698_v53 = vpop.f32.mrf.mxu2 }
0x12c2   : > { %v7737_v58 = vadd.f32 %v7721_v0, %v7698_v53 }
0x12c4   : > { %v7757_v29 = vadd.f32 %v15394_v27, %v7737_v58 }
0x12c7   : > { %7767 = vxpose.xlu2.b32.cont [7/16] %v7751_v3, 128 }
0x12c9   : > { %v7700_v52 = vpop.f32.mrf.mxu2 }
0x12ca   : > { %v7738_v23 = vadd.f32 %v7722_v48, %v7700_v52 }
0x12cc   : > { %v7758_v34 = vadd.f32 %v15394_v27, %v7738_v23 }
0x12cf   : > { %7768 = vxpose.xlu2.b32.cont [8/16] %v7752_v33, 128 }
0x12d7   : > { %7769 = vxpose.xlu2.b32.cont [9/16] %v7753_v51, 128 }
0x12df   : > { %7770 = vxpose.xlu2.b32.cont [10/16] %v7754_v47, 128 }
0x12e5   : > { %v7703_v2 = vpop.f32.mrf.mxu2 }
0x12e6   : > { %v7739_v9 = vadd.f32 %v7723_v31, %v7703_v2 }
0x12e7   : > { %7771 = vxpose.xlu2.b32.cont [11/16] %v7755_v39, 128 }
0x12e8   : > { %v7759_v50 = vadd.f32 %v15394_v27, %v7739_v9 }
0x12ed   : > { %v7705_v5 = vpop.f32.mrf.mxu2 }
0x12ee   : > { %v7740_v40 = vadd.f32 %v7724_v15, %v7705_v5 }
0x12ef   : > { %7772 = vxpose.xlu2.b32.cont [12/16] %v7756_v14, 128 }
0x12f0   : > { %v7760_v41 = vadd.f32 %v15394_v27, %v7740_v40 }
0x12f7   : > { %7773 = vxpose.xlu2.b32.cont [13/16] %v7757_v29, 128 }
0x12ff   : > { %7774 = vxpose.xlu2.b32.cont [14/16] %v7758_v34, 128 }
0x1307   : > { %7775 = vxpose.xlu2.b32.cont [15/16] %v7759_v50, 128 }
0x130f   : > { %7776 = vxpose.xlu2.b32.end [16/16] %v7760_v41, 128 }
0x1330   : > { %v7777_v61 = vpop.trf.xlu2 }
0x1331   : > { %7793 = vst [vmem:[%s10036_s10] sm:$0xff] %v7777_v61 }
0x1338   : > { %v7778_v28 = vpop.trf.xlu2  ;;  %v7878_v54 = vld [vmem:[%s10036_s10] sm:$0xff] (%p10015_p5) }
0x1339   : > { %7794 = vst [vmem:[%s10036_s10 + $0x8] sm:$0xff] %v7778_v28 }
0x133a   : > { %7879 = vst [vmem:[%s7819_s12] sm:$0xff] (%p10015_p5), %v7878_v54 }
0x1340   : > { %v7779_v12 = vpop.trf.xlu2  ;;  %v7880_v35 = vld [vmem:[%s10036_s10 + $0x8] sm:$0xff] (%p10015_p5) }
0x1341   : > { %7795 = vst [vmem:[%s10036_s10 + $0x10] sm:$0xff] %v7779_v12 }
0x1342   : > { %7881 = vst [vmem:[%s7819_s12 + $0x10] sm:$0xff] (%p10015_p5), %v7880_v35 }
0x1348   : > { %v7780_v32 = vpop.trf.xlu2  ;;  %v7882_v55 = vld [vmem:[%s10036_s10 + $0x10] sm:$0xff] (%p10015_p5) }
0x1349   : > { %7796 = vst [vmem:[%s10036_s10 + $0x18] sm:$0xff] %v7780_v32 }
0x134a   : > { %7883 = vst [vmem:[%s7819_s12 + $0x20] sm:$0xff] (%p10015_p5), %v7882_v55 }
0x1350   : > { %v7781_v45 = vpop.trf.xlu2  ;;  %v7884_v8 = vld [vmem:[%s10036_s10 + $0x18] sm:$0xff] (%p10015_p5) }
0x1351   : > { %7797 = vst [vmem:[%s10036_s10 + $0x20] sm:$0xff] %v7781_v45 }
0x1352   : > { %7885 = vst [vmem:[%s7819_s12 + $0x30] sm:$0xff] (%p10015_p5), %v7884_v8 }
0x1358   : > { %v7782_v42 = vpop.trf.xlu2  ;;  %v7886_v20 = vld [vmem:[%s10036_s10 + $0x20] sm:$0xff] (%p10015_p5) }
0x1359   : > { %7798 = vst [vmem:[%s10036_s10 + $0x28] sm:$0xff] %v7782_v42 }
0x135a   : > { %7887 = vst [vmem:[%s7819_s12 + $0x40] sm:$0xff] (%p10015_p5), %v7886_v20 }
0x1360   : > { %v7783_v27 = vpop.trf.xlu2  ;;  %v7888_v24 = vld [vmem:[%s10036_s10 + $0x28] sm:$0xff] (%p10015_p5) }
0x1361   : > { %7799 = vst [vmem:[%s10036_s10 + $0x30] sm:$0xff] %v7783_v27 }
0x1362   : > { %7889 = vst [vmem:[%s7819_s12 + $0x50] sm:$0xff] (%p10015_p5), %v7888_v24 }
0x1368   : > { %v7784_v22 = vpop.trf.xlu2  ;;  %v7890_v11 = vld [vmem:[%s10036_s10 + $0x30] sm:$0xff] (%p10015_p5) }
0x1369   : > { %7800 = vst [vmem:[%s10036_s10 + $0x38] sm:$0xff] %v7784_v22 }
0x136a   : > { %7891 = vst [vmem:[%s7819_s12 + $0x60] sm:$0xff] (%p10015_p5), %v7890_v11 }
0x1370   : > { %v7785_v30 = vpop.trf.xlu2  ;;  %v7892_v62 = vld [vmem:[%s10036_s10 + $0x38] sm:$0xff] (%p10015_p5) }
0x1371   : > { %7801 = vst [vmem:[%s10036_s10 + $0x40] sm:$0xff] %v7785_v30 }
0x1372   : > { %7893 = vst [vmem:[%s7819_s12 + $0x70] sm:$0xff] (%p10015_p5), %v7892_v62 }
0x1378   : > { %v7786_v26 = vpop.trf.xlu2  ;;  %v7894_v1 = vld [vmem:[%s10036_s10 + $0x40] sm:$0xff] (%p10015_p5) }
0x1379   : > { %7802 = vst [vmem:[%s10036_s10 + $0x48] sm:$0xff] %v7786_v26 }
0x137a   : > { %7895 = vst [vmem:[%s7819_s12 + $0x80] sm:$0xff] (%p10015_p5), %v7894_v1 }
0x1380   : > { %v7787_v7 = vpop.trf.xlu2  ;;  %v7896_v38 = vld [vmem:[%s10036_s10 + $0x48] sm:$0xff] (%p10015_p5) }
0x1381   : > { %7803 = vst [vmem:[%s10036_s10 + $0x50] sm:$0xff] %v7787_v7 }
0x1382   : > { %7897 = vst [vmem:[%s7819_s12 + $0x90] sm:$0xff] (%p10015_p5), %v7896_v38 }
0x1388   : > { %v7788_v17 = vpop.trf.xlu2  ;;  %v7898_v25 = vld [vmem:[%s10036_s10 + $0x50] sm:$0xff] (%p10015_p5) }
0x1389   : > { %7804 = vst [vmem:[%s10036_s10 + $0x58] sm:$0xff] %v7788_v17 }
0x138a   : > { %7899 = vst [vmem:[%s7819_s12 + $0xa0] sm:$0xff] (%p10015_p5), %v7898_v25 }
0x1390   : > { %v7789_v60 = vpop.trf.xlu2  ;;  %v7900_v16 = vld [vmem:[%s10036_s10 + $0x58] sm:$0xff] (%p10015_p5) }
0x1391   : > { %7805 = vst [vmem:[%s10036_s10 + $0x60] sm:$0xff] %v7789_v60 }
0x1392   : > { %7901 = vst [vmem:[%s7819_s12 + $0xb0] sm:$0xff] (%p10015_p5), %v7900_v16 }
0x1398   : > { %v7790_v44 = vpop.trf.xlu2  ;;  %v7902_v10 = vld [vmem:[%s10036_s10 + $0x60] sm:$0xff] (%p10015_p5) }
0x1399   : > { %7806 = vst [vmem:[%s10036_s10 + $0x68] sm:$0xff] %v7790_v44 }
0x139a   : > { %7903 = vst [vmem:[%s7819_s12 + $0xc0] sm:$0xff] (%p10015_p5), %v7902_v10 }
0x13a0   : > { %v7791_v6 = vpop.trf.xlu2  ;;  %v7904_v3 = vld [vmem:[%s10036_s10 + $0x68] sm:$0xff] (%p10015_p5) }
0x13a1   : > { %7807 = vst [vmem:[%s10036_s10 + $0x70] sm:$0xff] %v7791_v6 }
0x13a2   : > { %7905 = vst [vmem:[%s7819_s12 + $0xd0] sm:$0xff] (%p10015_p5), %v7904_v3 }
0x13a5   : > { %7815 = sbr.rel (!%p10015_p5) target bundleno = 5042 (0x13b2), region = 56 }
0x13a8   : > { %v7792_v49 = vpop.trf.xlu2  ;;  %v7906_v18 = vld [vmem:[%s10036_s10 + $0x70] sm:$0xff] (%p10015_p5) }
0x13a9   : > { %7808 = vst [vmem:[%s10036_s10 + $0x78] sm:$0xff] %v7792_v49 }
0x13aa   : > { %7907 = vst [vmem:[%s7819_s12 + $0xe0] sm:$0xff] %v7906_v18 }
0x13b0   : > { %v7908_v46 = vld [vmem:[%s10036_s10 + $0x78] sm:$0xff] }
0x13b1   : > { %7909 = vst [vmem:[%s7819_s12 + $0xf0] sm:$0xff] %v7908_v46 }
0x13b2 PF: > { %s17_s30 = sadd.s32 1, %s9919_s30   ;;  %s16146_s24 = smov %s9899_s25 }
0x13b3   : > { %p14_p11 = scmp.ge.s32.totalorder %s17_s30, 6   ;;  %s16147_s25 = smov %s10026_s16 }
0x13b4   : > { %s16148_s26 = smov %s9911_s28  ;;  %s16149_s27 = smov %s9915_s29 }
0x13b5   : > { %s16150_s28 = smov %s16153_s8  ;;  %s16151_s29 = smov %s16157_s9 }
0x13b6   :  { %16 = sbr.rel (!%p14_p11) target bundleno = 4 (0x4), region = 122 }

</bundles_post_ra>
